<compile_context>
chip_gen: v6e
topology: v6e:2x2x1
jax: 0.10.0
libtpu: 0.0.40
codegen_flags: <defaults>
</compile_context>

<pallas_src>
import functools

import jax
import jax.numpy as jnp
from jax.experimental import pallas as pl
from jax.experimental.pallas import tpu as pltpu  # noqa: F401  (TPU backend; no TPU-specific params needed at these sizes)

LN_EPS = 1e-12
F32 = jnp.float32
BF16 = jnp.bfloat16
NEG_INF = -1e9

LAYER_KEYS = ("q_w", "q_b", "k_w", "k_b", "v_w", "v_b",
              "ao_w", "ao_b", "ln1_g", "ln1_b",
              "ff1_w", "ff1_b", "ff2_w", "ff2_b", "ln2_g", "ln2_b")


def _round_up(n, m):
    return ((n + m - 1) // m) * m


# ----------------------------------------------------------------------------- in-kernel helpers

def _gelu(x):
    # tanh-approx GELU (reference BERT/ELECTRA use erf-GELU; difference is negligible)
    return 0.5 * x * (1.0 + jnp.tanh(0.7978845608028654 * (x + 0.044715 * x * x * x)))


def _ln(x, g, b, eps):
    mu = jnp.mean(x, axis=-1, keepdims=True)
    xc = x - mu
    var = jnp.mean(xc * xc, axis=-1, keepdims=True)
    return xc * jax.lax.rsqrt(var + eps) * g + b


def _mm(x, w):
    # bf16 operands on the MXU, f32 accumulation.
    return jnp.dot(x.astype(BF16), w.astype(BF16), preferred_element_type=F32)


def _mm_nt(a, b):
    # a [M, K] x b [N, K]^T -> [M, N]; contract last dims of both (no transpose op).
    return jax.lax.dot_general(a.astype(BF16), b.astype(BF16),
                               (((1,), (1,)), ((), ())),
                               preferred_element_type=F32)


def _encoder_layer(x, bias2d, lw, *, H, n_heads, eps):
    """One fused BERT/ELECTRA encoder layer on a VMEM-resident activation.

    x:      [B*L, H]    f32 activation (seq*batch -> sublanes, hidden -> lanes)
    bias2d: [B*L, B*L]  f32 additive attention bias (padding + block-diagonal batch mask)
    lw:     dict of weight refs for this layer
    """
    dh = H // n_heads
    scale = 1.0 / (dh ** 0.5)
    q = _mm(x, lw["q_w"][...]) + lw["q_b"][...]
    k = _mm(x, lw["k_w"][...]) + lw["k_b"][...]
    v = _mm(x, lw["v_w"][...]) + lw["v_b"][...]
    ao_w = lw["ao_w"][...]
    # Attention-output projection decomposed per head:
    #   concat_h(ctx_h) @ W == sum_h ctx_h @ W[h*dh:(h+1)*dh, :]
    # -> no in-kernel lane concat / reshape / transpose.
    y = x + lw["ao_b"][...]
    for h in range(n_heads):                      # static unroll over heads
        lo, hi = h * dh, (h + 1) * dh
        s = _mm_nt(q[:, lo:hi], k[:, lo:hi]) * scale + bias2d
        s = s - jnp.max(s, axis=-1, keepdims=True)
        p = jnp.exp(s)
        p = p * pl.reciprocal(jnp.sum(p, axis=-1, keepdims=True), approx=False)
        ctx_h = _mm(p, v[:, lo:hi])
        y = y + _mm(ctx_h, ao_w[lo:hi, :])
    h1 = _ln(y, lw["ln1_g"][...], lw["ln1_b"][...], eps)
    f = _gelu(_mm(h1, lw["ff1_w"][...]) + lw["ff1_b"][...])
    h2 = _mm(f, lw["ff2_w"][...]) + lw["ff2_b"][...] + h1
    return _ln(h2, lw["ln2_g"][...], lw["ln2_b"][...], eps)


# ----------------------------------------------------------------------------- kernels

def _pinyin_model_kernel(*refs, n_layers, H, n_heads, eps):
    """Whole pinyin ELECTRA generator in one kernel:
    emb LN -> embeddings_project -> encoder layers -> generator_predictions -> [lm|det] head."""
    it = iter(refs)
    emb = next(it)[...].astype(F32)           # [B*Lp, E]
    bias2d = next(it)[...]                    # [B*Lp, B*Lp]
    emb_g = next(it)[...]
    emb_b = next(it)[...]
    proj_w = next(it)
    proj_b = next(it)[...]
    layers = [{k: next(it) for k in LAYER_KEYS} for _ in range(n_layers)]
    gp_w = next(it)
    gp_b = next(it)[...]
    gp_g = next(it)[...]
    gp_bb = next(it)[...]
    head_w = next(it)
    head_b = next(it)[...]
    hidden_ref = next(it)                     # out: [B*Lp, H]
    head_ref = next(it)                       # out: [B*Lp, npad] (lane-dense)

    x = _ln(emb, emb_g, emb_b, eps)
    x = _mm(x, proj_w[...]) + proj_b
    for lw in layers:
        x = _encoder_layer(x, bias2d, lw, H=H, n_heads=n_heads, eps=eps)
    hidden_ref[...] = x.astype(hidden_ref.dtype)
    t = _gelu(_mm(x, gp_w[...]) + gp_b)
    t = _ln(t, gp_g, gp_bb, eps)
    head_ref[...] = (_mm(t, head_w[...]) + head_b).astype(head_ref.dtype)


def _hanzi_encoder_kernel(*refs, n_layers, H, n_heads, eps):
    """Whole hanzi BERT encoder in one kernel: emb LN -> encoder layers."""
    it = iter(refs)
    emb = next(it)[...].astype(F32)
    bias2d = next(it)[...]
    emb_g = next(it)[...]
    emb_b = next(it)[...]
    layers = [{k: next(it) for k in LAYER_KEYS} for _ in range(n_layers)]
    out_ref = next(it)
    x = _ln(emb, emb_g, emb_b, eps)
    for lw in layers:
        x = _encoder_layer(x, bias2d, lw, H=H, n_heads=n_heads, eps=eps)
    out_ref[...] = x.astype(out_ref.dtype)


def _hanzi_fuse_heads_kernel(hz_ref, cpy_ref, pm_w_ref, pm_b_ref,
                             fc_hz_ref, fc_py_ref, fc_b_ref, ln_g_ref, ln_b_ref,
                             ct_w_ref, ct_b_ref, cg_ref, cb_ref, dec_w_ref, dec_b_ref,
                             dt_w_ref, dt_b_ref, dg_ref, db_ref, det_w_ref, det_b_ref,
                             cor_ref, det_ref, *, eps):
    """pinyin_map + map_fc(concat) + LayerNorm + cls head + detector branch, fused.
    map_fc weight is pre-split so concat([hanzi, new_pinyin]) @ W is two matmuls
    (no in-kernel concat).  Both head outputs are zero-padded to 128 lanes so all
    stores are unmasked."""
    hz = hz_ref[...].astype(F32)
    cpy = cpy_ref[...].astype(F32)
    new_py = _mm(cpy, pm_w_ref[...]) + pm_b_ref[...]
    hs = _mm(hz, fc_hz_ref[...]) + _mm(new_py, fc_py_ref[...]) + fc_b_ref[...]
    hs = _ln(hs, ln_g_ref[...], ln_b_ref[...], eps)
    # dropout = eval-mode identity
    t = _ln(_gelu(_mm(hs, ct_w_ref[...]) + ct_b_ref[...]), cg_ref[...], cb_ref[...], eps)
    cor_ref[...] = (_mm(t, dec_w_ref[...]) + dec_b_ref[...]).astype(cor_ref.dtype)
    d = _ln(_gelu(_mm(hs, dt_w_ref[...]) + dt_b_ref[...]), dg_ref[...], db_ref[...], eps)
    det_ref[...] = (_mm(d, det_w_ref[...]) + det_b_ref[...]).astype(det_ref.dtype)


# ----------------------------------------------------------------------------- pallas_call helper

def _call(kernel, out_shape, *arrays, **statics):
    # Single-invocation pallas_call: no grid, every operand is a whole-array VMEM ref.
    return pl.pallas_call(functools.partial(kernel, **statics), out_shape=out_shape)(*arrays)


# ----------------------------------------------------------------------------- params

class ParamGen:
    def __init__(self, key):
        self.key = key

    def _next(self):
        self.key, k = jax.random.split(self.key)
        return k

    def normal(self, shape, std=0.02, dtype=F32):
        return (std * jax.random.normal(self._next(), shape)).astype(dtype)

    def zeros(self, shape):
        return jnp.zeros(shape, F32)

    def ones(self, shape):
        return jnp.ones(shape, F32)


def _pad_cols(w, b, n_to):
    n = w.shape[1]
    if n == n_to:
        return w, b.reshape(1, n_to)
    return (jnp.pad(w, ((0, 0), (0, n_to - n))),
            jnp.pad(b.reshape(1, n), ((0, 0), (0, n_to - n))))


def init_encoder_layer(pg, H, I):
    return dict(
        q_w=pg.normal((H, H), dtype=BF16), q_b=pg.zeros((1, H)),
        k_w=pg.normal((H, H), dtype=BF16), k_b=pg.zeros((1, H)),
        v_w=pg.normal((H, H), dtype=BF16), v_b=pg.zeros((1, H)),
        ao_w=pg.normal((H, H), dtype=BF16), ao_b=pg.zeros((1, H)),
        ln1_g=pg.ones((1, H)), ln1_b=pg.zeros((1, H)),
        ff1_w=pg.normal((H, I), dtype=BF16), ff1_b=pg.zeros((1, I)),
        ff2_w=pg.normal((I, H), dtype=BF16), ff2_b=pg.zeros((1, H)),
        ln2_g=pg.ones((1, H)), ln2_b=pg.zeros((1, H)),
    )


def init_hanzi_params(pg, vocab, H, I, layers, max_pos):
    vpad = _round_up(vocab, 128)
    dpad = 128
    dec_w, dec_b = _pad_cols(pg.normal((H, vocab)), pg.zeros((vocab,)), vpad)
    det_w, det_b = _pad_cols(pg.normal((H, 2)), pg.zeros((2,)), dpad)
    map_fc_w = pg.normal((2 * H, H))     # Linear(2H, H): rows 0:H multiply hanzi, H:2H new_pinyin
    return dict(
        word_emb=pg.normal((vocab, H)),
        pos_emb=pg.normal((max_pos, H)),
        type_emb=pg.normal((2, H)),
        emb_ln_g=pg.ones((1, H)), emb_ln_b=pg.zeros((1, H)),
        layers=[init_encoder_layer(pg, H, I) for _ in range(layers)],
        # cls = BertOnlyMLMHead: transform (dense+gelu+LN) + decoder (lane-padded)
        cls_t_w=pg.normal((H, H), dtype=BF16), cls_t_b=pg.zeros((1, H)),
        cls_ln_g=pg.ones((1, H)), cls_ln_b=pg.zeros((1, H)),
        dec_w=dec_w.astype(BF16), dec_b=dec_b,
        # multitask detector branch: BertPredictionHeadTransform + Linear(H, 2) (lane-padded)
        det_t_w=pg.normal((H, H), dtype=BF16), det_t_b=pg.zeros((1, H)),
        det_ln_g=pg.ones((1, H)), det_ln_b=pg.zeros((1, H)),
        det_w=det_w.astype(BF16), det_b=det_b,
        # pinyin fusion
        pinyin_map_w=pg.normal((H, H), dtype=BF16), pinyin_map_b=pg.zeros((1, H)),
        map_fc_w_hz=map_fc_w[:H].astype(BF16), map_fc_w_py=map_fc_w[H:].astype(BF16),
        map_fc_b=pg.zeros((1, H)),
        ln_g=pg.ones((1, H)), ln_b=pg.zeros((1, H)),
    )


def init_pinyin_params(pg, vocab, E, H, I, layers, max_pos):
    npad = _round_up(vocab + 2, 128)
    lm_w = pg.normal((E, vocab))
    det_w = pg.normal((E, 2))
    head_w = jnp.concatenate([lm_w, det_w], axis=1)      # [E, vocab+2] = [lm_head | detector]
    head_w, head_b = _pad_cols(head_w, pg.zeros((vocab + 2,)), npad)
    return dict(
        word_emb=pg.normal((vocab, E)),
        pos_emb=pg.normal((max_pos, E)),
        type_emb=pg.normal((2, E)),
        emb_ln_g=pg.ones((1, E)), emb_ln_b=pg.zeros((1, E)),
        proj_w=pg.normal((E, H), dtype=BF16), proj_b=pg.zeros((1, H)),   # embeddings_project
        layers=[init_encoder_layer(pg, H, I) for _ in range(layers)],
        # generator_predictions: dense H->E, gelu, LN(E)
        gp_w=pg.normal((H, E), dtype=BF16), gp_b=pg.zeros((1, E)),
        gp_ln_g=pg.ones((1, E)), gp_ln_b=pg.zeros((1, E)),
        head_w=head_w.astype(BF16), head_b=head_b,
    )


# ----------------------------------------------------------------------------- model

def _embeddings_sum(input_ids, p):
    B, L = input_ids.shape
    we = jnp.take(p["word_emb"], input_ids, axis=0)              # [B, L, dim]
    pe = p["pos_emb"][:L][None, :, :]
    te = p["type_emb"][0][None, None, :]
    return (we + pe + te).reshape(B * L, -1)


def _attn_bias2d(attention_mask):
    # Additive attention bias over the flattened [B*L] token axis:
    # 0 where (same batch AND key not padded), -1e9 otherwise.  Running each layer's
    # attention over all B*L rows at once keeps the kernel purely 2-D (no per-batch
    # slicing / reshapes) while being numerically equivalent to per-batch masked
    # attention (cross-batch keys get probability ~0, same as padded keys).
    B, L = attention_mask.shape
    am = attention_mask.reshape(B * L).astype(F32)
    bid = jnp.repeat(jnp.arange(B, dtype=jnp.int32), L)
    valid = (bid[:, None] == bid[None, :]).astype(F32) * am[None, :]
    return (1.0 - valid) * NEG_INF


def _layer_arrays(layers):
    out = []
    for lw in layers:
        out += [lw[k] for k in LAYER_KEYS]
    return out


def pinyin_model_forward(p, pinyin_input_ids, pinyin_attention_mask, *, H, n_heads, vocab):
    B, Lp = pinyin_input_ids.shape
    emb = _embeddings_sum(pinyin_input_ids, p)                   # [B*Lp, E]
    bias2d = _attn_bias2d(pinyin_attention_mask)                 # [B*Lp, B*Lp]
    npad = p["head_w"].shape[1]
    arrays = [emb, bias2d, p["emb_ln_g"], p["emb_ln_b"], p["proj_w"], p["proj_b"]]
    arrays += _layer_arrays(p["layers"])
    arrays += [p["gp_w"], p["gp_b"], p["gp_ln_g"], p["gp_ln_b"], p["head_w"], p["head_b"]]
    hidden, head = _call(
        _pinyin_model_kernel,
        (jax.ShapeDtypeStruct((B * Lp, H), F32),
         jax.ShapeDtypeStruct((B * Lp, npad), F32)),
        *arrays,
        n_layers=len(p["layers"]), H=H, n_heads=n_heads, eps=LN_EPS)
    cor_out = head[:, :vocab].reshape(B, Lp, vocab)
    det_out = head[:, vocab:vocab + 2].reshape(B, Lp, 2)
    return cor_out, det_out, hidden                              # hidden: [B*Lp, H]


def hanzi_model_forward(p, input_ids, attention_mask, pinyin_hidden, Lp, *, H, n_heads, vocab):
    B, L = input_ids.shape
    emb = _embeddings_sum(input_ids, p)
    bias2d = _attn_bias2d(attention_mask)
    arrays = [emb, bias2d, p["emb_ln_g"], p["emb_ln_b"]] + _layer_arrays(p["layers"])
    # independent of the pinyin kernel -> free to overlap with it
    hanzi_hidden = _call(
        _hanzi_encoder_kernel,
        jax.ShapeDtypeStruct((B * L, H), F32),
        *arrays,
        n_layers=len(p["layers"]), H=H, n_heads=n_heads, eps=LN_EPS)

    # sm/ym/sd index_select of the pinyin hidden states + concat along hidden.  The
    # indices are compile-time constants; these tiny gathers stay in XLA (same jit),
    # feeding the fused head kernel.
    py3 = pinyin_hidden.reshape(B, Lp, -1)
    sm_idx = jnp.array([0] + [3 * i + 1 for i in range(L - 2)] + [3 * L - 5], jnp.int32)
    ym_idx = jnp.array([0] + [3 * i + 2 for i in range(L - 2)] + [3 * L - 5], jnp.int32)
    sd_idx = jnp.array([0] + [3 * i + 3 for i in range(L - 2)] + [3 * L - 5], jnp.int32)
    concat_pinyin = jnp.concatenate(
        [jnp.take(py3, sm_idx, axis=1),
         jnp.take(py3, ym_idx, axis=1),
         jnp.take(py3, sd_idx, axis=1)], axis=2).reshape(B * L, -1)   # [B*L, 3*Hp] == [B*L, H]

    vpad = p["dec_w"].shape[1]
    dpad = p["det_w"].shape[1]
    cor_pad, det_pad = _call(
        _hanzi_fuse_heads_kernel,
        (jax.ShapeDtypeStruct((B * L, vpad), F32),
         jax.ShapeDtypeStruct((B * L, dpad), F32)),
        hanzi_hidden, concat_pinyin,
        p["pinyin_map_w"], p["pinyin_map_b"],
        p["map_fc_w_hz"], p["map_fc_w_py"], p["map_fc_b"], p["ln_g"], p["ln_b"],
        p["cls_t_w"], p["cls_t_b"], p["cls_ln_g"], p["cls_ln_b"], p["dec_w"], p["dec_b"],
        p["det_t_w"], p["det_t_b"], p["det_ln_g"], p["det_ln_b"], p["det_w"], p["det_b"],
        eps=LN_EPS)
    cor_out = cor_pad[:, :vocab].reshape(B, L, vocab)
    det_out = det_pad[:, :2].reshape(B, L, 2)
    return cor_out, det_out


def pygc_forward(params, input_ids, attention_mask, pinyin_input_ids, pinyin_attention_mask, cfg):
    pinyin_cor_out, pinyin_det_out, pinyin_hidden = pinyin_model_forward(
        params["pinyin"], pinyin_input_ids, pinyin_attention_mask,
        H=cfg["pin_hidden"], n_heads=cfg["pin_heads"], vocab=cfg["pin_vocab"])
    cor_out, det_out = hanzi_model_forward(
        params["hanzi"], input_ids, attention_mask, pinyin_hidden,
        pinyin_input_ids.shape[1],
        H=cfg["hz_hidden"], n_heads=cfg["hz_heads"], vocab=cfg["hz_vocab"])
    return cor_out, det_out, pinyin_cor_out, pinyin_det_out


# ----------------------------------------------------------------------------- main

if __name__ == "__main__":
    cfg = dict(
        hz_vocab=64, hz_hidden=96, hz_inter=192, hz_heads=4, hz_layers=2, hz_max_pos=32,
        pin_vocab=48, pin_emb=16, pin_hidden=32, pin_inter=64, pin_heads=2, pin_layers=2, pin_max_pos=64,
    )
    assert cfg["hz_hidden"] == 3 * cfg["pin_hidden"]  # required by the pinyin concat

    B, L = 2, 8
    Lp = 3 * L - 4  # 20, matches the module's length contract

    pg = ParamGen(jax.random.PRNGKey(0))
    params = dict(
        hanzi=init_hanzi_params(pg, cfg["hz_vocab"], cfg["hz_hidden"], cfg["hz_inter"],
                                cfg["hz_layers"], cfg["hz_max_pos"]),
        pinyin=init_pinyin_params(pg, cfg["pin_vocab"], cfg["pin_emb"], cfg["pin_hidden"],
                                  cfg["pin_inter"], cfg["pin_layers"], cfg["pin_max_pos"]),
    )

    kin = jax.random.PRNGKey(0)
    k1, k2 = jax.random.split(kin)
    input_ids = jax.random.randint(k1, (B, L), 0, cfg["hz_vocab"], dtype=jnp.int32)
    pinyin_input_ids = jax.random.randint(k2, (B, Lp), 0, cfg["pin_vocab"], dtype=jnp.int32)
    attention_mask = jnp.ones((B, L), jnp.int32).at[1, L - 1].set(0)
    pinyin_attention_mask = jnp.ones((B, Lp), jnp.int32).at[1, Lp - 2:].set(0)

    fwd = jax.jit(functools.partial(pygc_forward, cfg=cfg))
    cor_out, det_out, pinyin_cor_out, pinyin_det_out = fwd(
        params, input_ids, attention_mask, pinyin_input_ids, pinyin_attention_mask)

    jax.block_until_ready((cor_out, det_out, pinyin_cor_out, pinyin_det_out))
    assert cor_out.shape == (B, L, cfg["hz_vocab"])
    assert det_out.shape == (B, L, 2)
    assert pinyin_cor_out.shape == (B, Lp, cfg["pin_vocab"])
    assert pinyin_det_out.shape == (B, Lp, 2)
    # TODO(synk): tokenizer decoding / length-mismatch debug printing from the torch
    # module is host-side logging with no kernel equivalent; omitted.
    print("KERNEL_OK")
</pallas_src>

<mosaic_0001>
module attributes {stable_mosaic.version = 11 : i64} {
  func.func @_pinyin_model_kernel(%arg0: memref<40x16xf32, #tpu.memory_space<vmem>>, %arg1: memref<40x40xf32, #tpu.memory_space<vmem>>, %arg2: memref<1x16xf32, #tpu.memory_space<vmem>>, %arg3: memref<1x16xf32, #tpu.memory_space<vmem>>, %arg4: memref<16x32xbf16, #tpu.memory_space<vmem>>, %arg5: memref<1x32xf32, #tpu.memory_space<vmem>>, %arg6: memref<32x32xbf16, #tpu.memory_space<vmem>>, %arg7: memref<1x32xf32, #tpu.memory_space<vmem>>, %arg8: memref<32x32xbf16, #tpu.memory_space<vmem>>, %arg9: memref<1x32xf32, #tpu.memory_space<vmem>>, %arg10: memref<32x32xbf16, #tpu.memory_space<vmem>>, %arg11: memref<1x32xf32, #tpu.memory_space<vmem>>, %arg12: memref<32x32xbf16, #tpu.memory_space<vmem>>, %arg13: memref<1x32xf32, #tpu.memory_space<vmem>>, %arg14: memref<1x32xf32, #tpu.memory_space<vmem>>, %arg15: memref<1x32xf32, #tpu.memory_space<vmem>>, %arg16: memref<32x64xbf16, #tpu.memory_space<vmem>>, %arg17: memref<1x64xf32, #tpu.memory_space<vmem>>, %arg18: memref<64x32xbf16, #tpu.memory_space<vmem>>, %arg19: memref<1x32xf32, #tpu.memory_space<vmem>>, %arg20: memref<1x32xf32, #tpu.memory_space<vmem>>, %arg21: memref<1x32xf32, #tpu.memory_space<vmem>>, %arg22: memref<32x32xbf16, #tpu.memory_space<vmem>>, %arg23: memref<1x32xf32, #tpu.memory_space<vmem>>, %arg24: memref<32x32xbf16, #tpu.memory_space<vmem>>, %arg25: memref<1x32xf32, #tpu.memory_space<vmem>>, %arg26: memref<32x32xbf16, #tpu.memory_space<vmem>>, %arg27: memref<1x32xf32, #tpu.memory_space<vmem>>, %arg28: memref<32x32xbf16, #tpu.memory_space<vmem>>, %arg29: memref<1x32xf32, #tpu.memory_space<vmem>>, %arg30: memref<1x32xf32, #tpu.memory_space<vmem>>, %arg31: memref<1x32xf32, #tpu.memory_space<vmem>>, %arg32: memref<32x64xbf16, #tpu.memory_space<vmem>>, %arg33: memref<1x64xf32, #tpu.memory_space<vmem>>, %arg34: memref<64x32xbf16, #tpu.memory_space<vmem>>, %arg35: memref<1x32xf32, #tpu.memory_space<vmem>>, %arg36: memref<1x32xf32, #tpu.memory_space<vmem>>, %arg37: memref<1x32xf32, #tpu.memory_space<vmem>>, %arg38: memref<32x16xbf16, #tpu.memory_space<vmem>>, %arg39: memref<1x16xf32, #tpu.memory_space<vmem>>, %arg40: memref<1x16xf32, #tpu.memory_space<vmem>>, %arg41: memref<1x16xf32, #tpu.memory_space<vmem>>, %arg42: memref<16x128xbf16, #tpu.memory_space<vmem>>, %arg43: memref<1x128xf32, #tpu.memory_space<vmem>>, %arg44: memref<40x32xf32, #tpu.memory_space<vmem>>, %arg45: memref<40x128xf32, #tpu.memory_space<vmem>>) attributes {dimension_semantics = [], scalar_prefetch = 0 : i64, scratch_operands = 0 : i64, tpu.core_type = #tpu.core_type<tc>} {
    %c0 = arith.constant 0 : index
    %c0_0 = arith.constant 0 : index
    %0 = vector.load %arg0[%c0, %c0_0] : memref<40x16xf32, #tpu.memory_space<vmem>>, vector<40x16xf32>
    %c0_1 = arith.constant 0 : index
    %c0_2 = arith.constant 0 : index
    %1 = vector.load %arg1[%c0_1, %c0_2] : memref<40x40xf32, #tpu.memory_space<vmem>>, vector<40x40xf32>
    %c0_3 = arith.constant 0 : index
    %c0_4 = arith.constant 0 : index
    %2 = vector.load %arg2[%c0_3, %c0_4] : memref<1x16xf32, #tpu.memory_space<vmem>>, vector<1x16xf32>
    %c0_5 = arith.constant 0 : index
    %c0_6 = arith.constant 0 : index
    %3 = vector.load %arg3[%c0_5, %c0_6] : memref<1x16xf32, #tpu.memory_space<vmem>>, vector<1x16xf32>
    %c0_7 = arith.constant 0 : index
    %c0_8 = arith.constant 0 : index
    %4 = vector.load %arg5[%c0_7, %c0_8] : memref<1x32xf32, #tpu.memory_space<vmem>>, vector<1x32xf32>
    %c0_9 = arith.constant 0 : index
    %c0_10 = arith.constant 0 : index
    %5 = vector.load %arg39[%c0_9, %c0_10] : memref<1x16xf32, #tpu.memory_space<vmem>>, vector<1x16xf32>
    %c0_11 = arith.constant 0 : index
    %c0_12 = arith.constant 0 : index
    %6 = vector.load %arg40[%c0_11, %c0_12] : memref<1x16xf32, #tpu.memory_space<vmem>>, vector<1x16xf32>
    %c0_13 = arith.constant 0 : index
    %c0_14 = arith.constant 0 : index
    %7 = vector.load %arg41[%c0_13, %c0_14] : memref<1x16xf32, #tpu.memory_space<vmem>>, vector<1x16xf32>
    %c0_15 = arith.constant 0 : index
    %c0_16 = arith.constant 0 : index
    %8 = vector.load %arg43[%c0_15, %c0_16] : memref<1x128xf32, #tpu.memory_space<vmem>>, vector<1x128xf32>
    %cst = arith.constant dense<0.000000e+00> : vector<40xf32>
    %9 = vector.multi_reduction <add>, %0, %cst [1] : vector<40x16xf32> to vector<40xf32>
    %10 = vector.shape_cast %9 : vector<40xf32> to vector<40x1xf32>
    %cst_17 = arith.constant 1.600000e+01 : f32
    %11 = vector.broadcast %cst_17 : f32 to vector<40x1xf32>
    %12 = arith.divf %10, %11 : vector<40x1xf32>
    %13 = vector.broadcast %12 : vector<40x1xf32> to vector<40x16xf32>
    %14 = arith.subf %0, %13 : vector<40x16xf32>
    %15 = arith.mulf %14, %14 : vector<40x16xf32>
    %cst_18 = arith.constant dense<0.000000e+00> : vector<40xf32>
    %16 = vector.multi_reduction <add>, %15, %cst_18 [1] : vector<40x16xf32> to vector<40xf32>
    %17 = vector.shape_cast %16 : vector<40xf32> to vector<40x1xf32>
    %cst_19 = arith.constant 1.600000e+01 : f32
    %18 = vector.broadcast %cst_19 : f32 to vector<40x1xf32>
    %19 = arith.divf %17, %18 : vector<40x1xf32>
    %cst_20 = arith.constant 9.99999996E-13 : f32
    %20 = vector.broadcast %cst_20 : f32 to vector<40x1xf32>
    %21 = arith.addf %19, %20 : vector<40x1xf32>
    %22 = math.rsqrt %21 : vector<40x1xf32>
    %23 = vector.broadcast %22 : vector<40x1xf32> to vector<40x16xf32>
    %24 = arith.mulf %14, %23 : vector<40x16xf32>
    %25 = vector.broadcast %2 : vector<1x16xf32> to vector<40x16xf32>
    %26 = arith.mulf %24, %25 : vector<40x16xf32>
    %27 = vector.broadcast %3 : vector<1x16xf32> to vector<40x16xf32>
    %28 = arith.addf %26, %27 : vector<40x16xf32>
    %c0_21 = arith.constant 0 : index
    %c0_22 = arith.constant 0 : index
    %29 = vector.load %arg4[%c0_21, %c0_22] : memref<16x32xbf16, #tpu.memory_space<vmem>>, vector<16x32xbf16>
    %30 = arith.truncf %28 : vector<40x16xf32> to vector<40x16xbf16>
    %cst_23 = arith.constant dense<0.000000e+00> : vector<40x32xf32>
    %31 = tpu.matmul %30, %29, %cst_23 {dimension_numbers = #tpu.dot_dimension_numbers<[1], [0], [0], [1], [0, 0, 1, 1], [], []>} : vector<40x16xbf16>, vector<16x32xbf16>, vector<40x32xf32> -> vector<40x32xf32>
    %32 = vector.broadcast %4 : vector<1x32xf32> to vector<40x32xf32>
    %33 = arith.addf %31, %32 : vector<40x32xf32>
    %c0_24 = arith.constant 0 : index
    %c0_25 = arith.constant 0 : index
    %34 = vector.load %arg6[%c0_24, %c0_25] : memref<32x32xbf16, #tpu.memory_space<vmem>>, vector<32x32xbf16>
    %35 = arith.truncf %33 : vector<40x32xf32> to vector<40x32xbf16>
    %cst_26 = arith.constant dense<0.000000e+00> : vector<40x32xf32>
    %36 = tpu.matmul %35, %34, %cst_26 {dimension_numbers = #tpu.dot_dimension_numbers<[1], [0], [0], [1], [0, 0, 1, 1], [], []>} : vector<40x32xbf16>, vector<32x32xbf16>, vector<40x32xf32> -> vector<40x32xf32>
    %c0_27 = arith.constant 0 : index
    %c0_28 = arith.constant 0 : index
    %37 = vector.load %arg7[%c0_27, %c0_28] : memref<1x32xf32, #tpu.memory_space<vmem>>, vector<1x32xf32>
    %38 = vector.broadcast %37 : vector<1x32xf32> to vector<40x32xf32>
    %39 = arith.addf %36, %38 : vector<40x32xf32>
    %c0_29 = arith.constant 0 : index
    %c0_30 = arith.constant 0 : index
    %40 = vector.load %arg8[%c0_29, %c0_30] : memref<32x32xbf16, #tpu.memory_space<vmem>>, vector<32x32xbf16>
    %41 = arith.truncf %33 : vector<40x32xf32> to vector<40x32xbf16>
    %cst_31 = arith.constant dense<0.000000e+00> : vector<40x32xf32>
    %42 = tpu.matmul %41, %40, %cst_31 {dimension_numbers = #tpu.dot_dimension_numbers<[1], [0], [0], [1], [0, 0, 1, 1], [], []>} : vector<40x32xbf16>, vector<32x32xbf16>, vector<40x32xf32> -> vector<40x32xf32>
    %c0_32 = arith.constant 0 : index
    %c0_33 = arith.constant 0 : index
    %43 = vector.load %arg9[%c0_32, %c0_33] : memref<1x32xf32, #tpu.memory_space<vmem>>, vector<1x32xf32>
    %44 = vector.broadcast %43 : vector<1x32xf32> to vector<40x32xf32>
    %45 = arith.addf %42, %44 : vector<40x32xf32>
    %c0_34 = arith.constant 0 : index
    %c0_35 = arith.constant 0 : index
    %46 = vector.load %arg10[%c0_34, %c0_35] : memref<32x32xbf16, #tpu.memory_space<vmem>>, vector<32x32xbf16>
    %47 = arith.truncf %33 : vector<40x32xf32> to vector<40x32xbf16>
    %cst_36 = arith.constant dense<0.000000e+00> : vector<40x32xf32>
    %48 = tpu.matmul %47, %46, %cst_36 {dimension_numbers = #tpu.dot_dimension_numbers<[1], [0], [0], [1], [0, 0, 1, 1], [], []>} : vector<40x32xbf16>, vector<32x32xbf16>, vector<40x32xf32> -> vector<40x32xf32>
    %c0_37 = arith.constant 0 : index
    %c0_38 = arith.constant 0 : index
    %49 = vector.load %arg11[%c0_37, %c0_38] : memref<1x32xf32, #tpu.memory_space<vmem>>, vector<1x32xf32>
    %50 = vector.broadcast %49 : vector<1x32xf32> to vector<40x32xf32>
    %51 = arith.addf %48, %50 : vector<40x32xf32>
    %c0_39 = arith.constant 0 : index
    %c0_40 = arith.constant 0 : index
    %52 = vector.load %arg12[%c0_39, %c0_40] : memref<32x32xbf16, #tpu.memory_space<vmem>>, vector<32x32xbf16>
    %c0_41 = arith.constant 0 : index
    %c0_42 = arith.constant 0 : index
    %53 = vector.load %arg13[%c0_41, %c0_42] : memref<1x32xf32, #tpu.memory_space<vmem>>, vector<1x32xf32>
    %54 = vector.broadcast %53 : vector<1x32xf32> to vector<40x32xf32>
    %55 = arith.addf %33, %54 : vector<40x32xf32>
    %56 = vector.extract_strided_slice %39 {offsets = [0, 0], sizes = [40, 16], strides = [1, 1]} : vector<40x32xf32> to vector<40x16xf32>
    %57 = vector.extract_strided_slice %45 {offsets = [0, 0], sizes = [40, 16], strides = [1, 1]} : vector<40x32xf32> to vector<40x16xf32>
    %58 = arith.truncf %56 : vector<40x16xf32> to vector<40x16xbf16>
    %59 = arith.truncf %57 : vector<40x16xf32> to vector<40x16xbf16>
    %cst_43 = arith.constant dense<0.000000e+00> : vector<40x40xf32>
    %60 = tpu.matmul %58, %59, %cst_43 {dimension_numbers = #tpu.dot_dimension_numbers<[1], [1], [0], [0], [0, 0, 1, 0], [], []>} : vector<40x16xbf16>, vector<40x16xbf16>, vector<40x40xf32> -> vector<40x40xf32>
    %cst_44 = arith.constant 2.500000e-01 : f32
    %61 = vector.broadcast %cst_44 : f32 to vector<40x40xf32>
    %62 = arith.mulf %60, %61 : vector<40x40xf32>
    %63 = arith.addf %62, %1 : vector<40x40xf32>
    %cst_45 = arith.constant dense<0xFF800000> : vector<40xf32>
    %64 = vector.multi_reduction <maximumf>, %63, %cst_45 [1] : vector<40x40xf32> to vector<40xf32>
    %65 = vector.shape_cast %64 : vector<40xf32> to vector<40x1xf32>
    %66 = vector.broadcast %65 : vector<40x1xf32> to vector<40x40xf32>
    %67 = arith.subf %63, %66 : vector<40x40xf32>
    %68 = math.exp %67 : vector<40x40xf32>
    %cst_46 = arith.constant dense<0.000000e+00> : vector<40xf32>
    %69 = vector.multi_reduction <add>, %68, %cst_46 [1] : vector<40x40xf32> to vector<40xf32>
    %70 = vector.shape_cast %69 : vector<40xf32> to vector<40x1xf32>
    %71 = tpu.reciprocal %70 : vector<40x1xf32> -> vector<40x1xf32>
    %72 = vector.broadcast %71 : vector<40x1xf32> to vector<40x40xf32>
    %73 = arith.mulf %68, %72 : vector<40x40xf32>
    %74 = vector.extract_strided_slice %51 {offsets = [0, 0], sizes = [40, 16], strides = [1, 1]} : vector<40x32xf32> to vector<40x16xf32>
    %75 = arith.truncf %73 : vector<40x40xf32> to vector<40x40xbf16>
    %76 = arith.truncf %74 : vector<40x16xf32> to vector<40x16xbf16>
    %cst_47 = arith.constant dense<0.000000e+00> : vector<40x16xf32>
    %77 = tpu.matmul %75, %76, %cst_47 {dimension_numbers = #tpu.dot_dimension_numbers<[1], [0], [0], [1], [0, 0, 1, 1], [], []>} : vector<40x40xbf16>, vector<40x16xbf16>, vector<40x16xf32> -> vector<40x16xf32>
    %78 = vector.extract_strided_slice %52 {offsets = [0, 0], sizes = [16, 32], strides = [1, 1]} : vector<32x32xbf16> to vector<16x32xbf16>
    %79 = arith.truncf %77 : vector<40x16xf32> to vector<40x16xbf16>
    %cst_48 = arith.constant dense<0.000000e+00> : vector<40x32xf32>
    %80 = tpu.matmul %79, %78, %cst_48 {dimension_numbers = #tpu.dot_dimension_numbers<[1], [0], [0], [1], [0, 0, 1, 1], [], []>} : vector<40x16xbf16>, vector<16x32xbf16>, vector<40x32xf32> -> vector<40x32xf32>
    %81 = arith.addf %55, %80 : vector<40x32xf32>
    %82 = vector.extract_strided_slice %39 {offsets = [0, 16], sizes = [40, 16], strides = [1, 1]} : vector<40x32xf32> to vector<40x16xf32>
    %83 = vector.extract_strided_slice %45 {offsets = [0, 16], sizes = [40, 16], strides = [1, 1]} : vector<40x32xf32> to vector<40x16xf32>
    %84 = arith.truncf %82 : vector<40x16xf32> to vector<40x16xbf16>
    %85 = arith.truncf %83 : vector<40x16xf32> to vector<40x16xbf16>
    %cst_49 = arith.constant dense<0.000000e+00> : vector<40x40xf32>
    %86 = tpu.matmul %84, %85, %cst_49 {dimension_numbers = #tpu.dot_dimension_numbers<[1], [1], [0], [0], [0, 0, 1, 0], [], []>} : vector<40x16xbf16>, vector<40x16xbf16>, vector<40x40xf32> -> vector<40x40xf32>
    %cst_50 = arith.constant 2.500000e-01 : f32
    %87 = vector.broadcast %cst_50 : f32 to vector<40x40xf32>
    %88 = arith.mulf %86, %87 : vector<40x40xf32>
    %89 = arith.addf %88, %1 : vector<40x40xf32>
    %cst_51 = arith.constant dense<0xFF800000> : vector<40xf32>
    %90 = vector.multi_reduction <maximumf>, %89, %cst_51 [1] : vector<40x40xf32> to vector<40xf32>
    %91 = vector.shape_cast %90 : vector<40xf32> to vector<40x1xf32>
    %92 = vector.broadcast %91 : vector<40x1xf32> to vector<40x40xf32>
    %93 = arith.subf %89, %92 : vector<40x40xf32>
    %94 = math.exp %93 : vector<40x40xf32>
    %cst_52 = arith.constant dense<0.000000e+00> : vector<40xf32>
    %95 = vector.multi_reduction <add>, %94, %cst_52 [1] : vector<40x40xf32> to vector<40xf32>
    %96 = vector.shape_cast %95 : vector<40xf32> to vector<40x1xf32>
    %97 = tpu.reciprocal %96 : vector<40x1xf32> -> vector<40x1xf32>
    %98 = vector.broadcast %97 : vector<40x1xf32> to vector<40x40xf32>
    %99 = arith.mulf %94, %98 : vector<40x40xf32>
    %100 = vector.extract_strided_slice %51 {offsets = [0, 16], sizes = [40, 16], strides = [1, 1]} : vector<40x32xf32> to vector<40x16xf32>
    %101 = arith.truncf %99 : vector<40x40xf32> to vector<40x40xbf16>
    %102 = arith.truncf %100 : vector<40x16xf32> to vector<40x16xbf16>
    %cst_53 = arith.constant dense<0.000000e+00> : vector<40x16xf32>
    %103 = tpu.matmul %101, %102, %cst_53 {dimension_numbers = #tpu.dot_dimension_numbers<[1], [0], [0], [1], [0, 0, 1, 1], [], []>} : vector<40x40xbf16>, vector<40x16xbf16>, vector<40x16xf32> -> vector<40x16xf32>
    %104 = vector.extract_strided_slice %52 {offsets = [16, 0], sizes = [16, 32], strides = [1, 1]} : vector<32x32xbf16> to vector<16x32xbf16>
    %105 = arith.truncf %103 : vector<40x16xf32> to vector<40x16xbf16>
    %cst_54 = arith.constant dense<0.000000e+00> : vector<40x32xf32>
    %106 = tpu.matmul %105, %104, %cst_54 {dimension_numbers = #tpu.dot_dimension_numbers<[1], [0], [0], [1], [0, 0, 1, 1], [], []>} : vector<40x16xbf16>, vector<16x32xbf16>, vector<40x32xf32> -> vector<40x32xf32>
    %107 = arith.addf %81, %106 : vector<40x32xf32>
    %c0_55 = arith.constant 0 : index
    %c0_56 = arith.constant 0 : index
    %108 = vector.load %arg14[%c0_55, %c0_56] : memref<1x32xf32, #tpu.memory_space<vmem>>, vector<1x32xf32>
    %c0_57 = arith.constant 0 : index
    %c0_58 = arith.constant 0 : index
    %109 = vector.load %arg15[%c0_57, %c0_58] : memref<1x32xf32, #tpu.memory_space<vmem>>, vector<1x32xf32>
    %cst_59 = arith.constant dense<0.000000e+00> : vector<40xf32>
    %110 = vector.multi_reduction <add>, %107, %cst_59 [1] : vector<40x32xf32> to vector<40xf32>
    %111 = vector.shape_cast %110 : vector<40xf32> to vector<40x1xf32>
    %cst_60 = arith.constant 3.200000e+01 : f32
    %112 = vector.broadcast %cst_60 : f32 to vector<40x1xf32>
    %113 = arith.divf %111, %112 : vector<40x1xf32>
    %114 = vector.broadcast %113 : vector<40x1xf32> to vector<40x32xf32>
    %115 = arith.subf %107, %114 : vector<40x32xf32>
    %116 = arith.mulf %115, %115 : vector<40x32xf32>
    %cst_61 = arith.constant dense<0.000000e+00> : vector<40xf32>
    %117 = vector.multi_reduction <add>, %116, %cst_61 [1] : vector<40x32xf32> to vector<40xf32>
    %118 = vector.shape_cast %117 : vector<40xf32> to vector<40x1xf32>
    %cst_62 = arith.constant 3.200000e+01 : f32
    %119 = vector.broadcast %cst_62 : f32 to vector<40x1xf32>
    %120 = arith.divf %118, %119 : vector<40x1xf32>
    %cst_63 = arith.constant 9.99999996E-13 : f32
    %121 = vector.broadcast %cst_63 : f32 to vector<40x1xf32>
    %122 = arith.addf %120, %121 : vector<40x1xf32>
    %123 = math.rsqrt %122 : vector<40x1xf32>
    %124 = vector.broadcast %123 : vector<40x1xf32> to vector<40x32xf32>
    %125 = arith.mulf %115, %124 : vector<40x32xf32>
    %126 = vector.broadcast %108 : vector<1x32xf32> to vector<40x32xf32>
    %127 = arith.mulf %125, %126 : vector<40x32xf32>
    %128 = vector.broadcast %109 : vector<1x32xf32> to vector<40x32xf32>
    %129 = arith.addf %127, %128 : vector<40x32xf32>
    %c0_64 = arith.constant 0 : index
    %c0_65 = arith.constant 0 : index
    %130 = vector.load %arg16[%c0_64, %c0_65] : memref<32x64xbf16, #tpu.memory_space<vmem>>, vector<32x64xbf16>
    %131 = arith.truncf %129 : vector<40x32xf32> to vector<40x32xbf16>
    %cst_66 = arith.constant dense<0.000000e+00> : vector<40x64xf32>
    %132 = tpu.matmul %131, %130, %cst_66 {dimension_numbers = #tpu.dot_dimension_numbers<[1], [0], [0], [1], [0, 0, 1, 1], [], []>} : vector<40x32xbf16>, vector<32x64xbf16>, vector<40x64xf32> -> vector<40x64xf32>
    %c0_67 = arith.constant 0 : index
    %c0_68 = arith.constant 0 : index
    %133 = vector.load %arg17[%c0_67, %c0_68] : memref<1x64xf32, #tpu.memory_space<vmem>>, vector<1x64xf32>
    %134 = vector.broadcast %133 : vector<1x64xf32> to vector<40x64xf32>
    %135 = arith.addf %132, %134 : vector<40x64xf32>
    %cst_69 = arith.constant 5.000000e-01 : f32
    %136 = vector.broadcast %cst_69 : f32 to vector<40x64xf32>
    %137 = arith.mulf %136, %135 : vector<40x64xf32>
    %cst_70 = arith.constant 4.471500e-02 : f32
    %138 = vector.broadcast %cst_70 : f32 to vector<40x64xf32>
    %139 = arith.mulf %138, %135 : vector<40x64xf32>
    %140 = arith.mulf %139, %135 : vector<40x64xf32>
    %141 = arith.mulf %140, %135 : vector<40x64xf32>
    %142 = arith.addf %135, %141 : vector<40x64xf32>
    %cst_71 = arith.constant 0.797884583 : f32
    %143 = vector.broadcast %cst_71 : f32 to vector<40x64xf32>
    %144 = arith.mulf %143, %142 : vector<40x64xf32>
    %145 = math.tanh %144 : vector<40x64xf32>
    %cst_72 = arith.constant 1.000000e+00 : f32
    %146 = vector.broadcast %cst_72 : f32 to vector<40x64xf32>
    %147 = arith.addf %146, %145 : vector<40x64xf32>
    %148 = arith.mulf %137, %147 : vector<40x64xf32>
    %c0_73 = arith.constant 0 : index
    %c0_74 = arith.constant 0 : index
    %149 = vector.load %arg18[%c0_73, %c0_74] : memref<64x32xbf16, #tpu.memory_space<vmem>>, vector<64x32xbf16>
    %150 = arith.truncf %148 : vector<40x64xf32> to vector<40x64xbf16>
    %cst_75 = arith.constant dense<0.000000e+00> : vector<40x32xf32>
    %151 = tpu.matmul %150, %149, %cst_75 {dimension_numbers = #tpu.dot_dimension_numbers<[1], [0], [0], [1], [0, 0, 1, 1], [], []>} : vector<40x64xbf16>, vector<64x32xbf16>, vector<40x32xf32> -> vector<40x32xf32>
    %c0_76 = arith.constant 0 : index
    %c0_77 = arith.constant 0 : index
    %152 = vector.load %arg19[%c0_76, %c0_77] : memref<1x32xf32, #tpu.memory_space<vmem>>, vector<1x32xf32>
    %153 = vector.broadcast %152 : vector<1x32xf32> to vector<40x32xf32>
    %154 = arith.addf %151, %153 : vector<40x32xf32>
    %155 = arith.addf %154, %129 : vector<40x32xf32>
    %c0_78 = arith.constant 0 : index
    %c0_79 = arith.constant 0 : index
    %156 = vector.load %arg20[%c0_78, %c0_79] : memref<1x32xf32, #tpu.memory_space<vmem>>, vector<1x32xf32>
    %c0_80 = arith.constant 0 : index
    %c0_81 = arith.constant 0 : index
    %157 = vector.load %arg21[%c0_80, %c0_81] : memref<1x32xf32, #tpu.memory_space<vmem>>, vector<1x32xf32>
    %cst_82 = arith.constant dense<0.000000e+00> : vector<40xf32>
    %158 = vector.multi_reduction <add>, %155, %cst_82 [1] : vector<40x32xf32> to vector<40xf32>
    %159 = vector.shape_cast %158 : vector<40xf32> to vector<40x1xf32>
    %cst_83 = arith.constant 3.200000e+01 : f32
    %160 = vector.broadcast %cst_83 : f32 to vector<40x1xf32>
    %161 = arith.divf %159, %160 : vector<40x1xf32>
    %162 = vector.broadcast %161 : vector<40x1xf32> to vector<40x32xf32>
    %163 = arith.subf %155, %162 : vector<40x32xf32>
    %164 = arith.mulf %163, %163 : vector<40x32xf32>
    %cst_84 = arith.constant dense<0.000000e+00> : vector<40xf32>
    %165 = vector.multi_reduction <add>, %164, %cst_84 [1] : vector<40x32xf32> to vector<40xf32>
    %166 = vector.shape_cast %165 : vector<40xf32> to vector<40x1xf32>
    %cst_85 = arith.constant 3.200000e+01 : f32
    %167 = vector.broadcast %cst_85 : f32 to vector<40x1xf32>
    %168 = arith.divf %166, %167 : vector<40x1xf32>
    %cst_86 = arith.constant 9.99999996E-13 : f32
    %169 = vector.broadcast %cst_86 : f32 to vector<40x1xf32>
    %170 = arith.addf %168, %169 : vector<40x1xf32>
    %171 = math.rsqrt %170 : vector<40x1xf32>
    %172 = vector.broadcast %171 : vector<40x1xf32> to vector<40x32xf32>
    %173 = arith.mulf %163, %172 : vector<40x32xf32>
    %174 = vector.broadcast %156 : vector<1x32xf32> to vector<40x32xf32>
    %175 = arith.mulf %173, %174 : vector<40x32xf32>
    %176 = vector.broadcast %157 : vector<1x32xf32> to vector<40x32xf32>
    %177 = arith.addf %175, %176 : vector<40x32xf32>
    %c0_87 = arith.constant 0 : index
    %c0_88 = arith.constant 0 : index
    %178 = vector.load %arg22[%c0_87, %c0_88] : memref<32x32xbf16, #tpu.memory_space<vmem>>, vector<32x32xbf16>
    %179 = arith.truncf %177 : vector<40x32xf32> to vector<40x32xbf16>
    %cst_89 = arith.constant dense<0.000000e+00> : vector<40x32xf32>
    %180 = tpu.matmul %179, %178, %cst_89 {dimension_numbers = #tpu.dot_dimension_numbers<[1], [0], [0], [1], [0, 0, 1, 1], [], []>} : vector<40x32xbf16>, vector<32x32xbf16>, vector<40x32xf32> -> vector<40x32xf32>
    %c0_90 = arith.constant 0 : index
    %c0_91 = arith.constant 0 : index
    %181 = vector.load %arg23[%c0_90, %c0_91] : memref<1x32xf32, #tpu.memory_space<vmem>>, vector<1x32xf32>
    %182 = vector.broadcast %181 : vector<1x32xf32> to vector<40x32xf32>
    %183 = arith.addf %180, %182 : vector<40x32xf32>
    %c0_92 = arith.constant 0 : index
    %c0_93 = arith.constant 0 : index
    %184 = vector.load %arg24[%c0_92, %c0_93] : memref<32x32xbf16, #tpu.memory_space<vmem>>, vector<32x32xbf16>
    %185 = arith.truncf %177 : vector<40x32xf32> to vector<40x32xbf16>
    %cst_94 = arith.constant dense<0.000000e+00> : vector<40x32xf32>
    %186 = tpu.matmul %185, %184, %cst_94 {dimension_numbers = #tpu.dot_dimension_numbers<[1], [0], [0], [1], [0, 0, 1, 1], [], []>} : vector<40x32xbf16>, vector<32x32xbf16>, vector<40x32xf32> -> vector<40x32xf32>
    %c0_95 = arith.constant 0 : index
    %c0_96 = arith.constant 0 : index
    %187 = vector.load %arg25[%c0_95, %c0_96] : memref<1x32xf32, #tpu.memory_space<vmem>>, vector<1x32xf32>
    %188 = vector.broadcast %187 : vector<1x32xf32> to vector<40x32xf32>
    %189 = arith.addf %186, %188 : vector<40x32xf32>
    %c0_97 = arith.constant 0 : index
    %c0_98 = arith.constant 0 : index
    %190 = vector.load %arg26[%c0_97, %c0_98] : memref<32x32xbf16, #tpu.memory_space<vmem>>, vector<32x32xbf16>
    %191 = arith.truncf %177 : vector<40x32xf32> to vector<40x32xbf16>
    %cst_99 = arith.constant dense<0.000000e+00> : vector<40x32xf32>
    %192 = tpu.matmul %191, %190, %cst_99 {dimension_numbers = #tpu.dot_dimension_numbers<[1], [0], [0], [1], [0, 0, 1, 1], [], []>} : vector<40x32xbf16>, vector<32x32xbf16>, vector<40x32xf32> -> vector<40x32xf32>
    %c0_100 = arith.constant 0 : index
    %c0_101 = arith.constant 0 : index
    %193 = vector.load %arg27[%c0_100, %c0_101] : memref<1x32xf32, #tpu.memory_space<vmem>>, vector<1x32xf32>
    %194 = vector.broadcast %193 : vector<1x32xf32> to vector<40x32xf32>
    %195 = arith.addf %192, %194 : vector<40x32xf32>
    %c0_102 = arith.constant 0 : index
    %c0_103 = arith.constant 0 : index
    %196 = vector.load %arg28[%c0_102, %c0_103] : memref<32x32xbf16, #tpu.memory_space<vmem>>, vector<32x32xbf16>
    %c0_104 = arith.constant 0 : index
    %c0_105 = arith.constant 0 : index
    %197 = vector.load %arg29[%c0_104, %c0_105] : memref<1x32xf32, #tpu.memory_space<vmem>>, vector<1x32xf32>
    %198 = vector.broadcast %197 : vector<1x32xf32> to vector<40x32xf32>
    %199 = arith.addf %177, %198 : vector<40x32xf32>
    %200 = vector.extract_strided_slice %183 {offsets = [0, 0], sizes = [40, 16], strides = [1, 1]} : vector<40x32xf32> to vector<40x16xf32>
    %201 = vector.extract_strided_slice %189 {offsets = [0, 0], sizes = [40, 16], strides = [1, 1]} : vector<40x32xf32> to vector<40x16xf32>
    %202 = arith.truncf %200 : vector<40x16xf32> to vector<40x16xbf16>
    %203 = arith.truncf %201 : vector<40x16xf32> to vector<40x16xbf16>
    %cst_106 = arith.constant dense<0.000000e+00> : vector<40x40xf32>
    %204 = tpu.matmul %202, %203, %cst_106 {dimension_numbers = #tpu.dot_dimension_numbers<[1], [1], [0], [0], [0, 0, 1, 0], [], []>} : vector<40x16xbf16>, vector<40x16xbf16>, vector<40x40xf32> -> vector<40x40xf32>
    %cst_107 = arith.constant 2.500000e-01 : f32
    %205 = vector.broadcast %cst_107 : f32 to vector<40x40xf32>
    %206 = arith.mulf %204, %205 : vector<40x40xf32>
    %207 = arith.addf %206, %1 : vector<40x40xf32>
    %cst_108 = arith.constant dense<0xFF800000> : vector<40xf32>
    %208 = vector.multi_reduction <maximumf>, %207, %cst_108 [1] : vector<40x40xf32> to vector<40xf32>
    %209 = vector.shape_cast %208 : vector<40xf32> to vector<40x1xf32>
    %210 = vector.broadcast %209 : vector<40x1xf32> to vector<40x40xf32>
    %211 = arith.subf %207, %210 : vector<40x40xf32>
    %212 = math.exp %211 : vector<40x40xf32>
    %cst_109 = arith.constant dense<0.000000e+00> : vector<40xf32>
    %213 = vector.multi_reduction <add>, %212, %cst_109 [1] : vector<40x40xf32> to vector<40xf32>
    %214 = vector.shape_cast %213 : vector<40xf32> to vector<40x1xf32>
    %215 = tpu.reciprocal %214 : vector<40x1xf32> -> vector<40x1xf32>
    %216 = vector.broadcast %215 : vector<40x1xf32> to vector<40x40xf32>
    %217 = arith.mulf %212, %216 : vector<40x40xf32>
    %218 = vector.extract_strided_slice %195 {offsets = [0, 0], sizes = [40, 16], strides = [1, 1]} : vector<40x32xf32> to vector<40x16xf32>
    %219 = arith.truncf %217 : vector<40x40xf32> to vector<40x40xbf16>
    %220 = arith.truncf %218 : vector<40x16xf32> to vector<40x16xbf16>
    %cst_110 = arith.constant dense<0.000000e+00> : vector<40x16xf32>
    %221 = tpu.matmul %219, %220, %cst_110 {dimension_numbers = #tpu.dot_dimension_numbers<[1], [0], [0], [1], [0, 0, 1, 1], [], []>} : vector<40x40xbf16>, vector<40x16xbf16>, vector<40x16xf32> -> vector<40x16xf32>
    %222 = vector.extract_strided_slice %196 {offsets = [0, 0], sizes = [16, 32], strides = [1, 1]} : vector<32x32xbf16> to vector<16x32xbf16>
    %223 = arith.truncf %221 : vector<40x16xf32> to vector<40x16xbf16>
    %cst_111 = arith.constant dense<0.000000e+00> : vector<40x32xf32>
    %224 = tpu.matmul %223, %222, %cst_111 {dimension_numbers = #tpu.dot_dimension_numbers<[1], [0], [0], [1], [0, 0, 1, 1], [], []>} : vector<40x16xbf16>, vector<16x32xbf16>, vector<40x32xf32> -> vector<40x32xf32>
    %225 = arith.addf %199, %224 : vector<40x32xf32>
    %226 = vector.extract_strided_slice %183 {offsets = [0, 16], sizes = [40, 16], strides = [1, 1]} : vector<40x32xf32> to vector<40x16xf32>
    %227 = vector.extract_strided_slice %189 {offsets = [0, 16], sizes = [40, 16], strides = [1, 1]} : vector<40x32xf32> to vector<40x16xf32>
    %228 = arith.truncf %226 : vector<40x16xf32> to vector<40x16xbf16>
    %229 = arith.truncf %227 : vector<40x16xf32> to vector<40x16xbf16>
    %cst_112 = arith.constant dense<0.000000e+00> : vector<40x40xf32>
    %230 = tpu.matmul %228, %229, %cst_112 {dimension_numbers = #tpu.dot_dimension_numbers<[1], [1], [0], [0], [0, 0, 1, 0], [], []>} : vector<40x16xbf16>, vector<40x16xbf16>, vector<40x40xf32> -> vector<40x40xf32>
    %cst_113 = arith.constant 2.500000e-01 : f32
    %231 = vector.broadcast %cst_113 : f32 to vector<40x40xf32>
    %232 = arith.mulf %230, %231 : vector<40x40xf32>
    %233 = arith.addf %232, %1 : vector<40x40xf32>
    %cst_114 = arith.constant dense<0xFF800000> : vector<40xf32>
    %234 = vector.multi_reduction <maximumf>, %233, %cst_114 [1] : vector<40x40xf32> to vector<40xf32>
    %235 = vector.shape_cast %234 : vector<40xf32> to vector<40x1xf32>
    %236 = vector.broadcast %235 : vector<40x1xf32> to vector<40x40xf32>
    %237 = arith.subf %233, %236 : vector<40x40xf32>
    %238 = math.exp %237 : vector<40x40xf32>
    %cst_115 = arith.constant dense<0.000000e+00> : vector<40xf32>
    %239 = vector.multi_reduction <add>, %238, %cst_115 [1] : vector<40x40xf32> to vector<40xf32>
    %240 = vector.shape_cast %239 : vector<40xf32> to vector<40x1xf32>
    %241 = tpu.reciprocal %240 : vector<40x1xf32> -> vector<40x1xf32>
    %242 = vector.broadcast %241 : vector<40x1xf32> to vector<40x40xf32>
    %243 = arith.mulf %238, %242 : vector<40x40xf32>
    %244 = vector.extract_strided_slice %195 {offsets = [0, 16], sizes = [40, 16], strides = [1, 1]} : vector<40x32xf32> to vector<40x16xf32>
    %245 = arith.truncf %243 : vector<40x40xf32> to vector<40x40xbf16>
    %246 = arith.truncf %244 : vector<40x16xf32> to vector<40x16xbf16>
    %cst_116 = arith.constant dense<0.000000e+00> : vector<40x16xf32>
    %247 = tpu.matmul %245, %246, %cst_116 {dimension_numbers = #tpu.dot_dimension_numbers<[1], [0], [0], [1], [0, 0, 1, 1], [], []>} : vector<40x40xbf16>, vector<40x16xbf16>, vector<40x16xf32> -> vector<40x16xf32>
    %248 = vector.extract_strided_slice %196 {offsets = [16, 0], sizes = [16, 32], strides = [1, 1]} : vector<32x32xbf16> to vector<16x32xbf16>
    %249 = arith.truncf %247 : vector<40x16xf32> to vector<40x16xbf16>
    %cst_117 = arith.constant dense<0.000000e+00> : vector<40x32xf32>
    %250 = tpu.matmul %249, %248, %cst_117 {dimension_numbers = #tpu.dot_dimension_numbers<[1], [0], [0], [1], [0, 0, 1, 1], [], []>} : vector<40x16xbf16>, vector<16x32xbf16>, vector<40x32xf32> -> vector<40x32xf32>
    %251 = arith.addf %225, %250 : vector<40x32xf32>
    %c0_118 = arith.constant 0 : index
    %c0_119 = arith.constant 0 : index
    %252 = vector.load %arg30[%c0_118, %c0_119] : memref<1x32xf32, #tpu.memory_space<vmem>>, vector<1x32xf32>
    %c0_120 = arith.constant 0 : index
    %c0_121 = arith.constant 0 : index
    %253 = vector.load %arg31[%c0_120, %c0_121] : memref<1x32xf32, #tpu.memory_space<vmem>>, vector<1x32xf32>
    %cst_122 = arith.constant dense<0.000000e+00> : vector<40xf32>
    %254 = vector.multi_reduction <add>, %251, %cst_122 [1] : vector<40x32xf32> to vector<40xf32>
    %255 = vector.shape_cast %254 : vector<40xf32> to vector<40x1xf32>
    %cst_123 = arith.constant 3.200000e+01 : f32
    %256 = vector.broadcast %cst_123 : f32 to vector<40x1xf32>
    %257 = arith.divf %255, %256 : vector<40x1xf32>
    %258 = vector.broadcast %257 : vector<40x1xf32> to vector<40x32xf32>
    %259 = arith.subf %251, %258 : vector<40x32xf32>
    %260 = arith.mulf %259, %259 : vector<40x32xf32>
    %cst_124 = arith.constant dense<0.000000e+00> : vector<40xf32>
    %261 = vector.multi_reduction <add>, %260, %cst_124 [1] : vector<40x32xf32> to vector<40xf32>
    %262 = vector.shape_cast %261 : vector<40xf32> to vector<40x1xf32>
    %cst_125 = arith.constant 3.200000e+01 : f32
    %263 = vector.broadcast %cst_125 : f32 to vector<40x1xf32>
    %264 = arith.divf %262, %263 : vector<40x1xf32>
    %cst_126 = arith.constant 9.99999996E-13 : f32
    %265 = vector.broadcast %cst_126 : f32 to vector<40x1xf32>
    %266 = arith.addf %264, %265 : vector<40x1xf32>
    %267 = math.rsqrt %266 : vector<40x1xf32>
    %268 = vector.broadcast %267 : vector<40x1xf32> to vector<40x32xf32>
    %269 = arith.mulf %259, %268 : vector<40x32xf32>
    %270 = vector.broadcast %252 : vector<1x32xf32> to vector<40x32xf32>
    %271 = arith.mulf %269, %270 : vector<40x32xf32>
    %272 = vector.broadcast %253 : vector<1x32xf32> to vector<40x32xf32>
    %273 = arith.addf %271, %272 : vector<40x32xf32>
    %c0_127 = arith.constant 0 : index
    %c0_128 = arith.constant 0 : index
    %274 = vector.load %arg32[%c0_127, %c0_128] : memref<32x64xbf16, #tpu.memory_space<vmem>>, vector<32x64xbf16>
    %275 = arith.truncf %273 : vector<40x32xf32> to vector<40x32xbf16>
    %cst_129 = arith.constant dense<0.000000e+00> : vector<40x64xf32>
    %276 = tpu.matmul %275, %274, %cst_129 {dimension_numbers = #tpu.dot_dimension_numbers<[1], [0], [0], [1], [0, 0, 1, 1], [], []>} : vector<40x32xbf16>, vector<32x64xbf16>, vector<40x64xf32> -> vector<40x64xf32>
    %c0_130 = arith.constant 0 : index
    %c0_131 = arith.constant 0 : index
    %277 = vector.load %arg33[%c0_130, %c0_131] : memref<1x64xf32, #tpu.memory_space<vmem>>, vector<1x64xf32>
    %278 = vector.broadcast %277 : vector<1x64xf32> to vector<40x64xf32>
    %279 = arith.addf %276, %278 : vector<40x64xf32>
    %cst_132 = arith.constant 5.000000e-01 : f32
    %280 = vector.broadcast %cst_132 : f32 to vector<40x64xf32>
    %281 = arith.mulf %280, %279 : vector<40x64xf32>
    %cst_133 = arith.constant 4.471500e-02 : f32
    %282 = vector.broadcast %cst_133 : f32 to vector<40x64xf32>
    %283 = arith.mulf %282, %279 : vector<40x64xf32>
    %284 = arith.mulf %283, %279 : vector<40x64xf32>
    %285 = arith.mulf %284, %279 : vector<40x64xf32>
    %286 = arith.addf %279, %285 : vector<40x64xf32>
    %cst_134 = arith.constant 0.797884583 : f32
    %287 = vector.broadcast %cst_134 : f32 to vector<40x64xf32>
    %288 = arith.mulf %287, %286 : vector<40x64xf32>
    %289 = math.tanh %288 : vector<40x64xf32>
    %cst_135 = arith.constant 1.000000e+00 : f32
    %290 = vector.broadcast %cst_135 : f32 to vector<40x64xf32>
    %291 = arith.addf %290, %289 : vector<40x64xf32>
    %292 = arith.mulf %281, %291 : vector<40x64xf32>
    %c0_136 = arith.constant 0 : index
    %c0_137 = arith.constant 0 : index
    %293 = vector.load %arg34[%c0_136, %c0_137] : memref<64x32xbf16, #tpu.memory_space<vmem>>, vector<64x32xbf16>
    %294 = arith.truncf %292 : vector<40x64xf32> to vector<40x64xbf16>
    %cst_138 = arith.constant dense<0.000000e+00> : vector<40x32xf32>
    %295 = tpu.matmul %294, %293, %cst_138 {dimension_numbers = #tpu.dot_dimension_numbers<[1], [0], [0], [1], [0, 0, 1, 1], [], []>} : vector<40x64xbf16>, vector<64x32xbf16>, vector<40x32xf32> -> vector<40x32xf32>
    %c0_139 = arith.constant 0 : index
    %c0_140 = arith.constant 0 : index
    %296 = vector.load %arg35[%c0_139, %c0_140] : memref<1x32xf32, #tpu.memory_space<vmem>>, vector<1x32xf32>
    %297 = vector.broadcast %296 : vector<1x32xf32> to vector<40x32xf32>
    %298 = arith.addf %295, %297 : vector<40x32xf32>
    %299 = arith.addf %298, %273 : vector<40x32xf32>
    %c0_141 = arith.constant 0 : index
    %c0_142 = arith.constant 0 : index
    %300 = vector.load %arg36[%c0_141, %c0_142] : memref<1x32xf32, #tpu.memory_space<vmem>>, vector<1x32xf32>
    %c0_143 = arith.constant 0 : index
    %c0_144 = arith.constant 0 : index
    %301 = vector.load %arg37[%c0_143, %c0_144] : memref<1x32xf32, #tpu.memory_space<vmem>>, vector<1x32xf32>
    %cst_145 = arith.constant dense<0.000000e+00> : vector<40xf32>
    %302 = vector.multi_reduction <add>, %299, %cst_145 [1] : vector<40x32xf32> to vector<40xf32>
    %303 = vector.shape_cast %302 : vector<40xf32> to vector<40x1xf32>
    %cst_146 = arith.constant 3.200000e+01 : f32
    %304 = vector.broadcast %cst_146 : f32 to vector<40x1xf32>
    %305 = arith.divf %303, %304 : vector<40x1xf32>
    %306 = vector.broadcast %305 : vector<40x1xf32> to vector<40x32xf32>
    %307 = arith.subf %299, %306 : vector<40x32xf32>
    %308 = arith.mulf %307, %307 : vector<40x32xf32>
    %cst_147 = arith.constant dense<0.000000e+00> : vector<40xf32>
    %309 = vector.multi_reduction <add>, %308, %cst_147 [1] : vector<40x32xf32> to vector<40xf32>
    %310 = vector.shape_cast %309 : vector<40xf32> to vector<40x1xf32>
    %cst_148 = arith.constant 3.200000e+01 : f32
    %311 = vector.broadcast %cst_148 : f32 to vector<40x1xf32>
    %312 = arith.divf %310, %311 : vector<40x1xf32>
    %cst_149 = arith.constant 9.99999996E-13 : f32
    %313 = vector.broadcast %cst_149 : f32 to vector<40x1xf32>
    %314 = arith.addf %312, %313 : vector<40x1xf32>
    %315 = math.rsqrt %314 : vector<40x1xf32>
    %316 = vector.broadcast %315 : vector<40x1xf32> to vector<40x32xf32>
    %317 = arith.mulf %307, %316 : vector<40x32xf32>
    %318 = vector.broadcast %300 : vector<1x32xf32> to vector<40x32xf32>
    %319 = arith.mulf %317, %318 : vector<40x32xf32>
    %320 = vector.broadcast %301 : vector<1x32xf32> to vector<40x32xf32>
    %321 = arith.addf %319, %320 : vector<40x32xf32>
    %c0_150 = arith.constant 0 : index
    %c0_151 = arith.constant 0 : index
    %322 = vector.load %arg44[%c0_150, %c0_151] : memref<40x32xf32, #tpu.memory_space<vmem>>, vector<40x32xf32>
    tpu.vector_store %arg44[%c0_150, %c0_151], %321 {strides = array<i32>} : memref<40x32xf32, #tpu.memory_space<vmem>>, vector<40x32xf32>,
    %c0_152 = arith.constant 0 : index
    %c0_153 = arith.constant 0 : index
    %323 = vector.load %arg38[%c0_152, %c0_153] : memref<32x16xbf16, #tpu.memory_space<vmem>>, vector<32x16xbf16>
    %324 = arith.truncf %321 : vector<40x32xf32> to vector<40x32xbf16>
    %cst_154 = arith.constant dense<0.000000e+00> : vector<40x16xf32>
    %325 = tpu.matmul %324, %323, %cst_154 {dimension_numbers = #tpu.dot_dimension_numbers<[1], [0], [0], [1], [0, 0, 1, 1], [], []>} : vector<40x32xbf16>, vector<32x16xbf16>, vector<40x16xf32> -> vector<40x16xf32>
    %326 = vector.broadcast %5 : vector<1x16xf32> to vector<40x16xf32>
    %327 = arith.addf %325, %326 : vector<40x16xf32>
    %cst_155 = arith.constant 5.000000e-01 : f32
    %328 = vector.broadcast %cst_155 : f32 to vector<40x16xf32>
    %329 = arith.mulf %328, %327 : vector<40x16xf32>
    %cst_156 = arith.constant 4.471500e-02 : f32
    %330 = vector.broadcast %cst_156 : f32 to vector<40x16xf32>
    %331 = arith.mulf %330, %327 : vector<40x16xf32>
    %332 = arith.mulf %331, %327 : vector<40x16xf32>
    %333 = arith.mulf %332, %327 : vector<40x16xf32>
    %334 = arith.addf %327, %333 : vector<40x16xf32>
    %cst_157 = arith.constant 0.797884583 : f32
    %335 = vector.broadcast %cst_157 : f32 to vector<40x16xf32>
    %336 = arith.mulf %335, %334 : vector<40x16xf32>
    %337 = math.tanh %336 : vector<40x16xf32>
    %cst_158 = arith.constant 1.000000e+00 : f32
    %338 = vector.broadcast %cst_158 : f32 to vector<40x16xf32>
    %339 = arith.addf %338, %337 : vector<40x16xf32>
    %340 = arith.mulf %329, %339 : vector<40x16xf32>
    %cst_159 = arith.constant dense<0.000000e+00> : vector<40xf32>
    %341 = vector.multi_reduction <add>, %340, %cst_159 [1] : vector<40x16xf32> to vector<40xf32>
    %342 = vector.shape_cast %341 : vector<40xf32> to vector<40x1xf32>
    %cst_160 = arith.constant 1.600000e+01 : f32
    %343 = vector.broadcast %cst_160 : f32 to vector<40x1xf32>
    %344 = arith.divf %342, %343 : vector<40x1xf32>
    %345 = vector.broadcast %344 : vector<40x1xf32> to vector<40x16xf32>
    %346 = arith.subf %340, %345 : vector<40x16xf32>
    %347 = arith.mulf %346, %346 : vector<40x16xf32>
    %cst_161 = arith.constant dense<0.000000e+00> : vector<40xf32>
    %348 = vector.multi_reduction <add>, %347, %cst_161 [1] : vector<40x16xf32> to vector<40xf32>
    %349 = vector.shape_cast %348 : vector<40xf32> to vector<40x1xf32>
    %cst_162 = arith.constant 1.600000e+01 : f32
    %350 = vector.broadcast %cst_162 : f32 to vector<40x1xf32>
    %351 = arith.divf %349, %350 : vector<40x1xf32>
    %cst_163 = arith.constant 9.99999996E-13 : f32
    %352 = vector.broadcast %cst_163 : f32 to vector<40x1xf32>
    %353 = arith.addf %351, %352 : vector<40x1xf32>
    %354 = math.rsqrt %353 : vector<40x1xf32>
    %355 = vector.broadcast %354 : vector<40x1xf32> to vector<40x16xf32>
    %356 = arith.mulf %346, %355 : vector<40x16xf32>
    %357 = vector.broadcast %6 : vector<1x16xf32> to vector<40x16xf32>
    %358 = arith.mulf %356, %357 : vector<40x16xf32>
    %359 = vector.broadcast %7 : vector<1x16xf32> to vector<40x16xf32>
    %360 = arith.addf %358, %359 : vector<40x16xf32>
    %c0_164 = arith.constant 0 : index
    %c0_165 = arith.constant 0 : index
    %361 = vector.load %arg42[%c0_164, %c0_165] : memref<16x128xbf16, #tpu.memory_space<vmem>>, vector<16x128xbf16>
    %362 = arith.truncf %360 : vector<40x16xf32> to vector<40x16xbf16>
    %cst_166 = arith.constant dense<0.000000e+00> : vector<40x128xf32>
    %363 = tpu.matmul %362, %361, %cst_166 {dimension_numbers = #tpu.dot_dimension_numbers<[1], [0], [0], [1], [0, 0, 1, 1], [], []>} : vector<40x16xbf16>, vector<16x128xbf16>, vector<40x128xf32> -> vector<40x128xf32>
    %364 = vector.broadcast %8 : vector<1x128xf32> to vector<40x128xf32>
    %365 = arith.addf %363, %364 : vector<40x128xf32>
    %c0_167 = arith.constant 0 : index
    %c0_168 = arith.constant 0 : index
    %366 = vector.load %arg45[%c0_167, %c0_168] : memref<40x128xf32, #tpu.memory_space<vmem>>, vector<40x128xf32>
    tpu.vector_store %arg45[%c0_167, %c0_168], %365 {strides = array<i32>} : memref<40x128xf32, #tpu.memory_space<vmem>>, vector<40x128xf32>,
    return
  }
}

module attributes {stable_mosaic.version = 11 : i64} {
  func.func @_hanzi_fuse_heads_kernel(%arg0: memref<16x96xf32, #tpu.memory_space<vmem>>, %arg1: memref<16x96xf32, #tpu.memory_space<vmem>>, %arg2: memref<96x96xbf16, #tpu.memory_space<vmem>>, %arg3: memref<1x96xf32, #tpu.memory_space<vmem>>, %arg4: memref<96x96xbf16, #tpu.memory_space<vmem>>, %arg5: memref<96x96xbf16, #tpu.memory_space<vmem>>, %arg6: memref<1x96xf32, #tpu.memory_space<vmem>>, %arg7: memref<1x96xf32, #tpu.memory_space<vmem>>, %arg8: memref<1x96xf32, #tpu.memory_space<vmem>>, %arg9: memref<96x96xbf16, #tpu.memory_space<vmem>>, %arg10: memref<1x96xf32, #tpu.memory_space<vmem>>, %arg11: memref<1x96xf32, #tpu.memory_space<vmem>>, %arg12: memref<1x96xf32, #tpu.memory_space<vmem>>, %arg13: memref<96x128xbf16, #tpu.memory_space<vmem>>, %arg14: memref<1x128xf32, #tpu.memory_space<vmem>>, %arg15: memref<96x96xbf16, #tpu.memory_space<vmem>>, %arg16: memref<1x96xf32, #tpu.memory_space<vmem>>, %arg17: memref<1x96xf32, #tpu.memory_space<vmem>>, %arg18: memref<1x96xf32, #tpu.memory_space<vmem>>, %arg19: memref<96x128xbf16, #tpu.memory_space<vmem>>, %arg20: memref<1x128xf32, #tpu.memory_space<vmem>>, %arg21: memref<16x128xf32, #tpu.memory_space<vmem>>, %arg22: memref<16x128xf32, #tpu.memory_space<vmem>>) attributes {dimension_semantics = [], scalar_prefetch = 0 : i64, scratch_operands = 0 : i64, tpu.core_type = #tpu.core_type<tc>} {
    %c0 = arith.constant 0 : index
    %c0_0 = arith.constant 0 : index
    %0 = vector.load %arg0[%c0, %c0_0] : memref<16x96xf32, #tpu.memory_space<vmem>>, vector<16x96xf32>
    %c0_1 = arith.constant 0 : index
    %c0_2 = arith.constant 0 : index
    %1 = vector.load %arg1[%c0_1, %c0_2] : memref<16x96xf32, #tpu.memory_space<vmem>>, vector<16x96xf32>
    %c0_3 = arith.constant 0 : index
    %c0_4 = arith.constant 0 : index
    %2 = vector.load %arg2[%c0_3, %c0_4] : memref<96x96xbf16, #tpu.memory_space<vmem>>, vector<96x96xbf16>
    %3 = arith.truncf %1 : vector<16x96xf32> to vector<16x96xbf16>
    %cst = arith.constant dense<0.000000e+00> : vector<16x96xf32>
    %4 = tpu.matmul %3, %2, %cst {dimension_numbers = #tpu.dot_dimension_numbers<[1], [0], [0], [1], [0, 0, 1, 1], [], []>} : vector<16x96xbf16>, vector<96x96xbf16>, vector<16x96xf32> -> vector<16x96xf32>
    %c0_5 = arith.constant 0 : index
    %c0_6 = arith.constant 0 : index
    %5 = vector.load %arg3[%c0_5, %c0_6] : memref<1x96xf32, #tpu.memory_space<vmem>>, vector<1x96xf32>
    %6 = vector.broadcast %5 : vector<1x96xf32> to vector<16x96xf32>
    %7 = arith.addf %4, %6 : vector<16x96xf32>
    %c0_7 = arith.constant 0 : index
    %c0_8 = arith.constant 0 : index
    %8 = vector.load %arg4[%c0_7, %c0_8] : memref<96x96xbf16, #tpu.memory_space<vmem>>, vector<96x96xbf16>
    %9 = arith.truncf %0 : vector<16x96xf32> to vector<16x96xbf16>
    %cst_9 = arith.constant dense<0.000000e+00> : vector<16x96xf32>
    %10 = tpu.matmul %9, %8, %cst_9 {dimension_numbers = #tpu.dot_dimension_numbers<[1], [0], [0], [1], [0, 0, 1, 1], [], []>} : vector<16x96xbf16>, vector<96x96xbf16>, vector<16x96xf32> -> vector<16x96xf32>
    %c0_10 = arith.constant 0 : index
    %c0_11 = arith.constant 0 : index
    %11 = vector.load %arg5[%c0_10, %c0_11] : memref<96x96xbf16, #tpu.memory_space<vmem>>, vector<96x96xbf16>
    %12 = arith.truncf %7 : vector<16x96xf32> to vector<16x96xbf16>
    %cst_12 = arith.constant dense<0.000000e+00> : vector<16x96xf32>
    %13 = tpu.matmul %12, %11, %cst_12 {dimension_numbers = #tpu.dot_dimension_numbers<[1], [0], [0], [1], [0, 0, 1, 1], [], []>} : vector<16x96xbf16>, vector<96x96xbf16>, vector<16x96xf32> -> vector<16x96xf32>
    %14 = arith.addf %10, %13 : vector<16x96xf32>
    %c0_13 = arith.constant 0 : index
    %c0_14 = arith.constant 0 : index
    %15 = vector.load %arg6[%c0_13, %c0_14] : memref<1x96xf32, #tpu.memory_space<vmem>>, vector<1x96xf32>
    %16 = vector.broadcast %15 : vector<1x96xf32> to vector<16x96xf32>
    %17 = arith.addf %14, %16 : vector<16x96xf32>
    %c0_15 = arith.constant 0 : index
    %c0_16 = arith.constant 0 : index
    %18 = vector.load %arg7[%c0_15, %c0_16] : memref<1x96xf32, #tpu.memory_space<vmem>>, vector<1x96xf32>
    %c0_17 = arith.constant 0 : index
    %c0_18 = arith.constant 0 : index
    %19 = vector.load %arg8[%c0_17, %c0_18] : memref<1x96xf32, #tpu.memory_space<vmem>>, vector<1x96xf32>
    %cst_19 = arith.constant dense<0.000000e+00> : vector<16xf32>
    %20 = vector.multi_reduction <add>, %17, %cst_19 [1] : vector<16x96xf32> to vector<16xf32>
    %21 = vector.shape_cast %20 : vector<16xf32> to vector<16x1xf32>
    %cst_20 = arith.constant 9.600000e+01 : f32
    %22 = vector.broadcast %cst_20 : f32 to vector<16x1xf32>
    %23 = arith.divf %21, %22 : vector<16x1xf32>
    %24 = vector.broadcast %23 : vector<16x1xf32> to vector<16x96xf32>
    %25 = arith.subf %17, %24 : vector<16x96xf32>
    %26 = arith.mulf %25, %25 : vector<16x96xf32>
    %cst_21 = arith.constant dense<0.000000e+00> : vector<16xf32>
    %27 = vector.multi_reduction <add>, %26, %cst_21 [1] : vector<16x96xf32> to vector<16xf32>
    %28 = vector.shape_cast %27 : vector<16xf32> to vector<16x1xf32>
    %cst_22 = arith.constant 9.600000e+01 : f32
    %29 = vector.broadcast %cst_22 : f32 to vector<16x1xf32>
    %30 = arith.divf %28, %29 : vector<16x1xf32>
    %cst_23 = arith.constant 9.99999996E-13 : f32
    %31 = vector.broadcast %cst_23 : f32 to vector<16x1xf32>
    %32 = arith.addf %30, %31 : vector<16x1xf32>
    %33 = math.rsqrt %32 : vector<16x1xf32>
    %34 = vector.broadcast %33 : vector<16x1xf32> to vector<16x96xf32>
    %35 = arith.mulf %25, %34 : vector<16x96xf32>
    %36 = vector.broadcast %18 : vector<1x96xf32> to vector<16x96xf32>
    %37 = arith.mulf %35, %36 : vector<16x96xf32>
    %38 = vector.broadcast %19 : vector<1x96xf32> to vector<16x96xf32>
    %39 = arith.addf %37, %38 : vector<16x96xf32>
    %c0_24 = arith.constant 0 : index
    %c0_25 = arith.constant 0 : index
    %40 = vector.load %arg9[%c0_24, %c0_25] : memref<96x96xbf16, #tpu.memory_space<vmem>>, vector<96x96xbf16>
    %41 = arith.truncf %39 : vector<16x96xf32> to vector<16x96xbf16>
    %cst_26 = arith.constant dense<0.000000e+00> : vector<16x96xf32>
    %42 = tpu.matmul %41, %40, %cst_26 {dimension_numbers = #tpu.dot_dimension_numbers<[1], [0], [0], [1], [0, 0, 1, 1], [], []>} : vector<16x96xbf16>, vector<96x96xbf16>, vector<16x96xf32> -> vector<16x96xf32>
    %c0_27 = arith.constant 0 : index
    %c0_28 = arith.constant 0 : index
    %43 = vector.load %arg10[%c0_27, %c0_28] : memref<1x96xf32, #tpu.memory_space<vmem>>, vector<1x96xf32>
    %44 = vector.broadcast %43 : vector<1x96xf32> to vector<16x96xf32>
    %45 = arith.addf %42, %44 : vector<16x96xf32>
    %cst_29 = arith.constant 5.000000e-01 : f32
    %46 = vector.broadcast %cst_29 : f32 to vector<16x96xf32>
    %47 = arith.mulf %46, %45 : vector<16x96xf32>
    %cst_30 = arith.constant 4.471500e-02 : f32
    %48 = vector.broadcast %cst_30 : f32 to vector<16x96xf32>
    %49 = arith.mulf %48, %45 : vector<16x96xf32>
    %50 = arith.mulf %49, %45 : vector<16x96xf32>
    %51 = arith.mulf %50, %45 : vector<16x96xf32>
    %52 = arith.addf %45, %51 : vector<16x96xf32>
    %cst_31 = arith.constant 0.797884583 : f32
    %53 = vector.broadcast %cst_31 : f32 to vector<16x96xf32>
    %54 = arith.mulf %53, %52 : vector<16x96xf32>
    %55 = math.tanh %54 : vector<16x96xf32>
    %cst_32 = arith.constant 1.000000e+00 : f32
    %56 = vector.broadcast %cst_32 : f32 to vector<16x96xf32>
    %57 = arith.addf %56, %55 : vector<16x96xf32>
    %58 = arith.mulf %47, %57 : vector<16x96xf32>
    %c0_33 = arith.constant 0 : index
    %c0_34 = arith.constant 0 : index
    %59 = vector.load %arg11[%c0_33, %c0_34] : memref<1x96xf32, #tpu.memory_space<vmem>>, vector<1x96xf32>
    %c0_35 = arith.constant 0 : index
    %c0_36 = arith.constant 0 : index
    %60 = vector.load %arg12[%c0_35, %c0_36] : memref<1x96xf32, #tpu.memory_space<vmem>>, vector<1x96xf32>
    %cst_37 = arith.constant dense<0.000000e+00> : vector<16xf32>
    %61 = vector.multi_reduction <add>, %58, %cst_37 [1] : vector<16x96xf32> to vector<16xf32>
    %62 = vector.shape_cast %61 : vector<16xf32> to vector<16x1xf32>
    %cst_38 = arith.constant 9.600000e+01 : f32
    %63 = vector.broadcast %cst_38 : f32 to vector<16x1xf32>
    %64 = arith.divf %62, %63 : vector<16x1xf32>
    %65 = vector.broadcast %64 : vector<16x1xf32> to vector<16x96xf32>
    %66 = arith.subf %58, %65 : vector<16x96xf32>
    %67 = arith.mulf %66, %66 : vector<16x96xf32>
    %cst_39 = arith.constant dense<0.000000e+00> : vector<16xf32>
    %68 = vector.multi_reduction <add>, %67, %cst_39 [1] : vector<16x96xf32> to vector<16xf32>
    %69 = vector.shape_cast %68 : vector<16xf32> to vector<16x1xf32>
    %cst_40 = arith.constant 9.600000e+01 : f32
    %70 = vector.broadcast %cst_40 : f32 to vector<16x1xf32>
    %71 = arith.divf %69, %70 : vector<16x1xf32>
    %cst_41 = arith.constant 9.99999996E-13 : f32
    %72 = vector.broadcast %cst_41 : f32 to vector<16x1xf32>
    %73 = arith.addf %71, %72 : vector<16x1xf32>
    %74 = math.rsqrt %73 : vector<16x1xf32>
    %75 = vector.broadcast %74 : vector<16x1xf32> to vector<16x96xf32>
    %76 = arith.mulf %66, %75 : vector<16x96xf32>
    %77 = vector.broadcast %59 : vector<1x96xf32> to vector<16x96xf32>
    %78 = arith.mulf %76, %77 : vector<16x96xf32>
    %79 = vector.broadcast %60 : vector<1x96xf32> to vector<16x96xf32>
    %80 = arith.addf %78, %79 : vector<16x96xf32>
    %c0_42 = arith.constant 0 : index
    %c0_43 = arith.constant 0 : index
    %81 = vector.load %arg13[%c0_42, %c0_43] : memref<96x128xbf16, #tpu.memory_space<vmem>>, vector<96x128xbf16>
    %82 = arith.truncf %80 : vector<16x96xf32> to vector<16x96xbf16>
    %cst_44 = arith.constant dense<0.000000e+00> : vector<16x128xf32>
    %83 = tpu.matmul %82, %81, %cst_44 {dimension_numbers = #tpu.dot_dimension_numbers<[1], [0], [0], [1], [0, 0, 1, 1], [], []>} : vector<16x96xbf16>, vector<96x128xbf16>, vector<16x128xf32> -> vector<16x128xf32>
    %c0_45 = arith.constant 0 : index
    %c0_46 = arith.constant 0 : index
    %84 = vector.load %arg14[%c0_45, %c0_46] : memref<1x128xf32, #tpu.memory_space<vmem>>, vector<1x128xf32>
    %85 = vector.broadcast %84 : vector<1x128xf32> to vector<16x128xf32>
    %86 = arith.addf %83, %85 : vector<16x128xf32>
    %c0_47 = arith.constant 0 : index
    %c0_48 = arith.constant 0 : index
    %87 = vector.load %arg21[%c0_47, %c0_48] : memref<16x128xf32, #tpu.memory_space<vmem>>, vector<16x128xf32>
    tpu.vector_store %arg21[%c0_47, %c0_48], %86 {strides = array<i32>} : memref<16x128xf32, #tpu.memory_space<vmem>>, vector<16x128xf32>,
    %c0_49 = arith.constant 0 : index
    %c0_50 = arith.constant 0 : index
    %88 = vector.load %arg15[%c0_49, %c0_50] : memref<96x96xbf16, #tpu.memory_space<vmem>>, vector<96x96xbf16>
    %89 = arith.truncf %39 : vector<16x96xf32> to vector<16x96xbf16>
    %cst_51 = arith.constant dense<0.000000e+00> : vector<16x96xf32>
    %90 = tpu.matmul %89, %88, %cst_51 {dimension_numbers = #tpu.dot_dimension_numbers<[1], [0], [0], [1], [0, 0, 1, 1], [], []>} : vector<16x96xbf16>, vector<96x96xbf16>, vector<16x96xf32> -> vector<16x96xf32>
    %c0_52 = arith.constant 0 : index
    %c0_53 = arith.constant 0 : index
    %91 = vector.load %arg16[%c0_52, %c0_53] : memref<1x96xf32, #tpu.memory_space<vmem>>, vector<1x96xf32>
    %92 = vector.broadcast %91 : vector<1x96xf32> to vector<16x96xf32>
    %93 = arith.addf %90, %92 : vector<16x96xf32>
    %cst_54 = arith.constant 5.000000e-01 : f32
    %94 = vector.broadcast %cst_54 : f32 to vector<16x96xf32>
    %95 = arith.mulf %94, %93 : vector<16x96xf32>
    %cst_55 = arith.constant 4.471500e-02 : f32
    %96 = vector.broadcast %cst_55 : f32 to vector<16x96xf32>
    %97 = arith.mulf %96, %93 : vector<16x96xf32>
    %98 = arith.mulf %97, %93 : vector<16x96xf32>
    %99 = arith.mulf %98, %93 : vector<16x96xf32>
    %100 = arith.addf %93, %99 : vector<16x96xf32>
    %cst_56 = arith.constant 0.797884583 : f32
    %101 = vector.broadcast %cst_56 : f32 to vector<16x96xf32>
    %102 = arith.mulf %101, %100 : vector<16x96xf32>
    %103 = math.tanh %102 : vector<16x96xf32>
    %cst_57 = arith.constant 1.000000e+00 : f32
    %104 = vector.broadcast %cst_57 : f32 to vector<16x96xf32>
    %105 = arith.addf %104, %103 : vector<16x96xf32>
    %106 = arith.mulf %95, %105 : vector<16x96xf32>
    %c0_58 = arith.constant 0 : index
    %c0_59 = arith.constant 0 : index
    %107 = vector.load %arg17[%c0_58, %c0_59] : memref<1x96xf32, #tpu.memory_space<vmem>>, vector<1x96xf32>
    %c0_60 = arith.constant 0 : index
    %c0_61 = arith.constant 0 : index
    %108 = vector.load %arg18[%c0_60, %c0_61] : memref<1x96xf32, #tpu.memory_space<vmem>>, vector<1x96xf32>
    %cst_62 = arith.constant dense<0.000000e+00> : vector<16xf32>
    %109 = vector.multi_reduction <add>, %106, %cst_62 [1] : vector<16x96xf32> to vector<16xf32>
    %110 = vector.shape_cast %109 : vector<16xf32> to vector<16x1xf32>
    %cst_63 = arith.constant 9.600000e+01 : f32
    %111 = vector.broadcast %cst_63 : f32 to vector<16x1xf32>
    %112 = arith.divf %110, %111 : vector<16x1xf32>
    %113 = vector.broadcast %112 : vector<16x1xf32> to vector<16x96xf32>
    %114 = arith.subf %106, %113 : vector<16x96xf32>
    %115 = arith.mulf %114, %114 : vector<16x96xf32>
    %cst_64 = arith.constant dense<0.000000e+00> : vector<16xf32>
    %116 = vector.multi_reduction <add>, %115, %cst_64 [1] : vector<16x96xf32> to vector<16xf32>
    %117 = vector.shape_cast %116 : vector<16xf32> to vector<16x1xf32>
    %cst_65 = arith.constant 9.600000e+01 : f32
    %118 = vector.broadcast %cst_65 : f32 to vector<16x1xf32>
    %119 = arith.divf %117, %118 : vector<16x1xf32>
    %cst_66 = arith.constant 9.99999996E-13 : f32
    %120 = vector.broadcast %cst_66 : f32 to vector<16x1xf32>
    %121 = arith.addf %119, %120 : vector<16x1xf32>
    %122 = math.rsqrt %121 : vector<16x1xf32>
    %123 = vector.broadcast %122 : vector<16x1xf32> to vector<16x96xf32>
    %124 = arith.mulf %114, %123 : vector<16x96xf32>
    %125 = vector.broadcast %107 : vector<1x96xf32> to vector<16x96xf32>
    %126 = arith.mulf %124, %125 : vector<16x96xf32>
    %127 = vector.broadcast %108 : vector<1x96xf32> to vector<16x96xf32>
    %128 = arith.addf %126, %127 : vector<16x96xf32>
    %c0_67 = arith.constant 0 : index
    %c0_68 = arith.constant 0 : index
    %129 = vector.load %arg19[%c0_67, %c0_68] : memref<96x128xbf16, #tpu.memory_space<vmem>>, vector<96x128xbf16>
    %130 = arith.truncf %128 : vector<16x96xf32> to vector<16x96xbf16>
    %cst_69 = arith.constant dense<0.000000e+00> : vector<16x128xf32>
    %131 = tpu.matmul %130, %129, %cst_69 {dimension_numbers = #tpu.dot_dimension_numbers<[1], [0], [0], [1], [0, 0, 1, 1], [], []>} : vector<16x96xbf16>, vector<96x128xbf16>, vector<16x128xf32> -> vector<16x128xf32>
    %c0_70 = arith.constant 0 : index
    %c0_71 = arith.constant 0 : index
    %132 = vector.load %arg20[%c0_70, %c0_71] : memref<1x128xf32, #tpu.memory_space<vmem>>, vector<1x128xf32>
    %133 = vector.broadcast %132 : vector<1x128xf32> to vector<16x128xf32>
    %134 = arith.addf %131, %133 : vector<16x128xf32>
    %c0_72 = arith.constant 0 : index
    %c0_73 = arith.constant 0 : index
    %135 = vector.load %arg22[%c0_72, %c0_73] : memref<16x128xf32, #tpu.memory_space<vmem>>, vector<16x128xf32>
    tpu.vector_store %arg22[%c0_72, %c0_73], %134 {strides = array<i32>} : memref<16x128xf32, #tpu.memory_space<vmem>>, vector<16x128xf32>,
    return
  }
}

module attributes {stable_mosaic.version = 11 : i64} {
  func.func @_hanzi_encoder_kernel(%arg0: memref<16x96xf32, #tpu.memory_space<vmem>>, %arg1: memref<16x16xf32, #tpu.memory_space<vmem>>, %arg2: memref<1x96xf32, #tpu.memory_space<vmem>>, %arg3: memref<1x96xf32, #tpu.memory_space<vmem>>, %arg4: memref<96x96xbf16, #tpu.memory_space<vmem>>, %arg5: memref<1x96xf32, #tpu.memory_space<vmem>>, %arg6: memref<96x96xbf16, #tpu.memory_space<vmem>>, %arg7: memref<1x96xf32, #tpu.memory_space<vmem>>, %arg8: memref<96x96xbf16, #tpu.memory_space<vmem>>, %arg9: memref<1x96xf32, #tpu.memory_space<vmem>>, %arg10: memref<96x96xbf16, #tpu.memory_space<vmem>>, %arg11: memref<1x96xf32, #tpu.memory_space<vmem>>, %arg12: memref<1x96xf32, #tpu.memory_space<vmem>>, %arg13: memref<1x96xf32, #tpu.memory_space<vmem>>, %arg14: memref<96x192xbf16, #tpu.memory_space<vmem>>, %arg15: memref<1x192xf32, #tpu.memory_space<vmem>>, %arg16: memref<192x96xbf16, #tpu.memory_space<vmem>>, %arg17: memref<1x96xf32, #tpu.memory_space<vmem>>, %arg18: memref<1x96xf32, #tpu.memory_space<vmem>>, %arg19: memref<1x96xf32, #tpu.memory_space<vmem>>, %arg20: memref<96x96xbf16, #tpu.memory_space<vmem>>, %arg21: memref<1x96xf32, #tpu.memory_space<vmem>>, %arg22: memref<96x96xbf16, #tpu.memory_space<vmem>>, %arg23: memref<1x96xf32, #tpu.memory_space<vmem>>, %arg24: memref<96x96xbf16, #tpu.memory_space<vmem>>, %arg25: memref<1x96xf32, #tpu.memory_space<vmem>>, %arg26: memref<96x96xbf16, #tpu.memory_space<vmem>>, %arg27: memref<1x96xf32, #tpu.memory_space<vmem>>, %arg28: memref<1x96xf32, #tpu.memory_space<vmem>>, %arg29: memref<1x96xf32, #tpu.memory_space<vmem>>, %arg30: memref<96x192xbf16, #tpu.memory_space<vmem>>, %arg31: memref<1x192xf32, #tpu.memory_space<vmem>>, %arg32: memref<192x96xbf16, #tpu.memory_space<vmem>>, %arg33: memref<1x96xf32, #tpu.memory_space<vmem>>, %arg34: memref<1x96xf32, #tpu.memory_space<vmem>>, %arg35: memref<1x96xf32, #tpu.memory_space<vmem>>, %arg36: memref<16x96xf32, #tpu.memory_space<vmem>>) attributes {dimension_semantics = [], scalar_prefetch = 0 : i64, scratch_operands = 0 : i64, tpu.core_type = #tpu.core_type<tc>} {
    %c0 = arith.constant 0 : index
    %c0_0 = arith.constant 0 : index
    %0 = vector.load %arg0[%c0, %c0_0] : memref<16x96xf32, #tpu.memory_space<vmem>>, vector<16x96xf32>
    %c0_1 = arith.constant 0 : index
    %c0_2 = arith.constant 0 : index
    %1 = vector.load %arg1[%c0_1, %c0_2] : memref<16x16xf32, #tpu.memory_space<vmem>>, vector<16x16xf32>
    %c0_3 = arith.constant 0 : index
    %c0_4 = arith.constant 0 : index
    %2 = vector.load %arg2[%c0_3, %c0_4] : memref<1x96xf32, #tpu.memory_space<vmem>>, vector<1x96xf32>
    %c0_5 = arith.constant 0 : index
    %c0_6 = arith.constant 0 : index
    %3 = vector.load %arg3[%c0_5, %c0_6] : memref<1x96xf32, #tpu.memory_space<vmem>>, vector<1x96xf32>
    %cst = arith.constant dense<0.000000e+00> : vector<16xf32>
    %4 = vector.multi_reduction <add>, %0, %cst [1] : vector<16x96xf32> to vector<16xf32>
    %5 = vector.shape_cast %4 : vector<16xf32> to vector<16x1xf32>
    %cst_7 = arith.constant 9.600000e+01 : f32
    %6 = vector.broadcast %cst_7 : f32 to vector<16x1xf32>
    %7 = arith.divf %5, %6 : vector<16x1xf32>
    %8 = vector.broadcast %7 : vector<16x1xf32> to vector<16x96xf32>
    %9 = arith.subf %0, %8 : vector<16x96xf32>
    %10 = arith.mulf %9, %9 : vector<16x96xf32>
    %cst_8 = arith.constant dense<0.000000e+00> : vector<16xf32>
    %11 = vector.multi_reduction <add>, %10, %cst_8 [1] : vector<16x96xf32> to vector<16xf32>
    %12 = vector.shape_cast %11 : vector<16xf32> to vector<16x1xf32>
    %cst_9 = arith.constant 9.600000e+01 : f32
    %13 = vector.broadcast %cst_9 : f32 to vector<16x1xf32>
    %14 = arith.divf %12, %13 : vector<16x1xf32>
    %cst_10 = arith.constant 9.99999996E-13 : f32
    %15 = vector.broadcast %cst_10 : f32 to vector<16x1xf32>
    %16 = arith.addf %14, %15 : vector<16x1xf32>
    %17 = math.rsqrt %16 : vector<16x1xf32>
    %18 = vector.broadcast %17 : vector<16x1xf32> to vector<16x96xf32>
    %19 = arith.mulf %9, %18 : vector<16x96xf32>
    %20 = vector.broadcast %2 : vector<1x96xf32> to vector<16x96xf32>
    %21 = arith.mulf %19, %20 : vector<16x96xf32>
    %22 = vector.broadcast %3 : vector<1x96xf32> to vector<16x96xf32>
    %23 = arith.addf %21, %22 : vector<16x96xf32>
    %c0_11 = arith.constant 0 : index
    %c0_12 = arith.constant 0 : index
    %24 = vector.load %arg4[%c0_11, %c0_12] : memref<96x96xbf16, #tpu.memory_space<vmem>>, vector<96x96xbf16>
    %25 = arith.truncf %23 : vector<16x96xf32> to vector<16x96xbf16>
    %cst_13 = arith.constant dense<0.000000e+00> : vector<16x96xf32>
    %26 = tpu.matmul %25, %24, %cst_13 {dimension_numbers = #tpu.dot_dimension_numbers<[1], [0], [0], [1], [0, 0, 1, 1], [], []>} : vector<16x96xbf16>, vector<96x96xbf16>, vector<16x96xf32> -> vector<16x96xf32>
    %c0_14 = arith.constant 0 : index
    %c0_15 = arith.constant 0 : index
    %27 = vector.load %arg5[%c0_14, %c0_15] : memref<1x96xf32, #tpu.memory_space<vmem>>, vector<1x96xf32>
    %28 = vector.broadcast %27 : vector<1x96xf32> to vector<16x96xf32>
    %29 = arith.addf %26, %28 : vector<16x96xf32>
    %c0_16 = arith.constant 0 : index
    %c0_17 = arith.constant 0 : index
    %30 = vector.load %arg6[%c0_16, %c0_17] : memref<96x96xbf16, #tpu.memory_space<vmem>>, vector<96x96xbf16>
    %31 = arith.truncf %23 : vector<16x96xf32> to vector<16x96xbf16>
    %cst_18 = arith.constant dense<0.000000e+00> : vector<16x96xf32>
    %32 = tpu.matmul %31, %30, %cst_18 {dimension_numbers = #tpu.dot_dimension_numbers<[1], [0], [0], [1], [0, 0, 1, 1], [], []>} : vector<16x96xbf16>, vector<96x96xbf16>, vector<16x96xf32> -> vector<16x96xf32>
    %c0_19 = arith.constant 0 : index
    %c0_20 = arith.constant 0 : index
    %33 = vector.load %arg7[%c0_19, %c0_20] : memref<1x96xf32, #tpu.memory_space<vmem>>, vector<1x96xf32>
    %34 = vector.broadcast %33 : vector<1x96xf32> to vector<16x96xf32>
    %35 = arith.addf %32, %34 : vector<16x96xf32>
    %c0_21 = arith.constant 0 : index
    %c0_22 = arith.constant 0 : index
    %36 = vector.load %arg8[%c0_21, %c0_22] : memref<96x96xbf16, #tpu.memory_space<vmem>>, vector<96x96xbf16>
    %37 = arith.truncf %23 : vector<16x96xf32> to vector<16x96xbf16>
    %cst_23 = arith.constant dense<0.000000e+00> : vector<16x96xf32>
    %38 = tpu.matmul %37, %36, %cst_23 {dimension_numbers = #tpu.dot_dimension_numbers<[1], [0], [0], [1], [0, 0, 1, 1], [], []>} : vector<16x96xbf16>, vector<96x96xbf16>, vector<16x96xf32> -> vector<16x96xf32>
    %c0_24 = arith.constant 0 : index
    %c0_25 = arith.constant 0 : index
    %39 = vector.load %arg9[%c0_24, %c0_25] : memref<1x96xf32, #tpu.memory_space<vmem>>, vector<1x96xf32>
    %40 = vector.broadcast %39 : vector<1x96xf32> to vector<16x96xf32>
    %41 = arith.addf %38, %40 : vector<16x96xf32>
    %c0_26 = arith.constant 0 : index
    %c0_27 = arith.constant 0 : index
    %42 = vector.load %arg10[%c0_26, %c0_27] : memref<96x96xbf16, #tpu.memory_space<vmem>>, vector<96x96xbf16>
    %c0_28 = arith.constant 0 : index
    %c0_29 = arith.constant 0 : index
    %43 = vector.load %arg11[%c0_28, %c0_29] : memref<1x96xf32, #tpu.memory_space<vmem>>, vector<1x96xf32>
    %44 = vector.broadcast %43 : vector<1x96xf32> to vector<16x96xf32>
    %45 = arith.addf %23, %44 : vector<16x96xf32>
    %46 = vector.extract_strided_slice %29 {offsets = [0, 0], sizes = [16, 24], strides = [1, 1]} : vector<16x96xf32> to vector<16x24xf32>
    %47 = vector.extract_strided_slice %35 {offsets = [0, 0], sizes = [16, 24], strides = [1, 1]} : vector<16x96xf32> to vector<16x24xf32>
    %48 = arith.truncf %46 : vector<16x24xf32> to vector<16x24xbf16>
    %49 = arith.truncf %47 : vector<16x24xf32> to vector<16x24xbf16>
    %cst_30 = arith.constant dense<0.000000e+00> : vector<16x16xf32>
    %50 = tpu.matmul %48, %49, %cst_30 {dimension_numbers = #tpu.dot_dimension_numbers<[1], [1], [0], [0], [0, 0, 1, 0], [], []>} : vector<16x24xbf16>, vector<16x24xbf16>, vector<16x16xf32> -> vector<16x16xf32>
    %cst_31 = arith.constant 0.204124153 : f32
    %51 = vector.broadcast %cst_31 : f32 to vector<16x16xf32>
    %52 = arith.mulf %50, %51 : vector<16x16xf32>
    %53 = arith.addf %52, %1 : vector<16x16xf32>
    %cst_32 = arith.constant dense<0xFF800000> : vector<16xf32>
    %54 = vector.multi_reduction <maximumf>, %53, %cst_32 [1] : vector<16x16xf32> to vector<16xf32>
    %55 = vector.shape_cast %54 : vector<16xf32> to vector<16x1xf32>
    %56 = vector.broadcast %55 : vector<16x1xf32> to vector<16x16xf32>
    %57 = arith.subf %53, %56 : vector<16x16xf32>
    %58 = math.exp %57 : vector<16x16xf32>
    %cst_33 = arith.constant dense<0.000000e+00> : vector<16xf32>
    %59 = vector.multi_reduction <add>, %58, %cst_33 [1] : vector<16x16xf32> to vector<16xf32>
    %60 = vector.shape_cast %59 : vector<16xf32> to vector<16x1xf32>
    %61 = tpu.reciprocal %60 : vector<16x1xf32> -> vector<16x1xf32>
    %62 = vector.broadcast %61 : vector<16x1xf32> to vector<16x16xf32>
    %63 = arith.mulf %58, %62 : vector<16x16xf32>
    %64 = vector.extract_strided_slice %41 {offsets = [0, 0], sizes = [16, 24], strides = [1, 1]} : vector<16x96xf32> to vector<16x24xf32>
    %65 = arith.truncf %63 : vector<16x16xf32> to vector<16x16xbf16>
    %66 = arith.truncf %64 : vector<16x24xf32> to vector<16x24xbf16>
    %cst_34 = arith.constant dense<0.000000e+00> : vector<16x24xf32>
    %67 = tpu.matmul %65, %66, %cst_34 {dimension_numbers = #tpu.dot_dimension_numbers<[1], [0], [0], [1], [0, 0, 1, 1], [], []>} : vector<16x16xbf16>, vector<16x24xbf16>, vector<16x24xf32> -> vector<16x24xf32>
    %68 = vector.extract_strided_slice %42 {offsets = [0, 0], sizes = [24, 96], strides = [1, 1]} : vector<96x96xbf16> to vector<24x96xbf16>
    %69 = arith.truncf %67 : vector<16x24xf32> to vector<16x24xbf16>
    %cst_35 = arith.constant dense<0.000000e+00> : vector<16x96xf32>
    %70 = tpu.matmul %69, %68, %cst_35 {dimension_numbers = #tpu.dot_dimension_numbers<[1], [0], [0], [1], [0, 0, 1, 1], [], []>} : vector<16x24xbf16>, vector<24x96xbf16>, vector<16x96xf32> -> vector<16x96xf32>
    %71 = arith.addf %45, %70 : vector<16x96xf32>
    %72 = vector.extract_strided_slice %29 {offsets = [0, 24], sizes = [16, 24], strides = [1, 1]} : vector<16x96xf32> to vector<16x24xf32>
    %73 = vector.extract_strided_slice %35 {offsets = [0, 24], sizes = [16, 24], strides = [1, 1]} : vector<16x96xf32> to vector<16x24xf32>
    %74 = arith.truncf %72 : vector<16x24xf32> to vector<16x24xbf16>
    %75 = arith.truncf %73 : vector<16x24xf32> to vector<16x24xbf16>
    %cst_36 = arith.constant dense<0.000000e+00> : vector<16x16xf32>
    %76 = tpu.matmul %74, %75, %cst_36 {dimension_numbers = #tpu.dot_dimension_numbers<[1], [1], [0], [0], [0, 0, 1, 0], [], []>} : vector<16x24xbf16>, vector<16x24xbf16>, vector<16x16xf32> -> vector<16x16xf32>
    %cst_37 = arith.constant 0.204124153 : f32
    %77 = vector.broadcast %cst_37 : f32 to vector<16x16xf32>
    %78 = arith.mulf %76, %77 : vector<16x16xf32>
    %79 = arith.addf %78, %1 : vector<16x16xf32>
    %cst_38 = arith.constant dense<0xFF800000> : vector<16xf32>
    %80 = vector.multi_reduction <maximumf>, %79, %cst_38 [1] : vector<16x16xf32> to vector<16xf32>
    %81 = vector.shape_cast %80 : vector<16xf32> to vector<16x1xf32>
    %82 = vector.broadcast %81 : vector<16x1xf32> to vector<16x16xf32>
    %83 = arith.subf %79, %82 : vector<16x16xf32>
    %84 = math.exp %83 : vector<16x16xf32>
    %cst_39 = arith.constant dense<0.000000e+00> : vector<16xf32>
    %85 = vector.multi_reduction <add>, %84, %cst_39 [1] : vector<16x16xf32> to vector<16xf32>
    %86 = vector.shape_cast %85 : vector<16xf32> to vector<16x1xf32>
    %87 = tpu.reciprocal %86 : vector<16x1xf32> -> vector<16x1xf32>
    %88 = vector.broadcast %87 : vector<16x1xf32> to vector<16x16xf32>
    %89 = arith.mulf %84, %88 : vector<16x16xf32>
    %90 = vector.extract_strided_slice %41 {offsets = [0, 24], sizes = [16, 24], strides = [1, 1]} : vector<16x96xf32> to vector<16x24xf32>
    %91 = arith.truncf %89 : vector<16x16xf32> to vector<16x16xbf16>
    %92 = arith.truncf %90 : vector<16x24xf32> to vector<16x24xbf16>
    %cst_40 = arith.constant dense<0.000000e+00> : vector<16x24xf32>
    %93 = tpu.matmul %91, %92, %cst_40 {dimension_numbers = #tpu.dot_dimension_numbers<[1], [0], [0], [1], [0, 0, 1, 1], [], []>} : vector<16x16xbf16>, vector<16x24xbf16>, vector<16x24xf32> -> vector<16x24xf32>
    %94 = vector.extract_strided_slice %42 {offsets = [24, 0], sizes = [24, 96], strides = [1, 1]} : vector<96x96xbf16> to vector<24x96xbf16>
    %95 = arith.truncf %93 : vector<16x24xf32> to vector<16x24xbf16>
    %cst_41 = arith.constant dense<0.000000e+00> : vector<16x96xf32>
    %96 = tpu.matmul %95, %94, %cst_41 {dimension_numbers = #tpu.dot_dimension_numbers<[1], [0], [0], [1], [0, 0, 1, 1], [], []>} : vector<16x24xbf16>, vector<24x96xbf16>, vector<16x96xf32> -> vector<16x96xf32>
    %97 = arith.addf %71, %96 : vector<16x96xf32>
    %98 = vector.extract_strided_slice %29 {offsets = [0, 48], sizes = [16, 24], strides = [1, 1]} : vector<16x96xf32> to vector<16x24xf32>
    %99 = vector.extract_strided_slice %35 {offsets = [0, 48], sizes = [16, 24], strides = [1, 1]} : vector<16x96xf32> to vector<16x24xf32>
    %100 = arith.truncf %98 : vector<16x24xf32> to vector<16x24xbf16>
    %101 = arith.truncf %99 : vector<16x24xf32> to vector<16x24xbf16>
    %cst_42 = arith.constant dense<0.000000e+00> : vector<16x16xf32>
    %102 = tpu.matmul %100, %101, %cst_42 {dimension_numbers = #tpu.dot_dimension_numbers<[1], [1], [0], [0], [0, 0, 1, 0], [], []>} : vector<16x24xbf16>, vector<16x24xbf16>, vector<16x16xf32> -> vector<16x16xf32>
    %cst_43 = arith.constant 0.204124153 : f32
    %103 = vector.broadcast %cst_43 : f32 to vector<16x16xf32>
    %104 = arith.mulf %102, %103 : vector<16x16xf32>
    %105 = arith.addf %104, %1 : vector<16x16xf32>
    %cst_44 = arith.constant dense<0xFF800000> : vector<16xf32>
    %106 = vector.multi_reduction <maximumf>, %105, %cst_44 [1] : vector<16x16xf32> to vector<16xf32>
    %107 = vector.shape_cast %106 : vector<16xf32> to vector<16x1xf32>
    %108 = vector.broadcast %107 : vector<16x1xf32> to vector<16x16xf32>
    %109 = arith.subf %105, %108 : vector<16x16xf32>
    %110 = math.exp %109 : vector<16x16xf32>
    %cst_45 = arith.constant dense<0.000000e+00> : vector<16xf32>
    %111 = vector.multi_reduction <add>, %110, %cst_45 [1] : vector<16x16xf32> to vector<16xf32>
    %112 = vector.shape_cast %111 : vector<16xf32> to vector<16x1xf32>
    %113 = tpu.reciprocal %112 : vector<16x1xf32> -> vector<16x1xf32>
    %114 = vector.broadcast %113 : vector<16x1xf32> to vector<16x16xf32>
    %115 = arith.mulf %110, %114 : vector<16x16xf32>
    %116 = vector.extract_strided_slice %41 {offsets = [0, 48], sizes = [16, 24], strides = [1, 1]} : vector<16x96xf32> to vector<16x24xf32>
    %117 = arith.truncf %115 : vector<16x16xf32> to vector<16x16xbf16>
    %118 = arith.truncf %116 : vector<16x24xf32> to vector<16x24xbf16>
    %cst_46 = arith.constant dense<0.000000e+00> : vector<16x24xf32>
    %119 = tpu.matmul %117, %118, %cst_46 {dimension_numbers = #tpu.dot_dimension_numbers<[1], [0], [0], [1], [0, 0, 1, 1], [], []>} : vector<16x16xbf16>, vector<16x24xbf16>, vector<16x24xf32> -> vector<16x24xf32>
    %120 = vector.extract_strided_slice %42 {offsets = [48, 0], sizes = [24, 96], strides = [1, 1]} : vector<96x96xbf16> to vector<24x96xbf16>
    %121 = arith.truncf %119 : vector<16x24xf32> to vector<16x24xbf16>
    %cst_47 = arith.constant dense<0.000000e+00> : vector<16x96xf32>
    %122 = tpu.matmul %121, %120, %cst_47 {dimension_numbers = #tpu.dot_dimension_numbers<[1], [0], [0], [1], [0, 0, 1, 1], [], []>} : vector<16x24xbf16>, vector<24x96xbf16>, vector<16x96xf32> -> vector<16x96xf32>
    %123 = arith.addf %97, %122 : vector<16x96xf32>
    %124 = vector.extract_strided_slice %29 {offsets = [0, 72], sizes = [16, 24], strides = [1, 1]} : vector<16x96xf32> to vector<16x24xf32>
    %125 = vector.extract_strided_slice %35 {offsets = [0, 72], sizes = [16, 24], strides = [1, 1]} : vector<16x96xf32> to vector<16x24xf32>
    %126 = arith.truncf %124 : vector<16x24xf32> to vector<16x24xbf16>
    %127 = arith.truncf %125 : vector<16x24xf32> to vector<16x24xbf16>
    %cst_48 = arith.constant dense<0.000000e+00> : vector<16x16xf32>
    %128 = tpu.matmul %126, %127, %cst_48 {dimension_numbers = #tpu.dot_dimension_numbers<[1], [1], [0], [0], [0, 0, 1, 0], [], []>} : vector<16x24xbf16>, vector<16x24xbf16>, vector<16x16xf32> -> vector<16x16xf32>
    %cst_49 = arith.constant 0.204124153 : f32
    %129 = vector.broadcast %cst_49 : f32 to vector<16x16xf32>
    %130 = arith.mulf %128, %129 : vector<16x16xf32>
    %131 = arith.addf %130, %1 : vector<16x16xf32>
    %cst_50 = arith.constant dense<0xFF800000> : vector<16xf32>
    %132 = vector.multi_reduction <maximumf>, %131, %cst_50 [1] : vector<16x16xf32> to vector<16xf32>
    %133 = vector.shape_cast %132 : vector<16xf32> to vector<16x1xf32>
    %134 = vector.broadcast %133 : vector<16x1xf32> to vector<16x16xf32>
    %135 = arith.subf %131, %134 : vector<16x16xf32>
    %136 = math.exp %135 : vector<16x16xf32>
    %cst_51 = arith.constant dense<0.000000e+00> : vector<16xf32>
    %137 = vector.multi_reduction <add>, %136, %cst_51 [1] : vector<16x16xf32> to vector<16xf32>
    %138 = vector.shape_cast %137 : vector<16xf32> to vector<16x1xf32>
    %139 = tpu.reciprocal %138 : vector<16x1xf32> -> vector<16x1xf32>
    %140 = vector.broadcast %139 : vector<16x1xf32> to vector<16x16xf32>
    %141 = arith.mulf %136, %140 : vector<16x16xf32>
    %142 = vector.extract_strided_slice %41 {offsets = [0, 72], sizes = [16, 24], strides = [1, 1]} : vector<16x96xf32> to vector<16x24xf32>
    %143 = arith.truncf %141 : vector<16x16xf32> to vector<16x16xbf16>
    %144 = arith.truncf %142 : vector<16x24xf32> to vector<16x24xbf16>
    %cst_52 = arith.constant dense<0.000000e+00> : vector<16x24xf32>
    %145 = tpu.matmul %143, %144, %cst_52 {dimension_numbers = #tpu.dot_dimension_numbers<[1], [0], [0], [1], [0, 0, 1, 1], [], []>} : vector<16x16xbf16>, vector<16x24xbf16>, vector<16x24xf32> -> vector<16x24xf32>
    %146 = vector.extract_strided_slice %42 {offsets = [72, 0], sizes = [24, 96], strides = [1, 1]} : vector<96x96xbf16> to vector<24x96xbf16>
    %147 = arith.truncf %145 : vector<16x24xf32> to vector<16x24xbf16>
    %cst_53 = arith.constant dense<0.000000e+00> : vector<16x96xf32>
    %148 = tpu.matmul %147, %146, %cst_53 {dimension_numbers = #tpu.dot_dimension_numbers<[1], [0], [0], [1], [0, 0, 1, 1], [], []>} : vector<16x24xbf16>, vector<24x96xbf16>, vector<16x96xf32> -> vector<16x96xf32>
    %149 = arith.addf %123, %148 : vector<16x96xf32>
    %c0_54 = arith.constant 0 : index
    %c0_55 = arith.constant 0 : index
    %150 = vector.load %arg12[%c0_54, %c0_55] : memref<1x96xf32, #tpu.memory_space<vmem>>, vector<1x96xf32>
    %c0_56 = arith.constant 0 : index
    %c0_57 = arith.constant 0 : index
    %151 = vector.load %arg13[%c0_56, %c0_57] : memref<1x96xf32, #tpu.memory_space<vmem>>, vector<1x96xf32>
    %cst_58 = arith.constant dense<0.000000e+00> : vector<16xf32>
    %152 = vector.multi_reduction <add>, %149, %cst_58 [1] : vector<16x96xf32> to vector<16xf32>
    %153 = vector.shape_cast %152 : vector<16xf32> to vector<16x1xf32>
    %cst_59 = arith.constant 9.600000e+01 : f32
    %154 = vector.broadcast %cst_59 : f32 to vector<16x1xf32>
    %155 = arith.divf %153, %154 : vector<16x1xf32>
    %156 = vector.broadcast %155 : vector<16x1xf32> to vector<16x96xf32>
    %157 = arith.subf %149, %156 : vector<16x96xf32>
    %158 = arith.mulf %157, %157 : vector<16x96xf32>
    %cst_60 = arith.constant dense<0.000000e+00> : vector<16xf32>
    %159 = vector.multi_reduction <add>, %158, %cst_60 [1] : vector<16x96xf32> to vector<16xf32>
    %160 = vector.shape_cast %159 : vector<16xf32> to vector<16x1xf32>
    %cst_61 = arith.constant 9.600000e+01 : f32
    %161 = vector.broadcast %cst_61 : f32 to vector<16x1xf32>
    %162 = arith.divf %160, %161 : vector<16x1xf32>
    %cst_62 = arith.constant 9.99999996E-13 : f32
    %163 = vector.broadcast %cst_62 : f32 to vector<16x1xf32>
    %164 = arith.addf %162, %163 : vector<16x1xf32>
    %165 = math.rsqrt %164 : vector<16x1xf32>
    %166 = vector.broadcast %165 : vector<16x1xf32> to vector<16x96xf32>
    %167 = arith.mulf %157, %166 : vector<16x96xf32>
    %168 = vector.broadcast %150 : vector<1x96xf32> to vector<16x96xf32>
    %169 = arith.mulf %167, %168 : vector<16x96xf32>
    %170 = vector.broadcast %151 : vector<1x96xf32> to vector<16x96xf32>
    %171 = arith.addf %169, %170 : vector<16x96xf32>
    %c0_63 = arith.constant 0 : index
    %c0_64 = arith.constant 0 : index
    %172 = vector.load %arg14[%c0_63, %c0_64] : memref<96x192xbf16, #tpu.memory_space<vmem>>, vector<96x192xbf16>
    %173 = arith.truncf %171 : vector<16x96xf32> to vector<16x96xbf16>
    %cst_65 = arith.constant dense<0.000000e+00> : vector<16x192xf32>
    %174 = tpu.matmul %173, %172, %cst_65 {dimension_numbers = #tpu.dot_dimension_numbers<[1], [0], [0], [1], [0, 0, 1, 1], [], []>} : vector<16x96xbf16>, vector<96x192xbf16>, vector<16x192xf32> -> vector<16x192xf32>
    %c0_66 = arith.constant 0 : index
    %c0_67 = arith.constant 0 : index
    %175 = vector.load %arg15[%c0_66, %c0_67] : memref<1x192xf32, #tpu.memory_space<vmem>>, vector<1x192xf32>
    %176 = vector.broadcast %175 : vector<1x192xf32> to vector<16x192xf32>
    %177 = arith.addf %174, %176 : vector<16x192xf32>
    %cst_68 = arith.constant 5.000000e-01 : f32
    %178 = vector.broadcast %cst_68 : f32 to vector<16x192xf32>
    %179 = arith.mulf %178, %177 : vector<16x192xf32>
    %cst_69 = arith.constant 4.471500e-02 : f32
    %180 = vector.broadcast %cst_69 : f32 to vector<16x192xf32>
    %181 = arith.mulf %180, %177 : vector<16x192xf32>
    %182 = arith.mulf %181, %177 : vector<16x192xf32>
    %183 = arith.mulf %182, %177 : vector<16x192xf32>
    %184 = arith.addf %177, %183 : vector<16x192xf32>
    %cst_70 = arith.constant 0.797884583 : f32
    %185 = vector.broadcast %cst_70 : f32 to vector<16x192xf32>
    %186 = arith.mulf %185, %184 : vector<16x192xf32>
    %187 = math.tanh %186 : vector<16x192xf32>
    %cst_71 = arith.constant 1.000000e+00 : f32
    %188 = vector.broadcast %cst_71 : f32 to vector<16x192xf32>
    %189 = arith.addf %188, %187 : vector<16x192xf32>
    %190 = arith.mulf %179, %189 : vector<16x192xf32>
    %c0_72 = arith.constant 0 : index
    %c0_73 = arith.constant 0 : index
    %191 = vector.load %arg16[%c0_72, %c0_73] : memref<192x96xbf16, #tpu.memory_space<vmem>>, vector<192x96xbf16>
    %192 = arith.truncf %190 : vector<16x192xf32> to vector<16x192xbf16>
    %cst_74 = arith.constant dense<0.000000e+00> : vector<16x96xf32>
    %193 = tpu.matmul %192, %191, %cst_74 {dimension_numbers = #tpu.dot_dimension_numbers<[1], [0], [0], [1], [0, 0, 1, 1], [], []>} : vector<16x192xbf16>, vector<192x96xbf16>, vector<16x96xf32> -> vector<16x96xf32>
    %c0_75 = arith.constant 0 : index
    %c0_76 = arith.constant 0 : index
    %194 = vector.load %arg17[%c0_75, %c0_76] : memref<1x96xf32, #tpu.memory_space<vmem>>, vector<1x96xf32>
    %195 = vector.broadcast %194 : vector<1x96xf32> to vector<16x96xf32>
    %196 = arith.addf %193, %195 : vector<16x96xf32>
    %197 = arith.addf %196, %171 : vector<16x96xf32>
    %c0_77 = arith.constant 0 : index
    %c0_78 = arith.constant 0 : index
    %198 = vector.load %arg18[%c0_77, %c0_78] : memref<1x96xf32, #tpu.memory_space<vmem>>, vector<1x96xf32>
    %c0_79 = arith.constant 0 : index
    %c0_80 = arith.constant 0 : index
    %199 = vector.load %arg19[%c0_79, %c0_80] : memref<1x96xf32, #tpu.memory_space<vmem>>, vector<1x96xf32>
    %cst_81 = arith.constant dense<0.000000e+00> : vector<16xf32>
    %200 = vector.multi_reduction <add>, %197, %cst_81 [1] : vector<16x96xf32> to vector<16xf32>
    %201 = vector.shape_cast %200 : vector<16xf32> to vector<16x1xf32>
    %cst_82 = arith.constant 9.600000e+01 : f32
    %202 = vector.broadcast %cst_82 : f32 to vector<16x1xf32>
    %203 = arith.divf %201, %202 : vector<16x1xf32>
    %204 = vector.broadcast %203 : vector<16x1xf32> to vector<16x96xf32>
    %205 = arith.subf %197, %204 : vector<16x96xf32>
    %206 = arith.mulf %205, %205 : vector<16x96xf32>
    %cst_83 = arith.constant dense<0.000000e+00> : vector<16xf32>
    %207 = vector.multi_reduction <add>, %206, %cst_83 [1] : vector<16x96xf32> to vector<16xf32>
    %208 = vector.shape_cast %207 : vector<16xf32> to vector<16x1xf32>
    %cst_84 = arith.constant 9.600000e+01 : f32
    %209 = vector.broadcast %cst_84 : f32 to vector<16x1xf32>
    %210 = arith.divf %208, %209 : vector<16x1xf32>
    %cst_85 = arith.constant 9.99999996E-13 : f32
    %211 = vector.broadcast %cst_85 : f32 to vector<16x1xf32>
    %212 = arith.addf %210, %211 : vector<16x1xf32>
    %213 = math.rsqrt %212 : vector<16x1xf32>
    %214 = vector.broadcast %213 : vector<16x1xf32> to vector<16x96xf32>
    %215 = arith.mulf %205, %214 : vector<16x96xf32>
    %216 = vector.broadcast %198 : vector<1x96xf32> to vector<16x96xf32>
    %217 = arith.mulf %215, %216 : vector<16x96xf32>
    %218 = vector.broadcast %199 : vector<1x96xf32> to vector<16x96xf32>
    %219 = arith.addf %217, %218 : vector<16x96xf32>
    %c0_86 = arith.constant 0 : index
    %c0_87 = arith.constant 0 : index
    %220 = vector.load %arg20[%c0_86, %c0_87] : memref<96x96xbf16, #tpu.memory_space<vmem>>, vector<96x96xbf16>
    %221 = arith.truncf %219 : vector<16x96xf32> to vector<16x96xbf16>
    %cst_88 = arith.constant dense<0.000000e+00> : vector<16x96xf32>
    %222 = tpu.matmul %221, %220, %cst_88 {dimension_numbers = #tpu.dot_dimension_numbers<[1], [0], [0], [1], [0, 0, 1, 1], [], []>} : vector<16x96xbf16>, vector<96x96xbf16>, vector<16x96xf32> -> vector<16x96xf32>
    %c0_89 = arith.constant 0 : index
    %c0_90 = arith.constant 0 : index
    %223 = vector.load %arg21[%c0_89, %c0_90] : memref<1x96xf32, #tpu.memory_space<vmem>>, vector<1x96xf32>
    %224 = vector.broadcast %223 : vector<1x96xf32> to vector<16x96xf32>
    %225 = arith.addf %222, %224 : vector<16x96xf32>
    %c0_91 = arith.constant 0 : index
    %c0_92 = arith.constant 0 : index
    %226 = vector.load %arg22[%c0_91, %c0_92] : memref<96x96xbf16, #tpu.memory_space<vmem>>, vector<96x96xbf16>
    %227 = arith.truncf %219 : vector<16x96xf32> to vector<16x96xbf16>
    %cst_93 = arith.constant dense<0.000000e+00> : vector<16x96xf32>
    %228 = tpu.matmul %227, %226, %cst_93 {dimension_numbers = #tpu.dot_dimension_numbers<[1], [0], [0], [1], [0, 0, 1, 1], [], []>} : vector<16x96xbf16>, vector<96x96xbf16>, vector<16x96xf32> -> vector<16x96xf32>
    %c0_94 = arith.constant 0 : index
    %c0_95 = arith.constant 0 : index
    %229 = vector.load %arg23[%c0_94, %c0_95] : memref<1x96xf32, #tpu.memory_space<vmem>>, vector<1x96xf32>
    %230 = vector.broadcast %229 : vector<1x96xf32> to vector<16x96xf32>
    %231 = arith.addf %228, %230 : vector<16x96xf32>
    %c0_96 = arith.constant 0 : index
    %c0_97 = arith.constant 0 : index
    %232 = vector.load %arg24[%c0_96, %c0_97] : memref<96x96xbf16, #tpu.memory_space<vmem>>, vector<96x96xbf16>
    %233 = arith.truncf %219 : vector<16x96xf32> to vector<16x96xbf16>
    %cst_98 = arith.constant dense<0.000000e+00> : vector<16x96xf32>
    %234 = tpu.matmul %233, %232, %cst_98 {dimension_numbers = #tpu.dot_dimension_numbers<[1], [0], [0], [1], [0, 0, 1, 1], [], []>} : vector<16x96xbf16>, vector<96x96xbf16>, vector<16x96xf32> -> vector<16x96xf32>
    %c0_99 = arith.constant 0 : index
    %c0_100 = arith.constant 0 : index
    %235 = vector.load %arg25[%c0_99, %c0_100] : memref<1x96xf32, #tpu.memory_space<vmem>>, vector<1x96xf32>
    %236 = vector.broadcast %235 : vector<1x96xf32> to vector<16x96xf32>
    %237 = arith.addf %234, %236 : vector<16x96xf32>
    %c0_101 = arith.constant 0 : index
    %c0_102 = arith.constant 0 : index
    %238 = vector.load %arg26[%c0_101, %c0_102] : memref<96x96xbf16, #tpu.memory_space<vmem>>, vector<96x96xbf16>
    %c0_103 = arith.constant 0 : index
    %c0_104 = arith.constant 0 : index
    %239 = vector.load %arg27[%c0_103, %c0_104] : memref<1x96xf32, #tpu.memory_space<vmem>>, vector<1x96xf32>
    %240 = vector.broadcast %239 : vector<1x96xf32> to vector<16x96xf32>
    %241 = arith.addf %219, %240 : vector<16x96xf32>
    %242 = vector.extract_strided_slice %225 {offsets = [0, 0], sizes = [16, 24], strides = [1, 1]} : vector<16x96xf32> to vector<16x24xf32>
    %243 = vector.extract_strided_slice %231 {offsets = [0, 0], sizes = [16, 24], strides = [1, 1]} : vector<16x96xf32> to vector<16x24xf32>
    %244 = arith.truncf %242 : vector<16x24xf32> to vector<16x24xbf16>
    %245 = arith.truncf %243 : vector<16x24xf32> to vector<16x24xbf16>
    %cst_105 = arith.constant dense<0.000000e+00> : vector<16x16xf32>
    %246 = tpu.matmul %244, %245, %cst_105 {dimension_numbers = #tpu.dot_dimension_numbers<[1], [1], [0], [0], [0, 0, 1, 0], [], []>} : vector<16x24xbf16>, vector<16x24xbf16>, vector<16x16xf32> -> vector<16x16xf32>
    %cst_106 = arith.constant 0.204124153 : f32
    %247 = vector.broadcast %cst_106 : f32 to vector<16x16xf32>
    %248 = arith.mulf %246, %247 : vector<16x16xf32>
    %249 = arith.addf %248, %1 : vector<16x16xf32>
    %cst_107 = arith.constant dense<0xFF800000> : vector<16xf32>
    %250 = vector.multi_reduction <maximumf>, %249, %cst_107 [1] : vector<16x16xf32> to vector<16xf32>
    %251 = vector.shape_cast %250 : vector<16xf32> to vector<16x1xf32>
    %252 = vector.broadcast %251 : vector<16x1xf32> to vector<16x16xf32>
    %253 = arith.subf %249, %252 : vector<16x16xf32>
    %254 = math.exp %253 : vector<16x16xf32>
    %cst_108 = arith.constant dense<0.000000e+00> : vector<16xf32>
    %255 = vector.multi_reduction <add>, %254, %cst_108 [1] : vector<16x16xf32> to vector<16xf32>
    %256 = vector.shape_cast %255 : vector<16xf32> to vector<16x1xf32>
    %257 = tpu.reciprocal %256 : vector<16x1xf32> -> vector<16x1xf32>
    %258 = vector.broadcast %257 : vector<16x1xf32> to vector<16x16xf32>
    %259 = arith.mulf %254, %258 : vector<16x16xf32>
    %260 = vector.extract_strided_slice %237 {offsets = [0, 0], sizes = [16, 24], strides = [1, 1]} : vector<16x96xf32> to vector<16x24xf32>
    %261 = arith.truncf %259 : vector<16x16xf32> to vector<16x16xbf16>
    %262 = arith.truncf %260 : vector<16x24xf32> to vector<16x24xbf16>
    %cst_109 = arith.constant dense<0.000000e+00> : vector<16x24xf32>
    %263 = tpu.matmul %261, %262, %cst_109 {dimension_numbers = #tpu.dot_dimension_numbers<[1], [0], [0], [1], [0, 0, 1, 1], [], []>} : vector<16x16xbf16>, vector<16x24xbf16>, vector<16x24xf32> -> vector<16x24xf32>
    %264 = vector.extract_strided_slice %238 {offsets = [0, 0], sizes = [24, 96], strides = [1, 1]} : vector<96x96xbf16> to vector<24x96xbf16>
    %265 = arith.truncf %263 : vector<16x24xf32> to vector<16x24xbf16>
    %cst_110 = arith.constant dense<0.000000e+00> : vector<16x96xf32>
    %266 = tpu.matmul %265, %264, %cst_110 {dimension_numbers = #tpu.dot_dimension_numbers<[1], [0], [0], [1], [0, 0, 1, 1], [], []>} : vector<16x24xbf16>, vector<24x96xbf16>, vector<16x96xf32> -> vector<16x96xf32>
    %267 = arith.addf %241, %266 : vector<16x96xf32>
    %268 = vector.extract_strided_slice %225 {offsets = [0, 24], sizes = [16, 24], strides = [1, 1]} : vector<16x96xf32> to vector<16x24xf32>
    %269 = vector.extract_strided_slice %231 {offsets = [0, 24], sizes = [16, 24], strides = [1, 1]} : vector<16x96xf32> to vector<16x24xf32>
    %270 = arith.truncf %268 : vector<16x24xf32> to vector<16x24xbf16>
    %271 = arith.truncf %269 : vector<16x24xf32> to vector<16x24xbf16>
    %cst_111 = arith.constant dense<0.000000e+00> : vector<16x16xf32>
    %272 = tpu.matmul %270, %271, %cst_111 {dimension_numbers = #tpu.dot_dimension_numbers<[1], [1], [0], [0], [0, 0, 1, 0], [], []>} : vector<16x24xbf16>, vector<16x24xbf16>, vector<16x16xf32> -> vector<16x16xf32>
    %cst_112 = arith.constant 0.204124153 : f32
    %273 = vector.broadcast %cst_112 : f32 to vector<16x16xf32>
    %274 = arith.mulf %272, %273 : vector<16x16xf32>
    %275 = arith.addf %274, %1 : vector<16x16xf32>
    %cst_113 = arith.constant dense<0xFF800000> : vector<16xf32>
    %276 = vector.multi_reduction <maximumf>, %275, %cst_113 [1] : vector<16x16xf32> to vector<16xf32>
    %277 = vector.shape_cast %276 : vector<16xf32> to vector<16x1xf32>
    %278 = vector.broadcast %277 : vector<16x1xf32> to vector<16x16xf32>
    %279 = arith.subf %275, %278 : vector<16x16xf32>
    %280 = math.exp %279 : vector<16x16xf32>
    %cst_114 = arith.constant dense<0.000000e+00> : vector<16xf32>
    %281 = vector.multi_reduction <add>, %280, %cst_114 [1] : vector<16x16xf32> to vector<16xf32>
    %282 = vector.shape_cast %281 : vector<16xf32> to vector<16x1xf32>
    %283 = tpu.reciprocal %282 : vector<16x1xf32> -> vector<16x1xf32>
    %284 = vector.broadcast %283 : vector<16x1xf32> to vector<16x16xf32>
    %285 = arith.mulf %280, %284 : vector<16x16xf32>
    %286 = vector.extract_strided_slice %237 {offsets = [0, 24], sizes = [16, 24], strides = [1, 1]} : vector<16x96xf32> to vector<16x24xf32>
    %287 = arith.truncf %285 : vector<16x16xf32> to vector<16x16xbf16>
    %288 = arith.truncf %286 : vector<16x24xf32> to vector<16x24xbf16>
    %cst_115 = arith.constant dense<0.000000e+00> : vector<16x24xf32>
    %289 = tpu.matmul %287, %288, %cst_115 {dimension_numbers = #tpu.dot_dimension_numbers<[1], [0], [0], [1], [0, 0, 1, 1], [], []>} : vector<16x16xbf16>, vector<16x24xbf16>, vector<16x24xf32> -> vector<16x24xf32>
    %290 = vector.extract_strided_slice %238 {offsets = [24, 0], sizes = [24, 96], strides = [1, 1]} : vector<96x96xbf16> to vector<24x96xbf16>
    %291 = arith.truncf %289 : vector<16x24xf32> to vector<16x24xbf16>
    %cst_116 = arith.constant dense<0.000000e+00> : vector<16x96xf32>
    %292 = tpu.matmul %291, %290, %cst_116 {dimension_numbers = #tpu.dot_dimension_numbers<[1], [0], [0], [1], [0, 0, 1, 1], [], []>} : vector<16x24xbf16>, vector<24x96xbf16>, vector<16x96xf32> -> vector<16x96xf32>
    %293 = arith.addf %267, %292 : vector<16x96xf32>
    %294 = vector.extract_strided_slice %225 {offsets = [0, 48], sizes = [16, 24], strides = [1, 1]} : vector<16x96xf32> to vector<16x24xf32>
    %295 = vector.extract_strided_slice %231 {offsets = [0, 48], sizes = [16, 24], strides = [1, 1]} : vector<16x96xf32> to vector<16x24xf32>
    %296 = arith.truncf %294 : vector<16x24xf32> to vector<16x24xbf16>
    %297 = arith.truncf %295 : vector<16x24xf32> to vector<16x24xbf16>
    %cst_117 = arith.constant dense<0.000000e+00> : vector<16x16xf32>
    %298 = tpu.matmul %296, %297, %cst_117 {dimension_numbers = #tpu.dot_dimension_numbers<[1], [1], [0], [0], [0, 0, 1, 0], [], []>} : vector<16x24xbf16>, vector<16x24xbf16>, vector<16x16xf32> -> vector<16x16xf32>
    %cst_118 = arith.constant 0.204124153 : f32
    %299 = vector.broadcast %cst_118 : f32 to vector<16x16xf32>
    %300 = arith.mulf %298, %299 : vector<16x16xf32>
    %301 = arith.addf %300, %1 : vector<16x16xf32>
    %cst_119 = arith.constant dense<0xFF800000> : vector<16xf32>
    %302 = vector.multi_reduction <maximumf>, %301, %cst_119 [1] : vector<16x16xf32> to vector<16xf32>
    %303 = vector.shape_cast %302 : vector<16xf32> to vector<16x1xf32>
    %304 = vector.broadcast %303 : vector<16x1xf32> to vector<16x16xf32>
    %305 = arith.subf %301, %304 : vector<16x16xf32>
    %306 = math.exp %305 : vector<16x16xf32>
    %cst_120 = arith.constant dense<0.000000e+00> : vector<16xf32>
    %307 = vector.multi_reduction <add>, %306, %cst_120 [1] : vector<16x16xf32> to vector<16xf32>
    %308 = vector.shape_cast %307 : vector<16xf32> to vector<16x1xf32>
    %309 = tpu.reciprocal %308 : vector<16x1xf32> -> vector<16x1xf32>
    %310 = vector.broadcast %309 : vector<16x1xf32> to vector<16x16xf32>
    %311 = arith.mulf %306, %310 : vector<16x16xf32>
    %312 = vector.extract_strided_slice %237 {offsets = [0, 48], sizes = [16, 24], strides = [1, 1]} : vector<16x96xf32> to vector<16x24xf32>
    %313 = arith.truncf %311 : vector<16x16xf32> to vector<16x16xbf16>
    %314 = arith.truncf %312 : vector<16x24xf32> to vector<16x24xbf16>
    %cst_121 = arith.constant dense<0.000000e+00> : vector<16x24xf32>
    %315 = tpu.matmul %313, %314, %cst_121 {dimension_numbers = #tpu.dot_dimension_numbers<[1], [0], [0], [1], [0, 0, 1, 1], [], []>} : vector<16x16xbf16>, vector<16x24xbf16>, vector<16x24xf32> -> vector<16x24xf32>
    %316 = vector.extract_strided_slice %238 {offsets = [48, 0], sizes = [24, 96], strides = [1, 1]} : vector<96x96xbf16> to vector<24x96xbf16>
    %317 = arith.truncf %315 : vector<16x24xf32> to vector<16x24xbf16>
    %cst_122 = arith.constant dense<0.000000e+00> : vector<16x96xf32>
    %318 = tpu.matmul %317, %316, %cst_122 {dimension_numbers = #tpu.dot_dimension_numbers<[1], [0], [0], [1], [0, 0, 1, 1], [], []>} : vector<16x24xbf16>, vector<24x96xbf16>, vector<16x96xf32> -> vector<16x96xf32>
    %319 = arith.addf %293, %318 : vector<16x96xf32>
    %320 = vector.extract_strided_slice %225 {offsets = [0, 72], sizes = [16, 24], strides = [1, 1]} : vector<16x96xf32> to vector<16x24xf32>
    %321 = vector.extract_strided_slice %231 {offsets = [0, 72], sizes = [16, 24], strides = [1, 1]} : vector<16x96xf32> to vector<16x24xf32>
    %322 = arith.truncf %320 : vector<16x24xf32> to vector<16x24xbf16>
    %323 = arith.truncf %321 : vector<16x24xf32> to vector<16x24xbf16>
    %cst_123 = arith.constant dense<0.000000e+00> : vector<16x16xf32>
    %324 = tpu.matmul %322, %323, %cst_123 {dimension_numbers = #tpu.dot_dimension_numbers<[1], [1], [0], [0], [0, 0, 1, 0], [], []>} : vector<16x24xbf16>, vector<16x24xbf16>, vector<16x16xf32> -> vector<16x16xf32>
    %cst_124 = arith.constant 0.204124153 : f32
    %325 = vector.broadcast %cst_124 : f32 to vector<16x16xf32>
    %326 = arith.mulf %324, %325 : vector<16x16xf32>
    %327 = arith.addf %326, %1 : vector<16x16xf32>
    %cst_125 = arith.constant dense<0xFF800000> : vector<16xf32>
    %328 = vector.multi_reduction <maximumf>, %327, %cst_125 [1] : vector<16x16xf32> to vector<16xf32>
    %329 = vector.shape_cast %328 : vector<16xf32> to vector<16x1xf32>
    %330 = vector.broadcast %329 : vector<16x1xf32> to vector<16x16xf32>
    %331 = arith.subf %327, %330 : vector<16x16xf32>
    %332 = math.exp %331 : vector<16x16xf32>
    %cst_126 = arith.constant dense<0.000000e+00> : vector<16xf32>
    %333 = vector.multi_reduction <add>, %332, %cst_126 [1] : vector<16x16xf32> to vector<16xf32>
    %334 = vector.shape_cast %333 : vector<16xf32> to vector<16x1xf32>
    %335 = tpu.reciprocal %334 : vector<16x1xf32> -> vector<16x1xf32>
    %336 = vector.broadcast %335 : vector<16x1xf32> to vector<16x16xf32>
    %337 = arith.mulf %332, %336 : vector<16x16xf32>
    %338 = vector.extract_strided_slice %237 {offsets = [0, 72], sizes = [16, 24], strides = [1, 1]} : vector<16x96xf32> to vector<16x24xf32>
    %339 = arith.truncf %337 : vector<16x16xf32> to vector<16x16xbf16>
    %340 = arith.truncf %338 : vector<16x24xf32> to vector<16x24xbf16>
    %cst_127 = arith.constant dense<0.000000e+00> : vector<16x24xf32>
    %341 = tpu.matmul %339, %340, %cst_127 {dimension_numbers = #tpu.dot_dimension_numbers<[1], [0], [0], [1], [0, 0, 1, 1], [], []>} : vector<16x16xbf16>, vector<16x24xbf16>, vector<16x24xf32> -> vector<16x24xf32>
    %342 = vector.extract_strided_slice %238 {offsets = [72, 0], sizes = [24, 96], strides = [1, 1]} : vector<96x96xbf16> to vector<24x96xbf16>
    %343 = arith.truncf %341 : vector<16x24xf32> to vector<16x24xbf16>
    %cst_128 = arith.constant dense<0.000000e+00> : vector<16x96xf32>
    %344 = tpu.matmul %343, %342, %cst_128 {dimension_numbers = #tpu.dot_dimension_numbers<[1], [0], [0], [1], [0, 0, 1, 1], [], []>} : vector<16x24xbf16>, vector<24x96xbf16>, vector<16x96xf32> -> vector<16x96xf32>
    %345 = arith.addf %319, %344 : vector<16x96xf32>
    %c0_129 = arith.constant 0 : index
    %c0_130 = arith.constant 0 : index
    %346 = vector.load %arg28[%c0_129, %c0_130] : memref<1x96xf32, #tpu.memory_space<vmem>>, vector<1x96xf32>
    %c0_131 = arith.constant 0 : index
    %c0_132 = arith.constant 0 : index
    %347 = vector.load %arg29[%c0_131, %c0_132] : memref<1x96xf32, #tpu.memory_space<vmem>>, vector<1x96xf32>
    %cst_133 = arith.constant dense<0.000000e+00> : vector<16xf32>
    %348 = vector.multi_reduction <add>, %345, %cst_133 [1] : vector<16x96xf32> to vector<16xf32>
    %349 = vector.shape_cast %348 : vector<16xf32> to vector<16x1xf32>
    %cst_134 = arith.constant 9.600000e+01 : f32
    %350 = vector.broadcast %cst_134 : f32 to vector<16x1xf32>
    %351 = arith.divf %349, %350 : vector<16x1xf32>
    %352 = vector.broadcast %351 : vector<16x1xf32> to vector<16x96xf32>
    %353 = arith.subf %345, %352 : vector<16x96xf32>
    %354 = arith.mulf %353, %353 : vector<16x96xf32>
    %cst_135 = arith.constant dense<0.000000e+00> : vector<16xf32>
    %355 = vector.multi_reduction <add>, %354, %cst_135 [1] : vector<16x96xf32> to vector<16xf32>
    %356 = vector.shape_cast %355 : vector<16xf32> to vector<16x1xf32>
    %cst_136 = arith.constant 9.600000e+01 : f32
    %357 = vector.broadcast %cst_136 : f32 to vector<16x1xf32>
    %358 = arith.divf %356, %357 : vector<16x1xf32>
    %cst_137 = arith.constant 9.99999996E-13 : f32
    %359 = vector.broadcast %cst_137 : f32 to vector<16x1xf32>
    %360 = arith.addf %358, %359 : vector<16x1xf32>
    %361 = math.rsqrt %360 : vector<16x1xf32>
    %362 = vector.broadcast %361 : vector<16x1xf32> to vector<16x96xf32>
    %363 = arith.mulf %353, %362 : vector<16x96xf32>
    %364 = vector.broadcast %346 : vector<1x96xf32> to vector<16x96xf32>
    %365 = arith.mulf %363, %364 : vector<16x96xf32>
    %366 = vector.broadcast %347 : vector<1x96xf32> to vector<16x96xf32>
    %367 = arith.addf %365, %366 : vector<16x96xf32>
    %c0_138 = arith.constant 0 : index
    %c0_139 = arith.constant 0 : index
    %368 = vector.load %arg30[%c0_138, %c0_139] : memref<96x192xbf16, #tpu.memory_space<vmem>>, vector<96x192xbf16>
    %369 = arith.truncf %367 : vector<16x96xf32> to vector<16x96xbf16>
    %cst_140 = arith.constant dense<0.000000e+00> : vector<16x192xf32>
    %370 = tpu.matmul %369, %368, %cst_140 {dimension_numbers = #tpu.dot_dimension_numbers<[1], [0], [0], [1], [0, 0, 1, 1], [], []>} : vector<16x96xbf16>, vector<96x192xbf16>, vector<16x192xf32> -> vector<16x192xf32>
    %c0_141 = arith.constant 0 : index
    %c0_142 = arith.constant 0 : index
    %371 = vector.load %arg31[%c0_141, %c0_142] : memref<1x192xf32, #tpu.memory_space<vmem>>, vector<1x192xf32>
    %372 = vector.broadcast %371 : vector<1x192xf32> to vector<16x192xf32>
    %373 = arith.addf %370, %372 : vector<16x192xf32>
    %cst_143 = arith.constant 5.000000e-01 : f32
    %374 = vector.broadcast %cst_143 : f32 to vector<16x192xf32>
    %375 = arith.mulf %374, %373 : vector<16x192xf32>
    %cst_144 = arith.constant 4.471500e-02 : f32
    %376 = vector.broadcast %cst_144 : f32 to vector<16x192xf32>
    %377 = arith.mulf %376, %373 : vector<16x192xf32>
    %378 = arith.mulf %377, %373 : vector<16x192xf32>
    %379 = arith.mulf %378, %373 : vector<16x192xf32>
    %380 = arith.addf %373, %379 : vector<16x192xf32>
    %cst_145 = arith.constant 0.797884583 : f32
    %381 = vector.broadcast %cst_145 : f32 to vector<16x192xf32>
    %382 = arith.mulf %381, %380 : vector<16x192xf32>
    %383 = math.tanh %382 : vector<16x192xf32>
    %cst_146 = arith.constant 1.000000e+00 : f32
    %384 = vector.broadcast %cst_146 : f32 to vector<16x192xf32>
    %385 = arith.addf %384, %383 : vector<16x192xf32>
    %386 = arith.mulf %375, %385 : vector<16x192xf32>
    %c0_147 = arith.constant 0 : index
    %c0_148 = arith.constant 0 : index
    %387 = vector.load %arg32[%c0_147, %c0_148] : memref<192x96xbf16, #tpu.memory_space<vmem>>, vector<192x96xbf16>
    %388 = arith.truncf %386 : vector<16x192xf32> to vector<16x192xbf16>
    %cst_149 = arith.constant dense<0.000000e+00> : vector<16x96xf32>
    %389 = tpu.matmul %388, %387, %cst_149 {dimension_numbers = #tpu.dot_dimension_numbers<[1], [0], [0], [1], [0, 0, 1, 1], [], []>} : vector<16x192xbf16>, vector<192x96xbf16>, vector<16x96xf32> -> vector<16x96xf32>
    %c0_150 = arith.constant 0 : index
    %c0_151 = arith.constant 0 : index
    %390 = vector.load %arg33[%c0_150, %c0_151] : memref<1x96xf32, #tpu.memory_space<vmem>>, vector<1x96xf32>
    %391 = vector.broadcast %390 : vector<1x96xf32> to vector<16x96xf32>
    %392 = arith.addf %389, %391 : vector<16x96xf32>
    %393 = arith.addf %392, %367 : vector<16x96xf32>
    %c0_152 = arith.constant 0 : index
    %c0_153 = arith.constant 0 : index
    %394 = vector.load %arg34[%c0_152, %c0_153] : memref<1x96xf32, #tpu.memory_space<vmem>>, vector<1x96xf32>
    %c0_154 = arith.constant 0 : index
    %c0_155 = arith.constant 0 : index
    %395 = vector.load %arg35[%c0_154, %c0_155] : memref<1x96xf32, #tpu.memory_space<vmem>>, vector<1x96xf32>
    %cst_156 = arith.constant dense<0.000000e+00> : vector<16xf32>
    %396 = vector.multi_reduction <add>, %393, %cst_156 [1] : vector<16x96xf32> to vector<16xf32>
    %397 = vector.shape_cast %396 : vector<16xf32> to vector<16x1xf32>
    %cst_157 = arith.constant 9.600000e+01 : f32
    %398 = vector.broadcast %cst_157 : f32 to vector<16x1xf32>
    %399 = arith.divf %397, %398 : vector<16x1xf32>
    %400 = vector.broadcast %399 : vector<16x1xf32> to vector<16x96xf32>
    %401 = arith.subf %393, %400 : vector<16x96xf32>
    %402 = arith.mulf %401, %401 : vector<16x96xf32>
    %cst_158 = arith.constant dense<0.000000e+00> : vector<16xf32>
    %403 = vector.multi_reduction <add>, %402, %cst_158 [1] : vector<16x96xf32> to vector<16xf32>
    %404 = vector.shape_cast %403 : vector<16xf32> to vector<16x1xf32>
    %cst_159 = arith.constant 9.600000e+01 : f32
    %405 = vector.broadcast %cst_159 : f32 to vector<16x1xf32>
    %406 = arith.divf %404, %405 : vector<16x1xf32>
    %cst_160 = arith.constant 9.99999996E-13 : f32
    %407 = vector.broadcast %cst_160 : f32 to vector<16x1xf32>
    %408 = arith.addf %406, %407 : vector<16x1xf32>
    %409 = math.rsqrt %408 : vector<16x1xf32>
    %410 = vector.broadcast %409 : vector<16x1xf32> to vector<16x96xf32>
    %411 = arith.mulf %401, %410 : vector<16x96xf32>
    %412 = vector.broadcast %394 : vector<1x96xf32> to vector<16x96xf32>
    %413 = arith.mulf %411, %412 : vector<16x96xf32>
    %414 = vector.broadcast %395 : vector<1x96xf32> to vector<16x96xf32>
    %415 = arith.addf %413, %414 : vector<16x96xf32>
    %c0_161 = arith.constant 0 : index
    %c0_162 = arith.constant 0 : index
    %416 = vector.load %arg36[%c0_161, %c0_162] : memref<16x96xf32, #tpu.memory_space<vmem>>, vector<16x96xf32>
    tpu.vector_store %arg36[%c0_161, %c0_162], %415 {strides = array<i32>} : memref<16x96xf32, #tpu.memory_space<vmem>>, vector<16x96xf32>,
    return
  }
}

</mosaic_0001>

<bundles_post_ra>
// kernel: pygc_forward.5
= control target key start
LH: loop header
LB: loop body
LE: loop exit
PB: predicated region body
PF: predicated region fallthrough
CT: control target
= control target key end

     0   :  { %s1906_s0 = inlined_call_operand.vmem [shape: f32[16,96], index: 0, kind: input, shape index: {}]   ;;  %s1907_s1 = inlined_call_operand.vmem [shape: f32[16,96], index: 1, kind: input, shape index: {}]   ;;  %s1908_s2 = inlined_call_operand.vmem [shape: bf16[96,96], index: 2, kind: input, shape index: {}]   ;;  %s1909_s3 = inlined_call_operand.vmem [shape: f32[1,96], index: 3, kind: input, shape index: {}]   ;;  %s1910_s4 = inlined_call_operand.vmem [shape: bf16[96,96], index: 4, kind: input, shape index: {}]   ;;  %s1911_s5 = inlined_call_operand.vmem [shape: bf16[96,96], index: 5, kind: input, shape index: {}]   ;;  %s1912_s6 = inlined_call_operand.vmem [shape: f32[1,96], index: 6, kind: input, shape index: {}]   ;;  %s1913_s7 = inlined_call_operand.vmem [shape: f32[1,96], index: 7, kind: input, shape index: {}]   ;;  %s1914_s8 = inlined_call_operand.vmem [shape: f32[1,96], index: 8, kind: input, shape index: {}]   ;;  %s1915_s9 = inlined_call_operand.vmem [shape: bf16[96,96], index: 9, kind: input, shape index: {}]   ;;  %s1916_s10 = inlined_call_operand.hbm [shape: f32[1,96], index: 10, kind: input, shape index: {}]   ;;  %s1917_s11 = inlined_call_operand.hbm [shape: f32[1,96], index: 11, kind: input, shape index: {}]   ;;  %s1918_s12 = inlined_call_operand.hbm [shape: f32[1,96], index: 12, kind: input, shape index: {}]   ;;  %s1919_s13 = inlined_call_operand.vmem [shape: bf16[96,128], index: 13, kind: input, shape index: {}]   ;;  %s1920_s14 = inlined_call_operand.hbm [shape: f32[1,128], index: 14, kind: input, shape index: {}]   ;;  %s1921_s15 = inlined_call_operand.vmem [shape: bf16[96,96], index: 15, kind: input, shape index: {}]   ;;  %s1922_s16 = inlined_call_operand.hbm [shape: f32[1,96], index: 16, kind: input, shape index: {}]   ;;  %s1923_s17 = inlined_call_operand.hbm [shape: f32[1,96], index: 17, kind: input, shape index: {}]   ;;  %s1924_s18 = inlined_call_operand.hbm [shape: f32[1,96], index: 18, kind: input, shape index: {}]   ;;  %s1925_s19 = inlined_call_operand.vmem [shape: bf16[96,128], index: 19, kind: input, shape index: {}]   ;;  %s1926_s20 = inlined_call_operand.hbm [shape: f32[1,128], index: 20, kind: input, shape index: {}]   ;;  %s1927_s21 = inlined_call_operand.vmem [shape: f32[16,128], index: 21, kind: output, shape index: {0}]   ;;  %s1928_s22 = inlined_call_operand.vmem [shape: f32[16,128], index: 22, kind: output, shape index: {1}]  }
   0x1   :  { %1934 = sst [smem:[#allocation20_spill]] %s1906_s0 }
   0x2   :  { %1935 = sst [smem:[#allocation21_spill]] %s1907_s1 }
   0x3   :  { %1936 = sst [smem:[#allocation22_spill]] %s1908_s2 }
   0x4   :  { %1937 = sst [smem:[#allocation23_spill]] %s1909_s3 }
   0x5   :  { %1938 = sst [smem:[#allocation24_spill]] %s1910_s4 }
   0x6   :  { %1939 = sst [smem:[#allocation25_spill]] %s1911_s5 }
   0x7   :  { %1940 = sst [smem:[#allocation26_spill]] %s1912_s6 }
   0x8   :  { %28 = vsyncpa [#allocation3], 0 }
   0x9   :  { %29 = vsyncpa [#allocation5], 0 }
   0xa   :  { %30 = vsyncpa [#allocation8], 0 }
   0xb   :  { %31 = vsyncpa [#allocation11], 0 }
   0xc   :  { %32 = vsyncpa [#allocation14], 0  ;;  %s1510_s3 = smov [#allocation4]   ;;  %s1511_s29 = smov [#allocation7]  }
   0xd   :  { %s69_s28 = sshll.u32 %s1510_s3, 4  ;;  %s91_s30 = sshll.u32 %s1511_s29, 4  ;;  %s70_s28 = int_to_ptr.vmem [resolvable:$true] %s69_s28  ;;  %s92_s30 = int_to_ptr.vmem [resolvable:$true] %s91_s30 }
   0xe   :  { %s1348_s4 = scalar_lea.vmem %s70_s28, 16  ;;  %s1352_s0 = scalar_lea.vmem %s70_s28, 32 }
   0xf   :  { %p1349_p0 = scmp.ne.s32.totalorder %s70_s28, %s1348_s4  ;;  %p1353_p1 = scmp.lt.s32.totalorder %s70_s28, %s70_s28 }
  0x10   :  { %p1354_p2 = scmp.lt.s32.totalorder %s1352_s0, %s1348_s4 }
  0x12   :  { %p1355_p3 = por %p1354_p2, %p1353_p1 }
  0x14   :  { %p1356_p4 = pnand %p1355_p3, %p1349_p0 }
  0x16   :  { %1359 = shalt.err (!%p1356_p4)
}
  0x17   :  { %72 = dma.hbm_to_vmem [thread:$0]  %s1917_s11, 16, %s70_s28, [#allocation5]  }
  0x18   :  { %s1368_s5 = scalar_lea.vmem %s92_s30, 16  ;;  %s1372_s24 = scalar_lea.vmem %s92_s30, 32 }
  0x19   :  { %p1369_p5 = scmp.ne.s32.totalorder %s92_s30, %s1368_s5  ;;  %p1373_p6 = scmp.lt.s32.totalorder %s92_s30, %s92_s30 }
  0x1a   :  { %p1374_p7 = scmp.lt.s32.totalorder %s1372_s24, %s1368_s5 }
  0x1c   :  { %p1375_p8 = por %p1374_p7, %p1373_p6 }
  0x1e   :  { %p1376_p9 = pnand %p1375_p8, %p1369_p5 }
  0x20   :  { %1379 = shalt.err (!%p1376_p9)
}
  0x21   :  { %94 = dma.hbm_to_vmem [thread:$0]  %s1920_s14, 16, %s92_s30, [#allocation8]  }
  0x22   :  { %s1512_s26 = smov [#allocation10]   ;;  %s1513_s27 = smov [#allocation2]  }
  0x23   :  { %s113_s2 = sshll.u32 %s1512_s26, 4  ;;  %s59_s3 = sshll.u32 %s1513_s27, 4  ;;  %s114_s2 = int_to_ptr.vmem [resolvable:$true] %s113_s2  ;;  %s60_s3 = int_to_ptr.vmem [resolvable:$true] %s59_s3 }
  0x24   :  { %s1388_s29 = scalar_lea.vmem %s114_s2, 16  ;;  %s1392_s11 = scalar_lea.vmem %s114_s2, 32 }
  0x25   :  { %p1389_p10 = scmp.ne.s32.totalorder %s114_s2, %s1388_s29  ;;  %p1393_p11 = scmp.lt.s32.totalorder %s114_s2, %s114_s2 }
  0x26   :  { %p1394_p12 = scmp.lt.s32.totalorder %s1392_s11, %s1388_s29 }
  0x28   :  { %p1395_p13 = por %p1394_p12, %p1393_p11 }
  0x2a   :  { %p1396_p0 = pnand %p1395_p13, %p1389_p10 }
  0x2c   :  { %1399 = shalt.err (!%p1396_p0)
}
  0x2d   :  { %116 = dma.hbm_to_vmem [thread:$0]  %s1923_s17, 16, %s114_s2, [#allocation11]  }
  0x2e   :  { %s1408_s0 = scalar_lea.vmem %s60_s3, 16  ;;  %s1412_s14 = scalar_lea.vmem %s60_s3, 32 }
  0x2f   :  { %p1409_p1 = scmp.ne.s32.totalorder %s60_s3, %s1408_s0  ;;  %p1413_p2 = scmp.lt.s32.totalorder %s60_s3, %s60_s3 }
  0x30   :  { %p1414_p3 = scmp.lt.s32.totalorder %s1412_s14, %s1408_s0 }
  0x32   :  { %p1415_p4 = por %p1414_p3, %p1413_p2 }
  0x34   :  { %p1416_p5 = pnand %p1415_p4, %p1409_p1 }
  0x36   :  { %1419 = shalt.err (!%p1416_p5)
}
  0x37   :  { %62 = dma.hbm_to_vmem [thread:$0]  %s1916_s10, 16, %s60_s3, [#allocation3]  }
  0x38   :  { %s1514_s1 = smov [#allocation6]   ;;  %s1515_s24 = smov [#allocation9]  }
  0x39   :  { %s79_s5 = sshll.u32 %s1514_s1, 4  ;;  %s103_s6 = sshll.u32 %s1515_s24, 4  ;;  %s80_s5 = int_to_ptr.vmem [resolvable:$true] %s79_s5  ;;  %s104_s6 = int_to_ptr.vmem [resolvable:$true] %s103_s6 }
  0x3a   :  { %s1428_s25 = scalar_lea.vmem %s80_s5, 16  ;;  %s1432_s17 = scalar_lea.vmem %s80_s5, 32 }
  0x3b   :  { %p1429_p6 = scmp.ne.s32.totalorder %s80_s5, %s1428_s25  ;;  %p1433_p7 = scmp.lt.s32.totalorder %s80_s5, %s80_s5 }
  0x3c   :  { %p1434_p8 = scmp.lt.s32.totalorder %s1432_s17, %s1428_s25 }
  0x3e   :  { %p1435_p9 = por %p1434_p8, %p1433_p7 }
  0x40   :  { %p1436_p10 = pnand %p1435_p9, %p1429_p6 }
  0x42   :  { %1439 = shalt.err (!%p1436_p10)
}
  0x43   :  { %82 = dma.hbm_to_vmem [thread:$0]  %s1918_s12, 16, %s80_s5, [#allocation5]  }
  0x44   :  { %s1448_s27 = scalar_lea.vmem %s104_s6, 16  ;;  %s1452_s10 = scalar_lea.vmem %s104_s6, 32 }
  0x45   :  { %p1449_p11 = scmp.ne.s32.totalorder %s104_s6, %s1448_s27  ;;  %p1453_p12 = scmp.lt.s32.totalorder %s104_s6, %s104_s6 }
  0x46   :  { %p1454_p13 = scmp.lt.s32.totalorder %s1452_s10, %s1448_s27 }
  0x48   :  { %p1455_p0 = por %p1454_p13, %p1453_p12 }
  0x4a   :  { %p1456_p1 = pnand %p1455_p0, %p1449_p11 }
  0x4c   :  { %1459 = shalt.err (!%p1456_p1)
}
  0x4d   :  { %106 = dma.hbm_to_vmem [thread:$0]  %s1922_s16, 16, %s104_s6, [#allocation8]  }
  0x4e   :  { %s1516_s11 = smov [#allocation12]   ;;  %s1517_s4 = smov [#allocation13]  }
  0x4f   :  { %s123_s28 = sshll.u32 %s1516_s11, 4  ;;  %s135_s0 = sshll.u32 %s1517_s4, 4  ;;  %s124_s28 = int_to_ptr.vmem [resolvable:$true] %s123_s28  ;;  %s136_s0 = int_to_ptr.vmem [resolvable:$true] %s135_s0 }
  0x50   :  { %s1468_s14 = scalar_lea.vmem %s124_s28, 16  ;;  %s1472_s12 = scalar_lea.vmem %s124_s28, 32 }
  0x51   :  { %p1469_p2 = scmp.ne.s32.totalorder %s124_s28, %s1468_s14  ;;  %p1473_p3 = scmp.lt.s32.totalorder %s124_s28, %s124_s28 }
  0x52   :  { %p1474_p4 = scmp.lt.s32.totalorder %s1472_s12, %s1468_s14 }
  0x54   :  { %p1475_p5 = por %p1474_p4, %p1473_p3 }
  0x56   :  { %p1476_p6 = pnand %p1475_p5, %p1469_p2 }
  0x58   :  { %1479 = shalt.err (!%p1476_p6)
}
  0x59   :  { %126 = dma.hbm_to_vmem [thread:$0]  %s1924_s18, 16, %s124_s28, [#allocation11]  }
  0x5a   :  { %s1488_s1 = scalar_lea.vmem %s136_s0, 16  ;;  %s1492_s16 = scalar_lea.vmem %s136_s0, 32 }
  0x5b   :  { %p1489_p7 = scmp.ne.s32.totalorder %s136_s0, %s1488_s1  ;;  %p1493_p8 = scmp.lt.s32.totalorder %s136_s0, %s136_s0 }
  0x5c   :  { %p1494_p9 = scmp.lt.s32.totalorder %s1492_s16, %s1488_s1 }
  0x5e   :  { %p1495_p10 = por %p1494_p9, %p1493_p8 }
  0x60   :  { %p1496_p11 = pnand %p1495_p10, %p1489_p7 }
  0x62   :  { %1499 = shalt.err (!%p1496_p11)
}
  0x63   :  { %138 = dma.hbm_to_vmem [thread:$0]  %s1926_s20, 16, %s136_s0, [#allocation14]  }
  0x64   :  { %1500 = dma.done.wait [#allocation3], 16  }
  0x65   :  { %1501 = vsyncadd [#allocation3], 4294967280 }
  0x66   :  { %1502 = dma.done.wait [#allocation5], 32  }
  0x67   :  { %1503 = vsyncadd [#allocation5], 4294967264 }
  0x68   :  { %1504 = dma.done.wait [#allocation8], 32  }
  0x69   :  { %1505 = vsyncadd [#allocation8], 4294967264 }
  0x6a   :  { %1506 = dma.done.wait [#allocation11], 32  }
  0x6b   :  { %1507 = vsyncadd [#allocation11], 4294967264 }
  0x6c   :  { %1508 = dma.done.wait [#allocation14], 16  }
  0x6d   :  { %1509 = vsyncadd [#allocation14], 4294967280  ;;  %v1518_v0 = vmov 0.0   ;;  %vm1519_vm0 = vmmov 0   ;;  %s1941_s6 = sld [smem:[#allocation22_spill]]  ;;  %vm224_vm1 = vcmask 785408  }
  0x6e   :  { %1156 = vmatprep.subr.bf16.mxu0 %v1518_v0  ;;  %1168 = vmatprep.mubr.msk.bf16.mxu0 %vm1519_vm0, %v1518_v0  ;;  %s1942_s3 = sld [smem:[#allocation25_spill]]  ;;  %v1296_v58 = vld [vmem:[%s1915_s9 + $0x28] sm:$0xff]   ;;  %v1297_v59 = vld [vmem:[%s1915_s9 + $0x20] sm:$0xff]   ;;  %v1298_v60 = vld [vmem:[%s1915_s9 + $0x18] sm:$0xff]  }
  0x6f   :  { %1172 = vmatprep.subr.bf16.mxu1 %v1518_v0  ;;  %1184 = vmatprep.mubr.msk.bf16.mxu1 %vm1519_vm0, %v1518_v0  ;;  %s1943_s24 = sld [smem:[#allocation21_spill]]  ;;  %v1299_v61 = vld [vmem:[%s1915_s9 + $0x10] sm:$0xff]   ;;  %v1300_v62 = vld [vmem:[%s1915_s9 + $0x8] sm:$0xff]   ;;  %v1301_v63 = vld [vmem:[%s1915_s9] sm:$0xff]  }
  0x70   :  { %s1944_s2 = sld [smem:[#allocation24_spill]] }
  0x71   :  { %s1947_s10 = sld [smem:[#allocation26_spill]] }
  0x73   :  { %v1278_v1 = vld [vmem:[%s1941_s6 + $0x28] sm:$0xff]   ;;  %v1279_v2 = vld [vmem:[%s1941_s6 + $0x20] sm:$0xff]   ;;  %v1280_v3 = vld [vmem:[%s1941_s6 + $0x18] sm:$0xff]  }
  0x74   :  { %1157 = vmatpush3.bf16.msra.mxu0 %v1278_v1  ;;  %v1286_v4 = vld [vmem:[%s1942_s3 + $0x28] sm:$0xff]   ;;  %v1281_v5 = vld [vmem:[%s1941_s6 + $0x10] sm:$0xff]   ;;  %v1288_v6 = vld [vmem:[%s1942_s3 + $0x20] sm:$0xff]  }
  0x75   :  { %1158 = vmatprep.subr.bf16.mxu0 %v1518_v0  ;;  %1173 = vmatpush3.bf16.msra.mxu1 %v1286_v4  ;;  %v1282_v7 = vld [vmem:[%s1941_s6 + $0x8] sm:$0xff]   ;;  %v1290_v8 = vld [vmem:[%s1942_s3 + $0x18] sm:$0xff]   ;;  %v1283_v9 = vld [vmem:[%s1941_s6] sm:$0xff]  }
  0x76   :  { %1174 = vmatprep.subr.bf16.mxu1 %v1518_v0  ;;  %v166_v10 = vld [vmem:[%s1943_s24] sm:$0xff]  ;;  %v167_v11 = vld [vmem:[%s1943_s24 + $0x8] sm:$0xff]  ;;  %v1292_v12 = vld [vmem:[%s1942_s3 + $0x10] sm:$0xff]   ;;  %s1945_s24 = sld [smem:[#allocation20_spill]] }
  0x77   :  { %v1284_v13 = vld [vmem:[%s1944_s2 + $0x28] sm:$0xff]   ;;  %v180_v14 = vpack.c.bf16 %v167_v11, %v166_v10  ;;  %v1285_v15 = vld [vmem:[%s1944_s2 + $0x20] sm:$0xff]   ;;  %v1287_v16 = vld [vmem:[%s1944_s2 + $0x18] sm:$0xff]  }
  0x78   :  { %1159 = vmatpush3.bf16.msra.mxu0 %v1279_v2  ;;  %v1289_v17 = vld [vmem:[%s1944_s2 + $0x10] sm:$0xff]   ;;  %v1291_v18 = vld [vmem:[%s1944_s2 + $0x8] sm:$0xff]   ;;  %v1293_v19 = vld [vmem:[%s1944_s2] sm:$0xff]   ;;  %s1946_s2 = sld [smem:[#allocation23_spill]] }
  0x79   :  { %1160 = vmatprep.subr.bf16.mxu0 %v1518_v0  ;;  %1175 = vmatpush3.bf16.msra.mxu1 %v1288_v6  ;;  %v1294_v20 = vld [vmem:[%s1942_s3 + $0x8] sm:$0xff]   ;;  %v1295_v24 = vld [vmem:[%s1942_s3] sm:$0xff]  }
  0x7a   :  { %1176 = vmatprep.subr.bf16.mxu1 %v1518_v0  ;;  %v1068_v38 = vld [vmem:[%s1947_s10] ss:$0 sm:$0xff] }
  0x7c   :  { %1161 = vmatpush3.bf16.msra.mxu0 %v1280_v3  ;;  %v164_v21 = vld [vmem:[%s1945_s24] sm:$0xff]  ;;  %v165_v22 = vld [vmem:[%s1945_s24 + $0x8] sm:$0xff] }
  0x7d   :  { %1162 = vmatprep.subr.bf16.mxu0 %v1518_v0  ;;  %1177 = vmatpush3.bf16.msra.mxu1 %v1290_v8  ;;  %v281_v23 = vpack.c.bf16 %v165_v22, %v164_v21  ;;  %v1305_v21 = vld [vmem:[%s1921_s15 + $0x10] sm:$0xff]   ;;  %v1306_v22 = vld [vmem:[%s1921_s15 + $0x8] sm:$0xff]  }
  0x7e   :  { %1178 = vmatprep.subr.bf16.mxu1 %v1518_v0  ;;  %v1046_v26 = vld [vmem:[%s1946_s2] ss:$0 sm:$0xff] }
  0x80   :  { %1163 = vmatpush3.bf16.msra.mxu0 %v1281_v5 }
  0x81   :  { %1164 = vmatprep.subr.bf16.mxu0 %v1518_v0  ;;  %1179 = vmatpush3.bf16.msra.mxu1 %v1292_v12 }
  0x82   :  { %1180 = vmatprep.subr.bf16.mxu1 %v1518_v0 }
  0x84   :  { %1165 = vmatpush3.bf16.msra.mxu0 %v1282_v7 }
  0x85   :  { %1166 = vmatprep.subr.bf16.mxu0 %v1518_v0  ;;  %1181 = vmatpush3.bf16.msra.mxu1 %v1294_v20  ;;  %v1304_v20 = vld [vmem:[%s1921_s15 + $0x18] sm:$0xff]  }
  0x86   :  { %1182 = vmatprep.subr.bf16.mxu1 %v1518_v0 }
  0x88   :  { %1167 = vmatpush3.bf16.msra.mxu0 %v1283_v9  ;;  %v1069_v9 = vld [vmem:[%s1913_s7] ss:$0 sm:$0xff] }
  0x89   :  { %1188 = vmatprep.subr.bf16.mxu0 %v1518_v0  ;;  %1183 = vmatpush3.bf16.msra.mxu1 %v1295_v24  ;;  %v1071_v24 = vld [vmem:[#allocation2] ss:$0 sm:$0xff] }
  0x8a   :  { %1204 = vmatprep.subr.bf16.mxu1 %v1518_v0 }
  0x8b   :  { %1169 = vmatmul.mubr.msk.bf16.vlgmr.msra.gmra.mxu0 %vm224_vm1, %v180_v14 }
  0x8c   :  { %1189 = vmatpush3.bf16.msra.mxu0 %v1284_v13  ;;  %1200 = vmatprep.mubr.msk.bf16.mxu0 %vm1519_vm0, %v1518_v0  ;;  %v1070_v13 = vld [vmem:[%s1914_s8] ss:$0 sm:$0xff] }
  0x8d   :  { %1190 = vmatprep.subr.bf16.mxu0 %v1518_v0 }
  0x90   :  { %1191 = vmatpush3.bf16.msra.mxu0 %v1285_v15 }
  0x91   :  { %1192 = vmatprep.subr.bf16.mxu0 %v1518_v0 }
  0x94   :  { %1193 = vmatpush3.bf16.msra.mxu0 %v1287_v16 }
  0x95   :  { %1194 = vmatprep.subr.bf16.mxu0 %v1518_v0 }
  0x98   :  { %1195 = vmatpush3.bf16.msra.mxu0 %v1289_v17  ;;  %v1302_v17 = vld [vmem:[%s1921_s15 + $0x28] sm:$0xff]  }
  0x99   :  { %1196 = vmatprep.subr.bf16.mxu0 %v1518_v0 }
  0x9c   :  { %1197 = vmatpush3.bf16.msra.mxu0 %v1291_v18 }
  0x9d   :  { %1198 = vmatprep.subr.bf16.mxu0 %v1518_v0 }
  0xa0   :  { %1199 = vmatpush3.bf16.msra.mxu0 %v1293_v19  ;;  %v1303_v19 = vld [vmem:[%s1921_s15 + $0x20] sm:$0xff]  }
  0xa1   :  { %1220 = vmatprep.subr.bf16.mxu0 %v1518_v0 }
  0xa3   :  { %1201 = vmatmul.mubr.msk.bf16.vlgmr.msra.gmra.mxu0 %vm224_vm1, %v281_v23  ;;  %v1307_v23 = vld [vmem:[%s1921_s15] sm:$0xff]  }
  0xa4   :  { %1232 = vmatprep.mubr.msk.bf16.mxu0 %vm1519_vm0, %v1518_v0 }
 0x14b   :  { %v262_v25 = vpop.f32.mrf.mxu0 }
 0x14c   :  { %v263_v29 = vadd.f32 %v1046_v26, %v262_v25 }
 0x14d   :  { %v1170_v27 = vpop.f32.mrf.mxu0 }
 0x14f   :  { %v265_v28 = vpop.f32.mrf.mxu0 }
 0x150   :  { %v266_v30 = vadd.f32 %v1046_v26, %v265_v28 }
 0x151   :  { %v1171_v31 = vpop.f32.mrf.mxu0 }
 0x152   :  { %v294_v32 = vpack.c.bf16 %v266_v30, %v263_v29 }
 0x154   :  { %1185 = vmatmul.mubr.msk.bf16.vlgmr.msra.gmra.mxu1 %vm224_vm1, %v294_v32 }
 0x155   :  { %1216 = vmatprep.mubr.msk.bf16.mxu1 %vm1519_vm0, %v1518_v0  ;;  %1205 = vmatpush3.bf16.msra.mxu1 %v1296_v58 }
 0x156   :  { %1206 = vmatprep.subr.bf16.mxu1 %v1518_v0 }
 0x159   :  { %1207 = vmatpush3.bf16.msra.mxu1 %v1297_v59 }
 0x15a   :  { %1208 = vmatprep.subr.bf16.mxu1 %v1518_v0 }
 0x15d   :  { %1209 = vmatpush3.bf16.msra.mxu1 %v1298_v60 }
 0x15e   :  { %1210 = vmatprep.subr.bf16.mxu1 %v1518_v0 }
 0x161   :  { %1211 = vmatpush3.bf16.msra.mxu1 %v1299_v61 }
 0x162   :  { %1212 = vmatprep.subr.bf16.mxu1 %v1518_v0 }
 0x163   :  { %v448_v33 = vpop.f32.mrf.mxu0 }
 0x165   :  { %v1202_v34 = vpop.f32.mrf.mxu0  ;;  %1213 = vmatpush3.bf16.msra.mxu1 %v1300_v62 }
 0x166   :  { %1214 = vmatprep.subr.bf16.mxu1 %v1518_v0 }
 0x167   :  { %v451_v35 = vpop.f32.mrf.mxu0 }
 0x169   :  { %v1203_v36 = vpop.f32.mrf.mxu0  ;;  %1215 = vmatpush3.bf16.msra.mxu1 %v1301_v63 }
 0x16a   :  { %1236 = vmatprep.subr.bf16.mxu1 %v1518_v0 }
 0x214   :  { %v368_v37 = vpop.f32.mrf.mxu1 }
 0x215   :  { %v449_v39 = vadd.f32 %v448_v33, %v368_v37 }
 0x216   :  { %v1186_v40 = vpop.f32.mrf.mxu1 }
 0x217   :  { %v462_v41 = vadd.f32 %v1068_v38, %v449_v39 }
 0x218   :  { %v371_v42 = vpop.f32.mrf.mxu1 }
 0x219   :  { %v452_v43 = vadd.f32 %v451_v35, %v371_v42  ;;  %v466_v44 = vsel %vm224_vm1, %v462_v41, 0.0 }
 0x21a   :  { %v1187_v45 = vpop.f32.mrf.mxu1  ;;  %467 = vadd.xlane.f32.xlu0 %v466_v44 }
 0x21b   :  { %v463_v46 = vadd.f32 %v1068_v38, %v452_v43 }
 0x21d   :  { %v469_v47 = vsel %vm224_vm1, %v463_v46, 0.0 }
 0x21e   :  { %470 = vadd.xlane.f32.xlu0 %v469_v47 }
 0x2a3   :  { %v468_v48 = vpop.xlane.xlu0 %467 }
 0x2a4   :  { %v473_v49 = vmul.f32 0.010416667, %v468_v48 }
 0x2a6   :  { %v475_v50 = vsub.f32 %v462_v41, %v473_v49  ;;  %v1089_v41 = vld [vmem:[#allocation9] ss:$0 sm:$0xff] }
 0x2a7   :  { %v471_v51 = vpop.xlane.xlu0 %470 }
 0x2a8   :  { %v474_v52 = vmul.f32 0.010416667, %v471_v51  ;;  %v477_v53 = vmul.f32 %v475_v50, %v475_v50 }
 0x2aa   :  { %v476_v54 = vsub.f32 %v463_v46, %v474_v52  ;;  %v479_v55 = vsel %vm224_vm1, %v477_v53, 0.0 }
 0x2ab   :  { %480 = vadd.xlane.f32.xlu1 %v479_v55 }
 0x2ac   :  { %v478_v56 = vmul.f32 %v476_v54, %v476_v54 }
 0x2ae   :  { %v482_v57 = vsel %vm224_vm1, %v478_v56, 0.0 }
 0x2af   :  { %483 = vadd.xlane.f32.xlu1 %v482_v57 }
 0x334   :  { %v481_v1 = vpop.xlane.xlu1 %480 }
 0x335   :  { %v485_v2 = vmul.f32 0.010416667, %v481_v1 }
 0x337   :  { %v487_v3 = vadd.f32 1e-12, %v485_v2 }
 0x338   :  { %v484_v4 = vpop.xlane.xlu1 %483 }
 0x339   :  { %1320 = vrsqrt.f32 %v487_v3  ;;  %v486_v5 = vmul.f32 0.010416667, %v484_v4 }
 0x33b   :  { %v488_v6 = vadd.f32 1e-12, %v486_v5 }
 0x33d   :  { %1322 = vrsqrt.f32 %v488_v6 }
 0x346   :  { %v1321_v7 = vpop.eup %1320 }
 0x347   :  { %v491_v8 = vmul.f32 %v1321_v7, %v475_v50 }
 0x349   :  { %v499_v12 = vmul.f32 %v1069_v9, %v491_v8 }
 0x34a   :  { %v1323_v10 = vpop.eup %1322 }
 0x34b   :  { %v492_v11 = vmul.f32 %v1323_v10, %v476_v54  ;;  %v507_v15 = vadd.f32 %v1070_v13, %v499_v12 }
 0x34d   :  { %v500_v14 = vmul.f32 %v1069_v9, %v492_v11 }
 0x34f   :  { %v508_v16 = vadd.f32 %v1070_v13, %v500_v14 }
 0x351   :  { %v521_v18 = vpack.c.bf16 %v508_v16, %v507_v15 }
 0x353   :  { %1217 = vmatmul.mubr.msk.bf16.vlgmr.msra.gmra.mxu1 %vm224_vm1, %v521_v18 }
 0x354   :  { %1237 = vmatpush3.bf16.msra.mxu1 %v1302_v17  ;;  %1248 = vmatprep.mubr.msk.bf16.mxu1 %vm1519_vm0, %v1518_v0 }
 0x355   :  { %1238 = vmatprep.subr.bf16.mxu1 %v1518_v0 }
 0x358   :  { %1239 = vmatpush3.bf16.msra.mxu1 %v1303_v19 }
 0x359   :  { %1240 = vmatprep.subr.bf16.mxu1 %v1518_v0 }
 0x35c   :  { %1241 = vmatpush3.bf16.msra.mxu1 %v1304_v20 }
 0x35d   :  { %1242 = vmatprep.subr.bf16.mxu1 %v1518_v0 }
 0x360   :  { %1243 = vmatpush3.bf16.msra.mxu1 %v1305_v21 }
 0x361   :  { %1244 = vmatprep.subr.bf16.mxu1 %v1518_v0 }
 0x364   :  { %1245 = vmatpush3.bf16.msra.mxu1 %v1306_v22 }
 0x365   :  { %1246 = vmatprep.subr.bf16.mxu1 %v1518_v0 }
 0x368   :  { %1247 = vmatpush3.bf16.msra.mxu1 %v1307_v23 }
 0x36b   :  { %1249 = vmatmul.mubr.msk.bf16.vlgmr.msra.gmra.mxu1 %vm224_vm1, %v521_v18 }
 0x413   :  { %v602_v25 = vpop.f32.mrf.mxu1 }
 0x414   :  { %v603_v26 = vadd.f32 %v1071_v24, %v602_v25 }
 0x415   :  { %v1218_v27 = vpop.f32.mrf.mxu1 }
 0x416   :  { %v611_v28 = vmul.f32 0.044715, %v603_v26  ;;  %v609_v47 = vmul.f32 0.5, %v603_v26 }
 0x417   :  { %v605_v29 = vpop.f32.mrf.mxu1 }
 0x418   :  { %v606_v30 = vadd.f32 %v1071_v24, %v605_v29  ;;  %v613_v31 = vmul.f32 %v611_v28, %v603_v26 }
 0x419   :  { %v1219_v32 = vpop.f32.mrf.mxu1 }
 0x41a   :  { %v612_v33 = vmul.f32 0.044715, %v606_v30  ;;  %v615_v34 = vmul.f32 %v613_v31, %v603_v26  ;;  %v610_v55 = vmul.f32 0.5, %v606_v30 }
 0x41c   :  { %v617_v35 = vadd.f32 %v615_v34, %v603_v26  ;;  %v614_v36 = vmul.f32 %v612_v33, %v606_v30  ;;  %v1308_v26 = vld [vmem:[%s1919_s13 + $0x28] sm:$0xff]  }
 0x41d   :  { %1221 = vmatpush3.bf16.msra.mxu0 %v1308_v26 }
 0x41e   :  { %v619_v37 = vmul.f32 0.7978846, %v617_v35  ;;  %v616_v38 = vmul.f32 %v614_v36, %v606_v30  ;;  %1222 = vmatprep.subr.bf16.mxu0 %v1518_v0  ;;  %v1310_v35 = vld [vmem:[%s1919_s13 + $0x18] sm:$0xff]  }
 0x420   :  { %1324 = vtanh.f32 %v619_v37  ;;  %v618_v39 = vadd.f32 %v616_v38, %v606_v30  ;;  %v1309_v30 = vld [vmem:[%s1919_s13 + $0x20] sm:$0xff]   ;;  %v1311_v38 = vld [vmem:[%s1919_s13 + $0x10] sm:$0xff]  }
 0x421   :  { %1223 = vmatpush3.bf16.msra.mxu0 %v1309_v30 }
 0x422   :  { %v620_v40 = vmul.f32 0.7978846, %v618_v39  ;;  %1224 = vmatprep.subr.bf16.mxu0 %v1518_v0  ;;  %v1312_v39 = vld [vmem:[%s1919_s13 + $0x8] sm:$0xff]  }
 0x424   :  { %1326 = vtanh.f32 %v620_v40  ;;  %v1313_v40 = vld [vmem:[%s1919_s13] sm:$0xff]  }
 0x425   :  { %1225 = vmatpush3.bf16.msra.mxu0 %v1310_v35 }
 0x426   :  { %1226 = vmatprep.subr.bf16.mxu0 %v1518_v0 }
 0x429   :  { %1227 = vmatpush3.bf16.msra.mxu0 %v1311_v38 }
 0x42a   :  { %1228 = vmatprep.subr.bf16.mxu0 %v1518_v0 }
 0x42b   :  { %v862_v42 = vpop.f32.mrf.mxu1 }
 0x42c   :  { %v863_v43 = vadd.f32 %v1089_v41, %v862_v42 }
 0x42d   :  { %v1325_v44 = vpop.eup %1324  ;;  %v1250_v45 = vpop.f32.mrf.mxu1  ;;  %1229 = vmatpush3.bf16.msra.mxu0 %v1312_v39 }
 0x42e   :  { %v871_v46 = vmul.f32 0.044715, %v863_v43  ;;  %v623_v48 = vadd.f32 1.0, %v1325_v44  ;;  %v869_v6 = vmul.f32 0.5, %v863_v43  ;;  %1230 = vmatprep.subr.bf16.mxu0 %v1518_v0 }
 0x42f   :  { %v865_v49 = vpop.f32.mrf.mxu1 }
 0x430   :  { %v866_v50 = vadd.f32 %v1089_v41, %v865_v49  ;;  %v625_v51 = vmul.f32 %v623_v48, %v609_v47  ;;  %v873_v52 = vmul.f32 %v871_v46, %v863_v43  ;;  %v1079_v49 = vld [vmem:[#allocation4] ss:$0 sm:$0xff] }
 0x431   :  { %v1327_v53 = vpop.eup %1326  ;;  %v1251_v54 = vpop.f32.mrf.mxu1  ;;  %1231 = vmatpush3.bf16.msra.mxu0 %v1313_v40 }
 0x432   :  { %v872_v56 = vmul.f32 0.044715, %v866_v50  ;;  %v629_v57 = vsel %vm224_vm1, %v625_v51, 0.0  ;;  %v624_v58 = vadd.f32 1.0, %v1327_v53  ;;  %v875_v59 = vmul.f32 %v873_v52, %v863_v43  ;;  %1252 = vmatprep.subr.bf16.mxu0 %v1518_v0  ;;  %v1080_v54 = vld [vmem:[#allocation6] ss:$0 sm:$0xff] }
 0x433   :  { %630 = vadd.xlane.f32.xlu0 %v629_v57  ;;  %v870_v11 = vmul.f32 0.5, %v866_v50 }
 0x434   :  { %v626_v60 = vmul.f32 %v624_v58, %v610_v55  ;;  %v877_v61 = vadd.f32 %v875_v59, %v863_v43  ;;  %v874_v62 = vmul.f32 %v872_v56, %v866_v50 }
 0x436   :  { %v632_v63 = vsel %vm224_vm1, %v626_v60, 0.0  ;;  %v879_v1 = vmul.f32 0.7978846, %v877_v61  ;;  %v876_v2 = vmul.f32 %v874_v62, %v866_v50  ;;  %v1314_v61 = vld [vmem:[%s1925_s19 + $0x28] sm:$0xff]  }
 0x437   :  { %633 = vadd.xlane.f32.xlu1 %v632_v63 }
 0x438   :  { %1328 = vtanh.f32 %v879_v1  ;;  %v878_v3 = vadd.f32 %v876_v2, %v866_v50  ;;  %v1315_v2 = vld [vmem:[%s1925_s19 + $0x20] sm:$0xff]  }
 0x43a   :  { %v880_v4 = vmul.f32 0.7978846, %v878_v3  ;;  %v1316_v3 = vld [vmem:[%s1925_s19 + $0x18] sm:$0xff]  }
 0x43c   :  { %1330 = vtanh.f32 %v880_v4  ;;  %v1317_v4 = vld [vmem:[%s1925_s19 + $0x10] sm:$0xff]  }
 0x445   :  { %v1329_v5 = vpop.eup %1328 }
 0x446   :  { %v883_v7 = vadd.f32 1.0, %v1329_v5 }
 0x448   :  { %v885_v8 = vmul.f32 %v883_v7, %v869_v6  ;;  %v1318_v7 = vld [vmem:[%s1925_s19 + $0x8] sm:$0xff]  }
 0x449   :  { %v1331_v9 = vpop.eup %1330 }
 0x44a   :  { %v889_v10 = vsel %vm224_vm1, %v885_v8, 0.0  ;;  %v884_v12 = vadd.f32 1.0, %v1331_v9 }
 0x44b   :  { %890 = vadd.xlane.f32.xlu0 %v889_v10 }
 0x44c   :  { %v886_v13 = vmul.f32 %v884_v12, %v870_v11  ;;  %v1319_v12 = vld [vmem:[%s1925_s19] sm:$0xff]  }
 0x44e   :  { %v892_v14 = vsel %vm224_vm1, %v886_v13, 0.0 }
 0x44f   :  { %893 = vadd.xlane.f32.xlu1 %v892_v14 }
 0x4bc   :  { %v631_v15 = vpop.xlane.xlu0 %630 }
 0x4bd   :  { %v635_v16 = vmul.f32 0.010416667, %v631_v15 }
 0x4bf   :  { %v637_v17 = vsub.f32 %v625_v51, %v635_v16 }
 0x4c0   :  { %v634_v18 = vpop.xlane.xlu1 %633 }
 0x4c1   :  { %v636_v19 = vmul.f32 0.010416667, %v634_v18  ;;  %v639_v20 = vmul.f32 %v637_v17, %v637_v17  ;;  %v1081_v18 = vld [vmem:[#allocation7] ss:$0 sm:$0xff] }
 0x4c3   :  { %v638_v21 = vsub.f32 %v626_v60, %v636_v19  ;;  %v641_v22 = vsel %vm224_vm1, %v639_v20, 0.0 }
 0x4c4   :  { %642 = vadd.xlane.f32.xlu0 %v641_v22 }
 0x4c5   :  { %v640_v23 = vmul.f32 %v638_v21, %v638_v21 }
 0x4c7   :  { %v644_v24 = vsel %vm224_vm1, %v640_v23, 0.0 }
 0x4c8   :  { %645 = vadd.xlane.f32.xlu1 %v644_v24 }
 0x4d4   :  { %v891_v25 = vpop.xlane.xlu0 %890 }
 0x4d5   :  { %v895_v27 = vmul.f32 0.010416667, %v891_v25 }
 0x4d7   :  { %v1834_v28 = vsub.f32 %v885_v8, %v895_v27  ;;  %v1097_v8 = vld [vmem:[#allocation10] ss:$0 sm:$0xff] }
 0x4d8   :  { %v894_v29 = vpop.xlane.xlu1 %893 }
 0x4d9   :  { %v896_v31 = vmul.f32 0.010416667, %v894_v29  ;;  %v899_v32 = vmul.f32 %v1834_v28, %v1834_v28 }
 0x4db   :  { %v1842_v33 = vsub.f32 %v886_v13, %v896_v31  ;;  %v901_v34 = vsel %vm224_vm1, %v899_v32, 0.0  ;;  %v1098_v13 = vld [vmem:[#allocation12] ss:$0 sm:$0xff] }
 0x4dc   :  { %902 = vadd.xlane.f32.xlu0 %v901_v34 }
 0x4dd   :  { %v900_v36 = vmul.f32 %v1842_v33, %v1842_v33 }
 0x4df   :  { %v904_v37 = vsel %vm224_vm1, %v900_v36, 0.0 }
 0x4e0   :  { %905 = vadd.xlane.f32.xlu1 %v904_v37 }
 0x54d   :  { %v643_v41 = vpop.xlane.xlu0 %642 }
 0x54e   :  { %v647_v42 = vmul.f32 0.010416667, %v643_v41 }
 0x550   :  { %v649_v43 = vadd.f32 1e-12, %v647_v42 }
 0x551   :  { %v646_v44 = vpop.xlane.xlu1 %645 }
 0x552   :  { %1332 = vrsqrt.f32 %v649_v43  ;;  %v648_v45 = vmul.f32 0.010416667, %v646_v44 }
 0x554   :  { %v650_v46 = vadd.f32 1e-12, %v648_v45 }
 0x556   :  { %1334 = vrsqrt.f32 %v650_v46 }
 0x55f   :  { %v1333_v47 = vpop.eup %1332 }
 0x560   :  { %v653_v48 = vmul.f32 %v1333_v47, %v637_v17 }
 0x562   :  { %v661_v52 = vmul.f32 %v1079_v49, %v653_v48 }
 0x563   :  { %v1335_v50 = vpop.eup %1334 }
 0x564   :  { %v654_v51 = vmul.f32 %v1335_v50, %v638_v21  ;;  %v669_v58 = vadd.f32 %v1080_v54, %v661_v52 }
 0x565   :  { %v903_v53 = vpop.xlane.xlu0 %902 }
 0x566   :  { %v907_v55 = vmul.f32 0.010416667, %v903_v53  ;;  %v662_v56 = vmul.f32 %v1079_v49, %v654_v51 }
 0x568   :  { %v909_v57 = vadd.f32 1e-12, %v907_v55  ;;  %v670_v59 = vadd.f32 %v1080_v54, %v662_v56 }
 0x569   :  { %v906_v60 = vpop.xlane.xlu1 %905 }
 0x56a   :  { %1336 = vrsqrt.f32 %v909_v57  ;;  %v908_v62 = vmul.f32 0.010416667, %v906_v60  ;;  %v683_v63 = vpack.c.bf16 %v670_v59, %v669_v58 }
 0x56c   :  { %v910_v1 = vadd.f32 1e-12, %v908_v62  ;;  %1233 = vmatmul.mubr.msk.bf16.vlgmr.msra.gmra.mxu0 %vm224_vm1, %v683_v63 }
 0x56d   :  { %1253 = vmatpush3.bf16.msra.mxu0 %v1314_v61  ;;  %1264 = vmatprep.mubr.msk.bf16.mxu0 %vm1519_vm0, %v1518_v0 }
 0x56e   :  { %1338 = vrsqrt.f32 %v910_v1  ;;  %1254 = vmatprep.subr.bf16.mxu0 %v1518_v0 }
 0x571   :  { %1255 = vmatpush3.bf16.msra.mxu0 %v1315_v2 }
 0x572   :  { %1256 = vmatprep.subr.bf16.mxu0 %v1518_v0 }
 0x575   :  { %1257 = vmatpush3.bf16.msra.mxu0 %v1316_v3 }
 0x576   :  { %1258 = vmatprep.subr.bf16.mxu0 %v1518_v0 }
 0x577   :  { %v1337_v5 = vpop.eup %1336 }
 0x578   :  { %v913_v6 = vmul.f32 %v1337_v5, %v1834_v28 }
 0x579   :  { %1259 = vmatpush3.bf16.msra.mxu0 %v1317_v4 }
 0x57a   :  { %1260 = vmatprep.subr.bf16.mxu0 %v1518_v0  ;;  %v921_v11 = vmul.f32 %v1097_v8, %v913_v6 }
 0x57b   :  { %v1339_v9 = vpop.eup %1338 }
 0x57c   :  { %v914_v10 = vmul.f32 %v1339_v9, %v1842_v33  ;;  %v929_v15 = vadd.f32 %v1098_v13, %v921_v11 }
 0x57d   :  { %1261 = vmatpush3.bf16.msra.mxu0 %v1318_v7 }
 0x57e   :  { %1262 = vmatprep.subr.bf16.mxu0 %v1518_v0  ;;  %v922_v14 = vmul.f32 %v1097_v8, %v914_v10  ;;  %v1099_v0 = vld [vmem:[#allocation13] ss:$0 sm:$0xff] }
 0x580   :  { %v930_v16 = vadd.f32 %v1098_v13, %v922_v14 }
 0x581   :  { %1263 = vmatpush3.bf16.msra.mxu0 %v1319_v12 }
 0x582   :  { %v943_v17 = vpack.c.bf16 %v930_v16, %v929_v15 }
 0x584   :  { %1265 = vmatmul.mubr.msk.bf16.vlgmr.msra.gmra.mxu0 %vm224_vm1, %v943_v17 }
 0x62c   :  { %v764_v19 = vpop.f32.mrf.mxu0 }
 0x62d   :  { %v765_v20 = vadd.f32 %v1081_v18, %v764_v19 }
 0x62e   :  { %v1234_v21 = vpop.f32.mrf.mxu0 }
 0x62f   :  { %771 = vst [vmem:[%s1927_s21] sm:$0xff] %v765_v20 }
 0x630   :  { %v767_v22 = vpop.f32.mrf.mxu0 }
 0x631   :  { %v768_v23 = vadd.f32 %v1081_v18, %v767_v22 }
 0x632   :  { %v1235_v24 = vpop.f32.mrf.mxu0 }
 0x633   :  { %772 = vst [vmem:[%s1927_s21 + $0x8] sm:$0xff] %v768_v23 }
 0x644   :  { %v1024_v25 = vpop.f32.mrf.mxu0 }
 0x645   :  { %v1025_v26 = vadd.f32 %v1099_v0, %v1024_v25 }
 0x646   :  { %v1266_v27 = vpop.f32.mrf.mxu0 }
 0x647   :  { %1031 = vst [vmem:[%s1928_s22] sm:$0xff] %v1025_v26 }
 0x648   :  { %v1027_v28 = vpop.f32.mrf.mxu0 }
 0x649   :  { %v1028_v29 = vadd.f32 %v1099_v0, %v1027_v28 }
 0x64a   :  { %v1267_v30 = vpop.f32.mrf.mxu0 }
 0x64b   :  { %1032 = vst [vmem:[%s1928_s22 + $0x8] sm:$0xff] %v1028_v29 }
 0x64c   :  { %1041 = vsyncpa [#allocation3], 1 }
 0x64d   :  { %1042 = vsyncpa [#allocation5], 1 }
 0x64e   :  { %1043 = vsyncpa [#allocation8], 1 }
 0x64f   :  { %1044 = vsyncpa [#allocation11], 1 }
 0x650   :  { %1045 = vsyncpa [#allocation14], 1 }

// kernel: pygc_forward.3
= control target key start
LH: loop header
LB: loop body
LE: loop exit
PB: predicated region body
PF: predicated region fallthrough
CT: control target
= control target key end

     0   :  { %s4534_s6 = smov 1   ;;  %s4535_s10 = smov 2   ;;  %s5588_s0 = inlined_call_operand.smem [shape: u32[46], index: -1, kind: input, shape index: {}] }
   0x1   :  { %s4597_s5 = sld [smem:[%s5588_s0]]   ;;  %s4536_s14 = smov 3  }
   0x2   :  { %s4602_s9 = sld [smem:[%s5588_s0 + %s4534_s6]]   ;;  %s4537_s18 = smov 4  }
   0x3   :  { %s4607_s13 = sld [smem:[%s5588_s0 + %s4535_s10]]   ;;  %s4538_s22 = smov 5  }
   0x4   :  { %s4612_s17 = sld [smem:[%s5588_s0 + %s4536_s14]]   ;;  %s4539_s26 = smov 6  }
   0x5   :  { %s4617_s21 = sld [smem:[%s5588_s0 + %s4537_s18]]   ;;  %s4540_s30 = smov 7  }
   0x6   :  { %s4622_s25 = sld [smem:[%s5588_s0 + %s4538_s22]]   ;;  %s4541_s4 = smov 8  }
   0x7   :  { %s4627_s29 = sld [smem:[%s5588_s0 + %s4539_s26]]   ;;  %s4542_s10 = smov 9  }
   0x8   :  { %5600 = sst [smem:[#allocation17_spill]] %s4602_s9  ;;  %s4543_s15 = smov 10  }
   0x9   :  { %s4632_s3 = sld [smem:[%s5588_s0 + %s4540_s30]]   ;;  %s4544_s20 = smov 11  }
   0xa   :  { %s4637_s8 = sld [smem:[%s5588_s0 + %s4541_s4]]   ;;  %s4545_s26 = smov 12  }
   0xb   :  { %s4642_s14 = sld [smem:[%s5588_s0 + %s4542_s10]]   ;;  %s4546_s1 = smov 13  }
   0xc   :  { %s4647_s19 = sld [smem:[%s5588_s0 + %s4543_s15]]   ;;  %s4547_s7 = smov 14  }
   0xd   :  { %s4652_s24 = sld [smem:[%s5588_s0 + %s4544_s20]]   ;;  %s4548_s15 = smov 15  }
   0xe   :  { %s4657_s30 = sld [smem:[%s5588_s0 + %s4545_s26]]   ;;  %s4549_s22 = smov 16  }
   0xf   :  { %5601 = sst [smem:[#allocation18_spill]] %s4632_s3  ;;  %s4550_s28 = smov 17  }
  0x10   :  { %s4662_s6 = sld [smem:[%s5588_s0 + %s4546_s1]]  }
  0x11   :  { %5602 = sst [smem:[#allocation19_spill]] %s4642_s14 }
  0x12   :  { %s4667_s12 = sld [smem:[%s5588_s0 + %s4547_s7]]   ;;  %s4551_s7 = smov 18  }
  0x13   :  { %5603 = sst [smem:[#allocation20_spill]] %s4652_s24 }
  0x14   :  { %5604 = sst [smem:[#allocation21_spill]] %s4657_s30 }
  0x15   :  { %s4672_s20 = sld [smem:[%s5588_s0 + %s4548_s15]]   ;;  %s4552_s15 = smov 19  }
  0x16   :  { %5605 = sst [smem:[#allocation22_spill]] %s4662_s6 }
  0x17   :  { %s4677_s27 = sld [smem:[%s5588_s0 + %s4549_s22]]   ;;  %s4553_s22 = smov 20  }
  0x18   :  { %5606 = sst [smem:[#allocation23_spill]] %s4667_s12 }
  0x19   :  { %s4682_s4 = sld [smem:[%s5588_s0 + %s4550_s28]]   ;;  %s4554_s28 = smov 21  }
  0x1a   :  { %s4687_s12 = sld [smem:[%s5588_s0 + %s4551_s7]]   ;;  %s4555_s7 = smov 22  }
  0x1b   :  { %5607 = sst [smem:[#allocation24_spill]] %s4672_s20 }
  0x1c   :  { %s4692_s20 = sld [smem:[%s5588_s0 + %s4552_s15]]   ;;  %s4556_s15 = smov 23  }
  0x1d   :  { %5608 = sst [smem:[#allocation25_spill]] %s4677_s27 }
  0x1e   :  { %s4697_s27 = sld [smem:[%s5588_s0 + %s4553_s22]]   ;;  %s4557_s22 = smov 24  }
  0x1f   :  { %5609 = sst [smem:[#allocation26_spill]] %s4682_s4 }
  0x20   :  { %5610 = sst [smem:[#allocation27_spill]] %s4687_s12 }
  0x21   :  { %s4702_s4 = sld [smem:[%s5588_s0 + %s4554_s28]]   ;;  %s4558_s28 = smov 25  }
  0x22   :  { %5611 = sst [smem:[#allocation28_spill]] %s4692_s20 }
  0x23   :  { %s4707_s12 = sld [smem:[%s5588_s0 + %s4555_s7]]   ;;  %s4559_s7 = smov 26  }
  0x24   :  { %5612 = sst [smem:[#allocation29_spill]] %s4697_s27 }
  0x25   :  { %s4712_s20 = sld [smem:[%s5588_s0 + %s4556_s15]]   ;;  %s4560_s15 = smov 27  }
  0x26   :  { %s4717_s27 = sld [smem:[%s5588_s0 + %s4557_s22]]   ;;  %s4561_s22 = smov 28  }
  0x27   :  { %5613 = sst [smem:[#allocation30_spill]] %s4702_s4 }
  0x28   :  { %s4722_s4 = sld [smem:[%s5588_s0 + %s4558_s28]]   ;;  %s4562_s28 = smov 29  }
  0x29   :  { %5614 = sst [smem:[#allocation31_spill]] %s4707_s12 }
  0x2a   :  { %s4727_s12 = sld [smem:[%s5588_s0 + %s4559_s7]]   ;;  %s4563_s7 = smov 30  }
  0x2b   :  { %5615 = sst [smem:[#allocation32_spill]] %s4712_s20 }
  0x2c   :  { %5616 = sst [smem:[#allocation33_spill]] %s4717_s27 }
  0x2d   :  { %s4732_s20 = sld [smem:[%s5588_s0 + %s4560_s15]]   ;;  %s4564_s15 = smov 31  }
  0x2e   :  { %5617 = sst [smem:[#allocation34_spill]] %s4722_s4 }
  0x2f   :  { %s4737_s27 = sld [smem:[%s5588_s0 + %s4561_s22]]   ;;  %s4565_s22 = smov 32  }
  0x30   :  { %5618 = sst [smem:[#allocation35_spill]] %s4727_s12 }
  0x31   :  { %s4742_s4 = sld [smem:[%s5588_s0 + %s4562_s28]]   ;;  %s4566_s28 = smov 33  }
  0x32   :  { %s4747_s12 = sld [smem:[%s5588_s0 + %s4563_s7]]   ;;  %s4567_s7 = smov 34  }
  0x33   :  { %5619 = sst [smem:[#allocation36_spill]] %s4732_s20 }
  0x34   :  { %s4752_s20 = sld [smem:[%s5588_s0 + %s4564_s15]]   ;;  %s4568_s15 = smov 35  }
  0x35   :  { %5620 = sst [smem:[#allocation37_spill]] %s4737_s27 }
  0x36   :  { %s4757_s27 = sld [smem:[%s5588_s0 + %s4565_s22]]   ;;  %s4569_s22 = smov 36  }
  0x37   :  { %5621 = sst [smem:[#allocation38_spill]] %s4742_s4 }
  0x38   :  { %5622 = sst [smem:[#allocation39_spill]] %s4747_s12 }
  0x39   :  { %s4762_s4 = sld [smem:[%s5588_s0 + %s4566_s28]]   ;;  %s4570_s28 = smov 37  }
  0x3a   :  { %5623 = sst [smem:[#allocation40_spill]] %s4752_s20 }
  0x3b   :  { %s4767_s12 = sld [smem:[%s5588_s0 + %s4567_s7]]   ;;  %s4571_s7 = smov 38  }
  0x3c   :  { %5624 = sst [smem:[#allocation41_spill]] %s4757_s27 }
  0x3d   :  { %s4772_s20 = sld [smem:[%s5588_s0 + %s4568_s15]]   ;;  %s4572_s15 = smov 39  }
  0x3e   :  { %s4777_s27 = sld [smem:[%s5588_s0 + %s4569_s22]]   ;;  %s4573_s22 = smov 40  }
  0x3f   :  { %5625 = sst [smem:[#allocation42_spill]] %s4762_s4 }
  0x40   :  { %s4782_s4 = sld [smem:[%s5588_s0 + %s4570_s28]]   ;;  %s4574_s28 = smov 41  }
  0x41   :  { %5626 = sst [smem:[#allocation43_spill]] %s4767_s12 }
  0x42   :  { %s4787_s12 = sld [smem:[%s5588_s0 + %s4571_s7]]   ;;  %s4575_s7 = smov 42  }
  0x43   :  { %s4792_s6 = sld [smem:[%s5588_s0 + %s4572_s15]]   ;;  %s4576_s15 = smov 43  }
  0x44   :  { %s4797_s30 = sld [smem:[%s5588_s0 + %s4573_s22]]   ;;  %s4577_s22 = smov 44  }
  0x45   :  { %s4802_s9 = sld [smem:[%s5588_s0 + %s4574_s28]]   ;;  %s4578_s28 = smov 45  }
  0x46   :  { %s4812_s24 = sld [smem:[%s5588_s0 + %s4576_s15]]  }
  0x47   :  { %s4817_s3 = sld [smem:[%s5588_s0 + %s4577_s22]]  }
  0x48   :  { %5627 = sst [smem:[#allocation44_spill]] %s4787_s12 }
  0x49   :  { %s4807_s12 = sld [smem:[%s5588_s0 + %s4575_s7]]  }
  0x4a   :  { %s4822_s14 = sld [smem:[%s5588_s0 + %s4578_s28]]  }
  0x4b   :  { %97 = vsyncpa [#allocation3], 0 }
  0x4c   :  { %98 = vsyncpa [#allocation5], 0 }
  0x4d   :  { %99 = vsyncpa [#allocation8], 0 }
  0x4e   :  { %100 = vsyncpa [#allocation11], 0  ;;  %s4579_s7 = smov [#allocation4]   ;;  %s4580_s11 = smov [#allocation7]  }
  0x4f   :  { %s187_s10 = sshll.u32 %s4579_s7, 4  ;;  %s209_s15 = sshll.u32 %s4580_s11, 4  ;;  %s188_s10 = int_to_ptr.vmem [resolvable:$true] %s187_s10  ;;  %s210_s15 = int_to_ptr.vmem [resolvable:$true] %s209_s15 }
  0x50   :  { %s4394_s16 = scalar_lea.vmem %s188_s10, 16  ;;  %s4398_s18 = scalar_lea.vmem %s188_s10, 32 }
  0x51   :  { %p4395_p0 = scmp.ne.s32.totalorder %s188_s10, %s4394_s16  ;;  %p4399_p1 = scmp.lt.s32.totalorder %s188_s10, %s188_s10 }
  0x52   :  { %p4400_p2 = scmp.lt.s32.totalorder %s4398_s18, %s4394_s16 }
  0x54   :  { %p4401_p3 = por %p4400_p2, %p4399_p1 }
  0x56   :  { %p4402_p4 = pnand %p4401_p3, %p4395_p0 }
  0x58   :  { %4405 = shalt.err (!%p4402_p4)
}
  0x59   :  { %190 = dma.hbm_to_vmem [thread:$0]  %s4777_s27, 16, %s188_s10, [#allocation5]  }
  0x5a   :  { %s4414_s0 = scalar_lea.vmem %s210_s15, 16  ;;  %s4418_s22 = scalar_lea.vmem %s210_s15, 32 }
  0x5b   :  { %p4415_p5 = scmp.ne.s32.totalorder %s210_s15, %s4414_s0  ;;  %p4419_p6 = scmp.lt.s32.totalorder %s210_s15, %s210_s15 }
  0x5c   :  { %p4420_p7 = scmp.lt.s32.totalorder %s4418_s22, %s4414_s0 }
  0x5e   :  { %p4421_p8 = por %p4420_p7, %p4419_p6 }
  0x60   :  { %p4422_p9 = pnand %p4421_p8, %p4415_p5 }
  0x62   :  { %4425 = shalt.err (!%p4422_p9)
}
  0x63   :  { %212 = dma.hbm_to_vmem [thread:$0]  %s4792_s6, 16, %s210_s15, [#allocation8]  }
  0x64   :  { %s4581_s23 = smov [#allocation10]   ;;  %s4582_s28 = smov [#allocation2]  }
  0x65   :  { %s229_s26 = sshll.u32 %s4581_s23, 4  ;;  %s177_s1 = sshll.u32 %s4582_s28, 4  ;;  %s230_s26 = int_to_ptr.vmem [resolvable:$true] %s229_s26  ;;  %s178_s1 = int_to_ptr.vmem [resolvable:$true] %s177_s1 }
  0x66   :  { %s4434_s2 = scalar_lea.vmem %s230_s26, 16  ;;  %s4438_s7 = scalar_lea.vmem %s230_s26, 32 }
  0x67   :  { %p4435_p10 = scmp.ne.s32.totalorder %s230_s26, %s4434_s2  ;;  %p4439_p11 = scmp.lt.s32.totalorder %s230_s26, %s230_s26 }
  0x68   :  { %p4440_p12 = scmp.lt.s32.totalorder %s4438_s7, %s4434_s2 }
  0x6a   :  { %p4441_p13 = por %p4440_p12, %p4439_p11 }
  0x6c   :  { %p4442_p0 = pnand %p4441_p13, %p4435_p10 }
  0x6e   :  { %4445 = shalt.err (!%p4442_p0)
}
  0x6f   :  { %232 = dma.hbm_to_vmem [thread:$0]  %s4802_s9, 16, %s230_s26, [#allocation11]  }
  0x70   :  { %s4454_s27 = scalar_lea.vmem %s178_s1, 16  ;;  %s4458_s10 = scalar_lea.vmem %s178_s1, 32 }
  0x71   :  { %p4455_p1 = scmp.ne.s32.totalorder %s178_s1, %s4454_s27  ;;  %p4459_p2 = scmp.lt.s32.totalorder %s178_s1, %s178_s1 }
  0x72   :  { %p4460_p3 = scmp.lt.s32.totalorder %s4458_s10, %s4454_s27 }
  0x74   :  { %p4461_p4 = por %p4460_p3, %p4459_p2 }
  0x76   :  { %p4462_p5 = pnand %p4461_p4, %p4455_p1 }
  0x78   :  { %4465 = shalt.err (!%p4462_p5)
}
  0x79   :  { %180 = dma.hbm_to_vmem [thread:$0]  %s4772_s20, 16, %s178_s1, [#allocation3]  }
  0x7a   :  { %s4583_s6 = smov [#allocation6]   ;;  %s4584_s15 = smov [#allocation9]  }
  0x7b   :  { %s197_s11 = sshll.u32 %s4583_s6, 4  ;;  %s219_s16 = sshll.u32 %s4584_s15, 4  ;;  %s198_s11 = int_to_ptr.vmem [resolvable:$true] %s197_s11  ;;  %s220_s16 = int_to_ptr.vmem [resolvable:$true] %s219_s16 }
  0x7c   :  { %s4474_s18 = scalar_lea.vmem %s198_s11, 16  ;;  %s4478_s0 = scalar_lea.vmem %s198_s11, 32 }
  0x7d   :  { %p4475_p6 = scmp.ne.s32.totalorder %s198_s11, %s4474_s18  ;;  %p4479_p7 = scmp.lt.s32.totalorder %s198_s11, %s198_s11 }
  0x7e   :  { %p4480_p8 = scmp.lt.s32.totalorder %s4478_s0, %s4474_s18 }
  0x80   :  { %p4481_p9 = por %p4480_p8, %p4479_p7 }
  0x82   :  { %p4482_p10 = pnand %p4481_p9, %p4475_p6 }
  0x84   :  { %4485 = shalt.err (!%p4482_p10)
}
  0x85   :  { %200 = dma.hbm_to_vmem [thread:$0]  %s4782_s4, 16, %s198_s11, [#allocation5]  }
  0x86   :  { %s4494_s9 = scalar_lea.vmem %s220_s16, 16  ;;  %s4498_s22 = scalar_lea.vmem %s220_s16, 32 }
  0x87   :  { %p4495_p11 = scmp.ne.s32.totalorder %s220_s16, %s4494_s9  ;;  %p4499_p12 = scmp.lt.s32.totalorder %s220_s16, %s220_s16 }
  0x88   :  { %p4500_p13 = scmp.lt.s32.totalorder %s4498_s22, %s4494_s9 }
  0x8a   :  { %p4501_p0 = por %p4500_p13, %p4499_p12 }
  0x8c   :  { %p4502_p1 = pnand %p4501_p0, %p4495_p11 }
  0x8e   :  { %4505 = shalt.err (!%p4502_p1)
}
  0x8f   :  { %222 = dma.hbm_to_vmem [thread:$0]  %s4797_s30, 16, %s220_s16, [#allocation8]  }
  0x90   :  { %s4585_s20 = smov [#allocation12]  }
  0x91   :  { %s241_s23 = sshll.u32 %s4585_s20, 4  ;;  %s242_s23 = int_to_ptr.vmem [resolvable:$true] %s241_s23 }
  0x92   :  { %s4514_s26 = scalar_lea.vmem %s242_s23, 16  ;;  %s4518_s28 = scalar_lea.vmem %s242_s23, 32 }
  0x93   :  { %p4515_p2 = scmp.ne.s32.totalorder %s242_s23, %s4514_s26  ;;  %p4519_p3 = scmp.lt.s32.totalorder %s242_s23, %s242_s23 }
  0x94   :  { %p4520_p4 = scmp.lt.s32.totalorder %s4518_s28, %s4514_s26 }
  0x96   :  { %p4521_p5 = por %p4520_p4, %p4519_p3 }
  0x98   :  { %p4522_p6 = pnand %p4521_p5, %p4515_p2 }
  0x9a   :  { %4525 = shalt.err (!%p4522_p6)
}
  0x9b   :  { %244 = dma.hbm_to_vmem [thread:$0]  %s4812_s24, 16, %s242_s23, [#allocation11]  }
  0x9c   :  { %4526 = dma.done.wait [#allocation3], 16  }
  0x9d   :  { %4527 = vsyncadd [#allocation3], 4294967280 }
  0x9e   :  { %4528 = dma.done.wait [#allocation5], 32  }
  0x9f   :  { %4529 = vsyncadd [#allocation5], 4294967264 }
  0xa0   :  { %4530 = dma.done.wait [#allocation8], 32  }
  0xa1   :  { %4531 = vsyncadd [#allocation8], 4294967264 }
  0xa2   :  { %4532 = dma.done.wait [#allocation11], 32  }
  0xa3   :  { %4533 = vsyncadd [#allocation11], 4294967264  ;;  %vm284_vm0 = vcmask 130048   ;;  %v267_v0 = vld [vmem:[%s4597_s5] sm:$0xff]  ;;  %v269_v1 = vld [vmem:[%s4597_s5 + $0x10] sm:$0xff]  ;;  %v4586_v36 = vmov 0.0  }
  0xa4   :  { %v268_v2 = vld [vmem:[%s4597_s5 + $0x8] sm:$0xff]  ;;  %v285_v3 = vsel %vm284_vm0, %v267_v0, 0.0  ;;  %v291_v4 = vsel %vm284_vm0, %v269_v1, 0.0  ;;  %v270_v6 = vld [vmem:[%s4597_s5 + $0x18] sm:$0xff]  ;;  %v271_v7 = vld [vmem:[%s4597_s5 + $0x20] sm:$0xff]  ;;  %3710 = vmatprep.subr.bf16.mxu0 %v4586_v36  ;;  %vm4587_vm1 = vmmov 0   ;;  %4122 = vmatprep.subr.bf16.mxu1 %v4586_v36 }
  0xa5   :  { %v288_v5 = vsel %vm284_vm0, %v268_v2, 0.0  ;;  %286 = vadd.xlane.f32.xlu0 %v285_v3  ;;  %292 = vadd.xlane.f32.xlu1 %v291_v4  ;;  %v294_v8 = vsel %vm284_vm0, %v270_v6, 0.0  ;;  %v297_v9 = vsel %vm284_vm0, %v271_v7, 0.0  ;;  %v4179_v35 = vld [vmem:[%s4617_s21] sm:$0xff]   ;;  %vm481_vm2 = vcmask 261120   ;;  %s5628_s5 = sld [smem:[#allocation19_spill]] }
  0xa6   :  { %3712 = vmatprep.mubr.msk.bf16.mxu0 %vm4587_vm1, %v4586_v36  ;;  %3711 = vmatpush3.bf16.msra.mxu0 %v4179_v35  ;;  %v3445_v54 = vld [vmem:[%s4607_s13] ss:$0 sm:$0xff]  ;;  %s5629_s13 = sld [smem:[#allocation18_spill]]  ;;  %vm882_vm3 = vcmask 1043456   ;;  %vm811_vm4 = vcmask 326656   ;;  %vm1607_vm5 = vcmask 523264  }
  0xa7   :  { %4123 = vmatpush3.bf16.msra.mxu1 %v4179_v35  ;;  %3716 = vmatprep.mubr.msk.bf16.mxu1 %vm4587_vm1, %v4586_v36  ;;  %v3446_v60 = vld [vmem:[%s4612_s17] ss:$0 sm:$0xff]  ;;  %s5630_s17 = sld [smem:[#allocation20_spill]] }
  0xa8   :  { %3724 = vmatprep.subr.bf16.mxu1 %v4586_v36  ;;  %3740 = vmatprep.subr.bf16.mxu0 %v4586_v36  ;;  %s5631_s21 = sld [smem:[#allocation17_spill]] }
  0xa9   :  { %289 = vadd.xlane.f32.xlu0 %v288_v5  ;;  %295 = vadd.xlane.f32.xlu1 %v294_v8  ;;  %s5635_s24 = sld [smem:[#allocation23_spill]] }
  0xaa   :  { %s5636_s30 = sld [smem:[#allocation24_spill]] }
  0xab   :  { %s5637_s4 = sld [smem:[#allocation27_spill]] }
  0xac   :  { %s5638_s1 = sld [smem:[#allocation26_spill]] }
  0xad   :  { %298 = vadd.xlane.f32.xlu0 %v297_v9  ;;  %s5639_s2 = sld [smem:[#allocation28_spill]] }
  0xae   :  { %s5640_s7 = sld [smem:[#allocation31_spill]] }
  0xaf   :  { %s5641_s27 = sld [smem:[#allocation33_spill]] }
  0xb0   :  { %s5642_s10 = sld [smem:[#allocation29_spill]] }
  0xb1   :  { %s5643_s6 = sld [smem:[#allocation30_spill]] }
  0xb2   :  { %s5644_s11 = sld [smem:[#allocation35_spill]] }
  0xb3   :  { %s5645_s15 = sld [smem:[#allocation34_spill]] }
  0xb4   :  { %s5646_s16 = sld [smem:[#allocation32_spill]] }
  0xb5   :  { %s5647_s18 = sld [smem:[#allocation36_spill]] }
  0xb6   :  { %s5648_s0 = sld [smem:[#allocation37_spill]] }
  0xb7   :  { %s5649_s9 = sld [smem:[#allocation38_spill]] }
  0xb8   :  { %s5650_s22 = sld [smem:[#allocation41_spill]] }
  0xb9   :  { %s5651_s20 = sld [smem:[#allocation39_spill]] }
  0xba   :  { %s5652_s23 = sld [smem:[#allocation40_spill]] }
  0xbb   :  { %s5653_s26 = sld [smem:[#allocation43_spill]] }
  0xbc   :  { %s5654_s28 = sld [smem:[#allocation42_spill]] }
 0x12e   :  { %v287_v10 = vpop.xlane.xlu0 %286  ;;  %v293_v11 = vpop.xlane.xlu1 %292 }
 0x12f   :  { %v301_v12 = vmul.f32 0.0625, %v287_v10  ;;  %v303_v13 = vmul.f32 0.0625, %v293_v11 }
 0x131   :  { %v306_v14 = vsub.f32 %v267_v0, %v301_v12  ;;  %v4841_v15 = vsub.f32 %v269_v1, %v303_v13  ;;  %v4180_v13 = vld [vmem:[%s4627_s29 + $0x8] sm:$0xff]  }
 0x132   :  { %v290_v16 = vpop.xlane.xlu0 %289  ;;  %v296_v17 = vpop.xlane.xlu1 %295 }
 0x133   :  { %v302_v18 = vmul.f32 0.0625, %v290_v16  ;;  %v304_v19 = vmul.f32 0.0625, %v296_v17  ;;  %v311_v20 = vmul.f32 %v306_v14, %v306_v14  ;;  %v313_v21 = vmul.f32 %v4841_v15, %v4841_v15  ;;  %v4183_v16 = vld [vmem:[%s4637_s8] sm:$0xff]  }
 0x135   :  { %v307_v22 = vsub.f32 %v268_v2, %v302_v18  ;;  %v309_v23 = vsub.f32 %v270_v6, %v304_v19  ;;  %v316_v24 = vsel %vm284_vm0, %v311_v20, 0.0  ;;  %v322_v27 = vsel %vm284_vm0, %v313_v21, 0.0  ;;  %v3447_v18 = vld [vmem:[%s4622_s25] ss:$0 sm:$0xff]  ;;  %s4588_s25 = smov 112  }
 0x136   :  { %317 = vadd.xlane.f32.xlu1 %v316_v24  ;;  %v299_v25 = vpop.xlane.xlu0 %298 }
 0x137   :  { %v305_v26 = vmul.f32 0.0625, %v299_v25  ;;  %v312_v28 = vmul.f32 %v307_v22, %v307_v22  ;;  %v314_v29 = vmul.f32 %v309_v23, %v309_v23 }
 0x139   :  { %v310_v30 = vsub.f32 %v271_v7, %v305_v26  ;;  %v319_v31 = vsel %vm284_vm0, %v312_v28, 0.0  ;;  %v325_v32 = vsel %vm284_vm0, %v314_v29, 0.0 }
 0x13a   :  { %323 = vadd.xlane.f32.xlu1 %v322_v27  ;;  %320 = vadd.xlane.f32.xlu0 %v319_v31  ;;  %v4184_v27 = vld [vmem:[%s4647_s19 + $0x8] sm:$0xff]   ;;  %v4185_v31 = vld [vmem:[%s4647_s19] sm:$0xff]   ;;  %s5634_s19 = sld [smem:[#allocation25_spill]] }
 0x13b   :  { %v315_v33 = vmul.f32 %v310_v30, %v310_v30 }
 0x13d   :  { %v328_v34 = vsel %vm284_vm0, %v315_v33, 0.0 }
 0x13e   :  { %326 = vadd.xlane.f32.xlu0 %v325_v32  ;;  %329 = vadd.xlane.f32.xlu1 %v328_v34 }
 0x1bf   :  { %v318_v37 = vpop.xlane.xlu1 %317 }
 0x1c0   :  { %v331_v38 = vmul.f32 0.0625, %v318_v37 }
 0x1c2   :  { %v336_v39 = vadd.f32 1e-12, %v331_v38 }
 0x1c3   :  { %v324_v40 = vpop.xlane.xlu1 %323  ;;  %v321_v41 = vpop.xlane.xlu0 %320 }
 0x1c4   :  { %4211 = vrsqrt.f32 %v336_v39  ;;  %v333_v42 = vmul.f32 0.0625, %v324_v40  ;;  %v332_v43 = vmul.f32 0.0625, %v321_v41 }
 0x1c6   :  { %v338_v44 = vadd.f32 1e-12, %v333_v42  ;;  %v337_v45 = vadd.f32 1e-12, %v332_v43 }
 0x1c7   :  { %v330_v46 = vpop.xlane.xlu1 %329  ;;  %v327_v47 = vpop.xlane.xlu0 %326 }
 0x1c8   :  { %4213 = vrsqrt.f32 %v338_v44  ;;  %v335_v48 = vmul.f32 0.0625, %v330_v46  ;;  %v334_v49 = vmul.f32 0.0625, %v327_v47 }
 0x1c9   :  { %4215 = vrsqrt.f32 %v337_v45 }
 0x1ca   :  { %v340_v50 = vadd.f32 1e-12, %v335_v48  ;;  %v339_v51 = vadd.f32 1e-12, %v334_v49 }
 0x1cc   :  { %4217 = vrsqrt.f32 %v340_v50 }
 0x1cd   :  { %4219 = vrsqrt.f32 %v339_v51 }
 0x1d1   :  { %v4212_v52 = vpop.eup %4211 }
 0x1d2   :  { %v346_v53 = vmul.f32 %v4212_v52, %v306_v14  ;;  %v4181_v14 = vld [vmem:[%s4637_s8 + $0x8] sm:$0xff]   ;;  %s5633_s8 = sld [smem:[#allocation22_spill]] }
 0x1d4   :  { %v357_v58 = vmul.f32 %v3445_v54, %v346_v53 }
 0x1d5   :  { %v4214_v55 = vpop.eup %4213 }
 0x1d6   :  { %v4216_v56 = vpop.eup %4215  ;;  %v348_v59 = vmul.f32 %v4214_v55, %v4841_v15  ;;  %v368_v0 = vadd.f32 %v3446_v60, %v357_v58  ;;  %v4182_v15 = vld [vmem:[%s4627_s29] sm:$0xff]   ;;  %s5632_s29 = sld [smem:[#allocation21_spill]] }
 0x1d7   :  { %v347_v57 = vmul.f32 %v4216_v56, %v307_v22 }
 0x1d8   :  { %v359_v3 = vmul.f32 %v3445_v54, %v348_v59 }
 0x1d9   :  { %v4218_v61 = vpop.eup %4217  ;;  %v358_v62 = vmul.f32 %v3445_v54, %v347_v57  ;;  %v3458_v57 = vld [vmem:[%s5628_s5] ss:$0 sm:$0xff]  ;;  %s5655_s5 = sld [smem:[#allocation44_spill]] }
 0x1da   :  { %v4220_v63 = vpop.eup %4219  ;;  %v350_v6 = vmul.f32 %v4218_v61, %v310_v30  ;;  %v370_v7 = vadd.f32 %v3446_v60, %v359_v3 }
 0x1db   :  { %v369_v1 = vadd.f32 %v3446_v60, %v358_v62  ;;  %v349_v2 = vmul.f32 %v4220_v63, %v309_v23 }
 0x1dc   :  { %v361_v10 = vmul.f32 %v3445_v54, %v350_v6 }
 0x1dd   :  { %v375_v4 = vpack.c.bf16 %v369_v1, %v368_v0  ;;  %v360_v5 = vmul.f32 %v3445_v54, %v349_v2 }
 0x1de   :  { %v372_v11 = vadd.f32 %v3446_v60, %v361_v10 }
 0x1df   :  { %3713 = vmatmul.mubr.msk.bf16.vlgmr.msra.gmra.mxu0 %vm284_vm0, %v375_v4  ;;  %v371_v8 = vadd.f32 %v3446_v60, %v360_v5 }
 0x1e0   :  { %3744 = vmatprep.mubr.msk.bf16.mxu0 %vm4587_vm1, %v4586_v36  ;;  %v377_v12 = vpack.c.bf16 %v372_v11, %v372_v11  ;;  %3741 = vmatpush3.bf16.msra.mxu0 %v4181_v14 }
 0x1e1   :  { %v376_v9 = vpack.c.bf16 %v371_v8, %v370_v7  ;;  %3742 = vmatprep.subr.bf16.mxu0 %v4586_v36 }
 0x1e3   :  { %3717 = vmatmul.mubr.msk.bf16.vlgmr.msra.gmra.mxu1 %vm284_vm0, %v376_v9 }
 0x1e4   :  { %3720 = vmatprep.mubr.msk.bf16.mxu1 %vm4587_vm1, %v4586_v36  ;;  %3725 = vmatpush3.bf16.msra.mxu1 %v4180_v13 }
 0x1e5   :  { %3726 = vmatprep.subr.bf16.mxu1 %v4586_v36  ;;  %3743 = vmatpush3.bf16.msra.mxu0 %v4183_v16 }
 0x1e6   :  { %3772 = vmatprep.subr.bf16.mxu0 %v4586_v36 }
 0x1e8   :  { %3727 = vmatpush3.bf16.msra.mxu1 %v4182_v15 }
 0x1e9   :  { %3756 = vmatprep.subr.bf16.mxu1 %v4586_v36 }
 0x1eb   :  { %3721 = vmatmul.mubr.msk.bf16.gmra.mxu1 %vm284_vm0, %v377_v12 }
 0x1ec   :  { %3728 = vmatprep.mubr.msk.bf16.mxu1 %vm4587_vm1, %v4586_v36 }
 0x29f   :  { %v433_v17 = vpop.f32.mrf.mxu0 }
 0x2a0   :  { %v4880_v22 = vadd.f32 %v3447_v18, %v433_v17 }
 0x2a1   :  { %v3714_v19 = vpop.f32.mrf.mxu0 }
 0x2a3   :  { %v436_v20 = vpop.f32.mrf.mxu0  ;;  %v441_v21 = vpop.f32.mrf.mxu1 }
 0x2a4   :  { %v4882_v23 = vadd.f32 %v3447_v18, %v436_v20  ;;  %v4897_v33 = vadd.f32 %v3447_v18, %v441_v21  ;;  %v3452_v20 = vld [vmem:[%s5629_s13] ss:$0 sm:$0xff] }
 0x2a5   :  { %v3715_v24 = vpop.f32.mrf.mxu0  ;;  %v3718_v25 = vpop.f32.mrf.mxu1 }
 0x2a6   :  { %v459_v26 = vpack.c.bf16 %v4882_v23, %v4880_v22  ;;  %v3464_v25 = vld [vmem:[%s5630_s17] ss:$0 sm:$0xff] }
 0x2a7   :  { %v444_v28 = vpop.f32.mrf.mxu1 }
 0x2a8   :  { %3729 = vmatmul.mubr.msk.bf16.vlgmr.msra.gmra.mxu1 %vm481_vm2, %v459_v26  ;;  %3745 = vmatmul.mubr.msk.bf16.vlgmr.msra.gmra.mxu0 %vm481_vm2, %v459_v26  ;;  %v4893_v30 = vadd.f32 %v3447_v18, %v444_v28 }
 0x2a9   :  { %v3719_v29 = vpop.f32.mrf.mxu1  ;;  %3732 = vmatprep.mubr.msk.bf16.mxu1 %vm4587_vm1, %v4586_v36  ;;  %3748 = vmatprep.mubr.msk.bf16.mxu0 %vm4587_vm1, %v4586_v36 }
 0x2aa   :  { %3757 = vmatpush3.bf16.msra.mxu1 %v4184_v27  ;;  %v460_v35 = vpack.c.bf16 %v4893_v30, %v4897_v33 }
 0x2ab   :  { %v449_v32 = vpop.f32.mrf.mxu1  ;;  %3758 = vmatprep.subr.bf16.mxu1 %v4586_v36 }
 0x2ac   :  { %v4908_v39 = vadd.f32 %v3447_v18, %v449_v32 }
 0x2ad   :  { %v3722_v34 = vpop.f32.mrf.mxu1 }
 0x2ae   :  { %3759 = vmatpush3.bf16.msra.mxu1 %v4185_v31  ;;  %v461_v40 = vpack.c.bf16 %v4908_v39, %v4908_v39 }
 0x2af   :  { %v452_v37 = vpop.f32.mrf.mxu1  ;;  %3790 = vmatprep.subr.bf16.mxu1 %v4586_v36 }
 0x2b0   :  { %3733 = vmatmul.mubr.msk.bf16.gmra.mxu1 %vm481_vm2, %v460_v35  ;;  %3749 = vmatmul.mubr.msk.bf16.gmra.mxu0 %vm481_vm2, %v460_v35 }
 0x2b1   :  { %v3723_v38 = vpop.f32.mrf.mxu1  ;;  %3736 = vmatprep.mubr.msk.bf16.mxu1 %vm4587_vm1, %v4586_v36  ;;  %3752 = vmatprep.mubr.msk.bf16.mxu0 %vm4587_vm1, %v4586_v36 }
 0x2b8   :  { %3737 = vmatmul.mubr.msk.bf16.gmra.mxu1 %vm481_vm2, %v461_v40  ;;  %3753 = vmatmul.mubr.msk.bf16.gmra.mxu0 %vm481_vm2, %v461_v40 }
 0x2b9   :  { %3760 = vmatprep.mubr.msk.bf16.mxu1 %vm4587_vm1, %v4586_v36  ;;  %3778 = vmatprep.mubr.msk.bf16.mxu0 %vm4587_vm1, %v4586_v36 }
 0x2c0   :  { %3761 = vmatmul.mubr.msk.bf16.vlgmr.msra.gmra.mxu1 %vm481_vm2, %v459_v26 }
 0x2c1   :  { %3764 = vmatprep.mubr.msk.bf16.mxu1 %vm4587_vm1, %v4586_v36 }
 0x2c8   :  { %3765 = vmatmul.mubr.msk.bf16.gmra.mxu1 %vm481_vm2, %v460_v35 }
 0x2c9   :  { %3768 = vmatprep.mubr.msk.bf16.mxu1 %vm4587_vm1, %v4586_v36 }
 0x2d0   :  { %3769 = vmatmul.mubr.msk.bf16.gmra.mxu1 %vm481_vm2, %v461_v40 }
 0x2d1   :  { %3796 = vmatprep.mubr.msk.bf16.mxu1 %vm4587_vm1, %v4586_v36 }
 0x368   :  { %v525_v41 = vpop.f32.mrf.mxu1  ;;  %v604_v42 = vpop.f32.mrf.mxu0 }
 0x369   :  { %v605_v14 = vadd.f32 %v3458_v57, %v604_v42  ;;  %v526_v27 = vadd.f32 %v3452_v20, %v525_v41 }
 0x36a   :  { %v3730_v43 = vpop.f32.mrf.mxu1  ;;  %v3746_v44 = vpop.f32.mrf.mxu0 }
 0x36c   :  { %v528_v45 = vpop.f32.mrf.mxu1  ;;  %v607_v46 = vpop.f32.mrf.mxu0 }
 0x36d   :  { %v608_v11 = vadd.f32 %v3458_v57, %v607_v46  ;;  %v529_v24 = vadd.f32 %v3452_v20, %v528_v45 }
 0x36e   :  { %v3731_v47 = vpop.f32.mrf.mxu1  ;;  %v3747_v48 = vpop.f32.mrf.mxu0 }
 0x36f   :  { %v4942_v16 = vpack.c.bf16 %v608_v11, %v605_v14  ;;  %v4949_v31 = vpack.c.bf16 %v529_v24, %v526_v27 }
 0x370   :  { %v4927_v49 = vpop.f32.mrf.mxu1  ;;  %v612_v50 = vpop.f32.mrf.mxu0 }
 0x371   :  { %v613_v6 = vadd.f32 %v3458_v57, %v612_v50  ;;  %v737_v19 = vsel %vm284_vm0, %v4942_v16, 0  ;;  %v534_v44 = vadd.f32 %v3452_v20, %v4927_v49 }
 0x372   :  { %v3734_v51 = vpop.f32.mrf.mxu1  ;;  %v3750_v52 = vpop.f32.mrf.mxu0 }
 0x373   :  { %v4983_v51 = vld [vmem:[%s5631_s21] sm:$0xff] }
 0x374   :  { %v536_v53 = vpop.f32.mrf.mxu1  ;;  %v615_v54 = vpop.f32.mrf.mxu0 }
 0x375   :  { %v616_v2 = vadd.f32 %v3458_v57, %v615_v54  ;;  %v537_v41 = vadd.f32 %v3452_v20, %v536_v53 }
 0x376   :  { %v3735_v55 = vpop.f32.mrf.mxu1  ;;  %v3751_v56 = vpop.f32.mrf.mxu0 }
 0x377   :  { %v4937_v8 = vpack.c.bf16 %v616_v2, %v613_v6  ;;  %v4964_v46 = vpack.c.bf16 %v537_v41, %v534_v44  ;;  %v4987_v56 = vld [vmem:[%s5631_s21 + $0x8] sm:$0xff] }
 0x378   :  { %v4930_v58 = vpop.f32.mrf.mxu1  ;;  %v620_v59 = vpop.f32.mrf.mxu0 }
 0x379   :  { %v621_v60 = vadd.f32 %v3458_v57, %v620_v59  ;;  %v740_v12 = vsel %vm284_vm0, %v4937_v8, 0  ;;  %v542_v48 = vadd.f32 %v3452_v20, %v4930_v58 }
 0x37a   :  { %v3738_v61 = vpop.f32.mrf.mxu1  ;;  %v3754_v62 = vpop.f32.mrf.mxu0 }
 0x37b   :  { %v4932_v63 = vpack.c.bf16 %v621_v60, %v621_v60  ;;  %v4976_v49 = vpack.c.bf16 %v542_v48, %v542_v48  ;;  %v4992_v62 = vld [vmem:[%s5631_s21 + $0x10] sm:$0xff] }
 0x37c   :  { %v544_v0 = vpop.f32.mrf.mxu1  ;;  %v623_v1 = vpop.f32.mrf.mxu0 }
 0x37d   :  { %v743_v3 = vsel %vm284_vm0, %v4932_v63, 0 }
 0x37e   :  { %v3739_v4 = vpop.f32.mrf.mxu1  ;;  %v3755_v5 = vpop.f32.mrf.mxu0  ;;  %3773 = vmatpush3.bf16.xpose.msra.mxu0 %v743_v3 }
 0x37f   :  { %3774 = vmatprep.subr.bf16.mxu0 %v4586_v36  ;;  %v4997_v5 = vld [vmem:[%s5631_s21 + $0x18] sm:$0xff] }
 0x380   :  { %v683_v7 = vpop.f32.mrf.mxu1 }
 0x381   :  { %v684_v45 = vadd.f32 %v3464_v25, %v683_v7 }
 0x382   :  { %v3762_v9 = vpop.f32.mrf.mxu1 }
 0x384   :  { %v686_v10 = vpop.f32.mrf.mxu1 }
 0x385   :  { %v687_v42 = vadd.f32 %v3464_v25, %v686_v10 }
 0x386   :  { %v3763_v13 = vpop.f32.mrf.mxu1  ;;  %3775 = vmatpush3.bf16.xpose.msra.mxu0 %v740_v12  ;;  %v5002_v12 = vld [vmem:[%s5631_s21 + $0x20] sm:$0xff] }
 0x387   :  { %3776 = vmatprep.subr.bf16.mxu0 %v4586_v36  ;;  %v4967_v47 = vpack.c.bf16 %v687_v42, %v684_v45 }
 0x388   :  { %v691_v15 = vpop.f32.mrf.mxu1 }
 0x389   :  { %v692_v38 = vadd.f32 %v3464_v25, %v691_v15 }
 0x38a   :  { %v3766_v17 = vpop.f32.mrf.mxu1 }
 0x38c   :  { %v694_v18 = vpop.f32.mrf.mxu1 }
 0x38d   :  { %v695_v34 = vadd.f32 %v3464_v25, %v694_v18 }
 0x38e   :  { %v3767_v21 = vpop.f32.mrf.mxu1  ;;  %3777 = vmatpush3.bf16.xpose.msra.mxu0 %v737_v19 }
 0x38f   :  { %3808 = vmatprep.subr.bf16.mxu0 %v4586_v36  ;;  %v4960_v43 = vpack.c.bf16 %v695_v34, %v692_v38 }
 0x390   :  { %v699_v26 = vpop.f32.mrf.mxu1 }
 0x391   :  { %v700_v28 = vadd.f32 %v3464_v25, %v699_v26 }
 0x392   :  { %v3770_v29 = vpop.f32.mrf.mxu1 }
 0x393   :  { %v4951_v32 = vpack.c.bf16 %v700_v28, %v700_v28 }
 0x394   :  { %v702_v35 = vpop.f32.mrf.mxu1 }
 0x395   :  { %v884_v37 = vsel %vm882_vm3, %v4951_v32, 0  ;;  %3779 = vmatmul.mubr.msk.bf16.vlgmr.msra.gmra.mxu0 %vm284_vm0, %v4949_v31 }
 0x396   :  { %v3771_v40 = vpop.f32.mrf.mxu1  ;;  %3791 = vmatpush3.bf16.msra.mxu1 %v884_v37  ;;  %3782 = vmatprep.mubr.msk.bf16.mxu0 %vm4587_vm1, %v4586_v36 }
 0x397   :  { %3792 = vmatprep.subr.bf16.mxu1 %v4586_v36 }
 0x39a   :  { %3793 = vmatpush3.bf16.msra.mxu1 %v4960_v43 }
 0x39b   :  { %3794 = vmatprep.subr.bf16.mxu1 %v4586_v36 }
 0x39d   :  { %3783 = vmatmul.mubr.msk.bf16.gmra.mxu0 %vm284_vm0, %v4964_v46 }
 0x39e   :  { %3795 = vmatpush3.bf16.msra.mxu1 %v4967_v47  ;;  %3786 = vmatprep.mubr.msk.bf16.mxu0 %vm4587_vm1, %v4586_v36 }
 0x39f   :  { %3822 = vmatprep.subr.bf16.mxu1 %v4586_v36 }
 0x3a5   :  { %3787 = vmatmul.mubr.msk.bf16.gmra.mxu0 %vm284_vm0, %v4976_v49 }
 0x3a6   :  { %3810 = vmatprep.mubr.msk.bf16.mxu0 %vm4587_vm1, %v4586_v36 }
 0x455   :  { %v779_v50 = vpop.f32.mrf.mxu0 }
 0x456   :  { %v801_v52 = vmul.f32 0.25, %v779_v50 }
 0x457   :  { %v3780_v53 = vpop.f32.mrf.mxu0 }
 0x458   :  { %v806_v54 = vadd.f32 %v801_v52, %v4983_v51 }
 0x459   :  { %v782_v55 = vpop.f32.mrf.mxu0 }
 0x45a   :  { %v802_v57 = vmul.f32 0.25, %v782_v55  ;;  %v812_v58 = vsel %vm811_vm4, %v806_v54, -inf }
 0x45b   :  { %813 = vmax.xlane.f32.xlu0 %v812_v58  ;;  %v3781_v59 = vpop.f32.mrf.mxu0 }
 0x45c   :  { %v807_v60 = vadd.f32 %v802_v57, %v4987_v56 }
 0x45d   :  { %v787_v61 = vpop.f32.mrf.mxu0 }
 0x45e   :  { %v803_v0 = vmul.f32 0.25, %v787_v61  ;;  %v815_v1 = vsel %vm811_vm4, %v807_v60, -inf }
 0x45f   :  { %816 = vmax.xlane.f32.xlu1 %v815_v1  ;;  %v3784_v2 = vpop.f32.mrf.mxu0 }
 0x460   :  { %v808_v3 = vadd.f32 %v803_v0, %v4992_v62 }
 0x461   :  { %v790_v4 = vpop.f32.mrf.mxu0 }
 0x462   :  { %v804_v6 = vmul.f32 0.25, %v790_v4  ;;  %v818_v7 = vsel %vm811_vm4, %v808_v3, -inf }
 0x463   :  { %819 = vmax.xlane.f32.xlu0 %v818_v7  ;;  %v3785_v9 = vpop.f32.mrf.mxu0 }
 0x464   :  { %v809_v10 = vadd.f32 %v804_v6, %v4997_v5 }
 0x465   :  { %v795_v11 = vpop.f32.mrf.mxu0 }
 0x466   :  { %v805_v13 = vmul.f32 0.25, %v795_v11  ;;  %v821_v14 = vsel %vm811_vm4, %v809_v10, -inf }
 0x467   :  { %822 = vmax.xlane.f32.xlu1 %v821_v14  ;;  %v3788_v15 = vpop.f32.mrf.mxu0 }
 0x468   :  { %v810_v17 = vadd.f32 %v805_v13, %v5002_v12 }
 0x469   :  { %v798_v18 = vpop.f32.mrf.mxu0 }
 0x46a   :  { %v824_v19 = vsel %vm811_vm4, %v810_v17, -inf }
 0x46b   :  { %825 = vmax.xlane.f32.xlu0 %v824_v19  ;;  %v3789_v20 = vpop.f32.mrf.mxu0 }
 0x4e4   :  { %v814_v21 = vpop.xlane.xlu0 %813 }
 0x4e5   :  { %v827_v24 = vsub.f32 %v806_v54, %v814_v21  ;;  %v4186_v21 = vld [vmem:[%s5632_s29] sm:$0xff]  }
 0x4e6   :  { %3809 = vmatpush3.bf16.msra.mxu0 %v4186_v21 }
 0x4e7   :  { %v832_v25 = vmul.f32 1.442695, %v827_v24  ;;  %3840 = vmatprep.subr.bf16.mxu0 %v4586_v36 }
 0x4e8   :  { %v817_v26 = vpop.xlane.xlu1 %816 }
 0x4e9   :  { %4221 = vpow2.f32 %v832_v25  ;;  %v828_v27 = vsub.f32 %v807_v60, %v817_v26 }
 0x4eb   :  { %v834_v28 = vmul.f32 1.442695, %v828_v27 }
 0x4ec   :  { %v820_v29 = vpop.xlane.xlu0 %819 }
 0x4ed   :  { %4223 = vpow2.f32 %v834_v28  ;;  %v829_v34 = vsub.f32 %v808_v3, %v820_v29 }
 0x4ef   :  { %v836_v35 = vmul.f32 1.442695, %v829_v34 }
 0x4f0   :  { %v823_v37 = vpop.xlane.xlu1 %822 }
 0x4f1   :  { %4225 = vpow2.f32 %v836_v35  ;;  %v830_v38 = vsub.f32 %v809_v10, %v823_v37 }
 0x4f3   :  { %v838_v40 = vmul.f32 1.442695, %v830_v38 }
 0x4f4   :  { %v826_v54 = vpop.xlane.xlu0 %825 }
 0x4f5   :  { %4227 = vpow2.f32 %v838_v40  ;;  %v831_v55 = vsub.f32 %v810_v17, %v826_v54 }
 0x4f6   :  { %v4222_v41 = vpop.eup %4221 }
 0x4f7   :  { %v842_v42 = vsel %vm811_vm4, %v4222_v41, 0.0  ;;  %v840_v57 = vmul.f32 1.442695, %v831_v55 }
 0x4f8   :  { %843 = vadd.xlane.f32.xlu1 %v842_v42 }
 0x4f9   :  { %4229 = vpow2.f32 %v840_v57 }
 0x4fa   :  { %v4224_v44 = vpop.eup %4223 }
 0x4fb   :  { %v845_v45 = vsel %vm811_vm4, %v4224_v44, 0.0 }
 0x4fc   :  { %846 = vadd.xlane.f32.xlu0 %v845_v45 }
 0x4fe   :  { %v4226_v48 = vpop.eup %4225 }
 0x4ff   :  { %v848_v50 = vsel %vm811_vm4, %v4226_v48, 0.0 }
 0x500   :  { %849 = vadd.xlane.f32.xlu1 %v848_v50 }
 0x502   :  { %v4228_v52 = vpop.eup %4227 }
 0x503   :  { %v851_v53 = vsel %vm811_vm4, %v4228_v52, 0.0 }
 0x504   :  { %852 = vadd.xlane.f32.xlu0 %v851_v53 }
 0x506   :  { %v4230_v58 = vpop.eup %4229 }
 0x507   :  { %v854_v59 = vsel %vm811_vm4, %v4230_v58, 0.0 }
 0x511   :  { %1035 = vrot.lane.b32.xlu1 %v4937_v8, %s4588_s25 }
 0x51a   :  { %1037 = vrot.lane.b32.xlu0 %v4932_v63, %s4588_s25 }
 0x51e   :  { %1026 = vrot.lane.b32.xlu0 %v4964_v46, %s4588_s25 }
 0x535   :  { %855 = vadd.xlane.f32.xlu1 %v854_v59 }
 0x546   :  { %1033 = vrot.lane.b32.xlu1 %v4942_v16, %s4588_s25 }
 0x54a   :  { %1024 = vrot.lane.b32.xlu1 %v4949_v31, %s4588_s25 }
 0x54e   :  { %1028 = vrot.lane.b32.xlu1 %v4976_v49, %s4588_s25 }
 0x581   :  { %v844_v63 = vpop.xlane.xlu1 %843 }
 0x582   :  { %4231 = vrcp.f32 %v844_v63 }
 0x585   :  { %v847_v8 = vpop.xlane.xlu0 %846 }
 0x586   :  { %4233 = vrcp.f32 %v847_v8 }
 0x589   :  { %v850_v46 = vpop.xlane.xlu1 %849 }
 0x58a   :  { %4235 = vrcp.f32 %v850_v46 }
 0x58d   :  { %v853_v60 = vpop.xlane.xlu0 %852  ;;  %v1036_v9 = vpop.permute.xlu1 %1035 }
 0x58e   :  { %4237 = vrcp.f32 %v853_v60  ;;  %v1052_v11 = vsel %vm284_vm0, %v1036_v9, 0 }
 0x58f   :  { %v4232_v61 = vpop.eup %4231 }
 0x590   :  { %v862_v1 = vmul.f32 %v4232_v61, %v4222_v41 }
 0x591   :  { %v1038_v3 = vpop.permute.xlu0 %1037 }
 0x592   :  { %v1055_v4 = vsel %vm284_vm0, %v1038_v3, 0 }
 0x593   :  { %v4234_v0 = vpop.eup %4233 }
 0x594   :  { %v863_v2 = vmul.f32 %v4234_v0, %v4224_v44 }
 0x595   :  { %v1027_v24 = vpop.permute.xlu0 %1026 }
 0x596   :  { %v867_v16 = vpack.c.bf16 %v863_v2, %v862_v1 }
 0x597   :  { %v4236_v31 = vpop.eup %4235 }
 0x598   :  { %3797 = vmatmul.mubr.msk.bf16.vlgmr.msra.gmra.mxu1 %vm811_vm4, %v867_v16  ;;  %v864_v6 = vmul.f32 %v4236_v31, %v4226_v48 }
 0x599   :  { %3823 = vmatpush3.bf16.xpose.msra.mxu1 %v1055_v4  ;;  %3800 = vmatprep.mubr.msk.bf16.mxu1 %vm4587_vm1, %v4586_v36 }
 0x59a   :  { %3824 = vmatprep.subr.bf16.mxu1 %v4586_v36 }
 0x59b   :  { %v4238_v49 = vpop.eup %4237 }
 0x59c   :  { %v865_v7 = vmul.f32 %v4238_v49, %v4228_v52 }
 0x59e   :  { %v868_v10 = vpack.c.bf16 %v865_v7, %v864_v6 }
 0x5a0   :  { %3801 = vmatmul.mubr.msk.bf16.gmra.mxu1 %vm811_vm4, %v868_v10 }
 0x5a1   :  { %3825 = vmatpush3.bf16.xpose.msra.mxu1 %v1052_v11  ;;  %3804 = vmatprep.mubr.msk.bf16.mxu1 %vm4587_vm1, %v4586_v36  ;;  %v3470_v11 = vld [vmem:[%s5633_s8] ss:$0 sm:$0xff] }
 0x5a2   :  { %3826 = vmatprep.subr.bf16.mxu1 %v4586_v36 }
 0x5be   :  { %v856_v13 = vpop.xlane.xlu1 %855 }
 0x5bf   :  { %4239 = vrcp.f32 %v856_v13 }
 0x5c2   :  { %v1034_v14 = vpop.permute.xlu1 %1033 }
 0x5c3   :  { %v1049_v15 = vsel %vm284_vm0, %v1034_v14, 0 }
 0x5c4   :  { %3827 = vmatpush3.bf16.xpose.msra.mxu1 %v1049_v15 }
 0x5c5   :  { %3858 = vmatprep.subr.bf16.mxu1 %v4586_v36 }
 0x5c6   :  { %v1025_v20 = vpop.permute.xlu1 %1024 }
 0x5ca   :  { %v1029_v25 = vpop.permute.xlu1 %1028 }
 0x5cc   :  { %v4240_v17 = vpop.eup %4239 }
 0x5cd   :  { %v866_v18 = vmul.f32 %v4240_v17, %v4230_v58  ;;  %v717_v17 = vadd.f32 %v3470_v11, %v4882_v23 }
 0x5cf   :  { %v869_v19 = vpack.c.bf16 %v866_v18, %v866_v18 }
 0x5d1   :  { %3805 = vmatmul.mubr.msk.bf16.gmra.mxu1 %vm811_vm4, %v869_v19 }
 0x5d2   :  { %3828 = vmatprep.mubr.msk.bf16.mxu1 %vm4587_vm1, %v4586_v36 }
 0x5d9   :  { %3829 = vmatmul.mubr.msk.bf16.vlgmr.msra.gmra.mxu1 %vm284_vm0, %v1025_v20  ;;  %v718_v20 = vadd.f32 %v3470_v11, %v4897_v33 }
 0x5da   :  { %3832 = vmatprep.mubr.msk.bf16.mxu1 %vm4587_vm1, %v4586_v36 }
 0x5e1   :  { %3833 = vmatmul.mubr.msk.bf16.gmra.mxu1 %vm284_vm0, %v1027_v24 }
 0x5e2   :  { %3836 = vmatprep.mubr.msk.bf16.mxu1 %vm4587_vm1, %v4586_v36 }
 0x5e9   :  { %3837 = vmatmul.mubr.msk.bf16.gmra.mxu1 %vm284_vm0, %v1029_v25 }
 0x5ea   :  { %3860 = vmatprep.mubr.msk.bf16.mxu1 %vm4587_vm1, %v4586_v36 }
 0x658   :  { %v920_v26 = vpop.f32.mrf.mxu1 }
 0x65a   :  { %v3798_v27 = vpop.f32.mrf.mxu1 }
 0x65c   :  { %v923_v28 = vpop.f32.mrf.mxu1 }
 0x65d   :  { %v942_v29 = vpack.c.bf16 %v923_v28, %v920_v26 }
 0x65e   :  { %v3799_v34 = vpop.f32.mrf.mxu1 }
 0x65f   :  { %3811 = vmatmul.mubr.msk.bf16.vlgmr.msra.gmra.mxu0 %vm284_vm0, %v942_v29 }
 0x660   :  { %v928_v35 = vpop.f32.mrf.mxu1  ;;  %3814 = vmatprep.mubr.msk.bf16.mxu0 %vm4587_vm1, %v4586_v36 }
 0x662   :  { %v3802_v37 = vpop.f32.mrf.mxu1 }
 0x664   :  { %v931_v38 = vpop.f32.mrf.mxu1 }
 0x665   :  { %v943_v40 = vpack.c.bf16 %v931_v38, %v928_v35 }
 0x666   :  { %v3803_v41 = vpop.f32.mrf.mxu1 }
 0x667   :  { %3815 = vmatmul.mubr.msk.bf16.gmra.mxu0 %vm284_vm0, %v943_v40 }
 0x668   :  { %3818 = vmatprep.mubr.msk.bf16.mxu0 %vm4587_vm1, %v4586_v36 }
 0x691   :  { %v936_v42 = vpop.f32.mrf.mxu1 }
 0x692   :  { %v944_v44 = vpack.c.bf16 %v936_v42, %v936_v42 }
 0x693   :  { %v3806_v45 = vpop.f32.mrf.mxu1 }
 0x694   :  { %3819 = vmatmul.mubr.msk.bf16.gmra.mxu0 %vm284_vm0, %v944_v44 }
 0x695   :  { %v939_v48 = vpop.f32.mrf.mxu1  ;;  %3846 = vmatprep.mubr.msk.bf16.mxu0 %vm4587_vm1, %v4586_v36 }
 0x697   :  { %v3807_v50 = vpop.f32.mrf.mxu1 }
 0x699   :  { %v1091_v52 = vpop.f32.mrf.mxu1 }
 0x69a   :  { %v1113_v53 = vmul.f32 0.25, %v1091_v52 }
 0x69b   :  { %v3830_v54 = vpop.f32.mrf.mxu1 }
 0x69c   :  { %v1118_v55 = vadd.f32 %v1113_v53, %v4983_v51 }
 0x69d   :  { %v1094_v57 = vpop.f32.mrf.mxu1 }
 0x69e   :  { %v1114_v58 = vmul.f32 0.25, %v1094_v57  ;;  %v1123_v59 = vsel %vm811_vm4, %v1118_v55, -inf }
 0x69f   :  { %1124 = vmax.xlane.f32.xlu0 %v1123_v59  ;;  %v3831_v63 = vpop.f32.mrf.mxu1  ;;  %v720_v59 = vadd.f32 %v3470_v11, %v4908_v39 }
 0x6a0   :  { %v1119_v8 = vadd.f32 %v1114_v58, %v4987_v56 }
 0x6a1   :  { %v1099_v46 = vpop.f32.mrf.mxu1 }
 0x6a2   :  { %v1115_v60 = vmul.f32 0.25, %v1099_v46  ;;  %v1126_v61 = vsel %vm811_vm4, %v1119_v8, -inf }
 0x6a3   :  { %1127 = vmax.xlane.f32.xlu1 %v1126_v61  ;;  %v3834_v0 = vpop.f32.mrf.mxu1 }
 0x6a4   :  { %v1120_v1 = vadd.f32 %v1115_v60, %v4992_v62 }
 0x6a5   :  { %v1102_v2 = vpop.f32.mrf.mxu1 }
 0x6a6   :  { %v1116_v3 = vmul.f32 0.25, %v1102_v2  ;;  %v1129_v51 = vsel %vm811_vm4, %v1120_v1, -inf }
 0x6a7   :  { %1130 = vmax.xlane.f32.xlu0 %v1129_v51  ;;  %v3835_v16 = vpop.f32.mrf.mxu1 }
 0x6a8   :  { %v1121_v4 = vadd.f32 %v1116_v3, %v4997_v5  ;;  %v716_v5 = vadd.f32 %v3470_v11, %v4880_v22  ;;  %v719_v22 = vadd.f32 %v3470_v11, %v4893_v30 }
 0x6a9   :  { %v1107_v31 = vpop.f32.mrf.mxu1 }
 0x6aa   :  { %v1117_v49 = vmul.f32 0.25, %v1107_v31  ;;  %v1132_v56 = vsel %vm811_vm4, %v1121_v4, -inf }
 0x6ab   :  { %1133 = vmax.xlane.f32.xlu0 %v1132_v56  ;;  %v3838_v6 = vpop.f32.mrf.mxu1 }
 0x6ac   :  { %v5068_v7 = vadd.f32 %v1117_v49, %v5002_v12 }
 0x6ad   :  { %v1110_v9 = vpop.f32.mrf.mxu1 }
 0x6ae   :  { %v1135_v62 = vsel %vm811_vm4, %v5068_v7, -inf }
 0x6af   :  { %1136 = vmax.xlane.f32.xlu0 %v1135_v62  ;;  %v3839_v10 = vpop.f32.mrf.mxu1 }
 0x6b4   :  { %1188 = vrot.lane.b32.xlu1 %v4951_v32, %s4588_s25 }
 0x71f   :  { %v994_v13 = vpop.f32.mrf.mxu0 }
 0x720   :  { %v5076_v14 = vadd.f32 %v994_v13, %v716_v5 }
 0x721   :  { %v3812_v15 = vpop.f32.mrf.mxu0 }
 0x723   :  { %v997_v12 = vpop.f32.mrf.mxu0 }
 0x724   :  { %v5079_v18 = vadd.f32 %v997_v12, %v717_v17 }
 0x725   :  { %v3813_v19 = vpop.f32.mrf.mxu0 }
 0x727   :  { %v1002_v21 = vpop.f32.mrf.mxu0 }
 0x728   :  { %v5082_v24 = vadd.f32 %v1002_v21, %v718_v20  ;;  %v1125_v25 = vpop.xlane.xlu0 %1124  ;;  %v4187_v20 = vld [vmem:[%s5632_s29 + $0x8] sm:$0xff]  }
 0x729   :  { %v1138_v32 = vsub.f32 %v1118_v55, %v1125_v25  ;;  %v3816_v26 = vpop.f32.mrf.mxu0  ;;  %3859 = vmatpush3.bf16.msra.mxu1 %v4187_v20 }
 0x72a   :  { %3888 = vmatprep.subr.bf16.mxu1 %v4586_v36 }
 0x72b   :  { %v1143_v27 = vmul.f32 1.442695, %v1138_v32  ;;  %v1005_v28 = vpop.f32.mrf.mxu0 }
 0x72c   :  { %v5085_v29 = vadd.f32 %v1005_v28, %v719_v22  ;;  %v1128_v34 = vpop.xlane.xlu1 %1127 }
 0x72d   :  { %4241 = vpow2.f32 %v1143_v27  ;;  %v1139_v23 = vsub.f32 %v1119_v8, %v1128_v34  ;;  %v3817_v35 = vpop.f32.mrf.mxu0 }
 0x72f   :  { %v1145_v37 = vmul.f32 1.442695, %v1139_v23 }
 0x730   :  { %v1189_v38 = vpop.permute.xlu1 %1188  ;;  %v1131_v40 = vpop.xlane.xlu0 %1130 }
 0x731   :  { %4243 = vpow2.f32 %v1145_v37  ;;  %v1202_v33 = vsel %vm882_vm3, %v1189_v38, 0  ;;  %v1140_v41 = vsub.f32 %v1120_v1, %v1131_v40 }
 0x732   :  { %3841 = vmatpush3.bf16.msra.mxu0 %v1202_v33 }
 0x733   :  { %v1147_v42 = vmul.f32 1.442695, %v1140_v41  ;;  %3842 = vmatprep.subr.bf16.mxu0 %v4586_v36 }
 0x734   :  { %v1134_v30 = vpop.xlane.xlu0 %1133 }
 0x735   :  { %4245 = vpow2.f32 %v1147_v42  ;;  %v1141_v44 = vsub.f32 %v1121_v4, %v1134_v30 }
 0x737   :  { %v1149_v45 = vmul.f32 1.442695, %v1141_v44 }
 0x738   :  { %v1137_v0 = vpop.xlane.xlu0 %1136 }
 0x739   :  { %4247 = vpow2.f32 %v1149_v45  ;;  %v1142_v1 = vsub.f32 %v5068_v7, %v1137_v0 }
 0x73a   :  { %v4242_v48 = vpop.eup %4241 }
 0x73b   :  { %v1153_v50 = vsel %vm811_vm4, %v4242_v48, 0.0  ;;  %v1151_v2 = vmul.f32 1.442695, %v1142_v1 }
 0x73c   :  { %1154 = vadd.xlane.f32.xlu1 %v1153_v50 }
 0x73d   :  { %4249 = vpow2.f32 %v1151_v2 }
 0x73e   :  { %v4244_v52 = vpop.eup %4243 }
 0x73f   :  { %v1156_v53 = vsel %vm811_vm4, %v4244_v52, 0.0 }
 0x740   :  { %1157 = vadd.xlane.f32.xlu0 %v1156_v53 }
 0x742   :  { %v4246_v54 = vpop.eup %4245 }
 0x743   :  { %v1159_v55 = vsel %vm811_vm4, %v4246_v54, 0.0 }
 0x744   :  { %1160 = vadd.xlane.f32.xlu1 %v1159_v55 }
 0x746   :  { %v4248_v57 = vpop.eup %4247 }
 0x747   :  { %v1162_v58 = vsel %vm811_vm4, %v4248_v57, 0.0 }
 0x748   :  { %1163 = vadd.xlane.f32.xlu0 %v1162_v58 }
 0x74a   :  { %v4250_v3 = vpop.eup %4249 }
 0x74b   :  { %v1165_v39 = vsel %vm811_vm4, %v4250_v3, 0.0 }
 0x754   :  { %v1010_v63 = vpop.f32.mrf.mxu0 }
 0x755   :  { %v5094_v8 = vadd.f32 %v1010_v63, %v720_v59  ;;  %1184 = vrot.lane.b32.xlu1 %v4967_v47, %s4588_s25 }
 0x756   :  { %v3820_v46 = vpop.f32.mrf.mxu0 }
 0x758   :  { %v1013_v60 = vpop.f32.mrf.mxu0 }
 0x75a   :  { %v3821_v61 = vpop.f32.mrf.mxu0 }
 0x75e   :  { %1186 = vrot.lane.b32.xlu0 %v4960_v43, %s4588_s25 }
 0x779   :  { %1166 = vadd.xlane.f32.xlu1 %v1165_v39 }
 0x7c5   :  { %v1155_v51 = vpop.xlane.xlu1 %1154 }
 0x7c6   :  { %4251 = vrcp.f32 %v1155_v51 }
 0x7c9   :  { %v1158_v16 = vpop.xlane.xlu0 %1157 }
 0x7ca   :  { %4253 = vrcp.f32 %v1158_v16 }
 0x7cd   :  { %v1161_v47 = vpop.xlane.xlu1 %1160 }
 0x7ce   :  { %4255 = vrcp.f32 %v1161_v47 }
 0x7d1   :  { %v1164_v4 = vpop.xlane.xlu0 %1163  ;;  %v1185_v7 = vpop.permute.xlu1 %1184 }
 0x7d2   :  { %4257 = vrcp.f32 %v1164_v4 }
 0x7d3   :  { %v4252_v31 = vpop.eup %4251 }
 0x7d4   :  { %v1173_v56 = vmul.f32 %v4252_v31, %v4242_v48 }
 0x7d5   :  { %v1187_v49 = vpop.permute.xlu0 %1186 }
 0x7d6   :  { %3843 = vmatpush3.bf16.msra.mxu0 %v1187_v49 }
 0x7d7   :  { %v4254_v43 = vpop.eup %4253  ;;  %3844 = vmatprep.subr.bf16.mxu0 %v4586_v36 }
 0x7d8   :  { %v1174_v6 = vmul.f32 %v4254_v43, %v4244_v52 }
 0x7da   :  { %v1178_v9 = vpack.c.bf16 %v1174_v6, %v1173_v56  ;;  %3845 = vmatpush3.bf16.msra.mxu0 %v1185_v7 }
 0x7db   :  { %3872 = vmatprep.subr.bf16.mxu0 %v4586_v36  ;;  %v4256_v62 = vpop.eup %4255 }
 0x7dc   :  { %v1175_v11 = vmul.f32 %v4256_v62, %v4246_v54 }
 0x7dd   :  { %3847 = vmatmul.mubr.msk.bf16.vlgmr.msra.gmra.mxu0 %vm811_vm4, %v1178_v9 }
 0x7de   :  { %3850 = vmatprep.mubr.msk.bf16.mxu0 %vm4587_vm1, %v4586_v36 }
 0x7df   :  { %v4258_v10 = vpop.eup %4257 }
 0x7e0   :  { %v1176_v5 = vmul.f32 %v4258_v10, %v4248_v57 }
 0x7e2   :  { %v1179_v13 = vpack.c.bf16 %v1176_v5, %v1175_v11 }
 0x7e5   :  { %3851 = vmatmul.mubr.msk.bf16.gmra.mxu0 %vm811_vm4, %v1179_v13  ;;  %v4188_v13 = vld [vmem:[%s5634_s19 + $0x8] sm:$0xff]  }
 0x7e6   :  { %3854 = vmatprep.mubr.msk.bf16.mxu0 %vm4587_vm1, %v4586_v36  ;;  %3873 = vmatpush3.bf16.msra.mxu0 %v4188_v13 }
 0x7e7   :  { %3874 = vmatprep.subr.bf16.mxu0 %v4586_v36 }
 0x802   :  { %v1167_v15 = vpop.xlane.xlu1 %1166 }
 0x803   :  { %4259 = vrcp.f32 %v1167_v15  ;;  %v4189_v15 = vld [vmem:[%s5634_s19] sm:$0xff]  }
 0x804   :  { %3875 = vmatpush3.bf16.msra.mxu0 %v4189_v15 }
 0x805   :  { %3908 = vmatprep.subr.bf16.mxu0 %v4586_v36 }
 0x810   :  { %v4260_v17 = vpop.eup %4259 }
 0x811   :  { %v1177_v12 = vmul.f32 %v4260_v17, %v4250_v3 }
 0x813   :  { %v1180_v19 = vpack.c.bf16 %v1177_v12, %v1177_v12 }
 0x815   :  { %3855 = vmatmul.mubr.msk.bf16.gmra.mxu0 %vm811_vm4, %v1180_v19 }
 0x816   :  { %3876 = vmatprep.mubr.msk.bf16.mxu0 %vm4587_vm1, %v4586_v36 }
 0x89d   :  { %v1238_v21 = vpop.f32.mrf.mxu0 }
 0x89f   :  { %v3848_v25 = vpop.f32.mrf.mxu0 }
 0x8a1   :  { %v1241_v32 = vpop.f32.mrf.mxu0 }
 0x8a2   :  { %v1260_v26 = vpack.c.bf16 %v1241_v32, %v1238_v21 }
 0x8a3   :  { %v3849_v22 = vpop.f32.mrf.mxu0 }
 0x8a4   :  { %3861 = vmatmul.mubr.msk.bf16.vlgmr.msra.gmra.mxu1 %vm284_vm0, %v1260_v26 }
 0x8a5   :  { %v1246_v27 = vpop.f32.mrf.mxu0  ;;  %3864 = vmatprep.mubr.msk.bf16.mxu1 %vm4587_vm1, %v4586_v36 }
 0x8a7   :  { %v3852_v28 = vpop.f32.mrf.mxu0 }
 0x8a9   :  { %v1249_v34 = vpop.f32.mrf.mxu0 }
 0x8aa   :  { %v1261_v23 = vpack.c.bf16 %v1249_v34, %v1246_v27 }
 0x8ab   :  { %v3853_v35 = vpop.f32.mrf.mxu0 }
 0x8ac   :  { %3865 = vmatmul.mubr.msk.bf16.gmra.mxu1 %vm284_vm0, %v1261_v23 }
 0x8ad   :  { %3868 = vmatprep.mubr.msk.bf16.mxu1 %vm4587_vm1, %v4586_v36 }
 0x8d5   :  { %v1254_v37 = vpop.f32.mrf.mxu0 }
 0x8d6   :  { %v1262_v38 = vpack.c.bf16 %v1254_v37, %v1254_v37 }
 0x8d7   :  { %v3856_v40 = vpop.f32.mrf.mxu0 }
 0x8d8   :  { %3869 = vmatmul.mubr.msk.bf16.gmra.mxu1 %vm284_vm0, %v1262_v38 }
 0x8d9   :  { %v1257_v33 = vpop.f32.mrf.mxu0  ;;  %3896 = vmatprep.mubr.msk.bf16.mxu1 %vm4587_vm1, %v4586_v36 }
 0x8db   :  { %v3857_v41 = vpop.f32.mrf.mxu0 }
 0x964   :  { %v1312_v42 = vpop.f32.mrf.mxu1 }
 0x965   :  { %v1334_v30 = vadd.f32 %v1312_v42, %v5076_v14  ;;  %v3491_v42 = vld [vmem:[%s5635_s24] ss:$0 sm:$0xff] }
 0x966   :  { %v3862_v44 = vpop.f32.mrf.mxu1 }
 0x967   :  { %v1341_v45 = vsel %vm481_vm2, %v1334_v30, 0.0 }
 0x968   :  { %1342 = vadd.xlane.f32.xlu0 %v1341_v45  ;;  %v1315_v48 = vpop.f32.mrf.mxu1 }
 0x969   :  { %v1335_v50 = vadd.f32 %v1315_v48, %v5079_v18  ;;  %v3492_v48 = vld [vmem:[%s5636_s30] ss:$0 sm:$0xff] }
 0x96a   :  { %v3863_v52 = vpop.f32.mrf.mxu1 }
 0x96b   :  { %v1344_v53 = vsel %vm481_vm2, %v1335_v50, 0.0 }
 0x96c   :  { %1345 = vadd.xlane.f32.xlu0 %v1344_v53  ;;  %v1320_v54 = vpop.f32.mrf.mxu1 }
 0x96d   :  { %v1336_v55 = vadd.f32 %v1320_v54, %v5082_v24 }
 0x96e   :  { %v3866_v57 = vpop.f32.mrf.mxu1 }
 0x96f   :  { %v1347_v58 = vsel %vm481_vm2, %v1336_v55, 0.0 }
 0x970   :  { %1348 = vadd.xlane.f32.xlu1 %v1347_v58  ;;  %v1323_v59 = vpop.f32.mrf.mxu1 }
 0x971   :  { %v1337_v14 = vadd.f32 %v1323_v59, %v5085_v29 }
 0x972   :  { %v3867_v63 = vpop.f32.mrf.mxu1 }
 0x973   :  { %v1350_v46 = vsel %vm481_vm2, %v1337_v14, 0.0 }
 0x974   :  { %1351 = vadd.xlane.f32.xlu0 %v1350_v46 }
 0x998   :  { %v1328_v60 = vpop.f32.mrf.mxu1 }
 0x999   :  { %v1338_v18 = vadd.f32 %v1328_v60, %v5094_v8 }
 0x99a   :  { %v3870_v61 = vpop.f32.mrf.mxu1 }
 0x99b   :  { %v1353_v0 = vsel %vm481_vm2, %v1338_v18, 0.0 }
 0x99c   :  { %1354 = vadd.xlane.f32.xlu1 %v1353_v0  ;;  %v1331_v1 = vpop.f32.mrf.mxu1 }
 0x99e   :  { %v3871_v24 = vpop.f32.mrf.mxu1 }
 0x9f1   :  { %v1343_v2 = vpop.xlane.xlu0 %1342 }
 0x9f2   :  { %v1357_v3 = vmul.f32 0.03125, %v1343_v2 }
 0x9f4   :  { %v1362_v39 = vsub.f32 %v1334_v30, %v1357_v3 }
 0x9f5   :  { %v1346_v51 = vpop.xlane.xlu0 %1345 }
 0x9f6   :  { %v1358_v16 = vmul.f32 0.03125, %v1346_v51  ;;  %v1367_v47 = vmul.f32 %v1362_v39, %v1362_v39 }
 0x9f8   :  { %v1363_v29 = vsub.f32 %v1335_v50, %v1358_v16  ;;  %v1372_v4 = vsel %vm481_vm2, %v1367_v47, 0.0  ;;  %v4190_v16 = vld [vmem:[%s5637_s4 + $0x18] sm:$0xff]   ;;  %v4191_v47 = vld [vmem:[%s5637_s4 + $0x10] sm:$0xff]  }
 0x9f9   :  { %v1349_v31 = vpop.xlane.xlu1 %1348  ;;  %1373 = vadd.xlane.f32.xlu0 %v1372_v4  ;;  %3889 = vmatpush3.bf16.msra.mxu1 %v4190_v16  ;;  %v4193_v4 = vld [vmem:[%s5637_s4] sm:$0xff]  }
 0x9fa   :  { %v1359_v49 = vmul.f32 0.03125, %v1349_v31  ;;  %v1368_v8 = vmul.f32 %v1363_v29, %v1363_v29  ;;  %3890 = vmatprep.subr.bf16.mxu1 %v4586_v36  ;;  %v3493_v31 = vld [vmem:[%s5638_s1] ss:$0 sm:$0xff] }
 0x9fc   :  { %v1364_v43 = vsub.f32 %v1336_v55, %v1359_v49  ;;  %v1375_v56 = vsel %vm481_vm2, %v1368_v8, 0.0 }
 0x9fd   :  { %v1352_v6 = vpop.xlane.xlu0 %1351  ;;  %1376 = vadd.xlane.f32.xlu1 %v1375_v56  ;;  %3891 = vmatpush3.bf16.msra.mxu1 %v4191_v47 }
 0x9fe   :  { %v1360_v7 = vmul.f32 0.03125, %v1352_v6  ;;  %v1369_v9 = vmul.f32 %v1364_v43, %v1364_v43  ;;  %3892 = vmatprep.subr.bf16.mxu1 %v4586_v36 }
 0xa00   :  { %v1365_v62 = vsub.f32 %v1337_v14, %v1360_v7  ;;  %v1378_v10 = vsel %vm481_vm2, %v1369_v9, 0.0 }
 0xa01   :  { %1379 = vadd.xlane.f32.xlu0 %v1378_v10 }
 0xa02   :  { %v1370_v11 = vmul.f32 %v1365_v62, %v1365_v62 }
 0xa04   :  { %v1381_v5 = vsel %vm481_vm2, %v1370_v11, 0.0 }
 0xa05   :  { %1382 = vadd.xlane.f32.xlu1 %v1381_v5 }
 0xa25   :  { %v1355_v17 = vpop.xlane.xlu1 %1354 }
 0xa26   :  { %v1361_v12 = vmul.f32 0.03125, %v1355_v17 }
 0xa28   :  { %v1366_v19 = vsub.f32 %v1338_v18, %v1361_v12 }
 0xa2a   :  { %v1371_v20 = vmul.f32 %v1366_v19, %v1366_v19 }
 0xa2c   :  { %v1384_v21 = vsel %vm481_vm2, %v1371_v20, 0.0 }
 0xa2d   :  { %1385 = vadd.xlane.f32.xlu0 %v1384_v21 }
 0xa82   :  { %v1374_v25 = vpop.xlane.xlu0 %1373 }
 0xa83   :  { %v1387_v32 = vmul.f32 0.03125, %v1374_v25 }
 0xa85   :  { %v1392_v26 = vadd.f32 1e-12, %v1387_v32 }
 0xa86   :  { %v1377_v22 = vpop.xlane.xlu1 %1376 }
 0xa87   :  { %4261 = vrsqrt.f32 %v1392_v26  ;;  %v1388_v27 = vmul.f32 0.03125, %v1377_v22 }
 0xa89   :  { %v1393_v28 = vadd.f32 1e-12, %v1388_v27 }
 0xa8a   :  { %v1380_v34 = vpop.xlane.xlu0 %1379 }
 0xa8b   :  { %4263 = vrsqrt.f32 %v1393_v28  ;;  %v1389_v23 = vmul.f32 0.03125, %v1380_v34 }
 0xa8d   :  { %v1394_v35 = vadd.f32 1e-12, %v1389_v23 }
 0xa8e   :  { %v1383_v37 = vpop.xlane.xlu1 %1382 }
 0xa8f   :  { %4265 = vrsqrt.f32 %v1394_v35  ;;  %v1390_v38 = vmul.f32 0.03125, %v1383_v37 }
 0xa91   :  { %v1395_v40 = vadd.f32 1e-12, %v1390_v38 }
 0xa93   :  { %4267 = vrsqrt.f32 %v1395_v40 }
 0xa94   :  { %v4262_v33 = vpop.eup %4261 }
 0xa95   :  { %v1402_v41 = vmul.f32 %v4262_v33, %v1362_v39 }
 0xa97   :  { %v1413_v44 = vmul.f32 %v3491_v42, %v1402_v41 }
 0xa98   :  { %v4264_v30 = vpop.eup %4263 }
 0xa99   :  { %v1403_v45 = vmul.f32 %v4264_v30, %v1363_v29  ;;  %v5145_v53 = vadd.f32 %v3492_v48, %v1413_v44  ;;  %v4192_v29 = vld [vmem:[%s5637_s4 + $0x8] sm:$0xff]  }
 0xa9a   :  { %3893 = vmatpush3.bf16.msra.mxu1 %v4192_v29 }
 0xa9b   :  { %v1414_v50 = vmul.f32 %v3491_v42, %v1403_v45  ;;  %3894 = vmatprep.subr.bf16.mxu1 %v4586_v36 }
 0xa9c   :  { %v4266_v52 = vpop.eup %4265 }
 0xa9d   :  { %v5147_v54 = vadd.f32 %v3492_v48, %v1414_v50  ;;  %v1404_v55 = vmul.f32 %v4266_v52, %v1364_v43 }
 0xa9e   :  { %3895 = vmatpush3.bf16.msra.mxu1 %v4193_v4 }
 0xa9f   :  { %v1433_v57 = vpack.c.bf16 %v5147_v54, %v5145_v53  ;;  %v1415_v14 = vmul.f32 %v3491_v42, %v1404_v55  ;;  %3924 = vmatprep.subr.bf16.mxu1 %v4586_v36 }
 0xaa0   :  { %v4268_v58 = vpop.eup %4267 }
 0xaa1   :  { %3877 = vmatmul.mubr.msk.bf16.vlgmr.msra.gmra.mxu0 %vm481_vm2, %v1433_v57  ;;  %v1405_v59 = vmul.f32 %v4268_v58, %v1365_v62  ;;  %v5154_v46 = vadd.f32 %v3492_v48, %v1415_v14 }
 0xaa2   :  { %3880 = vmatprep.mubr.msk.bf16.mxu0 %vm4587_vm1, %v4586_v36 }
 0xaa3   :  { %v1416_v63 = vmul.f32 %v3491_v42, %v1405_v59 }
 0xaa5   :  { %v5156_v60 = vadd.f32 %v3492_v48, %v1416_v63 }
 0xaa7   :  { %v1434_v18 = vpack.c.bf16 %v5156_v60, %v5154_v46 }
 0xaa9   :  { %3881 = vmatmul.mubr.msk.bf16.gmra.mxu0 %vm481_vm2, %v1434_v18 }
 0xaaa   :  { %3884 = vmatprep.mubr.msk.bf16.mxu0 %vm4587_vm1, %v4586_v36 }
 0xab6   :  { %v1386_v61 = vpop.xlane.xlu0 %1385 }
 0xab7   :  { %v1391_v0 = vmul.f32 0.03125, %v1386_v61 }
 0xab9   :  { %v1396_v1 = vadd.f32 1e-12, %v1391_v0 }
 0xabb   :  { %4269 = vrsqrt.f32 %v1396_v1 }
 0xac8   :  { %v4270_v24 = vpop.eup %4269 }
 0xac9   :  { %v1406_v2 = vmul.f32 %v4270_v24, %v1366_v19 }
 0xacb   :  { %v1417_v3 = vmul.f32 %v3491_v42, %v1406_v2 }
 0xacd   :  { %v5163_v39 = vadd.f32 %v3492_v48, %v1417_v3 }
 0xacf   :  { %v1435_v51 = vpack.c.bf16 %v5163_v39, %v5163_v39 }
 0xad1   :  { %3885 = vmatmul.mubr.msk.bf16.gmra.mxu0 %vm481_vm2, %v1435_v51 }
 0xad2   :  { %3912 = vmatprep.mubr.msk.bf16.mxu0 %vm4587_vm1, %v4586_v36 }
 0xb61   :  { %v1498_v49 = vpop.f32.mrf.mxu0 }
 0xb62   :  { %v1499_v8 = vadd.f32 %v3493_v31, %v1498_v49 }
 0xb63   :  { %v3878_v43 = vpop.f32.mrf.mxu0 }
 0xb64   :  { %v1525_v56 = vmul.f32 0.044715, %v1499_v8  ;;  %v1520_v45 = vmul.f32 0.5, %v1499_v8 }
 0xb65   :  { %v1501_v6 = vpop.f32.mrf.mxu0 }
 0xb66   :  { %v1530_v7 = vmul.f32 %v1525_v56, %v1499_v8  ;;  %v1502_v9 = vadd.f32 %v3493_v31, %v1501_v6 }
 0xb67   :  { %v3879_v62 = vpop.f32.mrf.mxu0 }
 0xb68   :  { %v1535_v10 = vmul.f32 %v1530_v7, %v1499_v8  ;;  %v1526_v11 = vmul.f32 0.044715, %v1502_v9  ;;  %v1521_v48 = vmul.f32 0.5, %v1502_v9 }
 0xb69   :  { %v1506_v5 = vpop.f32.mrf.mxu0 }
 0xb6a   :  { %v1540_v13 = vadd.f32 %v1535_v10, %v1499_v8  ;;  %v1531_v15 = vmul.f32 %v1526_v11, %v1502_v9  ;;  %v1507_v17 = vadd.f32 %v3493_v31, %v1506_v5 }
 0xb6b   :  { %v3882_v12 = vpop.f32.mrf.mxu0 }
 0xb6c   :  { %v1545_v19 = vmul.f32 0.7978846, %v1540_v13  ;;  %v1536_v20 = vmul.f32 %v1531_v15, %v1502_v9  ;;  %v1527_v21 = vmul.f32 0.044715, %v1507_v17  ;;  %v1522_v63 = vmul.f32 0.5, %v1507_v17 }
 0xb6d   :  { %v1509_v25 = vpop.f32.mrf.mxu0 }
 0xb6e   :  { %4271 = vtanh.f32 %v1545_v19  ;;  %v1541_v32 = vadd.f32 %v1536_v20, %v1502_v9  ;;  %v1532_v26 = vmul.f32 %v1527_v21, %v1507_v17  ;;  %v1510_v22 = vadd.f32 %v3493_v31, %v1509_v25 }
 0xb6f   :  { %v3883_v27 = vpop.f32.mrf.mxu0 }
 0xb70   :  { %v1546_v28 = vmul.f32 0.7978846, %v1541_v32  ;;  %v1537_v34 = vmul.f32 %v1532_v26, %v1507_v17  ;;  %v1528_v23 = vmul.f32 0.044715, %v1510_v22  ;;  %v1523_v18 = vmul.f32 0.5, %v1510_v22 }
 0xb72   :  { %4273 = vtanh.f32 %v1546_v28  ;;  %v1542_v35 = vadd.f32 %v1537_v34, %v1507_v17  ;;  %v1533_v37 = vmul.f32 %v1528_v23, %v1510_v22 }
 0xb74   :  { %v1547_v38 = vmul.f32 0.7978846, %v1542_v35  ;;  %v1538_v40 = vmul.f32 %v1533_v37, %v1510_v22 }
 0xb76   :  { %4275 = vtanh.f32 %v1547_v38  ;;  %v1543_v33 = vadd.f32 %v1538_v40, %v1510_v22 }
 0xb78   :  { %v1548_v41 = vmul.f32 0.7978846, %v1543_v33 }
 0xb7a   :  { %4277 = vtanh.f32 %v1548_v41 }
 0xb7b   :  { %v4272_v42 = vpop.eup %4271 }
 0xb7c   :  { %v1555_v30 = vadd.f32 1.0, %v4272_v42 }
 0xb7e   :  { %v1560_v52 = vmul.f32 %v1555_v30, %v1520_v45 }
 0xb7f   :  { %v4274_v44 = vpop.eup %4273 }
 0xb80   :  { %v1556_v50 = vadd.f32 1.0, %v4274_v44 }
 0xb82   :  { %v1561_v55 = vmul.f32 %v1556_v50, %v1521_v48 }
 0xb83   :  { %v4276_v57 = vpop.eup %4275 }
 0xb84   :  { %v1573_v58 = vpack.c.bf16 %v1561_v55, %v1560_v52  ;;  %v1557_v59 = vadd.f32 1.0, %v4276_v57 }
 0xb86   :  { %3897 = vmatmul.mubr.msk.bf16.vlgmr.msra.gmra.mxu1 %vm1607_vm5, %v1573_v58  ;;  %v1562_v0 = vmul.f32 %v1557_v59, %v1522_v63 }
 0xb87   :  { %v4278_v14 = vpop.eup %4277  ;;  %3900 = vmatprep.mubr.msk.bf16.mxu1 %vm4587_vm1, %v4586_v36 }
 0xb88   :  { %v1558_v61 = vadd.f32 1.0, %v4278_v14 }
 0xb8a   :  { %v1563_v1 = vmul.f32 %v1558_v61, %v1523_v18 }
 0xb8c   :  { %v1574_v24 = vpack.c.bf16 %v1563_v1, %v1562_v0 }
 0xb8e   :  { %3901 = vmatmul.mubr.msk.bf16.gmra.mxu1 %vm1607_vm5, %v1574_v24 }
 0xb8f   :  { %3904 = vmatprep.mubr.msk.bf16.mxu1 %vm4587_vm1, %v4586_v36 }
 0xb91   :  { %v1514_v2 = vpop.f32.mrf.mxu0 }
 0xb92   :  { %v1515_v3 = vadd.f32 %v3493_v31, %v1514_v2  ;;  %v3499_v31 = vld [vmem:[%s5639_s2] ss:$0 sm:$0xff]  ;;  %v4194_v2 = vld [vmem:[%s5640_s7 + $0x8] sm:$0xff]  }
 0xb93   :  { %v3886_v51 = vpop.f32.mrf.mxu0  ;;  %3909 = vmatpush3.bf16.msra.mxu0 %v4194_v2 }
 0xb94   :  { %v1529_v16 = vmul.f32 0.044715, %v1515_v3  ;;  %v1524_v6 = vmul.f32 0.5, %v1515_v3  ;;  %v4196_v51 = vld [vmem:[%s5640_s7] sm:$0xff]   ;;  %3910 = vmatprep.subr.bf16.mxu0 %v4586_v36 }
 0xb95   :  { %v1517_v47 = vpop.f32.mrf.mxu0 }
 0xb96   :  { %v1534_v29 = vmul.f32 %v1529_v16, %v1515_v3  ;;  %v4197_v16 = vld [vmem:[%s5641_s27] sm:$0xff]  }
 0xb97   :  { %v3887_v4 = vpop.f32.mrf.mxu0  ;;  %3911 = vmatpush3.bf16.msra.mxu0 %v4196_v51 }
 0xb98   :  { %v1539_v49 = vmul.f32 %v1534_v29, %v1515_v3  ;;  %3940 = vmatprep.subr.bf16.mxu0 %v4586_v36 }
 0xb9a   :  { %v1544_v8 = vadd.f32 %v1539_v49, %v1515_v3  ;;  %v4195_v3 = vld [vmem:[%s5641_s27 + $0x8] sm:$0xff]  }
 0xb9b   :  { %3925 = vmatpush3.bf16.msra.mxu1 %v4195_v3 }
 0xb9c   :  { %v1549_v43 = vmul.f32 0.7978846, %v1544_v8  ;;  %3926 = vmatprep.subr.bf16.mxu1 %v4586_v36 }
 0xb9e   :  { %4279 = vtanh.f32 %v1549_v43 }
 0xb9f   :  { %3927 = vmatpush3.bf16.msra.mxu1 %v4197_v16 }
 0xba0   :  { %3956 = vmatprep.subr.bf16.mxu1 %v4586_v36 }
 0xbab   :  { %v4280_v56 = vpop.eup %4279 }
 0xbac   :  { %v1559_v7 = vadd.f32 1.0, %v4280_v56 }
 0xbae   :  { %v1564_v9 = vmul.f32 %v1559_v7, %v1524_v6 }
 0xbb0   :  { %v1575_v62 = vpack.c.bf16 %v1564_v9, %v1564_v9 }
 0xbb2   :  { %3905 = vmatmul.mubr.msk.bf16.gmra.mxu1 %vm1607_vm5, %v1575_v62 }
 0xbb3   :  { %3928 = vmatprep.mubr.msk.bf16.mxu1 %vm4587_vm1, %v4586_v36 }
 0xc46   :  { %v1651_v10 = vpop.f32.mrf.mxu1 }
 0xc47   :  { %v1652_v11 = vadd.f32 %v3499_v31, %v1651_v10 }
 0xc48   :  { %v3898_v5 = vpop.f32.mrf.mxu1 }
 0xc49   :  { %v1673_v13 = vadd.f32 %v1652_v11, %v5145_v53 }
 0xc4a   :  { %v1654_v15 = vpop.f32.mrf.mxu1 }
 0xc4b   :  { %v1655_v17 = vadd.f32 %v3499_v31, %v1654_v15  ;;  %v1680_v12 = vsel %vm481_vm2, %v1673_v13, 0.0 }
 0xc4c   :  { %1681 = vadd.xlane.f32.xlu1 %v1680_v12  ;;  %v3899_v19 = vpop.f32.mrf.mxu1 }
 0xc4d   :  { %v1674_v20 = vadd.f32 %v1655_v17, %v5147_v54  ;;  %v3507_v19 = vld [vmem:[%s5642_s10] ss:$0 sm:$0xff] }
 0xc4e   :  { %v1659_v21 = vpop.f32.mrf.mxu1 }
 0xc4f   :  { %v1660_v25 = vadd.f32 %v3499_v31, %v1659_v21  ;;  %v1683_v32 = vsel %vm481_vm2, %v1674_v20, 0.0 }
 0xc50   :  { %1684 = vadd.xlane.f32.xlu0 %v1683_v32  ;;  %v3902_v26 = vpop.f32.mrf.mxu1  ;;  %v3508_v32 = vld [vmem:[%s5643_s6] ss:$0 sm:$0xff] }
 0xc51   :  { %v1675_v22 = vadd.f32 %v1660_v25, %v5154_v46 }
 0xc52   :  { %v1662_v27 = vpop.f32.mrf.mxu1 }
 0xc53   :  { %v1663_v28 = vadd.f32 %v3499_v31, %v1662_v27  ;;  %v1686_v53 = vsel %vm481_vm2, %v1675_v22, 0.0 }
 0xc54   :  { %1687 = vadd.xlane.f32.xlu1 %v1686_v53  ;;  %v3903_v34 = vpop.f32.mrf.mxu1 }
 0xc55   :  { %v1676_v23 = vadd.f32 %v1663_v28, %v5156_v60 }
 0xc57   :  { %v1689_v35 = vsel %vm481_vm2, %v1676_v23, 0.0 }
 0xc58   :  { %1690 = vadd.xlane.f32.xlu0 %v1689_v35 }
 0xc72   :  { %v1667_v54 = vpop.f32.mrf.mxu1 }
 0xc73   :  { %v1668_v37 = vadd.f32 %v3499_v31, %v1667_v54 }
 0xc74   :  { %v3906_v38 = vpop.f32.mrf.mxu1 }
 0xc75   :  { %v1677_v40 = vadd.f32 %v1668_v37, %v5163_v39 }
 0xc76   :  { %v1670_v33 = vpop.f32.mrf.mxu1 }
 0xc77   :  { %v1692_v41 = vsel %vm481_vm2, %v1677_v40, 0.0 }
 0xc78   :  { %1693 = vadd.xlane.f32.xlu1 %v1692_v41  ;;  %v3907_v46 = vpop.f32.mrf.mxu1 }
 0xcd5   :  { %v1682_v42 = vpop.xlane.xlu1 %1681 }
 0xcd6   :  { %v1695_v30 = vmul.f32 0.03125, %v1682_v42 }
 0xcd8   :  { %v1700_v44 = vsub.f32 %v1673_v13, %v1695_v30 }
 0xcd9   :  { %v1685_v45 = vpop.xlane.xlu0 %1684 }
 0xcda   :  { %v1696_v48 = vmul.f32 0.03125, %v1685_v45  ;;  %v1705_v50 = vmul.f32 %v1700_v44, %v1700_v44 }
 0xcdc   :  { %v1701_v60 = vsub.f32 %v1674_v20, %v1696_v48  ;;  %v1710_v52 = vsel %vm481_vm2, %v1705_v50, 0.0 }
 0xcdd   :  { %v1688_v55 = vpop.xlane.xlu1 %1687  ;;  %1711 = vadd.xlane.f32.xlu0 %v1710_v52 }
 0xcde   :  { %v1697_v57 = vmul.f32 0.03125, %v1688_v55  ;;  %v1706_v39 = vmul.f32 %v1701_v60, %v1701_v60 }
 0xce0   :  { %v1702_v58 = vsub.f32 %v1675_v22, %v1697_v57  ;;  %v1713_v59 = vsel %vm481_vm2, %v1706_v39, 0.0 }
 0xce1   :  { %v1691_v14 = vpop.xlane.xlu0 %1690  ;;  %1714 = vadd.xlane.f32.xlu1 %v1713_v59 }
 0xce2   :  { %v1698_v63 = vmul.f32 0.03125, %v1691_v14  ;;  %v1707_v18 = vmul.f32 %v1702_v58, %v1702_v58 }
 0xce4   :  { %v1703_v61 = vsub.f32 %v1676_v23, %v1698_v63  ;;  %v1716_v0 = vsel %vm481_vm2, %v1707_v18, 0.0  ;;  %v4198_v23 = vld [vmem:[%s5644_s11 + $0x8] sm:$0xff]  }
 0xce5   :  { %1717 = vadd.xlane.f32.xlu0 %v1716_v0 }
 0xce6   :  { %v1708_v1 = vmul.f32 %v1703_v61, %v1703_v61 }
 0xce8   :  { %v1719_v24 = vsel %vm481_vm2, %v1708_v1, 0.0 }
 0xce9   :  { %1720 = vadd.xlane.f32.xlu1 %v1719_v24 }
 0xd01   :  { %v1694_v47 = vpop.xlane.xlu1 %1693 }
 0xd02   :  { %v1699_v29 = vmul.f32 0.03125, %v1694_v47  ;;  %v3515_v47 = vld [vmem:[%s5645_s15] ss:$0 sm:$0xff] }
 0xd04   :  { %v1704_v4 = vsub.f32 %v1677_v40, %v1699_v29  ;;  %v4199_v40 = vld [vmem:[%s5644_s11] sm:$0xff]  }
 0xd06   :  { %v1709_v49 = vmul.f32 %v1704_v4, %v1704_v4 }
 0xd08   :  { %v1722_v8 = vsel %vm481_vm2, %v1709_v49, 0.0 }
 0xd09   :  { %1723 = vadd.xlane.f32.xlu0 %v1722_v8 }
 0xd66   :  { %v1712_v43 = vpop.xlane.xlu0 %1711 }
 0xd67   :  { %v1725_v56 = vmul.f32 0.03125, %v1712_v43 }
 0xd69   :  { %v1730_v6 = vadd.f32 1e-12, %v1725_v56 }
 0xd6a   :  { %v1715_v7 = vpop.xlane.xlu1 %1714 }
 0xd6b   :  { %4281 = vrsqrt.f32 %v1730_v6  ;;  %v1726_v9 = vmul.f32 0.03125, %v1715_v7 }
 0xd6d   :  { %v1731_v62 = vadd.f32 1e-12, %v1726_v9 }
 0xd6e   :  { %v1718_v31 = vpop.xlane.xlu0 %1717 }
 0xd6f   :  { %4283 = vrsqrt.f32 %v1731_v62  ;;  %v1727_v10 = vmul.f32 0.03125, %v1718_v31 }
 0xd71   :  { %v1732_v11 = vadd.f32 1e-12, %v1727_v10 }
 0xd72   :  { %v1721_v5 = vpop.xlane.xlu1 %1720 }
 0xd73   :  { %4285 = vrsqrt.f32 %v1732_v11  ;;  %v1728_v13 = vmul.f32 0.03125, %v1721_v5 }
 0xd75   :  { %v1733_v15 = vadd.f32 1e-12, %v1728_v13 }
 0xd77   :  { %4287 = vrsqrt.f32 %v1733_v15 }
 0xd78   :  { %v4282_v17 = vpop.eup %4281 }
 0xd79   :  { %v1740_v12 = vmul.f32 %v4282_v17, %v1700_v44 }
 0xd7b   :  { %v1751_v21 = vmul.f32 %v3507_v19, %v1740_v12 }
 0xd7c   :  { %v4284_v20 = vpop.eup %4283 }
 0xd7d   :  { %v1741_v25 = vmul.f32 %v4284_v20, %v1701_v60  ;;  %v5214_v27 = vadd.f32 %v3508_v32, %v1751_v21 }
 0xd7f   :  { %v1752_v26 = vmul.f32 %v3507_v19, %v1741_v25 }
 0xd80   :  { %v4286_v22 = vpop.eup %4285 }
 0xd81   :  { %v5216_v28 = vadd.f32 %v3508_v32, %v1752_v26  ;;  %v1742_v53 = vmul.f32 %v4286_v22, %v1702_v58 }
 0xd83   :  { %v1771_v34 = vpack.c.bf16 %v5216_v28, %v5214_v27  ;;  %v1753_v37 = vmul.f32 %v3507_v19, %v1742_v53 }
 0xd84   :  { %v4288_v35 = vpop.eup %4287 }
 0xd85   :  { %3913 = vmatmul.mubr.msk.bf16.vlgmr.msra.gmra.mxu0 %vm481_vm2, %v1771_v34  ;;  %3929 = vmatmul.mubr.msk.bf16.vlgmr.msra.gmra.mxu1 %vm481_vm2, %v1771_v34  ;;  %v1743_v54 = vmul.f32 %v4288_v35, %v1703_v61  ;;  %v5229_v33 = vadd.f32 %v3508_v32, %v1753_v37 }
 0xd86   :  { %3916 = vmatprep.mubr.msk.bf16.mxu0 %vm4587_vm1, %v4586_v36  ;;  %3932 = vmatprep.mubr.msk.bf16.mxu1 %vm4587_vm1, %v4586_v36 }
 0xd87   :  { %v1754_v38 = vmul.f32 %v3507_v19, %v1743_v54  ;;  %3941 = vmatpush3.bf16.msra.mxu0 %v4198_v23  ;;  %v3521_v54 = vld [vmem:[%s5647_s18] ss:$0 sm:$0xff] }
 0xd88   :  { %3942 = vmatprep.subr.bf16.mxu0 %v4586_v36 }
 0xd89   :  { %v5231_v41 = vadd.f32 %v3508_v32, %v1754_v38 }
 0xd8b   :  { %v1772_v46 = vpack.c.bf16 %v5231_v41, %v5229_v33  ;;  %3943 = vmatpush3.bf16.msra.mxu0 %v4199_v40 }
 0xd8c   :  { %3974 = vmatprep.subr.bf16.mxu0 %v4586_v36 }
 0xd8d   :  { %3917 = vmatmul.mubr.msk.bf16.gmra.mxu0 %vm481_vm2, %v1772_v46  ;;  %3933 = vmatmul.mubr.msk.bf16.gmra.mxu1 %vm481_vm2, %v1772_v46 }
 0xd8e   :  { %3920 = vmatprep.mubr.msk.bf16.mxu0 %vm4587_vm1, %v4586_v36  ;;  %3936 = vmatprep.mubr.msk.bf16.mxu1 %vm4587_vm1, %v4586_v36 }
 0xd92   :  { %v1724_v42 = vpop.xlane.xlu0 %1723 }
 0xd93   :  { %v1729_v30 = vmul.f32 0.03125, %v1724_v42 }
 0xd95   :  { %v1734_v44 = vadd.f32 1e-12, %v1729_v30 }
 0xd97   :  { %4289 = vrsqrt.f32 %v1734_v44 }
 0xda4   :  { %v4290_v45 = vpop.eup %4289 }
 0xda5   :  { %v1744_v48 = vmul.f32 %v4290_v45, %v1704_v4 }
 0xda7   :  { %v1755_v50 = vmul.f32 %v3507_v19, %v1744_v48 }
 0xda9   :  { %v5242_v60 = vadd.f32 %v3508_v32, %v1755_v50 }
 0xdab   :  { %v1773_v52 = vpack.c.bf16 %v5242_v60, %v5242_v60 }
 0xdad   :  { %3921 = vmatmul.mubr.msk.bf16.gmra.mxu0 %vm481_vm2, %v1773_v52  ;;  %3937 = vmatmul.mubr.msk.bf16.gmra.mxu1 %vm481_vm2, %v1773_v52 }
 0xdae   :  { %3944 = vmatprep.mubr.msk.bf16.mxu0 %vm4587_vm1, %v4586_v36  ;;  %3962 = vmatprep.mubr.msk.bf16.mxu1 %vm4587_vm1, %v4586_v36 }
 0xdb5   :  { %3945 = vmatmul.mubr.msk.bf16.vlgmr.msra.gmra.mxu0 %vm481_vm2, %v1771_v34  ;;  %v3509_v34 = vld [vmem:[%s5646_s16] ss:$0 sm:$0xff] }
 0xdb6   :  { %3948 = vmatprep.mubr.msk.bf16.mxu0 %vm4587_vm1, %v4586_v36 }
 0xdbd   :  { %3949 = vmatmul.mubr.msk.bf16.gmra.mxu0 %vm481_vm2, %v1772_v46 }
 0xdbe   :  { %3952 = vmatprep.mubr.msk.bf16.mxu0 %vm4587_vm1, %v4586_v36 }
 0xdc5   :  { %3953 = vmatmul.mubr.msk.bf16.gmra.mxu0 %vm481_vm2, %v1773_v52 }
 0xdc6   :  { %3980 = vmatprep.mubr.msk.bf16.mxu0 %vm4587_vm1, %v4586_v36 }
 0xe45   :  { %v1836_v55 = vpop.f32.mrf.mxu0  ;;  %v1915_v57 = vpop.f32.mrf.mxu1 }
 0xe46   :  { %v1916_v21 = vadd.f32 %v3515_v47, %v1915_v57  ;;  %v1837_v38 = vadd.f32 %v3509_v34, %v1836_v55 }
 0xe47   :  { %v3914_v39 = vpop.f32.mrf.mxu0  ;;  %v3930_v58 = vpop.f32.mrf.mxu1 }
 0xe49   :  { %v1839_v59 = vpop.f32.mrf.mxu0  ;;  %v1918_v14 = vpop.f32.mrf.mxu1 }
 0xe4a   :  { %v1919_v12 = vadd.f32 %v3515_v47, %v1918_v14  ;;  %v1840_v35 = vadd.f32 %v3509_v34, %v1839_v59 }
 0xe4b   :  { %v3915_v63 = vpop.f32.mrf.mxu0  ;;  %v3931_v18 = vpop.f32.mrf.mxu1 }
 0xe4c   :  { %v5276_v32 = vpack.c.bf16 %v1919_v12, %v1916_v21  ;;  %v5283_v42 = vpack.c.bf16 %v1840_v35, %v1837_v38 }
 0xe4d   :  { %v5261_v61 = vpop.f32.mrf.mxu0  ;;  %v1923_v0 = vpop.f32.mrf.mxu1 }
 0xe4e   :  { %v1924_v11 = vadd.f32 %v3515_v47, %v1923_v0  ;;  %v2048_v53 = vsel %vm284_vm0, %v5276_v32, 0  ;;  %v1845_v58 = vadd.f32 %v3509_v34, %v5261_v61 }
 0xe4f   :  { %v3918_v1 = vpop.f32.mrf.mxu0  ;;  %v3934_v24 = vpop.f32.mrf.mxu1 }
 0xe51   :  { %v1847_v2 = vpop.f32.mrf.mxu0  ;;  %v1926_v3 = vpop.f32.mrf.mxu1 }
 0xe52   :  { %v1927_v9 = vadd.f32 %v3515_v47, %v1926_v3  ;;  %v1848_v55 = vadd.f32 %v3509_v34, %v1847_v2  ;;  %v5317_v2 = vld [vmem:[%s5631_s21] sm:$0xff] }
 0xe53   :  { %v3919_v51 = vpop.f32.mrf.mxu0  ;;  %v3935_v16 = vpop.f32.mrf.mxu1 }
 0xe54   :  { %v5271_v13 = vpack.c.bf16 %v1927_v9, %v1924_v11  ;;  %v5298_v14 = vpack.c.bf16 %v1848_v55, %v1845_v58  ;;  %v5327_v9 = vld [vmem:[%s5631_s21 + $0x10] sm:$0xff] }
 0xe56   :  { %v2051_v19 = vsel %vm284_vm0, %v5271_v13, 0 }
 0xe6d   :  { %v5264_v29 = vpop.f32.mrf.mxu0  ;;  %v1931_v4 = vpop.f32.mrf.mxu1 }
 0xe6e   :  { %v1932_v49 = vadd.f32 %v3515_v47, %v1931_v4  ;;  %v1853_v18 = vadd.f32 %v3509_v34, %v5264_v29  ;;  %v5322_v4 = vld [vmem:[%s5631_s21 + $0x8] sm:$0xff] }
 0xe6f   :  { %v3922_v8 = vpop.f32.mrf.mxu0  ;;  %v3938_v43 = vpop.f32.mrf.mxu1 }
 0xe70   :  { %v5266_v56 = vpack.c.bf16 %v1932_v49, %v1932_v49  ;;  %v5310_v61 = vpack.c.bf16 %v1853_v18, %v1853_v18 }
 0xe71   :  { %v1855_v6 = vpop.f32.mrf.mxu0  ;;  %v1934_v7 = vpop.f32.mrf.mxu1 }
 0xe72   :  { %v2054_v62 = vsel %vm284_vm0, %v5266_v56, 0 }
 0xe73   :  { %v3923_v31 = vpop.f32.mrf.mxu0  ;;  %v3939_v10 = vpop.f32.mrf.mxu1  ;;  %3957 = vmatpush3.bf16.xpose.msra.mxu1 %v2054_v62 }
 0xe74   :  { %3958 = vmatprep.subr.bf16.mxu1 %v4586_v36 }
 0xe75   :  { %v1994_v5 = vpop.f32.mrf.mxu0 }
 0xe76   :  { %v1995_v59 = vadd.f32 %v3521_v54, %v1994_v5 }
 0xe77   :  { %v3946_v15 = vpop.f32.mrf.mxu0 }
 0xe78   :  { %v5332_v15 = vld [vmem:[%s5631_s21 + $0x18] sm:$0xff] }
 0xe79   :  { %v1997_v17 = vpop.f32.mrf.mxu0 }
 0xe7a   :  { %v1998_v57 = vadd.f32 %v3521_v54, %v1997_v17 }
 0xe7b   :  { %v3947_v20 = vpop.f32.mrf.mxu0  ;;  %3959 = vmatpush3.bf16.xpose.msra.mxu1 %v2051_v19 }
 0xe7c   :  { %3960 = vmatprep.subr.bf16.mxu1 %v4586_v36  ;;  %v5301_v63 = vpack.c.bf16 %v1998_v57, %v1995_v59 }
 0xe7d   :  { %v2002_v25 = vpop.f32.mrf.mxu0 }
 0xe7e   :  { %v2003_v50 = vadd.f32 %v3521_v54, %v2002_v25  ;;  %v5337_v25 = vld [vmem:[%s5631_s21 + $0x20] sm:$0xff] }
 0xe7f   :  { %v3950_v26 = vpop.f32.mrf.mxu0 }
 0xe81   :  { %v2005_v22 = vpop.f32.mrf.mxu0 }
 0xe82   :  { %v2006_v44 = vadd.f32 %v3521_v54, %v2005_v22 }
 0xe83   :  { %v3951_v23 = vpop.f32.mrf.mxu0  ;;  %3961 = vmatpush3.bf16.xpose.msra.mxu1 %v2048_v53 }
 0xe84   :  { %3992 = vmatprep.subr.bf16.mxu1 %v4586_v36  ;;  %v5294_v39 = vpack.c.bf16 %v2006_v44, %v2003_v50 }
 0xe85   :  { %v2010_v37 = vpop.f32.mrf.mxu0 }
 0xe86   :  { %v2011_v40 = vadd.f32 %v3521_v54, %v2010_v37 }
 0xe87   :  { %v3954_v46 = vpop.f32.mrf.mxu0 }
 0xe88   :  { %v5285_v30 = vpack.c.bf16 %v2011_v40, %v2011_v40 }
 0xe89   :  { %v2013_v45 = vpop.f32.mrf.mxu0 }
 0xe8a   :  { %v2193_v48 = vsel %vm882_vm3, %v5285_v30, 0  ;;  %3963 = vmatmul.mubr.msk.bf16.vlgmr.msra.gmra.mxu1 %vm284_vm0, %v5283_v42 }
 0xe8b   :  { %v3955_v52 = vpop.f32.mrf.mxu0  ;;  %3975 = vmatpush3.bf16.msra.mxu0 %v2193_v48  ;;  %3966 = vmatprep.mubr.msk.bf16.mxu1 %vm4587_vm1, %v4586_v36 }
 0xe8c   :  { %3976 = vmatprep.subr.bf16.mxu0 %v4586_v36 }
 0xe8f   :  { %3977 = vmatpush3.bf16.msra.mxu0 %v5294_v39 }
 0xe90   :  { %3978 = vmatprep.subr.bf16.mxu0 %v4586_v36 }
 0xe92   :  { %3967 = vmatmul.mubr.msk.bf16.gmra.mxu1 %vm284_vm0, %v5298_v14 }
 0xe93   :  { %3979 = vmatpush3.bf16.msra.mxu0 %v5301_v63  ;;  %3970 = vmatprep.mubr.msk.bf16.mxu1 %vm4587_vm1, %v4586_v36 }
 0xe94   :  { %4006 = vmatprep.subr.bf16.mxu0 %v4586_v36 }
 0xe9a   :  { %3971 = vmatmul.mubr.msk.bf16.gmra.mxu1 %vm284_vm0, %v5310_v61 }
 0xe9b   :  { %3994 = vmatprep.mubr.msk.bf16.mxu1 %vm4587_vm1, %v4586_v36 }
 0xf4a   :  { %v2090_v0 = vpop.f32.mrf.mxu1 }
 0xf4b   :  { %v2112_v1 = vmul.f32 0.25, %v2090_v0 }
 0xf4c   :  { %v3964_v24 = vpop.f32.mrf.mxu1 }
 0xf4d   :  { %v2117_v3 = vadd.f32 %v5317_v2, %v2112_v1 }
 0xf4e   :  { %v2093_v51 = vpop.f32.mrf.mxu1 }
 0xf4f   :  { %v2113_v16 = vmul.f32 0.25, %v2093_v51  ;;  %v2122_v47 = vsel %vm811_vm4, %v2117_v3, -inf }
 0xf50   :  { %2123 = vmax.xlane.f32.xlu1 %v2122_v47  ;;  %v3965_v29 = vpop.f32.mrf.mxu1 }
 0xf51   :  { %v2118_v49 = vadd.f32 %v5322_v4, %v2113_v16 }
 0xf52   :  { %v2098_v8 = vpop.f32.mrf.mxu1 }
 0xf53   :  { %v2114_v43 = vmul.f32 0.25, %v2098_v8  ;;  %v2125_v6 = vsel %vm811_vm4, %v2118_v49, -inf }
 0xf54   :  { %2126 = vmax.xlane.f32.xlu0 %v2125_v6  ;;  %v3968_v7 = vpop.f32.mrf.mxu1 }
 0xf55   :  { %v2119_v62 = vadd.f32 %v5327_v9, %v2114_v43 }
 0xf56   :  { %v2101_v31 = vpop.f32.mrf.mxu1 }
 0xf57   :  { %v2115_v10 = vmul.f32 0.25, %v2101_v31  ;;  %v2128_v11 = vsel %vm811_vm4, %v2119_v62, -inf }
 0xf58   :  { %2129 = vmax.xlane.f32.xlu1 %v2128_v11  ;;  %v3969_v5 = vpop.f32.mrf.mxu1 }
 0xf59   :  { %v2120_v17 = vadd.f32 %v5332_v15, %v2115_v10 }
 0xf5a   :  { %v2106_v12 = vpop.f32.mrf.mxu1 }
 0xf5b   :  { %v2116_v19 = vmul.f32 0.25, %v2106_v12  ;;  %v2131_v20 = vsel %vm811_vm4, %v2120_v17, -inf }
 0xf5c   :  { %2132 = vmax.xlane.f32.xlu0 %v2131_v20  ;;  %v3972_v21 = vpop.f32.mrf.mxu1 }
 0xf5d   :  { %v2121_v26 = vadd.f32 %v5337_v25, %v2116_v19 }
 0xf5e   :  { %v2109_v22 = vpop.f32.mrf.mxu1 }
 0xf5f   :  { %v2134_v53 = vsel %vm811_vm4, %v2121_v26, -inf }
 0xf60   :  { %2135 = vmax.xlane.f32.xlu1 %v2134_v53  ;;  %v3973_v34 = vpop.f32.mrf.mxu1 }
 0xfd9   :  { %v2124_v23 = vpop.xlane.xlu1 %2123 }
 0xfda   :  { %v2137_v35 = vsub.f32 %v2117_v3, %v2124_v23 }
 0xfdc   :  { %v2142_v54 = vmul.f32 1.442695, %v2137_v35 }
 0xfdd   :  { %v2127_v37 = vpop.xlane.xlu0 %2126 }
 0xfde   :  { %4291 = vpow2.f32 %v2142_v54  ;;  %v2138_v38 = vsub.f32 %v2118_v49, %v2127_v37  ;;  %v4200_v54 = vld [vmem:[%s5648_s0] sm:$0xff]  }
 0xfdf   :  { %3993 = vmatpush3.bf16.msra.mxu1 %v4200_v54 }
 0xfe0   :  { %v2144_v40 = vmul.f32 1.442695, %v2138_v38  ;;  %4024 = vmatprep.subr.bf16.mxu1 %v4586_v36 }
 0xfe1   :  { %v2130_v46 = vpop.xlane.xlu1 %2129 }
 0xfe2   :  { %4293 = vpow2.f32 %v2144_v40  ;;  %v2139_v44 = vsub.f32 %v2119_v62, %v2130_v46 }
 0xfe4   :  { %v2146_v45 = vmul.f32 1.442695, %v2139_v44 }
 0xfe5   :  { %v2133_v48 = vpop.xlane.xlu0 %2132 }
 0xfe6   :  { %4295 = vpow2.f32 %v2146_v45  ;;  %v2140_v50 = vsub.f32 %v2120_v17, %v2133_v48 }
 0xfe8   :  { %v2148_v52 = vmul.f32 1.442695, %v2140_v50 }
 0xfe9   :  { %v2136_v55 = vpop.xlane.xlu1 %2135 }
 0xfea   :  { %4297 = vpow2.f32 %v2148_v52  ;;  %v2141_v57 = vsub.f32 %v2121_v26, %v2136_v55 }
 0xfeb   :  { %v4292_v58 = vpop.eup %4291 }
 0xfec   :  { %v2150_v59 = vmul.f32 1.442695, %v2141_v57  ;;  %v2152_v18 = vsel %vm811_vm4, %v4292_v58, 0.0 }
 0xfed   :  { %2153 = vadd.xlane.f32.xlu0 %v2152_v18 }
 0xfee   :  { %4299 = vpow2.f32 %v2150_v59 }
 0xfef   :  { %v4294_v0 = vpop.eup %4293 }
 0xff0   :  { %v2155_v1 = vsel %vm811_vm4, %v4294_v0, 0.0 }
 0xff1   :  { %2156 = vadd.xlane.f32.xlu1 %v2155_v1 }
 0xff3   :  { %v4296_v24 = vpop.eup %4295 }
 0xff4   :  { %v2158_v3 = vsel %vm811_vm4, %v4296_v24, 0.0 }
 0xff5   :  { %2159 = vadd.xlane.f32.xlu0 %v2158_v3 }
 0xff7   :  { %v4298_v51 = vpop.eup %4297 }
 0xff8   :  { %v2161_v16 = vsel %vm811_vm4, %v4298_v51, 0.0 }
 0xff9   :  { %2162 = vadd.xlane.f32.xlu1 %v2161_v16 }
 0xffb   :  { %v4300_v47 = vpop.eup %4299 }
 0xffc   :  { %v2164_v29 = vsel %vm811_vm4, %v4300_v47, 0.0 }
 0xffd   :  { %2165 = vadd.xlane.f32.xlu0 %v2164_v29 }
0x100a   :  { %2346 = vrot.lane.b32.xlu1 %v5266_v56, %s4588_s25 }
0x100e   :  { %2342 = vrot.lane.b32.xlu1 %v5276_v32, %s4588_s25 }
0x1012   :  { %2333 = vrot.lane.b32.xlu1 %v5283_v42, %s4588_s25 }
0x1013   :  { %2344 = vrot.lane.b32.xlu0 %v5271_v13, %s4588_s25 }
0x1016   :  { %2335 = vrot.lane.b32.xlu1 %v5298_v14, %s4588_s25 }
0x1017   :  { %2337 = vrot.lane.b32.xlu0 %v5310_v61, %s4588_s25 }
0x1076   :  { %v2154_v49 = vpop.xlane.xlu0 %2153 }
0x1077   :  { %4301 = vrcp.f32 %v2154_v49 }
0x107a   :  { %v2157_v8 = vpop.xlane.xlu1 %2156 }
0x107b   :  { %4303 = vrcp.f32 %v2157_v8 }
0x107e   :  { %v2160_v56 = vpop.xlane.xlu0 %2159 }
0x107f   :  { %4305 = vrcp.f32 %v2160_v56 }
0x1082   :  { %v2163_v43 = vpop.xlane.xlu1 %2162 }
0x1083   :  { %4307 = vrcp.f32 %v2163_v43 }
0x1084   :  { %v4302_v32 = vpop.eup %4301 }
0x1085   :  { %v2172_v7 = vmul.f32 %v4302_v32, %v4292_v58 }
0x1086   :  { %v2166_v6 = vpop.xlane.xlu0 %2165  ;;  %v2347_v62 = vpop.permute.xlu1 %2346 }
0x1087   :  { %4309 = vrcp.f32 %v2166_v6  ;;  %v2364_v14 = vsel %vm284_vm0, %v2347_v62, 0 }
0x1088   :  { %v4304_v42 = vpop.eup %4303 }
0x1089   :  { %v2173_v13 = vmul.f32 %v4304_v42, %v4294_v0 }
0x108a   :  { %v2345_v17 = vpop.permute.xlu0 %2344  ;;  %v2343_v26 = vpop.permute.xlu1 %2342 }
0x108b   :  { %v2177_v31 = vpack.c.bf16 %v2173_v13, %v2172_v7  ;;  %v2361_v20 = vsel %vm284_vm0, %v2345_v17, 0  ;;  %v2358_v53 = vsel %vm284_vm0, %v2343_v26, 0 }
0x108c   :  { %v4306_v61 = vpop.eup %4305 }
0x108d   :  { %3981 = vmatmul.mubr.msk.bf16.vlgmr.msra.gmra.mxu0 %vm811_vm4, %v2177_v31  ;;  %v2174_v11 = vmul.f32 %v4306_v61, %v4296_v24 }
0x108e   :  { %4007 = vmatpush3.bf16.xpose.msra.mxu0 %v2364_v14  ;;  %3984 = vmatprep.mubr.msk.bf16.mxu0 %vm4587_vm1, %v4586_v36  ;;  %v2334_v34 = vpop.permute.xlu1 %2333  ;;  %v2338_v35 = vpop.permute.xlu0 %2337 }
0x108f   :  { %4008 = vmatprep.subr.bf16.mxu0 %v4586_v36 }
0x1090   :  { %v4308_v10 = vpop.eup %4307 }
0x1091   :  { %v2175_v5 = vmul.f32 %v4308_v10, %v4298_v51 }
0x1092   :  { %v2336_v23 = vpop.permute.xlu1 %2335 }
0x1093   :  { %v2178_v12 = vpack.c.bf16 %v2175_v5, %v2174_v11 }
0x1094   :  { %v4310_v19 = vpop.eup %4309 }
0x1095   :  { %3985 = vmatmul.mubr.msk.bf16.gmra.mxu0 %vm811_vm4, %v2178_v12  ;;  %v2176_v21 = vmul.f32 %v4310_v19, %v4300_v47 }
0x1096   :  { %4009 = vmatpush3.bf16.xpose.msra.mxu0 %v2361_v20  ;;  %3988 = vmatprep.mubr.msk.bf16.mxu0 %vm4587_vm1, %v4586_v36 }
0x1097   :  { %4010 = vmatprep.subr.bf16.mxu0 %v4586_v36  ;;  %v2179_v22 = vpack.c.bf16 %v2176_v21, %v2176_v21 }
0x109d   :  { %3989 = vmatmul.mubr.msk.bf16.gmra.mxu0 %vm811_vm4, %v2179_v22 }
0x109e   :  { %4011 = vmatpush3.bf16.xpose.msra.mxu0 %v2358_v53  ;;  %4012 = vmatprep.mubr.msk.bf16.mxu0 %vm4587_vm1, %v4586_v36 }
0x109f   :  { %4042 = vmatprep.subr.bf16.mxu0 %v4586_v36 }
0x10a5   :  { %4013 = vmatmul.mubr.msk.bf16.vlgmr.msra.gmra.mxu0 %vm284_vm0, %v2334_v34 }
0x10a6   :  { %4016 = vmatprep.mubr.msk.bf16.mxu0 %vm4587_vm1, %v4586_v36 }
0x10ad   :  { %4017 = vmatmul.mubr.msk.bf16.gmra.mxu0 %vm284_vm0, %v2336_v23 }
0x10ae   :  { %4020 = vmatprep.mubr.msk.bf16.mxu0 %vm4587_vm1, %v4586_v36 }
0x10b5   :  { %4021 = vmatmul.mubr.msk.bf16.gmra.mxu0 %vm284_vm0, %v2338_v35 }
0x10b6   :  { %4044 = vmatprep.mubr.msk.bf16.mxu0 %vm4587_vm1, %v4586_v36 }
0x114d   :  { %v2229_v37 = vpop.f32.mrf.mxu0 }
0x114f   :  { %v3982_v38 = vpop.f32.mrf.mxu0 }
0x1151   :  { %v2232_v40 = vpop.f32.mrf.mxu0 }
0x1152   :  { %v2251_v46 = vpack.c.bf16 %v2232_v40, %v2229_v37  ;;  %v3527_v40 = vld [vmem:[%s5649_s9] ss:$0 sm:$0xff] }
0x1153   :  { %v3983_v44 = vpop.f32.mrf.mxu0 }
0x1154   :  { %3995 = vmatmul.mubr.msk.bf16.vlgmr.msra.gmra.mxu1 %vm284_vm0, %v2251_v46  ;;  %v2027_v46 = vadd.f32 %v3527_v40, %v5214_v27  ;;  %v2030_v27 = vadd.f32 %v3527_v40, %v5231_v41 }
0x1155   :  { %v2237_v45 = vpop.f32.mrf.mxu0  ;;  %3998 = vmatprep.mubr.msk.bf16.mxu1 %vm4587_vm1, %v4586_v36 }
0x1157   :  { %v3986_v48 = vpop.f32.mrf.mxu0 }
0x1159   :  { %v2240_v50 = vpop.f32.mrf.mxu0 }
0x115a   :  { %v2252_v52 = vpack.c.bf16 %v2240_v50, %v2237_v45  ;;  %v2028_v50 = vadd.f32 %v3527_v40, %v5216_v28  ;;  %v2031_v28 = vadd.f32 %v3527_v40, %v5242_v60 }
0x115b   :  { %v3987_v55 = vpop.f32.mrf.mxu0 }
0x115c   :  { %3999 = vmatmul.mubr.msk.bf16.gmra.mxu1 %vm284_vm0, %v2252_v52 }
0x115d   :  { %v2245_v57 = vpop.f32.mrf.mxu0  ;;  %4002 = vmatprep.mubr.msk.bf16.mxu1 %vm4587_vm1, %v4586_v36 }
0x115e   :  { %v2253_v18 = vpack.c.bf16 %v2245_v57, %v2245_v57 }
0x115f   :  { %v3990_v58 = vpop.f32.mrf.mxu0 }
0x1160   :  { %v2029_v58 = vadd.f32 %v3527_v40, %v5229_v33 }
0x1161   :  { %v2248_v59 = vpop.f32.mrf.mxu0 }
0x1163   :  { %v3991_v0 = vpop.f32.mrf.mxu0 }
0x1164   :  { %4003 = vmatmul.mubr.msk.bf16.gmra.mxu1 %vm284_vm0, %v2253_v18 }
0x1165   :  { %v2400_v1 = vpop.f32.mrf.mxu0  ;;  %4030 = vmatprep.mubr.msk.bf16.mxu1 %vm4587_vm1, %v4586_v36 }
0x1166   :  { %v2422_v24 = vmul.f32 0.25, %v2400_v1 }
0x1167   :  { %v4014_v3 = vpop.f32.mrf.mxu0 }
0x1168   :  { %v2427_v51 = vadd.f32 %v5317_v2, %v2422_v24 }
0x1169   :  { %v2403_v16 = vpop.f32.mrf.mxu0 }
0x116a   :  { %v2423_v47 = vmul.f32 0.25, %v2403_v16  ;;  %v2432_v29 = vsel %vm811_vm4, %v2427_v51, -inf }
0x116b   :  { %2433 = vmax.xlane.f32.xlu1 %v2432_v29  ;;  %v4015_v49 = vpop.f32.mrf.mxu0 }
0x116c   :  { %v2428_v8 = vadd.f32 %v5322_v4, %v2423_v47 }
0x116d   :  { %v2408_v56 = vpop.f32.mrf.mxu0 }
0x116e   :  { %v2424_v43 = vmul.f32 0.25, %v2408_v56  ;;  %v2435_v32 = vsel %vm811_vm4, %v2428_v8, -inf }
0x116f   :  { %2436 = vmax.xlane.f32.xlu0 %v2435_v32  ;;  %v4018_v6 = vpop.f32.mrf.mxu0 }
0x1170   :  { %v2429_v42 = vadd.f32 %v5327_v9, %v2424_v43 }
0x1171   :  { %v2411_v7 = vpop.f32.mrf.mxu0 }
0x1172   :  { %v2425_v13 = vmul.f32 0.25, %v2411_v7  ;;  %v2438_v2 = vsel %vm811_vm4, %v2429_v42, -inf }
0x1173   :  { %2439 = vmax.xlane.f32.xlu0 %v2438_v2  ;;  %v4019_v62 = vpop.f32.mrf.mxu0 }
0x1174   :  { %v2430_v31 = vadd.f32 %v5332_v15, %v2425_v13 }
0x1175   :  { %v2416_v14 = vpop.f32.mrf.mxu0 }
0x1176   :  { %v2426_v61 = vmul.f32 0.25, %v2416_v14  ;;  %v2441_v4 = vsel %vm811_vm4, %v2430_v31, -inf }
0x1177   :  { %2442 = vmax.xlane.f32.xlu0 %v2441_v4  ;;  %v4022_v10 = vpop.f32.mrf.mxu0 }
0x1178   :  { %v2431_v11 = vadd.f32 %v5337_v25, %v2426_v61 }
0x1179   :  { %v2419_v5 = vpop.f32.mrf.mxu0 }
0x117a   :  { %v2444_v17 = vsel %vm811_vm4, %v2431_v11, -inf }
0x117b   :  { %2445 = vmax.xlane.f32.xlu1 %v2444_v17  ;;  %v4023_v9 = vpop.f32.mrf.mxu0 }
0x11f4   :  { %v2434_v12 = vpop.xlane.xlu1 %2433 }
0x11f5   :  { %v2447_v19 = vsub.f32 %v2427_v51, %v2434_v12 }
0x11f7   :  { %v2452_v20 = vmul.f32 1.442695, %v2447_v19 }
0x11f8   :  { %v2437_v21 = vpop.xlane.xlu0 %2436 }
0x11f9   :  { %4311 = vpow2.f32 %v2452_v20  ;;  %v2448_v26 = vsub.f32 %v2428_v8, %v2437_v21 }
0x11fb   :  { %v2454_v15 = vmul.f32 1.442695, %v2448_v26 }
0x11fc   :  { %v2440_v22 = vpop.xlane.xlu0 %2439 }
0x11fd   :  { %4313 = vpow2.f32 %v2454_v15  ;;  %v2449_v53 = vsub.f32 %v2429_v42, %v2440_v22 }
0x11ff   :  { %v2456_v34 = vmul.f32 1.442695, %v2449_v53  ;;  %v4201_v53 = vld [vmem:[%s5648_s0 + $0x8] sm:$0xff]  }
0x1200   :  { %v2443_v16 = vpop.xlane.xlu0 %2442  ;;  %4043 = vmatpush3.bf16.msra.mxu0 %v4201_v53 }
0x1201   :  { %4315 = vpow2.f32 %v2456_v34  ;;  %v2450_v29 = vsub.f32 %v2430_v31, %v2443_v16  ;;  %4072 = vmatprep.subr.bf16.mxu0 %v4586_v36 }
0x1203   :  { %v2458_v8 = vmul.f32 1.442695, %v2450_v29 }
0x1204   :  { %v2446_v60 = vpop.xlane.xlu1 %2445 }
0x1205   :  { %4317 = vpow2.f32 %v2458_v8  ;;  %v2451_v43 = vsub.f32 %v2431_v11, %v2446_v60 }
0x1206   :  { %v5403_v23 = vpop.eup %4311 }
0x1207   :  { %v2462_v25 = vsel %vm811_vm4, %v5403_v23, 0.0  ;;  %v2460_v32 = vmul.f32 1.442695, %v2451_v43 }
0x1208   :  { %2463 = vadd.xlane.f32.xlu0 %v2462_v25 }
0x1209   :  { %4319 = vpow2.f32 %v2460_v32 }
0x120a   :  { %v5407_v35 = vpop.eup %4313 }
0x120b   :  { %v2465_v54 = vsel %vm811_vm4, %v5407_v35, 0.0 }
0x120c   :  { %2466 = vadd.xlane.f32.xlu1 %v2465_v54 }
0x120e   :  { %v5411_v37 = vpop.eup %4315 }
0x120f   :  { %v2468_v38 = vsel %vm811_vm4, %v5411_v37, 0.0 }
0x1210   :  { %2469 = vadd.xlane.f32.xlu0 %v2468_v38 }
0x1212   :  { %v4318_v41 = vpop.eup %4317 }
0x1213   :  { %v2471_v56 = vsel %vm811_vm4, %v4318_v41, 0.0 }
0x1214   :  { %v2303_v44 = vpop.f32.mrf.mxu1 }
0x1215   :  { %v5417_v45 = vadd.f32 %v2303_v44, %v2027_v46 }
0x1216   :  { %v3996_v48 = vpop.f32.mrf.mxu1  ;;  %v4320_v6 = vpop.eup %4319 }
0x1218   :  { %v2306_v52 = vpop.f32.mrf.mxu1 }
0x1219   :  { %v5420_v55 = vadd.f32 %v2306_v52, %v2028_v50 }
0x121a   :  { %v3997_v57 = vpop.f32.mrf.mxu1 }
0x121c   :  { %v2311_v59 = vpop.f32.mrf.mxu1 }
0x121d   :  { %v5423_v18 = vadd.f32 %v2311_v59, %v2029_v58  ;;  %2495 = vrot.lane.b32.xlu1 %v5294_v39, %s4588_s25 }
0x121e   :  { %v4000_v0 = vpop.f32.mrf.mxu1 }
0x1220   :  { %v2314_v1 = vpop.f32.mrf.mxu1 }
0x1221   :  { %v5428_v24 = vadd.f32 %v2314_v1, %v2030_v27 }
0x1222   :  { %v4001_v3 = vpop.f32.mrf.mxu1 }
0x1224   :  { %v2319_v51 = vpop.f32.mrf.mxu1 }
0x1225   :  { %v5431_v47 = vadd.f32 %v2319_v51, %v2031_v28 }
0x1226   :  { %2497 = vrot.lane.b32.xlu0 %v5285_v30, %s4588_s25  ;;  %v4004_v33 = vpop.f32.mrf.mxu1  ;;  %v2474_v30 = vsel %vm811_vm4, %v4320_v6, 0.0 }
0x1228   :  { %v2322_v49 = vpop.f32.mrf.mxu1 }
0x122a   :  { %v4005_v39 = vpop.f32.mrf.mxu1 }
0x1241   :  { %2472 = vadd.xlane.f32.xlu1 %v2471_v56 }
0x1252   :  { %2493 = vrot.lane.b32.xlu1 %v5301_v63, %s4588_s25 }
0x1276   :  { %2475 = vadd.xlane.f32.xlu1 %v2474_v30 }
0x1291   :  { %v2464_v42 = vpop.xlane.xlu0 %2463 }
0x1295   :  { %v2467_v13 = vpop.xlane.xlu1 %2466 }
0x1296   :  { %4321 = vrcp.f32 %v2467_v13 }
0x1297   :  { %4323 = vrcp.f32 %v2464_v42 }
0x1299   :  { %v2470_v7 = vpop.xlane.xlu0 %2469  ;;  %v2496_v31 = vpop.permute.xlu1 %2495 }
0x129a   :  { %4325 = vrcp.f32 %v2470_v7 }
0x129d   :  { %v2498_v2 = vpop.permute.xlu0 %2497 }
0x129e   :  { %v2511_v62 = vsel %vm882_vm3, %v2498_v2, 0 }
0x129f   :  { %4025 = vmatpush3.bf16.msra.mxu1 %v2511_v62 }
0x12a0   :  { %4026 = vmatprep.subr.bf16.mxu1 %v4586_v36 }
0x12a3   :  { %4027 = vmatpush3.bf16.msra.mxu1 %v2496_v31  ;;  %v4322_v63 = vpop.eup %4321 }
0x12a4   :  { %4028 = vmatprep.subr.bf16.mxu1 %v4586_v36  ;;  %v4324_v61 = vpop.eup %4323  ;;  %v2483_v4 = vmul.f32 %v4322_v63, %v5407_v35 }
0x12a5   :  { %v2482_v10 = vmul.f32 %v4324_v61, %v5403_v23 }
0x12a7   :  { %v2487_v5 = vpack.c.bf16 %v2483_v4, %v2482_v10  ;;  %v4326_v17 = vpop.eup %4325 }
0x12a8   :  { %v2484_v12 = vmul.f32 %v4326_v17, %v5411_v37 }
0x12ca   :  { %v2473_v14 = vpop.xlane.xlu1 %2472 }
0x12cb   :  { %4327 = vrcp.f32 %v2473_v14 }
0x12ce   :  { %v2494_v11 = vpop.permute.xlu1 %2493 }
0x12cf   :  { %4029 = vmatpush3.bf16.msra.mxu1 %v2494_v11 }
0x12d0   :  { %4056 = vmatprep.subr.bf16.mxu1 %v4586_v36 }
0x12d2   :  { %4031 = vmatmul.mubr.msk.bf16.vlgmr.msra.gmra.mxu1 %vm811_vm4, %v2487_v5 }
0x12d3   :  { %4034 = vmatprep.mubr.msk.bf16.mxu1 %vm4587_vm1, %v4586_v36 }
0x12d8   :  { %v4328_v9 = vpop.eup %4327 }
0x12d9   :  { %v2485_v19 = vmul.f32 %v4328_v9, %v4318_v41 }
0x12db   :  { %v2488_v20 = vpack.c.bf16 %v2485_v19, %v2484_v12 }
0x12dd   :  { %4035 = vmatmul.mubr.msk.bf16.gmra.mxu1 %vm811_vm4, %v2488_v20  ;;  %v4202_v20 = vld [vmem:[%s5650_s22 + $0x8] sm:$0xff]  }
0x12de   :  { %4038 = vmatprep.mubr.msk.bf16.mxu1 %vm4587_vm1, %v4586_v36  ;;  %4057 = vmatpush3.bf16.msra.mxu1 %v4202_v20 }
0x12df   :  { %4058 = vmatprep.subr.bf16.mxu1 %v4586_v36 }
0x12ff   :  { %v2476_v21 = vpop.xlane.xlu1 %2475 }
0x1300   :  { %4329 = vrcp.f32 %v2476_v21  ;;  %v4203_v21 = vld [vmem:[%s5650_s22] sm:$0xff]  }
0x1301   :  { %4059 = vmatpush3.bf16.msra.mxu1 %v4203_v21 }
0x1302   :  { %4092 = vmatprep.subr.bf16.mxu1 %v4586_v36 }
0x130d   :  { %v4330_v26 = vpop.eup %4329 }
0x130e   :  { %v2486_v15 = vmul.f32 %v4330_v26, %v4320_v6 }
0x1310   :  { %v2489_v22 = vpack.c.bf16 %v2486_v15, %v2486_v15 }
0x1312   :  { %4039 = vmatmul.mubr.msk.bf16.gmra.mxu1 %vm811_vm4, %v2489_v22 }
0x1313   :  { %4060 = vmatprep.mubr.msk.bf16.mxu1 %vm4587_vm1, %v4586_v36 }
0x1392   :  { %v2547_v34 = vpop.f32.mrf.mxu1 }
0x1394   :  { %v4032_v23 = vpop.f32.mrf.mxu1 }
0x1396   :  { %v2550_v25 = vpop.f32.mrf.mxu1 }
0x1397   :  { %v2569_v35 = vpack.c.bf16 %v2550_v25, %v2547_v34 }
0x1398   :  { %v4033_v54 = vpop.f32.mrf.mxu1 }
0x1399   :  { %4045 = vmatmul.mubr.msk.bf16.vlgmr.msra.gmra.mxu0 %vm284_vm0, %v2569_v35 }
0x139a   :  { %4048 = vmatprep.mubr.msk.bf16.mxu0 %vm4587_vm1, %v4586_v36 }
0x139d   :  { %v2555_v37 = vpop.f32.mrf.mxu1 }
0x139f   :  { %v4036_v38 = vpop.f32.mrf.mxu1 }
0x13a1   :  { %v2558_v40 = vpop.f32.mrf.mxu1 }
0x13a2   :  { %v2570_v46 = vpack.c.bf16 %v2558_v40, %v2555_v37 }
0x13a3   :  { %v4037_v44 = vpop.f32.mrf.mxu1 }
0x13a4   :  { %4049 = vmatmul.mubr.msk.bf16.gmra.mxu0 %vm284_vm0, %v2570_v46 }
0x13a5   :  { %4052 = vmatprep.mubr.msk.bf16.mxu0 %vm4587_vm1, %v4586_v36 }
0x13d2   :  { %v2563_v48 = vpop.f32.mrf.mxu1 }
0x13d3   :  { %v2571_v50 = vpack.c.bf16 %v2563_v48, %v2563_v48 }
0x13d4   :  { %v4040_v52 = vpop.f32.mrf.mxu1 }
0x13d5   :  { %4053 = vmatmul.mubr.msk.bf16.gmra.mxu0 %vm284_vm0, %v2571_v50 }
0x13d6   :  { %v2566_v57 = vpop.f32.mrf.mxu1  ;;  %4080 = vmatprep.mubr.msk.bf16.mxu0 %vm4587_vm1, %v4586_v36 }
0x13d8   :  { %v4041_v58 = vpop.f32.mrf.mxu1 }
0x1459   :  { %v2621_v59 = vpop.f32.mrf.mxu0 }
0x145a   :  { %v2643_v0 = vadd.f32 %v2621_v59, %v5417_v45  ;;  %v3548_v59 = vld [vmem:[%s5651_s20] ss:$0 sm:$0xff] }
0x145b   :  { %v4046_v27 = vpop.f32.mrf.mxu0 }
0x145c   :  { %v2650_v1 = vsel %vm481_vm2, %v2643_v0, 0.0 }
0x145d   :  { %2651 = vadd.xlane.f32.xlu0 %v2650_v1  ;;  %v2624_v3 = vpop.f32.mrf.mxu0 }
0x145e   :  { %v2644_v28 = vadd.f32 %v2624_v3, %v5420_v55  ;;  %v3549_v3 = vld [vmem:[%s5652_s23] ss:$0 sm:$0xff] }
0x145f   :  { %v4047_v51 = vpop.f32.mrf.mxu0 }
0x1460   :  { %v2653_v16 = vsel %vm481_vm2, %v2644_v28, 0.0 }
0x1461   :  { %2654 = vadd.xlane.f32.xlu0 %v2653_v16 }
0x1464   :  { %v2629_v33 = vpop.f32.mrf.mxu0 }
0x1465   :  { %v2645_v29 = vadd.f32 %v2629_v33, %v5423_v18 }
0x1466   :  { %v4050_v49 = vpop.f32.mrf.mxu0 }
0x1467   :  { %v2656_v39 = vsel %vm481_vm2, %v2645_v29, 0.0 }
0x1468   :  { %2657 = vadd.xlane.f32.xlu0 %v2656_v39  ;;  %v2632_v8 = vpop.f32.mrf.mxu0 }
0x1469   :  { %v2646_v45 = vadd.f32 %v2632_v8, %v5428_v24 }
0x146a   :  { %v4051_v41 = vpop.f32.mrf.mxu0 }
0x146b   :  { %v2659_v56 = vsel %vm481_vm2, %v2646_v45, 0.0 }
0x146c   :  { %2660 = vadd.xlane.f32.xlu1 %v2659_v56 }
0x1495   :  { %v2637_v60 = vpop.f32.mrf.mxu0 }
0x1496   :  { %v2647_v55 = vadd.f32 %v2637_v60, %v5431_v47 }
0x1497   :  { %v4054_v43 = vpop.f32.mrf.mxu0 }
0x1498   :  { %v2662_v32 = vsel %vm481_vm2, %v2647_v55, 0.0 }
0x1499   :  { %2663 = vadd.xlane.f32.xlu0 %v2662_v32  ;;  %v2640_v6 = vpop.f32.mrf.mxu0 }
0x149b   :  { %v4055_v18 = vpop.f32.mrf.mxu0 }
0x14e6   :  { %v2652_v30 = vpop.xlane.xlu0 %2651 }
0x14e7   :  { %v2665_v42 = vmul.f32 0.03125, %v2652_v30 }
0x14e9   :  { %v2670_v7 = vsub.f32 %v2643_v0, %v2665_v42 }
0x14ea   :  { %v2655_v13 = vpop.xlane.xlu0 %2654 }
0x14eb   :  { %v2666_v2 = vmul.f32 0.03125, %v2655_v13  ;;  %v2675_v62 = vmul.f32 %v2670_v7, %v2670_v7 }
0x14ed   :  { %v2671_v24 = vsub.f32 %v2644_v28, %v2666_v2  ;;  %v2680_v31 = vsel %vm481_vm2, %v2675_v62, 0.0  ;;  %v4204_v2 = vld [vmem:[%s5653_s26 + $0x18] sm:$0xff]   ;;  %v4205_v62 = vld [vmem:[%s5653_s26 + $0x10] sm:$0xff]  }
0x14ee   :  { %2681 = vadd.xlane.f32.xlu1 %v2680_v31  ;;  %4073 = vmatpush3.bf16.msra.mxu0 %v4204_v2  ;;  %v4207_v31 = vld [vmem:[%s5653_s26] sm:$0xff]  }
0x14ef   :  { %v2676_v63 = vmul.f32 %v2671_v24, %v2671_v24  ;;  %4074 = vmatprep.subr.bf16.mxu0 %v4586_v36 }
0x14f1   :  { %v2658_v14 = vpop.xlane.xlu0 %2657  ;;  %v2683_v47 = vsel %vm481_vm2, %v2676_v63, 0.0  ;;  %v3550_v63 = vld [vmem:[%s5654_s28] ss:$0 sm:$0xff] }
0x14f2   :  { %v2667_v61 = vmul.f32 0.03125, %v2658_v14  ;;  %2684 = vadd.xlane.f32.xlu0 %v2683_v47  ;;  %4075 = vmatpush3.bf16.msra.mxu0 %v4205_v62 }
0x14f3   :  { %4076 = vmatprep.subr.bf16.mxu0 %v4586_v36 }
0x14f4   :  { %v2672_v4 = vsub.f32 %v2645_v29, %v2667_v61 }
0x14f5   :  { %v2661_v10 = vpop.xlane.xlu1 %2660 }
0x14f6   :  { %v2668_v11 = vmul.f32 0.03125, %v2661_v10  ;;  %v2677_v5 = vmul.f32 %v2672_v4, %v2672_v4 }
0x14f8   :  { %v2673_v17 = vsub.f32 %v2646_v45, %v2668_v11  ;;  %v2686_v9 = vsel %vm481_vm2, %v2677_v5, 0.0 }
0x14f9   :  { %2687 = vadd.xlane.f32.xlu1 %v2686_v9 }
0x14fa   :  { %v2678_v12 = vmul.f32 %v2673_v17, %v2673_v17 }
0x14fc   :  { %v2689_v19 = vsel %vm481_vm2, %v2678_v12, 0.0 }
0x14fd   :  { %2690 = vadd.xlane.f32.xlu0 %v2689_v19 }
0x1522   :  { %v2664_v26 = vpop.xlane.xlu0 %2663 }
0x1523   :  { %v2669_v15 = vmul.f32 0.03125, %v2664_v26 }
0x1525   :  { %v2674_v22 = vsub.f32 %v2647_v55, %v2669_v15 }
0x1527   :  { %v2679_v53 = vmul.f32 %v2674_v22, %v2674_v22 }
0x1529   :  { %v2692_v34 = vsel %vm481_vm2, %v2679_v53, 0.0 }
0x152a   :  { %2693 = vadd.xlane.f32.xlu1 %v2692_v34 }
0x1577   :  { %v2682_v23 = vpop.xlane.xlu1 %2681 }
0x1578   :  { %v2695_v25 = vmul.f32 0.03125, %v2682_v23 }
0x157a   :  { %v2700_v35 = vadd.f32 1e-12, %v2695_v25 }
0x157b   :  { %v2685_v54 = vpop.xlane.xlu0 %2684 }
0x157c   :  { %4331 = vrsqrt.f32 %v2700_v35  ;;  %v2696_v37 = vmul.f32 0.03125, %v2685_v54 }
0x157e   :  { %v2701_v38 = vadd.f32 1e-12, %v2696_v37 }
0x1580   :  { %4333 = vrsqrt.f32 %v2701_v38 }
0x1582   :  { %v2688_v40 = vpop.xlane.xlu1 %2687 }
0x1583   :  { %v2697_v46 = vmul.f32 0.03125, %v2688_v40 }
0x1585   :  { %v2702_v44 = vadd.f32 1e-12, %v2697_v46 }
0x1586   :  { %v2691_v48 = vpop.xlane.xlu0 %2690 }
0x1587   :  { %4335 = vrsqrt.f32 %v2702_v44  ;;  %v2698_v50 = vmul.f32 0.03125, %v2691_v48 }
0x1589   :  { %v4332_v52 = vpop.eup %4331  ;;  %v2703_v57 = vadd.f32 1e-12, %v2698_v50 }
0x158a   :  { %v2710_v58 = vmul.f32 %v4332_v52, %v2670_v7 }
0x158b   :  { %4337 = vrsqrt.f32 %v2703_v57 }
0x158c   :  { %v2721_v27 = vmul.f32 %v3548_v59, %v2710_v58 }
0x158d   :  { %v4334_v0 = vpop.eup %4333 }
0x158e   :  { %v2711_v1 = vmul.f32 %v4334_v0, %v2671_v24  ;;  %v5487_v51 = vadd.f32 %v3549_v3, %v2721_v27  ;;  %v4206_v24 = vld [vmem:[%s5653_s26 + $0x8] sm:$0xff]  }
0x158f   :  { %4077 = vmatpush3.bf16.msra.mxu0 %v4206_v24 }
0x1590   :  { %v2722_v28 = vmul.f32 %v3548_v59, %v2711_v1  ;;  %4078 = vmatprep.subr.bf16.mxu0 %v4586_v36 }
0x1592   :  { %v5489_v16 = vadd.f32 %v3549_v3, %v2722_v28 }
0x1593   :  { %4079 = vmatpush3.bf16.msra.mxu0 %v4207_v31 }
0x1594   :  { %v4336_v33 = vpop.eup %4335  ;;  %v2741_v29 = vpack.c.bf16 %v5489_v16, %v5487_v51  ;;  %4108 = vmatprep.subr.bf16.mxu0 %v4586_v36 }
0x1595   :  { %v2712_v49 = vmul.f32 %v4336_v33, %v2672_v4 }
0x1596   :  { %4061 = vmatmul.mubr.msk.bf16.vlgmr.msra.gmra.mxu1 %vm481_vm2, %v2741_v29 }
0x1597   :  { %4064 = vmatprep.mubr.msk.bf16.mxu1 %vm4587_vm1, %v4586_v36  ;;  %v2723_v45 = vmul.f32 %v3548_v59, %v2712_v49 }
0x1598   :  { %v4338_v39 = vpop.eup %4337 }
0x1599   :  { %v2713_v8 = vmul.f32 %v4338_v39, %v2673_v17  ;;  %v5496_v56 = vadd.f32 %v3549_v3, %v2723_v45 }
0x159b   :  { %v2724_v41 = vmul.f32 %v3548_v59, %v2713_v8 }
0x159d   :  { %v5498_v60 = vadd.f32 %v3549_v3, %v2724_v41 }
0x159f   :  { %v2742_v55 = vpack.c.bf16 %v5498_v60, %v5496_v56 }
0x15a1   :  { %4065 = vmatmul.mubr.msk.bf16.gmra.mxu1 %vm481_vm2, %v2742_v55 }
0x15a2   :  { %4068 = vmatprep.mubr.msk.bf16.mxu1 %vm4587_vm1, %v4586_v36 }
0x15b3   :  { %v2694_v43 = vpop.xlane.xlu1 %2693 }
0x15b4   :  { %v2699_v32 = vmul.f32 0.03125, %v2694_v43 }
0x15b6   :  { %v2704_v6 = vadd.f32 1e-12, %v2699_v32 }
0x15b8   :  { %4339 = vrsqrt.f32 %v2704_v6 }
0x15c5   :  { %v4340_v18 = vpop.eup %4339 }
0x15c6   :  { %v2714_v30 = vmul.f32 %v4340_v18, %v2674_v22 }
0x15c8   :  { %v2725_v42 = vmul.f32 %v3548_v59, %v2714_v30 }
0x15ca   :  { %v5505_v7 = vadd.f32 %v3549_v3, %v2725_v42 }
0x15cc   :  { %v2743_v13 = vpack.c.bf16 %v5505_v7, %v5505_v7 }
0x15ce   :  { %4069 = vmatmul.mubr.msk.bf16.gmra.mxu1 %vm481_vm2, %v2743_v13 }
0x15cf   :  { %4096 = vmatprep.mubr.msk.bf16.mxu1 %vm4587_vm1, %v4586_v36 }
0x1656   :  { %v2806_v14 = vpop.f32.mrf.mxu1 }
0x1657   :  { %v2807_v47 = vadd.f32 %v3550_v63, %v2806_v14 }
0x1658   :  { %v4062_v61 = vpop.f32.mrf.mxu1 }
0x1659   :  { %v2833_v4 = vmul.f32 0.044715, %v2807_v47  ;;  %v2828_v1 = vmul.f32 0.5, %v2807_v47 }
0x165a   :  { %v2809_v10 = vpop.f32.mrf.mxu1 }
0x165b   :  { %v2838_v11 = vmul.f32 %v2833_v4, %v2807_v47  ;;  %v2810_v5 = vadd.f32 %v3550_v63, %v2809_v10 }
0x165c   :  { %v4063_v17 = vpop.f32.mrf.mxu1 }
0x165d   :  { %v2843_v9 = vmul.f32 %v2838_v11, %v2807_v47  ;;  %v2834_v12 = vmul.f32 0.044715, %v2810_v5  ;;  %v2829_v3 = vmul.f32 0.5, %v2810_v5 }
0x165f   :  { %v2848_v19 = vadd.f32 %v2843_v9, %v2807_v47  ;;  %v2839_v20 = vmul.f32 %v2834_v12, %v2810_v5 }
0x1661   :  { %v2853_v21 = vmul.f32 0.7978846, %v2848_v19  ;;  %v2844_v26 = vmul.f32 %v2839_v20, %v2810_v5  ;;  %v2814_v15 = vpop.f32.mrf.mxu1 }
0x1662   :  { %v2815_v22 = vadd.f32 %v3550_v63, %v2814_v15 }
0x1663   :  { %4341 = vtanh.f32 %v2853_v21  ;;  %v2849_v53 = vadd.f32 %v2844_v26, %v2810_v5  ;;  %v4066_v34 = vpop.f32.mrf.mxu1 }
0x1664   :  { %v2835_v23 = vmul.f32 0.044715, %v2815_v22  ;;  %v2830_v41 = vmul.f32 0.5, %v2815_v22 }
0x1665   :  { %v2854_v25 = vmul.f32 0.7978846, %v2849_v53  ;;  %v2817_v35 = vpop.f32.mrf.mxu1 }
0x1666   :  { %v2840_v54 = vmul.f32 %v2835_v23, %v2815_v22  ;;  %v2818_v37 = vadd.f32 %v3550_v63, %v2817_v35 }
0x1667   :  { %4343 = vtanh.f32 %v2854_v25  ;;  %v4067_v38 = vpop.f32.mrf.mxu1 }
0x1668   :  { %v2845_v40 = vmul.f32 %v2840_v54, %v2815_v22  ;;  %v2836_v46 = vmul.f32 0.044715, %v2818_v37  ;;  %v2831_v55 = vmul.f32 0.5, %v2818_v37 }
0x166a   :  { %v2850_v44 = vadd.f32 %v2845_v40, %v2815_v22  ;;  %v2841_v48 = vmul.f32 %v2836_v46, %v2818_v37 }
0x166c   :  { %v2855_v50 = vmul.f32 0.7978846, %v2850_v44  ;;  %v2846_v52 = vmul.f32 %v2841_v48, %v2818_v37 }
0x166e   :  { %4345 = vtanh.f32 %v2855_v50  ;;  %v2851_v57 = vadd.f32 %v2846_v52, %v2818_v37 }
0x1670   :  { %v4342_v58 = vpop.eup %4341  ;;  %v2856_v59 = vmul.f32 0.7978846, %v2851_v57 }
0x1671   :  { %v2863_v0 = vadd.f32 1.0, %v4342_v58 }
0x1672   :  { %4347 = vtanh.f32 %v2856_v59 }
0x1673   :  { %v2868_v33 = vmul.f32 %v2863_v0, %v2828_v1 }
0x1674   :  { %v4344_v27 = vpop.eup %4343 }
0x1675   :  { %v2864_v28 = vadd.f32 1.0, %v4344_v27 }
0x1677   :  { %v2869_v29 = vmul.f32 %v2864_v28, %v2829_v3 }
0x1679   :  { %v2881_v49 = vpack.c.bf16 %v2869_v29, %v2868_v33 }
0x167b   :  { %v4346_v39 = vpop.eup %4345  ;;  %4081 = vmatmul.mubr.msk.bf16.vlgmr.msra.gmra.mxu0 %vm1607_vm5, %v2881_v49 }
0x167c   :  { %4084 = vmatprep.mubr.msk.bf16.mxu0 %vm4587_vm1, %v4586_v36  ;;  %v2865_v8 = vadd.f32 1.0, %v4346_v39 }
0x167e   :  { %v2870_v32 = vmul.f32 %v2865_v8, %v2830_v41 }
0x167f   :  { %v4348_v45 = vpop.eup %4347 }
0x1680   :  { %v2866_v43 = vadd.f32 1.0, %v4348_v45 }
0x1682   :  { %v2871_v6 = vmul.f32 %v2866_v43, %v2831_v55 }
0x1684   :  { %v2882_v18 = vpack.c.bf16 %v2871_v6, %v2870_v32 }
0x1686   :  { %4085 = vmatmul.mubr.msk.bf16.gmra.mxu0 %vm1607_vm5, %v2882_v18 }
0x1687   :  { %4088 = vmatprep.mubr.msk.bf16.mxu0 %vm4587_vm1, %v4586_v36 }
0x168e   :  { %v2822_v30 = vpop.f32.mrf.mxu1 }
0x168f   :  { %v2823_v42 = vadd.f32 %v3550_v63, %v2822_v30  ;;  %v3556_v63 = vld [vmem:[#allocation2] ss:$0 sm:$0xff]  ;;  %v4208_v30 = vld [vmem:[%s5655_s5 + $0x8] sm:$0xff]  }
0x1690   :  { %v4070_v13 = vpop.f32.mrf.mxu1  ;;  %4093 = vmatpush3.bf16.msra.mxu1 %v4208_v30 }
0x1691   :  { %v2837_v2 = vmul.f32 0.044715, %v2823_v42  ;;  %v2832_v10 = vmul.f32 0.5, %v2823_v42  ;;  %4094 = vmatprep.subr.bf16.mxu1 %v4586_v36 }
0x1692   :  { %v2825_v62 = vpop.f32.mrf.mxu1 }
0x1693   :  { %v2842_v24 = vmul.f32 %v2837_v2, %v2823_v42 }
0x1694   :  { %v4071_v31 = vpop.f32.mrf.mxu1 }
0x1695   :  { %v2847_v14 = vmul.f32 %v2842_v24, %v2823_v42 }
0x1697   :  { %v2852_v47 = vadd.f32 %v2847_v14, %v2823_v42  ;;  %v4209_v42 = vld [vmem:[%s5655_s5] sm:$0xff]  }
0x1698   :  { %4095 = vmatpush3.bf16.msra.mxu1 %v4209_v42 }
0x1699   :  { %v2857_v61 = vmul.f32 0.7978846, %v2852_v47 }
0x169b   :  { %4349 = vtanh.f32 %v2857_v61 }
0x16a8   :  { %v4350_v4 = vpop.eup %4349 }
0x16a9   :  { %v2867_v11 = vadd.f32 1.0, %v4350_v4 }
0x16ab   :  { %v2872_v5 = vmul.f32 %v2867_v11, %v2832_v10 }
0x16ad   :  { %v2883_v17 = vpack.c.bf16 %v2872_v5, %v2872_v5 }
0x16af   :  { %4089 = vmatmul.mubr.msk.bf16.gmra.mxu0 %vm1607_vm5, %v2883_v17 }
0x16b0   :  { %4110 = vmatprep.mubr.msk.bf16.mxu0 %vm4587_vm1, %v4586_v36 }
0x173b   :  { %v2958_v9 = vpop.f32.mrf.mxu0 }
0x173c   :  { %v2959_v12 = vadd.f32 %v3556_v63, %v2958_v9 }
0x173d   :  { %v4082_v19 = vpop.f32.mrf.mxu0 }
0x173e   :  { %v2980_v20 = vadd.f32 %v2959_v12, %v5487_v51 }
0x173f   :  { %v2961_v21 = vpop.f32.mrf.mxu0 }
0x1740   :  { %v2962_v26 = vadd.f32 %v3556_v63, %v2961_v21  ;;  %v2987_v15 = vsel %vm481_vm2, %v2980_v20, 0.0 }
0x1741   :  { %2988 = vadd.xlane.f32.xlu0 %v2987_v15  ;;  %v4083_v22 = vpop.f32.mrf.mxu0  ;;  %v3565_v15 = vld [vmem:[#allocation6] ss:$0 sm:$0xff] }
0x1742   :  { %v2981_v53 = vadd.f32 %v2962_v26, %v5489_v16 }
0x1744   :  { %v2990_v34 = vsel %vm481_vm2, %v2981_v53, 0.0 }
0x1745   :  { %2991 = vadd.xlane.f32.xlu1 %v2990_v34 }
0x1746   :  { %v2966_v23 = vpop.f32.mrf.mxu0 }
0x1747   :  { %v2967_v25 = vadd.f32 %v3556_v63, %v2966_v23 }
0x1748   :  { %v4086_v35 = vpop.f32.mrf.mxu0 }
0x1749   :  { %v2982_v54 = vadd.f32 %v2967_v25, %v5496_v56 }
0x174a   :  { %v2969_v37 = vpop.f32.mrf.mxu0 }
0x174b   :  { %v2970_v38 = vadd.f32 %v3556_v63, %v2969_v37  ;;  %v2993_v51 = vsel %vm481_vm2, %v2982_v54, 0.0 }
0x174c   :  { %2994 = vadd.xlane.f32.xlu0 %v2993_v51  ;;  %v4087_v40 = vpop.f32.mrf.mxu0 }
0x174d   :  { %v2983_v46 = vadd.f32 %v2970_v38, %v5498_v60 }
0x174f   :  { %v2996_v44 = vsel %vm481_vm2, %v2983_v46, 0.0 }
0x1750   :  { %2997 = vadd.xlane.f32.xlu1 %v2996_v44 }
0x176f   :  { %v2974_v16 = vpop.f32.mrf.mxu0 }
0x1770   :  { %v2975_v48 = vadd.f32 %v3556_v63, %v2974_v16 }
0x1771   :  { %v4090_v50 = vpop.f32.mrf.mxu0 }
0x1772   :  { %v2984_v52 = vadd.f32 %v2975_v48, %v5505_v7 }
0x1773   :  { %v2977_v57 = vpop.f32.mrf.mxu0 }
0x1774   :  { %v2999_v58 = vsel %vm481_vm2, %v2984_v52, 0.0 }
0x1775   :  { %3000 = vadd.xlane.f32.xlu0 %v2999_v58  ;;  %v4091_v56 = vpop.f32.mrf.mxu0 }
0x17ca   :  { %v2989_v59 = vpop.xlane.xlu0 %2988 }
0x17cb   :  { %v3002_v0 = vmul.f32 0.03125, %v2989_v59 }
0x17cd   :  { %v3007_v27 = vsub.f32 %v2980_v20, %v3002_v0  ;;  %v3564_v20 = vld [vmem:[#allocation4] ss:$0 sm:$0xff] }
0x17ce   :  { %v2992_v1 = vpop.xlane.xlu1 %2991 }
0x17cf   :  { %v3003_v3 = vmul.f32 0.03125, %v2992_v1  ;;  %v3012_v28 = vmul.f32 %v3007_v27, %v3007_v27 }
0x17d1   :  { %v3008_v60 = vsub.f32 %v2981_v53, %v3003_v3  ;;  %v3017_v33 = vsel %vm481_vm2, %v3012_v28, 0.0  ;;  %v3566_v3 = vld [vmem:[#allocation7] ss:$0 sm:$0xff] }
0x17d2   :  { %3018 = vadd.xlane.f32.xlu1 %v3017_v33 }
0x17d3   :  { %v3013_v29 = vmul.f32 %v3008_v60, %v3008_v60 }
0x17d5   :  { %v2995_v49 = vpop.xlane.xlu0 %2994  ;;  %v3020_v7 = vsel %vm481_vm2, %v3013_v29, 0.0 }
0x17d6   :  { %v3004_v39 = vmul.f32 0.03125, %v2995_v49  ;;  %3021 = vadd.xlane.f32.xlu0 %v3020_v7 }
0x17d8   :  { %v3009_v8 = vsub.f32 %v2982_v54, %v3004_v39 }
0x17d9   :  { %v2998_v45 = vpop.xlane.xlu1 %2997 }
0x17da   :  { %v3005_v41 = vmul.f32 0.03125, %v2998_v45  ;;  %v3014_v55 = vmul.f32 %v3009_v8, %v3009_v8 }
0x17dc   :  { %v3010_v43 = vsub.f32 %v2983_v46, %v3005_v41  ;;  %v3023_v32 = vsel %vm481_vm2, %v3014_v55, 0.0 }
0x17dd   :  { %3024 = vadd.xlane.f32.xlu1 %v3023_v32 }
0x17de   :  { %v3015_v6 = vmul.f32 %v3010_v43, %v3010_v43 }
0x17e0   :  { %v3026_v18 = vsel %vm481_vm2, %v3015_v6, 0.0 }
0x17e1   :  { %3027 = vadd.xlane.f32.xlu0 %v3026_v18 }
0x17fe   :  { %v3001_v13 = vpop.xlane.xlu0 %3000 }
0x17ff   :  { %v3006_v2 = vmul.f32 0.03125, %v3001_v13 }
0x1801   :  { %v3011_v62 = vsub.f32 %v2984_v52, %v3006_v2 }
0x1803   :  { %v3016_v24 = vmul.f32 %v3011_v62, %v3011_v62 }
0x1805   :  { %v3029_v31 = vsel %vm481_vm2, %v3016_v24, 0.0 }
0x1806   :  { %3030 = vadd.xlane.f32.xlu1 %v3029_v31 }
0x185b   :  { %v3019_v14 = vpop.xlane.xlu1 %3018 }
0x185c   :  { %v3032_v47 = vmul.f32 0.03125, %v3019_v14 }
0x185e   :  { %v3037_v61 = vadd.f32 1e-12, %v3032_v47 }
0x185f   :  { %v3022_v4 = vpop.xlane.xlu0 %3021 }
0x1860   :  { %4351 = vrsqrt.f32 %v3037_v61  ;;  %v3033_v10 = vmul.f32 0.03125, %v3022_v4 }
0x1862   :  { %v3038_v11 = vadd.f32 1e-12, %v3033_v10 }
0x1864   :  { %4353 = vrsqrt.f32 %v3038_v11 }
0x1866   :  { %v3025_v5 = vpop.xlane.xlu1 %3024 }
0x1867   :  { %v3034_v17 = vmul.f32 0.03125, %v3025_v5 }
0x1869   :  { %v3039_v63 = vadd.f32 1e-12, %v3034_v17 }
0x186a   :  { %v3028_v9 = vpop.xlane.xlu0 %3027 }
0x186b   :  { %4355 = vrsqrt.f32 %v3039_v63  ;;  %v3035_v12 = vmul.f32 0.03125, %v3028_v9 }
0x186d   :  { %v4352_v19 = vpop.eup %4351  ;;  %v3040_v21 = vadd.f32 1e-12, %v3035_v12 }
0x186e   :  { %v3047_v26 = vmul.f32 %v4352_v19, %v3007_v27 }
0x186f   :  { %4357 = vrsqrt.f32 %v3040_v21 }
0x1870   :  { %v3058_v22 = vmul.f32 %v3564_v20, %v3047_v26 }
0x1871   :  { %v4354_v53 = vpop.eup %4353 }
0x1872   :  { %v3069_v34 = vadd.f32 %v3565_v15, %v3058_v22  ;;  %v3048_v23 = vmul.f32 %v4354_v53, %v3008_v60 }
0x1874   :  { %3074 = vst.msk [vmem:[%s4817_s3] sm:$0xff] %vm481_vm2, %v3069_v34  ;;  %v3059_v25 = vmul.f32 %v3564_v20, %v3048_v23 }
0x1876   :  { %v3070_v35 = vadd.f32 %v3565_v15, %v3059_v25 }
0x1878   :  { %v4356_v54 = vpop.eup %4355  ;;  %3075 = vst.msk [vmem:[%s4817_s3 + $0x8] sm:$0xff] %vm481_vm2, %v3070_v35  ;;  %v3083_v37 = vpack.c.bf16 %v3070_v35, %v3069_v34 }
0x1879   :  { %v3049_v38 = vmul.f32 %v4356_v54, %v3009_v8 }
0x187a   :  { %4097 = vmatmul.mubr.msk.bf16.vlgmr.msra.gmra.mxu1 %vm481_vm2, %v3083_v37 }
0x187b   :  { %4100 = vmatprep.mubr.msk.bf16.mxu1 %vm4587_vm1, %v4586_v36  ;;  %v3060_v51 = vmul.f32 %v3564_v20, %v3049_v38 }
0x187c   :  { %v4358_v40 = vpop.eup %4357 }
0x187d   :  { %v3050_v46 = vmul.f32 %v4358_v40, %v3010_v43  ;;  %v3071_v44 = vadd.f32 %v3565_v15, %v3060_v51 }
0x187f   :  { %v3061_v16 = vmul.f32 %v3564_v20, %v3050_v46  ;;  %3076 = vst.msk [vmem:[%s4817_s3 + $0x10] sm:$0xff] %vm481_vm2, %v3071_v44 }
0x1881   :  { %v3072_v48 = vadd.f32 %v3565_v15, %v3061_v16 }
0x1883   :  { %3077 = vst.msk [vmem:[%s4817_s3 + $0x18] sm:$0xff] %vm481_vm2, %v3072_v48  ;;  %v3084_v50 = vpack.c.bf16 %v3072_v48, %v3071_v44 }
0x1885   :  { %4101 = vmatmul.mubr.msk.bf16.gmra.mxu1 %vm481_vm2, %v3084_v50 }
0x1886   :  { %4104 = vmatprep.mubr.msk.bf16.mxu1 %vm4587_vm1, %v4586_v36 }
0x188f   :  { %v3031_v52 = vpop.xlane.xlu1 %3030 }
0x1890   :  { %v3036_v57 = vmul.f32 0.03125, %v3031_v52 }
0x1892   :  { %v3041_v58 = vadd.f32 1e-12, %v3036_v57 }
0x1894   :  { %4359 = vrsqrt.f32 %v3041_v58 }
0x18a1   :  { %v4360_v56 = vpop.eup %4359 }
0x18a2   :  { %v3051_v59 = vmul.f32 %v4360_v56, %v3011_v62 }
0x18a4   :  { %v3062_v0 = vmul.f32 %v3564_v20, %v3051_v59 }
0x18a6   :  { %v3073_v27 = vadd.f32 %v3565_v15, %v3062_v0 }
0x18a8   :  { %3078 = vst.msk [vmem:[%s4817_s3 + $0x20] sm:$0xff] %vm481_vm2, %v3073_v27  ;;  %v3085_v1 = vpack.c.bf16 %v3073_v27, %v3073_v27 }
0x18aa   :  { %4105 = vmatmul.mubr.msk.bf16.gmra.mxu1 %vm481_vm2, %v3085_v1 }
0x193a   :  { %v3147_v28 = vpop.f32.mrf.mxu1 }
0x193b   :  { %v3148_v60 = vadd.f32 %v3566_v3, %v3147_v28 }
0x193c   :  { %v4098_v33 = vpop.f32.mrf.mxu1 }
0x193d   :  { %v3174_v29 = vmul.f32 0.044715, %v3148_v60  ;;  %v3169_v19 = vmul.f32 0.5, %v3148_v60 }
0x193e   :  { %v3150_v49 = vpop.f32.mrf.mxu1 }
0x193f   :  { %v3179_v7 = vmul.f32 %v3174_v29, %v3148_v60  ;;  %v3151_v39 = vadd.f32 %v3566_v3, %v3150_v49 }
0x1940   :  { %v4099_v8 = vpop.f32.mrf.mxu1 }
0x1941   :  { %v3175_v45 = vmul.f32 0.044715, %v3151_v39  ;;  %v3184_v41 = vmul.f32 %v3179_v7, %v3148_v60  ;;  %v3170_v22 = vmul.f32 0.5, %v3151_v39 }
0x1943   :  { %v3180_v55 = vmul.f32 %v3175_v45, %v3151_v39  ;;  %v3189_v43 = vadd.f32 %v3184_v41, %v3148_v60 }
0x1945   :  { %v3155_v32 = vpop.f32.mrf.mxu1  ;;  %v3194_v6 = vmul.f32 0.7978846, %v3189_v43  ;;  %v3185_v18 = vmul.f32 %v3180_v55, %v3151_v39 }
0x1946   :  { %v3156_v30 = vadd.f32 %v3566_v3, %v3155_v32 }
0x1947   :  { %v4102_v42 = vpop.f32.mrf.mxu1  ;;  %4361 = vtanh.f32 %v3194_v6  ;;  %v3190_v13 = vadd.f32 %v3185_v18, %v3151_v39 }
0x1948   :  { %v3176_v2 = vmul.f32 0.044715, %v3156_v30  ;;  %v3171_v35 = vmul.f32 0.5, %v3156_v30 }
0x1949   :  { %v3158_v62 = vpop.f32.mrf.mxu1  ;;  %v3195_v24 = vmul.f32 0.7978846, %v3190_v13 }
0x194a   :  { %v3181_v31 = vmul.f32 %v3176_v2, %v3156_v30  ;;  %v3159_v14 = vadd.f32 %v3566_v3, %v3158_v62 }
0x194b   :  { %v4103_v47 = vpop.f32.mrf.mxu1  ;;  %4363 = vtanh.f32 %v3195_v24 }
0x194c   :  { %v3177_v61 = vmul.f32 0.044715, %v3159_v14  ;;  %v3186_v4 = vmul.f32 %v3181_v31, %v3156_v30  ;;  %v3172_v40 = vmul.f32 0.5, %v3159_v14 }
0x194e   :  { %v3182_v10 = vmul.f32 %v3177_v61, %v3159_v14  ;;  %v3191_v11 = vadd.f32 %v3186_v4, %v3156_v30  ;;  %v4210_v61 = vld [vmem:[%s4807_s12] sm:$0xff]  }
0x194f   :  { %4109 = vmatpush3.bf16.msra.mxu0 %v4210_v61 }
0x1950   :  { %v3196_v5 = vmul.f32 0.7978846, %v3191_v11  ;;  %v3187_v17 = vmul.f32 %v3182_v10, %v3159_v14 }
0x1952   :  { %4365 = vtanh.f32 %v3196_v5  ;;  %v3192_v63 = vadd.f32 %v3187_v17, %v3159_v14 }
0x1954   :  { %v4362_v9 = vpop.eup %4361  ;;  %v3197_v12 = vmul.f32 0.7978846, %v3192_v63 }
0x1955   :  { %v3204_v20 = vadd.f32 1.0, %v4362_v9 }
0x1956   :  { %4367 = vtanh.f32 %v3197_v12 }
0x1957   :  { %v3209_v21 = vmul.f32 %v3204_v20, %v3169_v19 }
0x1958   :  { %v4364_v26 = vpop.eup %4363 }
0x1959   :  { %v3214_v15 = vsel %vm284_vm0, %v3209_v21, 0.0  ;;  %v3205_v53 = vadd.f32 1.0, %v4364_v26 }
0x195a   :  { %3215 = vadd.xlane.f32.xlu0 %v3214_v15 }
0x195b   :  { %v3210_v34 = vmul.f32 %v3205_v53, %v3170_v22 }
0x195d   :  { %v3217_v23 = vsel %vm284_vm0, %v3210_v34, 0.0 }
0x195e   :  { %3218 = vadd.xlane.f32.xlu1 %v3217_v23 }
0x195f   :  { %v4366_v25 = vpop.eup %4365 }
0x1960   :  { %v3206_v54 = vadd.f32 1.0, %v4366_v25 }
0x1962   :  { %v3211_v37 = vmul.f32 %v3206_v54, %v3171_v35  ;;  %v3572_v54 = vld [vmem:[#allocation9] ss:$0 sm:$0xff] }
0x1963   :  { %v4368_v38 = vpop.eup %4367 }
0x1964   :  { %v3220_v51 = vsel %vm284_vm0, %v3211_v37, 0.0  ;;  %v3207_v46 = vadd.f32 1.0, %v4368_v38 }
0x1965   :  { %3221 = vadd.xlane.f32.xlu0 %v3220_v51 }
0x1966   :  { %v3212_v44 = vmul.f32 %v3207_v46, %v3172_v40  ;;  %v3573_v40 = vld [vmem:[#allocation10] ss:$0 sm:$0xff] }
0x1968   :  { %v3223_v16 = vsel %vm284_vm0, %v3212_v44, 0.0 }
0x1969   :  { %3224 = vadd.xlane.f32.xlu1 %v3223_v16 }
0x196a   :  { %v3163_v48 = vpop.f32.mrf.mxu1 }
0x196b   :  { %v3164_v50 = vadd.f32 %v3566_v3, %v3163_v48 }
0x196c   :  { %v4106_v52 = vpop.f32.mrf.mxu1 }
0x196d   :  { %v3178_v57 = vmul.f32 0.044715, %v3164_v50  ;;  %v3173_v60 = vmul.f32 0.5, %v3164_v50 }
0x196e   :  { %v3166_v58 = vpop.f32.mrf.mxu1 }
0x196f   :  { %v3183_v56 = vmul.f32 %v3178_v57, %v3164_v50 }
0x1970   :  { %v4107_v59 = vpop.f32.mrf.mxu1 }
0x1971   :  { %v3188_v0 = vmul.f32 %v3183_v56, %v3164_v50 }
0x1973   :  { %v3193_v27 = vadd.f32 %v3188_v0, %v3164_v50 }
0x1975   :  { %v3198_v1 = vmul.f32 0.7978846, %v3193_v27 }
0x1977   :  { %4369 = vtanh.f32 %v3198_v1 }
0x1984   :  { %v4370_v28 = vpop.eup %4369 }
0x1985   :  { %v3208_v33 = vadd.f32 1.0, %v4370_v28 }
0x1987   :  { %v3213_v29 = vmul.f32 %v3208_v33, %v3173_v60 }
0x1989   :  { %v3226_v49 = vsel %vm284_vm0, %v3213_v29, 0.0 }
0x198a   :  { %3227 = vadd.xlane.f32.xlu0 %v3226_v49 }
0x19e3   :  { %v3216_v7 = vpop.xlane.xlu0 %3215 }
0x19e4   :  { %v3229_v39 = vmul.f32 0.0625, %v3216_v7 }
0x19e6   :  { %v3234_v8 = vsub.f32 %v3209_v21, %v3229_v39 }
0x19e7   :  { %v3219_v3 = vpop.xlane.xlu1 %3218 }
0x19e8   :  { %v3230_v45 = vmul.f32 0.0625, %v3219_v3  ;;  %v3239_v41 = vmul.f32 %v3234_v8, %v3234_v8  ;;  %v3574_v3 = vld [vmem:[#allocation12] ss:$0 sm:$0xff] }
0x19ea   :  { %v3235_v55 = vsub.f32 %v3210_v34, %v3230_v45  ;;  %v3244_v43 = vsel %vm284_vm0, %v3239_v41, 0.0 }
0x19eb   :  { %3245 = vadd.xlane.f32.xlu1 %v3244_v43 }
0x19ec   :  { %v3240_v32 = vmul.f32 %v3235_v55, %v3235_v55 }
0x19ee   :  { %v3222_v6 = vpop.xlane.xlu0 %3221  ;;  %v3247_v18 = vsel %vm284_vm0, %v3240_v32, 0.0 }
0x19ef   :  { %v3231_v30 = vmul.f32 0.0625, %v3222_v6  ;;  %3248 = vadd.xlane.f32.xlu0 %v3247_v18 }
0x19f1   :  { %v3236_v42 = vsub.f32 %v3211_v37, %v3231_v30 }
0x19f2   :  { %v3225_v13 = vpop.xlane.xlu1 %3224 }
0x19f3   :  { %v3232_v2 = vmul.f32 0.0625, %v3225_v13  ;;  %v3241_v62 = vmul.f32 %v3236_v42, %v3236_v42 }
0x19f5   :  { %v3237_v24 = vsub.f32 %v3212_v44, %v3232_v2  ;;  %v3250_v31 = vsel %vm284_vm0, %v3241_v62, 0.0 }
0x19f6   :  { %3251 = vadd.xlane.f32.xlu1 %v3250_v31 }
0x19f7   :  { %v3242_v14 = vmul.f32 %v3237_v24, %v3237_v24 }
0x19f9   :  { %v3253_v47 = vsel %vm284_vm0, %v3242_v14, 0.0 }
0x19fa   :  { %3254 = vadd.xlane.f32.xlu0 %v3253_v47 }
0x1a13   :  { %v3228_v4 = vpop.xlane.xlu0 %3227 }
0x1a14   :  { %v3233_v10 = vmul.f32 0.0625, %v3228_v4 }
0x1a16   :  { %v3238_v11 = vsub.f32 %v3213_v29, %v3233_v10 }
0x1a18   :  { %v3243_v5 = vmul.f32 %v3238_v11, %v3238_v11 }
0x1a1a   :  { %v3256_v17 = vsel %vm284_vm0, %v3243_v5, 0.0 }
0x1a1b   :  { %3257 = vadd.xlane.f32.xlu1 %v3256_v17 }
0x1a74   :  { %v3246_v63 = vpop.xlane.xlu1 %3245 }
0x1a75   :  { %v3259_v9 = vmul.f32 0.0625, %v3246_v63 }
0x1a77   :  { %v3264_v12 = vadd.f32 1e-12, %v3259_v9 }
0x1a78   :  { %v3249_v19 = vpop.xlane.xlu0 %3248 }
0x1a79   :  { %4371 = vrsqrt.f32 %v3264_v12  ;;  %v3260_v20 = vmul.f32 0.0625, %v3249_v19 }
0x1a7b   :  { %v3265_v21 = vadd.f32 1e-12, %v3260_v20 }
0x1a7d   :  { %4373 = vrsqrt.f32 %v3265_v21 }
0x1a7f   :  { %v3252_v26 = vpop.xlane.xlu1 %3251 }
0x1a80   :  { %v3261_v15 = vmul.f32 0.0625, %v3252_v26 }
0x1a82   :  { %v3266_v22 = vadd.f32 1e-12, %v3261_v15 }
0x1a83   :  { %v3255_v53 = vpop.xlane.xlu0 %3254 }
0x1a84   :  { %4375 = vrsqrt.f32 %v3266_v22  ;;  %v3262_v34 = vmul.f32 0.0625, %v3255_v53 }
0x1a86   :  { %v4372_v23 = vpop.eup %4371  ;;  %v3267_v25 = vadd.f32 1e-12, %v3262_v34 }
0x1a87   :  { %v3274_v35 = vmul.f32 %v4372_v23, %v3234_v8 }
0x1a88   :  { %4377 = vrsqrt.f32 %v3267_v25 }
0x1a89   :  { %v3285_v38 = vmul.f32 %v3572_v54, %v3274_v35 }
0x1a8a   :  { %v4374_v37 = vpop.eup %4373 }
0x1a8b   :  { %v3275_v51 = vmul.f32 %v4374_v37, %v3235_v55  ;;  %v3296_v44 = vadd.f32 %v3573_v40, %v3285_v38 }
0x1a8d   :  { %v3286_v46 = vmul.f32 %v3572_v54, %v3275_v51 }
0x1a8f   :  { %v3297_v16 = vadd.f32 %v3573_v40, %v3286_v46 }
0x1a91   :  { %v4376_v48 = vpop.eup %4375  ;;  %v3303_v50 = vpack.c.bf16 %v3297_v16, %v3296_v44 }
0x1a92   :  { %v3276_v52 = vmul.f32 %v4376_v48, %v3236_v42 }
0x1a93   :  { %4111 = vmatmul.mubr.msk.bf16.vlgmr.msra.gmra.mxu0 %vm284_vm0, %v3303_v50 }
0x1a94   :  { %4114 = vmatprep.mubr.msk.bf16.mxu0 %vm4587_vm1, %v4586_v36  ;;  %v3287_v56 = vmul.f32 %v3572_v54, %v3276_v52 }
0x1a95   :  { %v4378_v57 = vpop.eup %4377 }
0x1a96   :  { %v3277_v58 = vmul.f32 %v4378_v57, %v3237_v24  ;;  %v3298_v0 = vadd.f32 %v3573_v40, %v3287_v56 }
0x1a98   :  { %v3288_v59 = vmul.f32 %v3572_v54, %v3277_v58 }
0x1a9a   :  { %v3299_v27 = vadd.f32 %v3573_v40, %v3288_v59 }
0x1a9c   :  { %v3304_v1 = vpack.c.bf16 %v3299_v27, %v3298_v0 }
0x1a9e   :  { %4115 = vmatmul.mubr.msk.bf16.gmra.mxu0 %vm284_vm0, %v3304_v1 }
0x1a9f   :  { %4118 = vmatprep.mubr.msk.bf16.mxu0 %vm4587_vm1, %v4586_v36 }
0x1aa4   :  { %v3258_v28 = vpop.xlane.xlu1 %3257 }
0x1aa5   :  { %v3263_v60 = vmul.f32 0.0625, %v3258_v28 }
0x1aa7   :  { %v3268_v33 = vadd.f32 1e-12, %v3263_v60 }
0x1aa9   :  { %4379 = vrsqrt.f32 %v3268_v33 }
0x1ab6   :  { %v4380_v29 = vpop.eup %4379 }
0x1ab7   :  { %v3278_v49 = vmul.f32 %v4380_v29, %v3238_v11 }
0x1ab9   :  { %v3289_v7 = vmul.f32 %v3572_v54, %v3278_v49 }
0x1abb   :  { %v3300_v39 = vadd.f32 %v3573_v40, %v3289_v7 }
0x1abd   :  { %v3305_v8 = vpack.c.bf16 %v3300_v39, %v3300_v39 }
0x1abf   :  { %4119 = vmatmul.mubr.msk.bf16.gmra.mxu0 %vm284_vm0, %v3305_v8 }
0x1b53   :  { %v3361_v45 = vpop.f32.mrf.mxu0 }
0x1b54   :  { %v3362_v41 = vadd.f32 %v3574_v3, %v3361_v45 }
0x1b55   :  { %v4112_v55 = vpop.f32.mrf.mxu0 }
0x1b56   :  { %3383 = vst [vmem:[%s4822_s14] sm:$0xff] %v3362_v41 }
0x1b57   :  { %v3364_v36 = vpop.f32.mrf.mxu0 }
0x1b58   :  { %v3365_v43 = vadd.f32 %v3574_v3, %v3364_v36 }
0x1b59   :  { %v4113_v32 = vpop.f32.mrf.mxu0 }
0x1b5a   :  { %3384 = vst [vmem:[%s4822_s14 + $0x8] sm:$0xff] %v3365_v43 }
0x1b5e   :  { %v3369_v6 = vpop.f32.mrf.mxu0 }
0x1b5f   :  { %v3370_v18 = vadd.f32 %v3574_v3, %v3369_v6 }
0x1b60   :  { %v4116_v30 = vpop.f32.mrf.mxu0 }
0x1b61   :  { %3385 = vst [vmem:[%s4822_s14 + $0x10] sm:$0xff] %v3370_v18 }
0x1b62   :  { %v3372_v42 = vpop.f32.mrf.mxu0 }
0x1b63   :  { %v3373_v13 = vadd.f32 %v3574_v3, %v3372_v42 }
0x1b64   :  { %v4117_v2 = vpop.f32.mrf.mxu0 }
0x1b65   :  { %3386 = vst [vmem:[%s4822_s14 + $0x18] sm:$0xff] %v3373_v13 }
0x1b7f   :  { %v3377_v62 = vpop.f32.mrf.mxu0 }
0x1b80   :  { %v3378_v24 = vadd.f32 %v3574_v3, %v3377_v62 }
0x1b81   :  { %v4120_v31 = vpop.f32.mrf.mxu0 }
0x1b82   :  { %3387 = vst [vmem:[%s4822_s14 + $0x20] sm:$0xff] %v3378_v24 }
0x1b83   :  { %v3380_v14 = vpop.f32.mrf.mxu0 }
0x1b85   :  { %v4121_v47 = vpop.f32.mrf.mxu0 }
0x1b86   :  { %3396 = vsyncpa [#allocation3], 1 }
0x1b87   :  { %3397 = vsyncpa [#allocation5], 1 }
0x1b88   :  { %3398 = vsyncpa [#allocation8], 1 }
0x1b89   :  { %3399 = vsyncpa [#allocation11], 1 }

// kernel: pygc_forward.4
= control target key start
LH: loop header
LB: loop body
LE: loop exit
PB: predicated region body
PF: predicated region fallthrough
CT: control target
= control target key end

     0   :  { %s4091_s6 = smov 1   ;;  %s4092_s10 = smov 2   ;;  %s4856_s0 = inlined_call_operand.smem [shape: u32[37], index: -1, kind: input, shape index: {}] }
   0x1   :  { %s4146_s5 = sld [smem:[%s4856_s0]]   ;;  %s4093_s14 = smov 3  }
   0x2   :  { %s4151_s9 = sld [smem:[%s4856_s0 + %s4091_s6]]   ;;  %s4094_s18 = smov 4  }
   0x3   :  { %s4156_s13 = sld [smem:[%s4856_s0 + %s4092_s10]]   ;;  %s4095_s22 = smov 5  }
   0x4   :  { %s4161_s17 = sld [smem:[%s4856_s0 + %s4093_s14]]   ;;  %s4096_s26 = smov 6  }
   0x5   :  { %s4166_s21 = sld [smem:[%s4856_s0 + %s4094_s18]]   ;;  %s4097_s30 = smov 7  }
   0x6   :  { %s4171_s25 = sld [smem:[%s4856_s0 + %s4095_s22]]   ;;  %s4098_s4 = smov 8  }
   0x7   :  { %s4176_s29 = sld [smem:[%s4856_s0 + %s4096_s26]]   ;;  %s4099_s10 = smov 9  }
   0x8   :  { %s4181_s3 = sld [smem:[%s4856_s0 + %s4097_s30]]   ;;  %s4100_s15 = smov 10  }
   0x9   :  { %s4186_s8 = sld [smem:[%s4856_s0 + %s4098_s4]]   ;;  %s4101_s20 = smov 11  }
   0xa   :  { %s4191_s14 = sld [smem:[%s4856_s0 + %s4099_s10]]   ;;  %s4102_s26 = smov 12  }
   0xb   :  { %s4196_s19 = sld [smem:[%s4856_s0 + %s4100_s15]]   ;;  %s4103_s1 = smov 13  }
   0xc   :  { %s4201_s24 = sld [smem:[%s4856_s0 + %s4101_s20]]   ;;  %s4104_s7 = smov 14  }
   0xd   :  { %s4206_s30 = sld [smem:[%s4856_s0 + %s4102_s26]]   ;;  %s4105_s15 = smov 15  }
   0xe   :  { %s4211_s6 = sld [smem:[%s4856_s0 + %s4103_s1]]   ;;  %s4106_s22 = smov 16  }
   0xf   :  { %s4216_s12 = sld [smem:[%s4856_s0 + %s4104_s7]]   ;;  %s4107_s28 = smov 17  }
  0x10   :  { %s4221_s20 = sld [smem:[%s4856_s0 + %s4105_s15]]   ;;  %s4108_s7 = smov 18  }
  0x11   :  { %s4226_s27 = sld [smem:[%s4856_s0 + %s4106_s22]]   ;;  %s4109_s15 = smov 19  }
  0x12   :  { %s4231_s4 = sld [smem:[%s4856_s0 + %s4107_s28]]   ;;  %s4110_s22 = smov 20  }
  0x13   :  { %4865 = sst [smem:[#allocation13_spill]] %s4206_s30  ;;  %s4111_s28 = smov 21  }
  0x14   :  { %4866 = sst [smem:[#allocation14_spill]] %s4211_s6 }
  0x15   :  { %4867 = sst [smem:[#allocation15_spill]] %s4216_s12 }
  0x16   :  { %4868 = sst [smem:[#allocation16_spill]] %s4221_s20 }
  0x17   :  { %4869 = sst [smem:[#allocation17_spill]] %s4226_s27 }
  0x18   :  { %4870 = sst [smem:[#allocation18_spill]] %s4231_s4 }
  0x19   :  { %s4236_s6 = sld [smem:[%s4856_s0 + %s4108_s7]]   ;;  %s4112_s7 = smov 22  }
  0x1a   :  { %s4241_s20 = sld [smem:[%s4856_s0 + %s4109_s15]]   ;;  %s4113_s15 = smov 23  }
  0x1b   :  { %s4246_s30 = sld [smem:[%s4856_s0 + %s4110_s22]]   ;;  %s4114_s22 = smov 24  }
  0x1c   :  { %s4251_s4 = sld [smem:[%s4856_s0 + %s4111_s28]]   ;;  %s4115_s28 = smov 25  }
  0x1f   :  { %4871 = sst [smem:[#allocation19_spill]] %s4236_s6 }
  0x20   :  { %4872 = sst [smem:[#allocation20_spill]] %s4241_s20 }
  0x21   :  { %4873 = sst [smem:[#allocation21_spill]] %s4246_s30 }
  0x22   :  { %4874 = sst [smem:[#allocation22_spill]] %s4251_s4 }
  0x23   :  { %s4256_s6 = sld [smem:[%s4856_s0 + %s4112_s7]]   ;;  %s4116_s7 = smov 26  }
  0x24   :  { %s4261_s20 = sld [smem:[%s4856_s0 + %s4113_s15]]   ;;  %s4117_s15 = smov 27  }
  0x25   :  { %s4266_s30 = sld [smem:[%s4856_s0 + %s4114_s22]]   ;;  %s4118_s22 = smov 28  }
  0x26   :  { %s4271_s4 = sld [smem:[%s4856_s0 + %s4115_s28]]   ;;  %s4119_s28 = smov 29  }
  0x29   :  { %4875 = sst [smem:[#allocation23_spill]] %s4256_s6 }
  0x2a   :  { %4876 = sst [smem:[#allocation24_spill]] %s4261_s20 }
  0x2b   :  { %4877 = sst [smem:[#allocation25_spill]] %s4266_s30 }
  0x2c   :  { %4878 = sst [smem:[#allocation26_spill]] %s4271_s4 }
  0x2d   :  { %s4276_s6 = sld [smem:[%s4856_s0 + %s4116_s7]]   ;;  %s4120_s7 = smov 30  }
  0x2e   :  { %s4281_s20 = sld [smem:[%s4856_s0 + %s4117_s15]]   ;;  %s4121_s15 = smov 31  }
  0x2f   :  { %s4286_s30 = sld [smem:[%s4856_s0 + %s4118_s22]]   ;;  %s4122_s22 = smov 32  }
  0x30   :  { %s4291_s4 = sld [smem:[%s4856_s0 + %s4119_s28]]   ;;  %s4123_s28 = smov 33  }
  0x31   :  { %s4306_s27 = sld [smem:[%s4856_s0 + %s4122_s22]]   ;;  %s4126_s22 = smov 36  }
  0x32   :  { %s4311_s12 = sld [smem:[%s4856_s0 + %s4123_s28]]  }
  0x33   :  { %4879 = sst [smem:[#allocation27_spill]] %s4276_s6 }
  0x34   :  { %4880 = sst [smem:[#allocation28_spill]] %s4281_s20 }
  0x35   :  { %s4296_s6 = sld [smem:[%s4856_s0 + %s4120_s7]]   ;;  %s4124_s7 = smov 34  }
  0x36   :  { %s4301_s20 = sld [smem:[%s4856_s0 + %s4121_s15]]   ;;  %s4125_s15 = smov 35  }
  0x37   :  { %4883 = sst [smem:[#allocation31_spill]] %s4306_s27 }
  0x38   :  { %s4326_s27 = sld [smem:[%s4856_s0 + %s4126_s22]]  }
  0x3b   :  { %4881 = sst [smem:[#allocation29_spill]] %s4296_s6 }
  0x3c   :  { %4882 = sst [smem:[#allocation30_spill]] %s4301_s20 }
  0x3d   :  { %s4316_s6 = sld [smem:[%s4856_s0 + %s4124_s7]]  }
  0x3e   :  { %s4321_s20 = sld [smem:[%s4856_s0 + %s4125_s15]]  }
  0x3f   :  { %78 = vsyncpa [#allocation3], 0 }
  0x40   :  { %79 = vsyncpa [#allocation5], 0 }
  0x41   :  { %80 = vsyncpa [#allocation8], 0  ;;  %s4127_s28 = smov [#allocation4]   ;;  %s4128_s2 = smov [#allocation7]  }
  0x42   :  { %s153_s1 = sshll.u32 %s4127_s28, 4  ;;  %s179_s7 = sshll.u32 %s4128_s2, 4  ;;  %s154_s1 = int_to_ptr.vmem [resolvable:$true] %s153_s1  ;;  %s180_s7 = int_to_ptr.vmem [resolvable:$true] %s179_s7 }
  0x43   :  { %s3993_s10 = scalar_lea.vmem %s154_s1, 16  ;;  %s3997_s11 = scalar_lea.vmem %s154_s1, 32 }
  0x44   :  { %p3994_p0 = scmp.ne.s32.totalorder %s154_s1, %s3993_s10  ;;  %p3998_p1 = scmp.lt.s32.totalorder %s154_s1, %s154_s1 }
  0x45   :  { %p3999_p2 = scmp.lt.s32.totalorder %s3997_s11, %s3993_s10 }
  0x47   :  { %p4000_p3 = por %p3999_p2, %p3998_p1 }
  0x49   :  { %p4001_p4 = pnand %p4000_p3, %p3994_p0 }
  0x4b   :  { %4004 = shalt.err (!%p4001_p4)
}
  0x4c   :  { %156 = dma.hbm_to_vmem [thread:$0]  %s4291_s4, 16, %s154_s1, [#allocation5]  }
  0x4d   :  { %s4013_s0 = scalar_lea.vmem %s180_s7, 16  ;;  %s4017_s15 = scalar_lea.vmem %s180_s7, 32 }
  0x4e   :  { %p4014_p5 = scmp.ne.s32.totalorder %s180_s7, %s4013_s0  ;;  %p4018_p6 = scmp.lt.s32.totalorder %s180_s7, %s180_s7 }
  0x4f   :  { %p4019_p7 = scmp.lt.s32.totalorder %s4017_s15, %s4013_s0 }
  0x51   :  { %p4020_p8 = por %p4019_p7, %p4018_p6 }
  0x53   :  { %p4021_p9 = pnand %p4020_p8, %p4014_p5 }
  0x55   :  { %4024 = shalt.err (!%p4021_p9)
}
  0x56   :  { %182 = dma.hbm_to_vmem [thread:$0]  %s4316_s6, 16, %s180_s7, [#allocation8]  }
  0x57   :  { %s4129_s16 = smov [#allocation2]   ;;  %s4130_s22 = smov [#allocation6]  }
  0x58   :  { %s143_s18 = sshll.u32 %s4129_s16, 4  ;;  %s169_s23 = sshll.u32 %s4130_s22, 4  ;;  %s144_s18 = int_to_ptr.vmem [resolvable:$true] %s143_s18  ;;  %s170_s23 = int_to_ptr.vmem [resolvable:$true] %s169_s23 }
  0x59   :  { %s4033_s26 = scalar_lea.vmem %s144_s18, 16  ;;  %s4037_s28 = scalar_lea.vmem %s144_s18, 32 }
  0x5a   :  { %p4034_p10 = scmp.ne.s32.totalorder %s144_s18, %s4033_s26  ;;  %p4038_p11 = scmp.lt.s32.totalorder %s144_s18, %s144_s18 }
  0x5b   :  { %p4039_p12 = scmp.lt.s32.totalorder %s4037_s28, %s4033_s26 }
  0x5d   :  { %p4040_p13 = por %p4039_p12, %p4038_p11 }
  0x5f   :  { %p4041_p0 = pnand %p4040_p13, %p4034_p10 }
  0x61   :  { %4044 = shalt.err (!%p4041_p0)
}
  0x62   :  { %146 = dma.hbm_to_vmem [thread:$0]  %s4286_s30, 16, %s144_s18, [#allocation3]  }
  0x63   :  { %s4053_s4 = scalar_lea.vmem %s170_s23, 16  ;;  %s4057_s1 = scalar_lea.vmem %s170_s23, 32 }
  0x64   :  { %p4054_p1 = scmp.ne.s32.totalorder %s170_s23, %s4053_s4  ;;  %p4058_p2 = scmp.lt.s32.totalorder %s170_s23, %s170_s23 }
  0x65   :  { %p4059_p3 = scmp.lt.s32.totalorder %s4057_s1, %s4053_s4 }
  0x67   :  { %p4060_p4 = por %p4059_p3, %p4058_p2 }
  0x69   :  { %p4061_p5 = pnand %p4060_p4, %p4054_p1 }
  0x6b   :  { %4064 = shalt.err (!%p4061_p5)
}
  0x6c   :  { %172 = dma.hbm_to_vmem [thread:$0]  %s4311_s12, 16, %s170_s23, [#allocation5]  }
  0x6d   :  { %s4131_s6 = smov [#allocation9]  }
  0x6e   :  { %s189_s2 = sshll.u32 %s4131_s6, 4  ;;  %s190_s2 = int_to_ptr.vmem [resolvable:$true] %s189_s2 }
  0x6f   :  { %s4073_s7 = scalar_lea.vmem %s190_s2, 16  ;;  %s4077_s10 = scalar_lea.vmem %s190_s2, 32 }
  0x70   :  { %p4074_p6 = scmp.ne.s32.totalorder %s190_s2, %s4073_s7  ;;  %p4078_p7 = scmp.lt.s32.totalorder %s190_s2, %s190_s2 }
  0x71   :  { %p4079_p8 = scmp.lt.s32.totalorder %s4077_s10, %s4073_s7 }
  0x73   :  { %p4080_p9 = por %p4079_p8, %p4078_p7 }
  0x75   :  { %p4081_p10 = pnand %p4080_p9, %p4074_p6 }
  0x77   :  { %4084 = shalt.err (!%p4081_p10)
}
  0x78   :  { %192 = dma.hbm_to_vmem [thread:$0]  %s4321_s20, 16, %s190_s2, [#allocation8]  }
  0x79   :  { %4085 = dma.done.wait [#allocation3], 16  }
  0x7a   :  { %4086 = vsyncadd [#allocation3], 4294967280 }
  0x7b   :  { %4087 = dma.done.wait [#allocation5], 32  }
  0x7c   :  { %4088 = vsyncadd [#allocation5], 4294967264 }
  0x7d   :  { %4089 = dma.done.wait [#allocation8], 32  }
  0x7e   :  { %4090 = vsyncadd [#allocation8], 4294967264  ;;  %vm215_vm0 = vcmask 785408   ;;  %v209_v0 = vld [vmem:[%s4146_s5] sm:$0xff]  ;;  %v210_v1 = vld [vmem:[%s4146_s5 + $0x8] sm:$0xff]  ;;  %v4132_v15 = vmov 0.0  }
  0x7f   :  { %v216_v2 = vsel %vm215_vm0, %v209_v0, 0.0  ;;  %v219_v3 = vsel %vm215_vm0, %v210_v1, 0.0  ;;  %v3771_v14 = vld [vmem:[%s4166_s21 + $0x28] sm:$0xff]   ;;  %3468 = vmatprep.subr.bf16.mxu1 %v4132_v15  ;;  %3500 = vmatprep.subr.bf16.mxu0 %v4132_v15  ;;  %v3773_v17 = vld [vmem:[%s4166_s21 + $0x20] sm:$0xff]   ;;  %vm4133_vm1 = vmmov 0   ;;  %v3775_v19 = vld [vmem:[%s4166_s21 + $0x18] sm:$0xff]  }
  0x80   :  { %217 = vadd.xlane.f32.xlu0 %v216_v2  ;;  %v3772_v16 = vld [vmem:[%s4186_s8 + $0x28] sm:$0xff]   ;;  %3469 = vmatpush3.bf16.msra.mxu1 %v3771_v14  ;;  %v3774_v18 = vld [vmem:[%s4186_s8 + $0x20] sm:$0xff]   ;;  %v3776_v20 = vld [vmem:[%s4186_s8 + $0x18] sm:$0xff]   ;;  %s4134_s5 = smov 104   ;;  %vm574_vm2 = vcmask 195584   ;;  %vm626_vm3 = vcmask 130048  }
  0x81   :  { %3501 = vmatpush3.bf16.msra.mxu0 %v3772_v16  ;;  %3470 = vmatprep.subr.bf16.mxu1 %v4132_v15  ;;  %v3777_v21 = vld [vmem:[%s4166_s21 + $0x10] sm:$0xff]   ;;  %v3779_v23 = vld [vmem:[%s4166_s21 + $0x8] sm:$0xff]   ;;  %v3781_v25 = vld [vmem:[%s4166_s21] sm:$0xff]   ;;  %vm708_vm4 = vcmask 1043456   ;;  %s4884_s21 = sld [smem:[#allocation15_spill]]  ;;  %vm1626_vm5 = vcmask 523264  }
  0x82   :  { %3502 = vmatprep.subr.bf16.mxu0 %v4132_v15  ;;  %3480 = vmatprep.mubr.msk.bf16.mxu1 %vm4133_vm1, %v4132_v15  ;;  %v3778_v22 = vld [vmem:[%s4186_s8 + $0x10] sm:$0xff]   ;;  %v3780_v24 = vld [vmem:[%s4186_s8 + $0x8] sm:$0xff]   ;;  %v3782_v26 = vld [vmem:[%s4186_s8] sm:$0xff]   ;;  %s4888_s8 = sld [smem:[#allocation16_spill]] }
  0x83   :  { %3512 = vmatprep.mubr.msk.bf16.mxu0 %vm4133_vm1, %v4132_v15  ;;  %v3216_v35 = vld [vmem:[%s4156_s13] ss:$0 sm:$0xff]  ;;  %v3783_v43 = vld [vmem:[%s4176_s29 + $0x28] sm:$0xff]   ;;  %v3785_v46 = vld [vmem:[%s4176_s29 + $0x18] sm:$0xff]   ;;  %s4135_s13 = smov 80   ;;  %s4892_s30 = sld [smem:[#allocation19_spill]] }
  0x84   :  { %220 = vadd.xlane.f32.xlu0 %v219_v3  ;;  %3471 = vmatpush3.bf16.msra.mxu1 %v3773_v17  ;;  %v3217_v39 = vld [vmem:[%s4161_s17] ss:$0 sm:$0xff]  ;;  %v3786_v47 = vld [vmem:[%s4176_s29 + $0x10] sm:$0xff]   ;;  %v3787_v48 = vld [vmem:[%s4176_s29 + $0x8] sm:$0xff]   ;;  %s4136_s17 = smov 56   ;;  %s4893_s12 = sld [smem:[#allocation20_spill]] }
  0x85   :  { %3503 = vmatpush3.bf16.msra.mxu0 %v3774_v18  ;;  %3472 = vmatprep.subr.bf16.mxu1 %v4132_v15  ;;  %v3784_v45 = vld [vmem:[%s4176_s29 + $0x20] sm:$0xff]   ;;  %s4894_s20 = sld [smem:[#allocation23_spill]] }
  0x86   :  { %3504 = vmatprep.subr.bf16.mxu0 %v4132_v15  ;;  %v3788_v49 = vld [vmem:[%s4176_s29] sm:$0xff]   ;;  %s4886_s29 = sld [smem:[#allocation13_spill]] }
  0x87   :  { %v3218_v52 = vld [vmem:[%s4171_s25] ss:$0 sm:$0xff]  ;;  %s4885_s25 = sld [smem:[#allocation17_spill]] }
  0x88   :  { %3473 = vmatpush3.bf16.msra.mxu1 %v3775_v19  ;;  %v3234_v53 = vld [vmem:[%s4191_s14] ss:$0 sm:$0xff]  ;;  %s4889_s14 = sld [smem:[#allocation18_spill]] }
  0x89   :  { %3505 = vmatpush3.bf16.msra.mxu0 %v3776_v20  ;;  %3474 = vmatprep.subr.bf16.mxu1 %v4132_v15  ;;  %v3226_v3 = vld [vmem:[%s4181_s3] ss:$0 sm:$0xff]  ;;  %s4887_s3 = sld [smem:[#allocation14_spill]] }
  0x8a   :  { %3506 = vmatprep.subr.bf16.mxu0 %v4132_v15  ;;  %v4426_v16 = vld [vmem:[%s4151_s9] sm:$0xff]  ;;  %s4895_s11 = sld [smem:[#allocation22_spill]] }
  0x8b   :  { %s4896_s0 = sld [smem:[#allocation26_spill]] }
  0x8c   :  { %3475 = vmatpush3.bf16.msra.mxu1 %v3777_v21  ;;  %v4430_v21 = vld [vmem:[%s4151_s9 + $0x8] sm:$0xff]  ;;  %s4897_s15 = sld [smem:[#allocation24_spill]] }
  0x8d   :  { %3507 = vmatpush3.bf16.msra.mxu0 %v3778_v22  ;;  %3476 = vmatprep.subr.bf16.mxu1 %v4132_v15  ;;  %s4899_s16 = sld [smem:[#allocation28_spill]] }
  0x8e   :  { %3508 = vmatprep.subr.bf16.mxu0 %v4132_v15  ;;  %s4900_s18 = sld [smem:[#allocation29_spill]] }
  0x8f   :  { %s4901_s22 = sld [smem:[#allocation31_spill]] }
  0x90   :  { %3477 = vmatpush3.bf16.msra.mxu1 %v3779_v23  ;;  %s4902_s23 = sld [smem:[#allocation30_spill]] }
  0x91   :  { %3509 = vmatpush3.bf16.msra.mxu0 %v3780_v24  ;;  %3478 = vmatprep.subr.bf16.mxu1 %v4132_v15 }
  0x92   :  { %3510 = vmatprep.subr.bf16.mxu0 %v4132_v15 }
  0x94   :  { %3479 = vmatpush3.bf16.msra.mxu1 %v3781_v25 }
  0x95   :  { %3511 = vmatpush3.bf16.msra.mxu0 %v3782_v26  ;;  %3484 = vmatprep.subr.bf16.mxu1 %v4132_v15 }
  0x96   :  { %3516 = vmatprep.subr.bf16.mxu0 %v4132_v15 }
 0x109   :  { %v218_v4 = vpop.xlane.xlu0 %217 }
 0x10a   :  { %v223_v5 = vmul.f32 0.010416667, %v218_v4 }
 0x10c   :  { %v225_v6 = vsub.f32 %v209_v0, %v223_v5 }
 0x10d   :  { %v221_v7 = vpop.xlane.xlu0 %220 }
 0x10e   :  { %v224_v8 = vmul.f32 0.010416667, %v221_v7  ;;  %v227_v9 = vmul.f32 %v225_v6, %v225_v6 }
 0x110   :  { %v226_v10 = vsub.f32 %v210_v1, %v224_v8  ;;  %v229_v11 = vsel %vm215_vm0, %v227_v9, 0.0 }
 0x111   :  { %230 = vadd.xlane.f32.xlu1 %v229_v11 }
 0x112   :  { %v228_v12 = vmul.f32 %v226_v10, %v226_v10 }
 0x114   :  { %v232_v13 = vsel %vm215_vm0, %v228_v12, 0.0 }
 0x115   :  { %233 = vadd.xlane.f32.xlu1 %v232_v13 }
 0x19a   :  { %v231_v27 = vpop.xlane.xlu1 %230 }
 0x19b   :  { %v235_v28 = vmul.f32 0.010416667, %v231_v27 }
 0x19d   :  { %v237_v29 = vadd.f32 1e-12, %v235_v28 }
 0x19e   :  { %v234_v30 = vpop.xlane.xlu1 %233 }
 0x19f   :  { %3883 = vrsqrt.f32 %v237_v29  ;;  %v236_v31 = vmul.f32 0.010416667, %v234_v30 }
 0x1a1   :  { %v238_v32 = vadd.f32 1e-12, %v236_v31 }
 0x1a3   :  { %3885 = vrsqrt.f32 %v238_v32 }
 0x1ac   :  { %v3884_v33 = vpop.eup %3883 }
 0x1ad   :  { %v241_v34 = vmul.f32 %v3884_v33, %v225_v6 }
 0x1af   :  { %v249_v38 = vmul.f32 %v3216_v35, %v241_v34 }
 0x1b0   :  { %v3886_v36 = vpop.eup %3885 }
 0x1b1   :  { %v242_v37 = vmul.f32 %v3886_v36, %v226_v10  ;;  %v4371_v41 = vadd.f32 %v3217_v39, %v249_v38 }
 0x1b3   :  { %v250_v40 = vmul.f32 %v3216_v35, %v242_v37 }
 0x1b5   :  { %v4373_v42 = vadd.f32 %v3217_v39, %v250_v40 }
 0x1b7   :  { %v271_v44 = vpack.c.bf16 %v4373_v42, %v4371_v41 }
 0x1b9   :  { %3481 = vmatmul.mubr.msk.bf16.vlgmr.msra.gmra.mxu1 %vm215_vm0, %v271_v44  ;;  %3513 = vmatmul.mubr.msk.bf16.vlgmr.msra.gmra.mxu0 %vm215_vm0, %v271_v44 }
 0x1ba   :  { %3485 = vmatpush3.bf16.msra.mxu1 %v3783_v43  ;;  %3496 = vmatprep.mubr.msk.bf16.mxu1 %vm4133_vm1, %v4132_v15 }
 0x1bb   :  { %3486 = vmatprep.subr.bf16.mxu1 %v4132_v15  ;;  %3518 = vmatprep.mubr.msk.bf16.mxu0 %vm4133_vm1, %v4132_v15 }
 0x1be   :  { %3487 = vmatpush3.bf16.msra.mxu1 %v3784_v45 }
 0x1bf   :  { %3488 = vmatprep.subr.bf16.mxu1 %v4132_v15 }
 0x1c2   :  { %3489 = vmatpush3.bf16.msra.mxu1 %v3785_v46 }
 0x1c3   :  { %3490 = vmatprep.subr.bf16.mxu1 %v4132_v15 }
 0x1c6   :  { %3491 = vmatpush3.bf16.msra.mxu1 %v3786_v47 }
 0x1c7   :  { %3492 = vmatprep.subr.bf16.mxu1 %v4132_v15 }
 0x1ca   :  { %3493 = vmatpush3.bf16.msra.mxu1 %v3787_v48 }
 0x1cb   :  { %3494 = vmatprep.subr.bf16.mxu1 %v4132_v15 }
 0x1ce   :  { %3495 = vmatpush3.bf16.msra.mxu1 %v3788_v49 }
 0x1cf   :  { %3522 = vmatprep.subr.bf16.mxu1 %v4132_v15 }
 0x1d1   :  { %3497 = vmatmul.mubr.msk.bf16.vlgmr.msra.gmra.mxu1 %vm215_vm0, %v271_v44 }
 0x1d2   :  { %3524 = vmatprep.mubr.msk.bf16.mxu1 %vm4133_vm1, %v4132_v15 }
 0x279   :  { %v352_v50 = vpop.f32.mrf.mxu1  ;;  %v544_v51 = vpop.f32.mrf.mxu0 }
 0x27a   :  { %v353_v58 = vadd.f32 %v3218_v52, %v352_v50  ;;  %v545_v59 = vadd.f32 %v3234_v53, %v544_v51 }
 0x27b   :  { %v3482_v54 = vpop.f32.mrf.mxu1  ;;  %v3514_v55 = vpop.f32.mrf.mxu0 }
 0x27d   :  { %v355_v56 = vpop.f32.mrf.mxu1  ;;  %v547_v57 = vpop.f32.mrf.mxu0 }
 0x27e   :  { %v356_v60 = vadd.f32 %v3218_v52, %v355_v56  ;;  %v548_v61 = vadd.f32 %v3234_v53, %v547_v57 }
 0x27f   :  { %v3483_v62 = vpop.f32.mrf.mxu1  ;;  %v3515_v63 = vpop.f32.mrf.mxu0 }
 0x280   :  { %v4400_v0 = vpack.c.bf16 %v356_v60, %v353_v58  ;;  %v4402_v1 = vpack.c.bf16 %v548_v61, %v545_v59 }
 0x282   :  { %3523 = vmatpush3.bf16.msra.mxu1 %v4402_v1  ;;  %756 = vrot.lane.b32.xlu1 %v4400_v0, %s4134_s5 }
 0x283   :  { %3528 = vmatprep.subr.bf16.mxu1 %v4132_v15 }
 0x291   :  { %v448_v2 = vpop.f32.mrf.mxu1 }
 0x292   :  { %v449_v6 = vadd.f32 %v3226_v3, %v448_v2 }
 0x293   :  { %v3498_v4 = vpop.f32.mrf.mxu1 }
 0x294   :  { %v3789_v4 = vld [vmem:[%s4196_s19 + $0x8] ss:$0 sps:$4 sm:$0xff]  }
 0x295   :  { %v451_v5 = vpop.f32.mrf.mxu1 }
 0x296   :  { %v452_v7 = vadd.f32 %v3226_v3, %v451_v5  ;;  %v710_v5 = vsel %vm708_vm4, %v3789_v4, 0 }
 0x297   :  { %v3499_v8 = vpop.f32.mrf.mxu1 }
 0x298   :  { %v4409_v9 = vpack.c.bf16 %v452_v7, %v449_v6  ;;  %v3790_v6 = vld [vmem:[%s4196_s19] sm:$0xff]  }
 0x29a   :  { %759 = vrot.lane.b32.xlu0 %v4409_v9, %s4134_s5  ;;  %v579_v10 = vsel %vm574_vm2, %v4409_v9, 0 }
 0x29b   :  { %3517 = vmatpush3.bf16.xpose.msra.mxu0 %v579_v10 }
 0x29c   :  { %3536 = vmatprep.subr.bf16.mxu0 %v4132_v15 }
 0x2a2   :  { %3519 = vmatmul.mubr.msk.bf16.vlgmr.msra.gmra.mxu0 %vm574_vm2, %v4400_v0 }
 0x2a3   :  { %3538 = vmatprep.mubr.msk.bf16.mxu0 %vm4133_vm1, %v4132_v15 }
 0x2f4   :  { %v757_v13 = vpop.permute.xlu1 %756 }
 0x30c   :  { %v760_v11 = vpop.permute.xlu0 %759 }
 0x30d   :  { %v765_v12 = vsel %vm574_vm2, %v760_v11, 0 }
 0x30e   :  { %3537 = vmatpush3.bf16.xpose.msra.mxu0 %v765_v12 }
 0x30f   :  { %3548 = vmatprep.subr.bf16.mxu0 %v4132_v15 }
 0x315   :  { %3539 = vmatmul.mubr.msk.bf16.vlgmr.msra.gmra.mxu0 %vm574_vm2, %v757_v13 }
 0x316   :  { %3552 = vmatprep.mubr.msk.bf16.mxu0 %vm4133_vm1, %v4132_v15 }
 0x362   :  { %v615_v14 = vpop.f32.mrf.mxu0 }
 0x363   :  { %v622_v17 = vmul.f32 0.20412415, %v615_v14 }
 0x364   :  { %v3520_v18 = vpop.f32.mrf.mxu0 }
 0x365   :  { %v624_v19 = vadd.f32 %v622_v17, %v4426_v16 }
 0x366   :  { %v618_v20 = vpop.f32.mrf.mxu0 }
 0x367   :  { %v623_v22 = vmul.f32 0.20412415, %v618_v20  ;;  %v627_v23 = vsel %vm626_vm3, %v624_v19, -inf }
 0x368   :  { %628 = vmax.xlane.f32.xlu1 %v627_v23  ;;  %v3521_v24 = vpop.f32.mrf.mxu0 }
 0x369   :  { %v625_v25 = vadd.f32 %v623_v22, %v4430_v21 }
 0x36b   :  { %v630_v26 = vsel %vm626_vm3, %v625_v25, -inf }
 0x36c   :  { %631 = vmax.xlane.f32.xlu0 %v630_v26 }
 0x3d5   :  { %v801_v27 = vpop.f32.mrf.mxu0 }
 0x3d6   :  { %v808_v37 = vmul.f32 0.20412415, %v801_v27  ;;  %v3791_v27 = vld [vmem:[%s4196_s19 + $0x14] ss:$0 sps:$4 sm:$0xff]  }
 0x3d7   :  { %v3540_v28 = vpop.f32.mrf.mxu0 }
 0x3d8   :  { %v810_v43 = vadd.f32 %v808_v37, %v4426_v16  ;;  %v897_v28 = vsel %vm708_vm4, %v3791_v27, 0 }
 0x3d9   :  { %v804_v29 = vpop.f32.mrf.mxu0  ;;  %3549 = vmatpush3.bf16.msra.mxu0 %v897_v28 }
 0x3da   :  { %v809_v39 = vmul.f32 0.20412415, %v804_v29  ;;  %v812_v46 = vsel %vm626_vm3, %v810_v43, -inf  ;;  %3550 = vmatprep.subr.bf16.mxu0 %v4132_v15  ;;  %v3792_v29 = vld [vmem:[%s4196_s19 + $0xc] sm:$0xff]  }
 0x3db   :  { %v3541_v30 = vpop.f32.mrf.mxu0 }
 0x3dc   :  { %v811_v47 = vadd.f32 %v809_v39, %v4430_v21  ;;  %v3242_v30 = vld [vmem:[%s4201_s24] ss:$0 sm:$0xff]  ;;  %s4891_s24 = sld [smem:[#allocation25_spill]] }
 0x3dd   :  { %3551 = vmatpush3.bf16.msra.mxu0 %v3792_v29 }
 0x3de   :  { %v815_v48 = vsel %vm626_vm3, %v811_v47, -inf  ;;  %3562 = vmatprep.subr.bf16.mxu0 %v4132_v15 }
 0x3f1   :  { %v629_v31 = vpop.xlane.xlu1 %628 }
 0x3f2   :  { %v633_v32 = vsub.f32 %v624_v19, %v629_v31  ;;  %v570_v31 = vadd.f32 %v3242_v30, %v4371_v41 }
 0x3f4   :  { %v635_v33 = vmul.f32 1.442695, %v633_v32 }
 0x3f5   :  { %v632_v34 = vpop.xlane.xlu0 %631 }
 0x3f6   :  { %3887 = vpow2.f32 %v635_v33  ;;  %v634_v35 = vsub.f32 %v625_v25, %v632_v34 }
 0x3f8   :  { %v637_v36 = vmul.f32 1.442695, %v634_v35  ;;  %v571_v35 = vadd.f32 %v3242_v30, %v4373_v42 }
 0x3fa   :  { %3889 = vpow2.f32 %v637_v36 }
 0x403   :  { %v3888_v38 = vpop.eup %3887 }
 0x404   :  { %v639_v40 = vsel %vm626_vm3, %v3888_v38, 0.0 }
 0x405   :  { %640 = vadd.xlane.f32.xlu0 %v639_v40 }
 0x407   :  { %v3890_v44 = vpop.eup %3889 }
 0x408   :  { %v642_v45 = vsel %vm626_vm3, %v3890_v44, 0.0 }
 0x409   :  { %643 = vadd.xlane.f32.xlu1 %v642_v45  ;;  %813 = vmax.xlane.f32.xlu0 %v812_v46 }
 0x40d   :  { %816 = vmax.xlane.f32.xlu1 %v815_v48 }
 0x48e   :  { %v641_v49 = vpop.xlane.xlu0 %640 }
 0x48f   :  { %3891 = vrcp.f32 %v641_v49 }
 0x492   :  { %v644_v50 = vpop.xlane.xlu1 %643  ;;  %v814_v51 = vpop.xlane.xlu0 %813 }
 0x493   :  { %3893 = vrcp.f32 %v644_v50  ;;  %v818_v52 = vsub.f32 %v810_v43, %v814_v51 }
 0x495   :  { %v820_v53 = vmul.f32 1.442695, %v818_v52 }
 0x496   :  { %v817_v54 = vpop.xlane.xlu1 %816 }
 0x497   :  { %3895 = vpow2.f32 %v820_v53  ;;  %v819_v55 = vsub.f32 %v811_v47, %v817_v54 }
 0x499   :  { %v822_v56 = vmul.f32 1.442695, %v819_v55 }
 0x49b   :  { %3897 = vpow2.f32 %v822_v56 }
 0x49c   :  { %v3892_v57 = vpop.eup %3891 }
 0x49d   :  { %v647_v59 = vmul.f32 %v3892_v57, %v3888_v38 }
 0x4a0   :  { %v3894_v58 = vpop.eup %3893 }
 0x4a1   :  { %v648_v60 = vmul.f32 %v3894_v58, %v3890_v44 }
 0x4a3   :  { %v649_v61 = vpack.c.bf16 %v648_v60, %v647_v59 }
 0x4a4   :  { %v3896_v62 = vpop.eup %3895 }
 0x4a5   :  { %3525 = vmatmul.mubr.msk.bf16.vlgmr.msra.gmra.mxu1 %vm626_vm3, %v649_v61  ;;  %v824_v63 = vsel %vm626_vm3, %v3896_v62, 0.0 }
 0x4a6   :  { %825 = vadd.xlane.f32.xlu0 %v824_v63  ;;  %3532 = vmatprep.mubr.msk.bf16.mxu1 %vm4133_vm1, %v4132_v15 }
 0x4a7   :  { %3529 = vmatpush3.bf16.msra.mxu1 %v710_v5 }
 0x4a8   :  { %v3898_v2 = vpop.eup %3897  ;;  %3530 = vmatprep.subr.bf16.mxu1 %v4132_v15 }
 0x4a9   :  { %v827_v3 = vsel %vm626_vm3, %v3898_v2, 0.0 }
 0x4aa   :  { %828 = vadd.xlane.f32.xlu1 %v827_v3 }
 0x4ab   :  { %3531 = vmatpush3.bf16.msra.mxu1 %v3790_v6 }
 0x4ac   :  { %3542 = vmatprep.subr.bf16.mxu1 %v4132_v15 }
 0x4bb   :  { %944 = vrot.lane.b32.xlu1 %v4409_v9, %s4135_s13 }
 0x4bc   :  { %836 = vrot.lane.b32.xlu0 %v4402_v1, %s4134_s5 }
 0x4bf   :  { %942 = vrot.lane.b32.xlu1 %v4400_v0, %s4135_s13 }
 0x52f   :  { %v826_v8 = vpop.xlane.xlu0 %825 }
 0x533   :  { %v829_v7 = vpop.xlane.xlu1 %828  ;;  %v837_v18 = vpop.permute.xlu0 %836 }
 0x534   :  { %3899 = vrcp.f32 %v829_v7 }
 0x535   :  { %3901 = vrcp.f32 %v826_v8 }
 0x537   :  { %v945_v23 = vpop.permute.xlu1 %944 }
 0x538   :  { %v950_v25 = vsel %vm574_vm2, %v945_v23, 0  ;;  %v3794_v23 = vld [vmem:[%s4196_s19 + $0x18] sm:$0xff]  }
 0x53b   :  { %v943_v26 = vpop.permute.xlu1 %942 }
 0x541   :  { %v3900_v14 = vpop.eup %3899 }
 0x542   :  { %v3902_v19 = vpop.eup %3901  ;;  %v833_v20 = vmul.f32 %v3900_v14, %v3898_v2 }
 0x543   :  { %v832_v22 = vmul.f32 %v3902_v19, %v3896_v62 }
 0x545   :  { %v834_v24 = vpack.c.bf16 %v833_v20, %v832_v22  ;;  %v3793_v20 = vld [vmem:[%s4196_s19 + $0x20] ss:$0 sps:$4 sm:$0xff]  }
 0x546   :  { %v1081_v22 = vsel %vm708_vm4, %v3793_v20, 0 }
 0x565   :  { %v688_v10 = vpop.f32.mrf.mxu1 }
 0x567   :  { %v3526_v11 = vpop.f32.mrf.mxu1 }
 0x569   :  { %v691_v12 = vpop.f32.mrf.mxu1 }
 0x56a   :  { %v695_v13 = vpack.c.bf16 %v691_v12, %v688_v10 }
 0x56b   :  { %v3527_v17 = vpop.f32.mrf.mxu1 }
 0x56c   :  { %3533 = vmatmul.mubr.msk.bf16.vlgmr.msra.gmra.mxu1 %vm574_vm2, %v695_v13 }
 0x56d   :  { %3543 = vmatpush3.bf16.msra.mxu1 %v837_v18  ;;  %3544 = vmatprep.mubr.msk.bf16.mxu1 %vm4133_vm1, %v4132_v15 }
 0x56e   :  { %3556 = vmatprep.subr.bf16.mxu1 %v4132_v15 }
 0x574   :  { %3545 = vmatmul.mubr.msk.bf16.vlgmr.msra.gmra.mxu1 %vm626_vm3, %v834_v24 }
 0x575   :  { %3557 = vmatpush3.bf16.xpose.msra.mxu1 %v950_v25  ;;  %3558 = vmatprep.mubr.msk.bf16.mxu1 %vm4133_vm1, %v4132_v15 }
 0x576   :  { %3568 = vmatprep.subr.bf16.mxu1 %v4132_v15 }
 0x57c   :  { %3559 = vmatmul.mubr.msk.bf16.vlgmr.msra.gmra.mxu1 %vm574_vm2, %v943_v26 }
 0x57d   :  { %3572 = vmatprep.mubr.msk.bf16.mxu1 %vm4133_vm1, %v4132_v15  ;;  %3569 = vmatpush3.bf16.msra.mxu1 %v1081_v22 }
 0x57e   :  { %3570 = vmatprep.subr.bf16.mxu1 %v4132_v15 }
 0x581   :  { %3571 = vmatpush3.bf16.msra.mxu1 %v3794_v23 }
 0x582   :  { %3582 = vmatprep.subr.bf16.mxu1 %v4132_v15 }
 0x62c   :  { %v746_v32 = vpop.f32.mrf.mxu1 }
 0x62d   :  { %v753_v33 = vadd.f32 %v746_v32, %v570_v31 }
 0x62e   :  { %v3534_v34 = vpop.f32.mrf.mxu1 }
 0x630   :  { %v749_v36 = vpop.f32.mrf.mxu1 }
 0x631   :  { %v754_v37 = vadd.f32 %v749_v36, %v571_v35 }
 0x632   :  { %v3535_v38 = vpop.f32.mrf.mxu1 }
 0x634   :  { %v876_v39 = vpop.f32.mrf.mxu1 }
 0x636   :  { %v3546_v40 = vpop.f32.mrf.mxu1 }
 0x638   :  { %v879_v43 = vpop.f32.mrf.mxu1 }
 0x639   :  { %v883_v44 = vpack.c.bf16 %v879_v43, %v876_v39 }
 0x63a   :  { %v3547_v45 = vpop.f32.mrf.mxu1 }
 0x63b   :  { %3553 = vmatmul.mubr.msk.bf16.vlgmr.msra.gmra.mxu0 %vm574_vm2, %v883_v44 }
 0x63c   :  { %v986_v46 = vpop.f32.mrf.mxu1  ;;  %3564 = vmatprep.mubr.msk.bf16.mxu0 %vm4133_vm1, %v4132_v15 }
 0x63d   :  { %v993_v41 = vmul.f32 0.20412415, %v986_v46 }
 0x63e   :  { %v3560_v47 = vpop.f32.mrf.mxu1 }
 0x63f   :  { %v995_v48 = vadd.f32 %v993_v41, %v4426_v16 }
 0x640   :  { %v989_v49 = vpop.f32.mrf.mxu1 }
 0x641   :  { %v994_v42 = vmul.f32 0.20412415, %v989_v49  ;;  %v997_v50 = vsel %vm626_vm3, %v995_v48, -inf }
 0x642   :  { %998 = vmax.xlane.f32.xlu1 %v997_v50  ;;  %v3561_v51 = vpop.f32.mrf.mxu1 }
 0x643   :  { %v996_v52 = vadd.f32 %v994_v42, %v4430_v21 }
 0x645   :  { %v1000_v53 = vsel %vm626_vm3, %v996_v52, -inf }
 0x646   :  { %1001 = vmax.xlane.f32.xlu0 %v1000_v53 }
 0x653   :  { %1020 = vrot.lane.b32.xlu1 %v4402_v1, %s4135_s13 }
 0x657   :  { %1126 = vrot.lane.b32.xlu1 %v4400_v0, %s4136_s17 }
 0x6cb   :  { %v999_v54 = vpop.xlane.xlu1 %998 }
 0x6cc   :  { %v1003_v55 = vsub.f32 %v995_v48, %v999_v54 }
 0x6ce   :  { %v1005_v56 = vmul.f32 1.442695, %v1003_v55 }
 0x6cf   :  { %v1021_v57 = vpop.permute.xlu1 %1020  ;;  %v1002_v58 = vpop.xlane.xlu0 %1001 }
 0x6d0   :  { %3903 = vpow2.f32 %v1005_v56  ;;  %v1004_v59 = vsub.f32 %v996_v52, %v1002_v58  ;;  %3563 = vmatpush3.bf16.msra.mxu0 %v1021_v57 }
 0x6d1   :  { %3576 = vmatprep.subr.bf16.mxu0 %v4132_v15 }
 0x6d2   :  { %v1007_v60 = vmul.f32 1.442695, %v1004_v59 }
 0x6d3   :  { %v1127_v19 = vpop.permute.xlu1 %1126 }
 0x6d4   :  { %3905 = vpow2.f32 %v1007_v60  ;;  %v3795_v60 = vld [vmem:[%s4196_s19 + $0x2c] ss:$0 sps:$4 sm:$0xff]  }
 0x6dd   :  { %v3904_v61 = vpop.eup %3903 }
 0x6de   :  { %v1009_v62 = vsel %vm626_vm3, %v3904_v61, 0.0 }
 0x6df   :  { %1010 = vadd.xlane.f32.xlu0 %v1009_v62  ;;  %v3796_v62 = vld [vmem:[%s4196_s19 + $0x24] sm:$0xff]   ;;  %s4890_s19 = sld [smem:[#allocation21_spill]] }
 0x6e1   :  { %v3906_v63 = vpop.eup %3905 }
 0x6e2   :  { %v1012_v2 = vsel %vm626_vm3, %v3906_v63, 0.0 }
 0x6e3   :  { %1013 = vadd.xlane.f32.xlu0 %v1012_v2 }
 0x6f9   :  { %1128 = vrot.lane.b32.xlu0 %v4409_v9, %s4136_s17 }
 0x6fb   :  { %v933_v0 = vpop.f32.mrf.mxu0 }
 0x6fc   :  { %v4493_v3 = vadd.f32 %v933_v0, %v753_v33 }
 0x6fd   :  { %v3554_v4 = vpop.f32.mrf.mxu0 }
 0x6ff   :  { %v936_v5 = vpop.f32.mrf.mxu0 }
 0x700   :  { %v4495_v6 = vadd.f32 %v936_v5, %v754_v37 }
 0x701   :  { %v3555_v7 = vpop.f32.mrf.mxu0 }
 0x768   :  { %v1011_v8 = vpop.xlane.xlu0 %1010 }
 0x769   :  { %3907 = vrcp.f32 %v1011_v8 }
 0x76c   :  { %v1014_v10 = vpop.xlane.xlu0 %1013 }
 0x76d   :  { %3909 = vrcp.f32 %v1014_v10 }
 0x770   :  { %v1129_v17 = vpop.permute.xlu0 %1128 }
 0x771   :  { %v1134_v18 = vsel %vm574_vm2, %v1129_v17, 0 }
 0x776   :  { %v3908_v11 = vpop.eup %3907 }
 0x777   :  { %v1017_v13 = vmul.f32 %v3908_v11, %v3904_v61  ;;  %v1265_v61 = vsel %vm708_vm4, %v3795_v60, 0  ;;  %v3822_v60 = vld [vmem:[%s4885_s25] sm:$0xff]  }
 0x77a   :  { %v3910_v12 = vpop.eup %3909 }
 0x77b   :  { %v1018_v14 = vmul.f32 %v3910_v12, %v3906_v63 }
 0x77d   :  { %v1019_v9 = vpack.c.bf16 %v1018_v14, %v1017_v13 }
 0x77f   :  { %3565 = vmatmul.mubr.msk.bf16.vlgmr.msra.gmra.mxu0 %vm626_vm3, %v1019_v9 }
 0x780   :  { %3577 = vmatpush3.bf16.xpose.msra.mxu0 %v1134_v18  ;;  %3578 = vmatprep.mubr.msk.bf16.mxu0 %vm4133_vm1, %v4132_v15 }
 0x781   :  { %3588 = vmatprep.subr.bf16.mxu0 %v4132_v15 }
 0x787   :  { %3579 = vmatmul.mubr.msk.bf16.vlgmr.msra.gmra.mxu0 %vm574_vm2, %v1127_v19 }
 0x788   :  { %3592 = vmatprep.mubr.msk.bf16.mxu0 %vm4133_vm1, %v4132_v15  ;;  %3589 = vmatpush3.bf16.msra.mxu0 %v1265_v61  ;;  %v3823_v61 = vld [vmem:[%s4885_s25 + $0x58] sm:$0xff]  }
 0x789   :  { %3590 = vmatprep.subr.bf16.mxu0 %v4132_v15 }
 0x78c   :  { %3591 = vmatpush3.bf16.msra.mxu0 %v3796_v62  ;;  %v3824_v62 = vld [vmem:[%s4885_s25 + $0x50] sm:$0xff]  }
 0x83f   :  { %v1060_v24 = vpop.f32.mrf.mxu0 }
 0x841   :  { %v3566_v25 = vpop.f32.mrf.mxu0 }
 0x843   :  { %v1063_v26 = vpop.f32.mrf.mxu0 }
 0x844   :  { %v1067_v27 = vpack.c.bf16 %v1063_v26, %v1060_v24  ;;  %v3799_v26 = vld [vmem:[%s4884_s21 + $0x54] ss:$8 sps:$4 sm:$0xff]  }
 0x845   :  { %v3567_v28 = vpop.f32.mrf.mxu0 }
 0x846   :  { %3573 = vmatmul.mubr.msk.bf16.vlgmr.msra.gmra.mxu1 %vm574_vm2, %v1067_v27  ;;  %v3797_v27 = vld [vmem:[%s4884_s21 + $0x50] ss:$8 sps:$4 sm:$0xff]   ;;  %v3802_v28 = vld [vmem:[%s4884_s21 + $0x44] ss:$8 sps:$4 sm:$0xff]  }
 0x847   :  { %v1170_v29 = vpop.f32.mrf.mxu0  ;;  %3584 = vmatprep.mubr.msk.bf16.mxu1 %vm4133_vm1, %v4132_v15 }
 0x848   :  { %v1177_v30 = vmul.f32 0.20412415, %v1170_v29  ;;  %v3800_v29 = vld [vmem:[%s4884_s21 + $0x40] ss:$8 sps:$4 sm:$0xff]  }
 0x849   :  { %v3580_v31 = vpop.f32.mrf.mxu0 }
 0x84a   :  { %v1179_v32 = vadd.f32 %v1177_v30, %v4426_v16  ;;  %v3805_v30 = vld [vmem:[%s4884_s21 + $0x34] ss:$8 sps:$4 sm:$0xff]   ;;  %v3803_v31 = vld [vmem:[%s4884_s21 + $0x30] ss:$8 sps:$4 sm:$0xff]  }
 0x84b   :  { %v1173_v33 = vpop.f32.mrf.mxu0 }
 0x84c   :  { %v1178_v34 = vmul.f32 0.20412415, %v1173_v33  ;;  %v1181_v35 = vsel %vm626_vm3, %v1179_v32, -inf  ;;  %v3806_v33 = vld [vmem:[%s4884_s21 + $0x20] ss:$8 sps:$4 sm:$0xff]  }
 0x84d   :  { %1182 = vmax.xlane.f32.xlu1 %v1181_v35  ;;  %v3581_v36 = vpop.f32.mrf.mxu0  ;;  %v3809_v35 = vld [vmem:[%s4884_s21 + $0x10] ss:$8 sps:$4 sm:$0xff]  }
 0x84e   :  { %v1180_v37 = vadd.f32 %v1178_v34, %v4430_v21  ;;  %v3811_v34 = vld [vmem:[%s4884_s21 + $0x14] ss:$8 sps:$4 sm:$0xff]   ;;  %v3814_v36 = vld [vmem:[%s4884_s21 + $0x4] ss:$8 sps:$4 sm:$0xff]  }
 0x850   :  { %v1184_v38 = vsel %vm626_vm3, %v1180_v37, -inf }
 0x851   :  { %1185 = vmax.xlane.f32.xlu0 %v1184_v38  ;;  %v4137_v38 = vmov 0  }
 0x852   :  { %1630 = vmatprep.subr.bf16.mxu0 %v4137_v38 }
 0x8d6   :  { %v1183_v39 = vpop.xlane.xlu1 %1182 }
 0x8d7   :  { %v1187_v40 = vsub.f32 %v1179_v32, %v1183_v39  ;;  %v3808_v32 = vld [vmem:[%s4884_s21 + $0x24] ss:$8 sps:$4 sm:$0xff]   ;;  %v3815_v39 = vld [vmem:[%s4885_s25 + $0x38] sm:$0xff]  }
 0x8d9   :  { %v1189_v43 = vmul.f32 1.442695, %v1187_v40  ;;  %v3816_v40 = vld [vmem:[%s4885_s25 + $0x30] sm:$0xff]  }
 0x8da   :  { %v1186_v44 = vpop.xlane.xlu0 %1185 }
 0x8db   :  { %3911 = vpow2.f32 %v1189_v43  ;;  %v1188_v45 = vsub.f32 %v1180_v37, %v1186_v44  ;;  %v3812_v37 = vld [vmem:[%s4884_s21] ss:$8 sps:$4 sm:$0xff]  }
 0x8dd   :  { %v1191_v46 = vmul.f32 1.442695, %v1188_v45 }
 0x8df   :  { %3913 = vpow2.f32 %v1191_v46 }
 0x8e8   :  { %v3912_v16 = vpop.eup %3911 }
 0x8e9   :  { %v1193_v41 = vsel %vm626_vm3, %v3912_v16, 0.0 }
 0x8ea   :  { %1194 = vadd.xlane.f32.xlu0 %v1193_v41 }
 0x8ec   :  { %v3914_v47 = vpop.eup %3913 }
 0x8ed   :  { %v1196_v48 = vsel %vm626_vm3, %v3914_v47, 0.0 }
 0x8ee   :  { %1197 = vadd.xlane.f32.xlu1 %v1196_v48 }
 0x900   :  { %1204 = vrot.lane.b32.xlu0 %v4402_v1, %s4136_s17 }
 0x906   :  { %v1117_v21 = vpop.f32.mrf.mxu1 }
 0x907   :  { %v1124_v49 = vadd.f32 %v1117_v21, %v4493_v3  ;;  %v3263_v21 = vld [vmem:[%s4886_s29] ss:$0 sm:$0xff] }
 0x908   :  { %v3574_v42 = vpop.f32.mrf.mxu1 }
 0x90a   :  { %v1120_v50 = vpop.f32.mrf.mxu1 }
 0x90b   :  { %v1125_v51 = vadd.f32 %v1120_v50, %v4495_v6 }
 0x90c   :  { %v3575_v52 = vpop.f32.mrf.mxu1 }
 0x973   :  { %v1195_v53 = vpop.xlane.xlu0 %1194 }
 0x974   :  { %3915 = vrcp.f32 %v1195_v53 }
 0x977   :  { %v1198_v54 = vpop.xlane.xlu1 %1197  ;;  %v1205_v55 = vpop.permute.xlu0 %1204 }
 0x978   :  { %3917 = vrcp.f32 %v1198_v54  ;;  %3583 = vmatpush3.bf16.msra.mxu1 %v1205_v55 }
 0x979   :  { %1446 = vmatprep.subr.bf16.mxu1 %v3799_v26 }
 0x981   :  { %v3916_v56 = vpop.eup %3915 }
 0x982   :  { %v1201_v58 = vmul.f32 %v3916_v56, %v3912_v16  ;;  %v3817_v56 = vld [vmem:[%s4885_s25 + $0x28] sm:$0xff]  }
 0x985   :  { %v3918_v57 = vpop.eup %3917 }
 0x986   :  { %v1202_v1 = vmul.f32 %v3918_v57, %v3914_v47  ;;  %v3818_v57 = vld [vmem:[%s4885_s25 + $0x20] sm:$0xff]  }
 0x988   :  { %v1203_v59 = vpack.c.bf16 %v1202_v1, %v1201_v58  ;;  %v3819_v58 = vld [vmem:[%s4885_s25 + $0x18] sm:$0xff]   ;;  %v3820_v1 = vld [vmem:[%s4885_s25 + $0x10] sm:$0xff]  }
 0x98a   :  { %3585 = vmatmul.mubr.msk.bf16.vlgmr.msra.gmra.mxu1 %vm626_vm3, %v1203_v59  ;;  %v3821_v59 = vld [vmem:[%s4885_s25 + $0x8] sm:$0xff]  }
 0x98b   :  { %1447 = vmatpush1.bf16.msra.mxu1 %v3797_v27  ;;  %1474 = vmatprep.mubr.bf16.mxu1 %v4137_v38 }
 0x98c   :  { %1448 = vmatprep.subr.bf16.mxu1 %v3802_v28 }
 0x98f   :  { %1449 = vmatpush1.bf16.msra.mxu1 %v3800_v29 }
 0x990   :  { %1450 = vmatprep.subr.bf16.mxu1 %v3805_v30 }
 0x993   :  { %1451 = vmatpush1.bf16.msra.mxu1 %v3803_v31 }
 0x994   :  { %1452 = vmatprep.subr.bf16.mxu1 %v3808_v32 }
 0x997   :  { %1453 = vmatpush1.bf16.msra.mxu1 %v3806_v33 }
 0x998   :  { %1454 = vmatprep.subr.bf16.mxu1 %v3811_v34 }
 0x99b   :  { %1455 = vmatpush1.bf16.msra.mxu1 %v3809_v35 }
 0x99c   :  { %1456 = vmatprep.subr.bf16.mxu1 %v3814_v36 }
 0x99f   :  { %1457 = vmatpush1.bf16.msra.mxu1 %v3812_v37 }
 0x9a0   :  { %3596 = vmatprep.subr.bf16.mxu1 %v4132_v15 }
 0xa4a   :  { %v1244_v63 = vpop.f32.mrf.mxu1 }
 0xa4c   :  { %v3586_v2 = vpop.f32.mrf.mxu1 }
 0xa4d   :  { %v3826_v2 = vld [vmem:[%s4885_s25 + $0x40] sm:$0xff]  }
 0xa4e   :  { %v1247_v0 = vpop.f32.mrf.mxu1 }
 0xa4f   :  { %v1251_v3 = vpack.c.bf16 %v1247_v0, %v1244_v63  ;;  %v3825_v63 = vld [vmem:[%s4885_s25 + $0x48] sm:$0xff]   ;;  %v1369_v0 = vlaneseq }
 0xa50   :  { %v3587_v4 = vpop.f32.mrf.mxu1 }
 0xa51   :  { %3593 = vmatmul.mubr.msk.bf16.vlgmr.msra.gmra.mxu0 %vm574_vm2, %v1251_v3  ;;  %v4583_v3 = vshrl.u32 %v1369_v0, 7 }
 0xa52   :  { %1631 = vmatpush1.bf16.msra.mxu0 %v3815_v39 }
 0xa53   :  { %1632 = vmatprep.subr.bf16.mxu0 %v4137_v38  ;;  %v1371_v4 = vsub.s32 0, %v4583_v3 }
 0xa56   :  { %1633 = vmatpush1.bf16.msra.mxu0 %v3816_v40 }
 0xa57   :  { %1634 = vmatprep.subr.bf16.mxu0 %v4137_v38 }
 0xa5a   :  { %1635 = vmatpush1.bf16.msra.mxu0 %v3817_v56 }
 0xa5b   :  { %1636 = vmatprep.subr.bf16.mxu0 %v4137_v38 }
 0xa5e   :  { %1637 = vmatpush1.bf16.msra.mxu0 %v3818_v57 }
 0xa5f   :  { %1638 = vmatprep.subr.bf16.mxu0 %v4137_v38 }
 0xa62   :  { %1639 = vmatpush1.bf16.msra.mxu0 %v3819_v58 }
 0xa63   :  { %1640 = vmatprep.subr.bf16.mxu0 %v4137_v38 }
 0xa66   :  { %1641 = vmatpush1.bf16.msra.mxu0 %v3820_v1  ;;  %v3278_v1 = vld [vmem:[%s4889_s14] ss:$0 sm:$0xff] }
 0xa67   :  { %1642 = vmatprep.subr.bf16.mxu0 %v4137_v38 }
 0xa6a   :  { %1643 = vmatpush1.bf16.msra.mxu0 %v3821_v59 }
 0xa6b   :  { %1644 = vmatprep.subr.bf16.mxu0 %v4137_v38 }
 0xa6e   :  { %1645 = vmatpush1.bf16.msra.mxu0 %v3822_v60 }
 0xa6f   :  { %1654 = vmatprep.subr.bf16.mxu0 %v4137_v38 }
 0xa72   :  { %1655 = vmatpush2.bf16.msra.mxu0 %v3823_v61 }
 0xa73   :  { %1656 = vmatprep.subr.bf16.mxu0 %v4137_v38 }
 0xa76   :  { %1657 = vmatpush2.bf16.msra.mxu0 %v3824_v62 }
 0xa77   :  { %1658 = vmatprep.subr.bf16.mxu0 %v4137_v38 }
 0xa7a   :  { %1659 = vmatpush2.bf16.msra.mxu0 %v3825_v63 }
 0xa7b   :  { %1660 = vmatprep.subr.bf16.mxu0 %v4137_v38 }
 0xa7e   :  { %1661 = vmatpush2.bf16.msra.mxu0 %v3826_v2 }
 0xa7f   :  { %3628 = vmatprep.subr.bf16.mxu0 %v4132_v15 }
 0xb11   :  { %v1301_v5 = vpop.f32.mrf.mxu0 }
 0xb12   :  { %v1308_v6 = vadd.f32 %v1301_v5, %v1124_v49  ;;  %v1367_v5 = vld [vmem:[%s4888_s8] sm:$0x3] }
 0xb13   :  { %v3594_v7 = vpop.f32.mrf.mxu0 }
 0xb14   :  { %v1312_v8 = vsel %vm215_vm0, %v1308_v6, 0.0  ;;  %v1372_v7 = vrot.slane %v1367_v5, %v1371_v4 }
 0xb15   :  { %1313 = vadd.xlane.f32.xlu1 %v1312_v8  ;;  %v1304_v10 = vpop.f32.mrf.mxu0 }
 0xb16   :  { %v1309_v11 = vadd.f32 %v1304_v10, %v1125_v51  ;;  %v3264_v51 = vld [vmem:[%s4887_s3] ss:$0 sm:$0xff] }
 0xb17   :  { %v3595_v12 = vpop.f32.mrf.mxu0 }
 0xb18   :  { %v1315_v13 = vsel %vm215_vm0, %v1309_v11, 0.0 }
 0xb19   :  { %1316 = vadd.xlane.f32.xlu1 %v1315_v13 }
 0xb9e   :  { %v1314_v14 = vpop.xlane.xlu1 %1313 }
 0xb9f   :  { %v1318_v17 = vmul.f32 0.010416667, %v1314_v14 }
 0xba1   :  { %v1320_v9 = vsub.f32 %v1308_v6, %v1318_v17  ;;  %v1375_v6 = vsub.s32 1, %v4583_v3 }
 0xba2   :  { %v1317_v18 = vpop.xlane.xlu1 %1316 }
 0xba3   :  { %v1319_v19 = vmul.f32 0.010416667, %v1317_v18  ;;  %v1322_v20 = vmul.f32 %v1320_v9, %v1320_v9  ;;  %v1376_v8 = vrot.slane %v1367_v5, %v1375_v6 }
 0xba5   :  { %v1321_v22 = vsub.f32 %v1309_v11, %v1319_v19  ;;  %v1324_v23 = vsel %vm215_vm0, %v1322_v20, 0.0 }
 0xba6   :  { %1325 = vadd.xlane.f32.xlu1 %v1324_v23 }
 0xba7   :  { %v1323_v24 = vmul.f32 %v1321_v22, %v1321_v22 }
 0xba9   :  { %v1327_v25 = vsel %vm215_vm0, %v1323_v24, 0.0 }
 0xbaa   :  { %1328 = vadd.xlane.f32.xlu1 %v1327_v25 }
 0xc2f   :  { %v1326_v43 = vpop.xlane.xlu1 %1325 }
 0xc30   :  { %v1330_v44 = vmul.f32 0.010416667, %v1326_v43 }
 0xc32   :  { %v1332_v45 = vadd.f32 1e-12, %v1330_v44 }
 0xc33   :  { %v1329_v46 = vpop.xlane.xlu1 %1328 }
 0xc34   :  { %3919 = vrsqrt.f32 %v1332_v45  ;;  %v1331_v16 = vmul.f32 0.010416667, %v1329_v46 }
 0xc36   :  { %v1333_v41 = vadd.f32 1e-12, %v1331_v16 }
 0xc38   :  { %3921 = vrsqrt.f32 %v1333_v41 }
 0xc41   :  { %v3920_v47 = vpop.eup %3919 }
 0xc42   :  { %v1336_v48 = vmul.f32 %v3920_v47, %v1320_v9 }
 0xc44   :  { %v1344_v50 = vmul.f32 %v3263_v21, %v1336_v48 }
 0xc45   :  { %v3922_v49 = vpop.eup %3921 }
 0xc46   :  { %v1337_v42 = vmul.f32 %v3922_v49, %v1321_v22  ;;  %v4554_v53 = vadd.f32 %v3264_v51, %v1344_v50 }
 0xc48   :  { %v1345_v52 = vmul.f32 %v3263_v21, %v1337_v42 }
 0xc4a   :  { %v4556_v54 = vadd.f32 %v3264_v51, %v1345_v52 }
 0xc4c   :  { %v1366_v55 = vpack.c.bf16 %v4556_v54, %v4554_v53 }
 0xc4e   :  { %3277 = vmatmul.mubr.msk.bf16.vlgmr.msra.gmra.mxu1 %vm215_vm0, %v1366_v55 }
 0xc4f   :  { %3608 = vmatprep.mubr.msk.bf16.mxu1 %vm4133_vm1, %v4132_v15 }
 0xd0e   :  { %v1476_v10 = vpop.f32.mrf.mxu1 }
 0xd0f   :  { %v1477_v11 = vadd.f32 %v1476_v10, %v1372_v7 }
 0xd10   :  { %v1478_v12 = vpop.f32.mrf.mxu1 }
 0xd11   :  { %v1489_v13 = vmul.f32 0.044715, %v1477_v11  ;;  %v1479_v14 = vadd.f32 %v1478_v12, %v1376_v8  ;;  %v1485_v50 = vmul.f32 0.5, %v1477_v11 }
 0xd12   :  { %v1480_v17 = vpop.f32.mrf.mxu1 }
 0xd13   :  { %v1493_v9 = vmul.f32 %v1489_v13, %v1477_v11  ;;  %v1490_v18 = vmul.f32 0.044715, %v1479_v14  ;;  %v1481_v19 = vadd.f32 %v1480_v17, %v1372_v7  ;;  %v1486_v21 = vmul.f32 0.5, %v1479_v14 }
 0xd14   :  { %v1482_v20 = vpop.f32.mrf.mxu1 }
 0xd15   :  { %v1497_v22 = vmul.f32 %v1493_v9, %v1477_v11  ;;  %v1494_v23 = vmul.f32 %v1490_v18, %v1479_v14  ;;  %v1491_v24 = vmul.f32 0.044715, %v1481_v19  ;;  %v1483_v25 = vadd.f32 %v1482_v20, %v1376_v8  ;;  %v3828_v20 = vld [vmem:[%s4891_s24 + $0x28] sm:$0xff]  }
 0xd16   :  { %v1487_v47 = vmul.f32 0.5, %v1481_v19 }
 0xd17   :  { %v1501_v26 = vadd.f32 %v1497_v22, %v1477_v11  ;;  %v1498_v27 = vmul.f32 %v1494_v23, %v1479_v14  ;;  %v1495_v28 = vmul.f32 %v1491_v24, %v1481_v19  ;;  %v1492_v29 = vmul.f32 0.044715, %v1483_v25  ;;  %v3829_v22 = vld [vmem:[%s4890_s19 + $0x20] sm:$0xff]   ;;  %v3831_v24 = vld [vmem:[%s4890_s19 + $0x18] sm:$0xff]  }
 0xd18   :  { %v1488_v49 = vmul.f32 0.5, %v1483_v25  ;;  %v3830_v23 = vld [vmem:[%s4891_s24 + $0x20] sm:$0xff]  }
 0xd19   :  { %v1502_v30 = vadd.f32 %v1498_v27, %v1479_v14  ;;  %v1499_v31 = vmul.f32 %v1495_v28, %v1481_v19  ;;  %v1496_v32 = vmul.f32 %v1492_v29, %v1483_v25  ;;  %v1505_v33 = vmul.f32 0.7978846, %v1501_v26  ;;  %v3833_v26 = vld [vmem:[%s4890_s19 + $0x10] sm:$0xff]   ;;  %v3835_v28 = vld [vmem:[%s4890_s19 + $0x8] sm:$0xff]  }
 0xd1a   :  { %v3834_v27 = vld [vmem:[%s4891_s24 + $0x10] sm:$0xff]   ;;  %v3836_v29 = vld [vmem:[%s4891_s24 + $0x8] sm:$0xff]  }
 0xd1b   :  { %v1506_v34 = vmul.f32 0.7978846, %v1502_v30  ;;  %v1503_v35 = vadd.f32 %v1499_v31, %v1481_v19  ;;  %v1500_v36 = vmul.f32 %v1496_v32, %v1483_v25  ;;  %v3827_v19 = vld [vmem:[%s4890_s19 + $0x28] sm:$0xff]   ;;  %v3837_v30 = vld [vmem:[%s4890_s19] sm:$0xff]  }
 0xd1c   :  { %3597 = vmatpush3.bf16.msra.mxu1 %v3827_v19  ;;  %v3838_v31 = vld [vmem:[%s4891_s24] sm:$0xff]  }
 0xd1d   :  { %3923 = vtanh.f32 %v1506_v34  ;;  %v1507_v37 = vmul.f32 0.7978846, %v1503_v35  ;;  %v1504_v39 = vadd.f32 %v1500_v36, %v1483_v25  ;;  %3598 = vmatprep.subr.bf16.mxu1 %v4132_v15  ;;  %v3832_v25 = vld [vmem:[%s4891_s24 + $0x18] sm:$0xff]  }
 0xd1e   :  { %3925 = vtanh.f32 %v1505_v33 }
 0xd1f   :  { %3927 = vtanh.f32 %v1507_v37  ;;  %v1508_v40 = vmul.f32 0.7978846, %v1504_v39 }
 0xd20   :  { %3599 = vmatpush3.bf16.msra.mxu1 %v3829_v22 }
 0xd21   :  { %3929 = vtanh.f32 %v1508_v40  ;;  %3600 = vmatprep.subr.bf16.mxu1 %v4132_v15 }
 0xd24   :  { %3601 = vmatpush3.bf16.msra.mxu1 %v3831_v24  ;;  %v4676_v24 = vld [vmem:[%s4151_s9] sm:$0xff] }
 0xd25   :  { %3602 = vmatprep.subr.bf16.mxu1 %v4132_v15 }
 0xd28   :  { %3603 = vmatpush3.bf16.msra.mxu1 %v3833_v26 }
 0xd29   :  { %3604 = vmatprep.subr.bf16.mxu1 %v4132_v15 }
 0xd2a   :  { %v3924_v43 = vpop.eup %3923 }
 0xd2b   :  { %v3926_v44 = vpop.eup %3925  ;;  %v1514_v46 = vadd.f32 1.0, %v3924_v43  ;;  %v3292_v43 = vld [vmem:[%s4892_s30] ss:$0 sm:$0xff] }
 0xd2c   :  { %v3928_v45 = vpop.eup %3927  ;;  %v1513_v48 = vadd.f32 1.0, %v3926_v44  ;;  %3605 = vmatpush3.bf16.msra.mxu1 %v3835_v28 }
 0xd2d   :  { %v1515_v16 = vadd.f32 1.0, %v3928_v45  ;;  %v1518_v52 = vmul.f32 %v1514_v46, %v1486_v21  ;;  %3606 = vmatprep.subr.bf16.mxu1 %v4132_v15  ;;  %v3839_v21 = vld [vmem:[%s4894_s20 + $0x28] sm:$0xff]  }
 0xd2e   :  { %v3930_v41 = vpop.eup %3929  ;;  %v1517_v56 = vmul.f32 %v1513_v48, %v1485_v50  ;;  %v3841_v50 = vld [vmem:[%s4894_s20 + $0x18] sm:$0xff]  }
 0xd2f   :  { %v1516_v42 = vadd.f32 1.0, %v3930_v41  ;;  %v1519_v51 = vmul.f32 %v1515_v16, %v1487_v47  ;;  %v3293_v16 = vld [vmem:[%s4893_s12] ss:$0 sm:$0xff] }
 0xd30   :  { %3607 = vmatpush3.bf16.msra.mxu1 %v3837_v30  ;;  %v4681_v30 = vld [vmem:[%s4151_s9 + $0x8] sm:$0xff]  ;;  %s4898_s9 = sld [smem:[#allocation27_spill]] }
 0xd31   :  { %v1520_v55 = vmul.f32 %v1516_v42, %v1488_v49  ;;  %v1545_v58 = vpack.c.bf16 %v1519_v51, %v1517_v56  ;;  %3612 = vmatprep.subr.bf16.mxu1 %v4132_v15  ;;  %v3840_v42 = vld [vmem:[%s4894_s20 + $0x20] sm:$0xff]   ;;  %v3842_v51 = vld [vmem:[%s4894_s20 + $0x10] sm:$0xff]  }
 0xd33   :  { %v1546_v57 = vpack.c.bf16 %v1520_v55, %v1518_v52  ;;  %v3843_v52 = vld [vmem:[%s4894_s20 + $0x8] sm:$0xff]   ;;  %v3844_v55 = vld [vmem:[%s4894_s20] sm:$0xff]  }
 0xd35   :  { %3291 = vmatprep.mubr.msk.bf16.mxu0 %vm1626_vm5, %v1546_v57 }
 0xd36   :  { %1663 = vmatmul.mubr.bf16.vlgmr.msra.gmra.mxu0 %v1545_v58  ;;  %v3294_v58 = vld [vmem:[%s4895_s11] ss:$0 sm:$0xff] }
 0xd37   :  { %3640 = vmatprep.mubr.msk.bf16.mxu0 %vm4133_vm1, %v4132_v15  ;;  %3629 = vmatpush3.bf16.msra.mxu0 %v3828_v20 }
 0xd38   :  { %3630 = vmatprep.subr.bf16.mxu0 %v4132_v15 }
 0xd3b   :  { %3631 = vmatpush3.bf16.msra.mxu0 %v3830_v23 }
 0xd3c   :  { %3632 = vmatprep.subr.bf16.mxu0 %v4132_v15 }
 0xd3f   :  { %3633 = vmatpush3.bf16.msra.mxu0 %v3832_v25 }
 0xd40   :  { %3634 = vmatprep.subr.bf16.mxu0 %v4132_v15 }
 0xd43   :  { %3635 = vmatpush3.bf16.msra.mxu0 %v3834_v27 }
 0xd44   :  { %3636 = vmatprep.subr.bf16.mxu0 %v4132_v15 }
 0xd47   :  { %3637 = vmatpush3.bf16.msra.mxu0 %v3836_v29 }
 0xd48   :  { %3638 = vmatprep.subr.bf16.mxu0 %v4132_v15 }
 0xd4b   :  { %3639 = vmatpush3.bf16.msra.mxu0 %v3838_v31 }
 0xd4c   :  { %3650 = vmatprep.subr.bf16.mxu0 %v4132_v15 }
 0xdf6   :  { %v1664_v59 = vpop.f32.mrf.mxu0 }
 0xdf7   :  { %v1665_v60 = vadd.f32 %v3278_v1, %v1664_v59 }
 0xdf8   :  { %v1666_v61 = vpop.f32.mrf.mxu0 }
 0xdf9   :  { %v1671_v62 = vadd.f32 %v1665_v60, %v4554_v53 }
 0xdfa   :  { %v1667_v63 = vpop.f32.mrf.mxu0 }
 0xdfb   :  { %v1668_v2 = vadd.f32 %v3278_v1, %v1667_v63  ;;  %v1675_v0 = vsel %vm215_vm0, %v1671_v62, 0.0  ;;  %v3310_v1 = vld [vmem:[%s4896_s0] ss:$0 sm:$0xff] }
 0xdfc   :  { %v1669_v5 = vpop.f32.mrf.mxu0  ;;  %1676 = vadd.xlane.f32.xlu1 %v1675_v0 }
 0xdfd   :  { %v1672_v7 = vadd.f32 %v1668_v2, %v4556_v54 }
 0xdff   :  { %v1678_v8 = vsel %vm215_vm0, %v1672_v7, 0.0 }
 0xe00   :  { %1679 = vadd.xlane.f32.xlu1 %v1678_v8 }
 0xe85   :  { %v1677_v10 = vpop.xlane.xlu1 %1676 }
 0xe86   :  { %v1681_v11 = vmul.f32 0.010416667, %v1677_v10 }
 0xe88   :  { %v1683_v12 = vsub.f32 %v1671_v62, %v1681_v11 }
 0xe89   :  { %v1680_v13 = vpop.xlane.xlu1 %1679 }
 0xe8a   :  { %v1682_v53 = vmul.f32 0.010416667, %v1680_v13  ;;  %v1685_v14 = vmul.f32 %v1683_v12, %v1683_v12  ;;  %v3302_v13 = vld [vmem:[%s4897_s15] ss:$0 sm:$0xff] }
 0xe8c   :  { %v1684_v17 = vsub.f32 %v1672_v7, %v1682_v53  ;;  %v1687_v9 = vsel %vm215_vm0, %v1685_v14, 0.0 }
 0xe8d   :  { %1688 = vadd.xlane.f32.xlu0 %v1687_v9 }
 0xe8e   :  { %v1686_v18 = vmul.f32 %v1684_v17, %v1684_v17 }
 0xe90   :  { %v1690_v54 = vsel %vm215_vm0, %v1686_v18, 0.0 }
 0xe91   :  { %1691 = vadd.xlane.f32.xlu1 %v1690_v54 }
 0xf16   :  { %v1689_v32 = vpop.xlane.xlu0 %1688 }
 0xf17   :  { %v1693_v33 = vmul.f32 0.010416667, %v1689_v32 }
 0xf19   :  { %v1695_v34 = vadd.f32 1e-12, %v1693_v33 }
 0xf1a   :  { %v1692_v35 = vpop.xlane.xlu1 %1691 }
 0xf1b   :  { %3931 = vrsqrt.f32 %v1695_v34  ;;  %v1694_v36 = vmul.f32 0.010416667, %v1692_v35 }
 0xf1d   :  { %v1696_v37 = vadd.f32 1e-12, %v1694_v36 }
 0xf1f   :  { %3933 = vrsqrt.f32 %v1696_v37 }
 0xf28   :  { %v3932_v39 = vpop.eup %3931 }
 0xf29   :  { %v1699_v40 = vmul.f32 %v3932_v39, %v1683_v12 }
 0xf2b   :  { %v1707_v46 = vmul.f32 %v3292_v43, %v1699_v40 }
 0xf2c   :  { %v3934_v44 = vpop.eup %3933 }
 0xf2d   :  { %v1700_v45 = vmul.f32 %v3934_v44, %v1684_v17  ;;  %v4628_v47 = vadd.f32 %v3293_v16, %v1707_v46 }
 0xf2f   :  { %v1708_v41 = vmul.f32 %v3292_v43, %v1700_v45 }
 0xf31   :  { %v4630_v48 = vadd.f32 %v3293_v16, %v1708_v41 }
 0xf33   :  { %v1729_v49 = vpack.c.bf16 %v4630_v48, %v4628_v47 }
 0xf35   :  { %3609 = vmatmul.mubr.msk.bf16.vlgmr.msra.gmra.mxu1 %vm215_vm0, %v1729_v49  ;;  %3641 = vmatmul.mubr.msk.bf16.vlgmr.msra.gmra.mxu0 %vm215_vm0, %v1729_v49 }
 0xf36   :  { %3613 = vmatpush3.bf16.msra.mxu1 %v3839_v21  ;;  %3624 = vmatprep.mubr.msk.bf16.mxu1 %vm4133_vm1, %v4132_v15 }
 0xf37   :  { %3614 = vmatprep.subr.bf16.mxu1 %v4132_v15  ;;  %3652 = vmatprep.mubr.msk.bf16.mxu0 %vm4133_vm1, %v4132_v15 }
 0xf3a   :  { %3615 = vmatpush3.bf16.msra.mxu1 %v3840_v42 }
 0xf3b   :  { %3616 = vmatprep.subr.bf16.mxu1 %v4132_v15 }
 0xf3e   :  { %3617 = vmatpush3.bf16.msra.mxu1 %v3841_v50 }
 0xf3f   :  { %3618 = vmatprep.subr.bf16.mxu1 %v4132_v15 }
 0xf42   :  { %3619 = vmatpush3.bf16.msra.mxu1 %v3842_v51 }
 0xf43   :  { %3620 = vmatprep.subr.bf16.mxu1 %v4132_v15 }
 0xf46   :  { %3621 = vmatpush3.bf16.msra.mxu1 %v3843_v52 }
 0xf47   :  { %3622 = vmatprep.subr.bf16.mxu1 %v4132_v15 }
 0xf4a   :  { %3623 = vmatpush3.bf16.msra.mxu1 %v3844_v55 }
 0xf4b   :  { %3644 = vmatprep.subr.bf16.mxu1 %v4132_v15 }
 0xf4d   :  { %3625 = vmatmul.mubr.msk.bf16.vlgmr.msra.gmra.mxu1 %vm215_vm0, %v1729_v49 }
 0xf4e   :  { %3646 = vmatprep.mubr.msk.bf16.mxu1 %vm4133_vm1, %v4132_v15 }
 0xff5   :  { %v1810_v56 = vpop.f32.mrf.mxu1  ;;  %v2002_v57 = vpop.f32.mrf.mxu0 }
 0xff6   :  { %v1811_v63 = vadd.f32 %v3294_v58, %v1810_v56  ;;  %v2003_v2 = vadd.f32 %v3310_v1, %v2002_v57  ;;  %v3845_v56 = vld [vmem:[%s4898_s9 + $0x8] ss:$0 sps:$4 sm:$0xff]  }
 0xff7   :  { %v3610_v59 = vpop.f32.mrf.mxu1  ;;  %v3642_v60 = vpop.f32.mrf.mxu0  ;;  %v2165_v57 = vsel %vm708_vm4, %v3845_v56, 0 }
 0xff9   :  { %v1813_v61 = vpop.f32.mrf.mxu1  ;;  %v2005_v62 = vpop.f32.mrf.mxu0 }
 0xffa   :  { %v1814_v0 = vadd.f32 %v3294_v58, %v1813_v61  ;;  %v2006_v5 = vadd.f32 %v3310_v1, %v2005_v62  ;;  %v3846_v58 = vld [vmem:[%s4898_s9] sm:$0xff]  }
 0xffb   :  { %v3611_v7 = vpop.f32.mrf.mxu1  ;;  %v3643_v8 = vpop.f32.mrf.mxu0 }
 0xffc   :  { %v4657_v10 = vpack.c.bf16 %v1814_v0, %v1811_v63  ;;  %v4659_v11 = vpack.c.bf16 %v2006_v5, %v2003_v2 }
 0xffe   :  { %3651 = vmatpush3.bf16.msra.mxu0 %v4659_v11  ;;  %2211 = vrot.lane.b32.xlu0 %v4657_v10, %s4134_s5 }
 0xfff   :  { %3664 = vmatprep.subr.bf16.mxu0 %v4132_v15 }
0x100d   :  { %v1906_v12 = vpop.f32.mrf.mxu1 }
0x100e   :  { %v1907_v17 = vadd.f32 %v3302_v13, %v1906_v12 }
0x100f   :  { %v3626_v53 = vpop.f32.mrf.mxu1 }
0x1011   :  { %v1909_v14 = vpop.f32.mrf.mxu1 }
0x1012   :  { %v1910_v9 = vadd.f32 %v3302_v13, %v1909_v14 }
0x1013   :  { %v3627_v18 = vpop.f32.mrf.mxu1 }
0x1014   :  { %v4666_v54 = vpack.c.bf16 %v1910_v9, %v1907_v17 }
0x1016   :  { %v2036_v19 = vsel %vm574_vm2, %v4666_v54, 0 }
0x1017   :  { %3645 = vmatpush3.bf16.xpose.msra.mxu1 %v2036_v19 }
0x1018   :  { %3656 = vmatprep.subr.bf16.mxu1 %v4132_v15 }
0x101e   :  { %3647 = vmatmul.mubr.msk.bf16.vlgmr.msra.gmra.mxu1 %vm574_vm2, %v4657_v10 }
0x101f   :  { %3660 = vmatprep.mubr.msk.bf16.mxu1 %vm4133_vm1, %v4132_v15  ;;  %3657 = vmatpush3.bf16.msra.mxu1 %v2165_v57 }
0x1020   :  { %3658 = vmatprep.subr.bf16.mxu1 %v4132_v15 }
0x1023   :  { %3659 = vmatpush3.bf16.msra.mxu1 %v3846_v58 }
0x1024   :  { %3670 = vmatprep.subr.bf16.mxu1 %v4132_v15 }
0x1070   :  { %v2212_v55 = vpop.permute.xlu0 %2211 }
0x10de   :  { %v2072_v20 = vpop.f32.mrf.mxu1 }
0x10df   :  { %v2079_v22 = vmul.f32 0.20412415, %v2072_v20 }
0x10e0   :  { %v3648_v23 = vpop.f32.mrf.mxu1 }
0x10e1   :  { %v2081_v25 = vadd.f32 %v4676_v24, %v2079_v22 }
0x10e2   :  { %v2075_v26 = vpop.f32.mrf.mxu1 }
0x10e3   :  { %v2080_v27 = vmul.f32 0.20412415, %v2075_v26  ;;  %v2083_v28 = vsel %vm626_vm3, %v2081_v25, -inf }
0x10e4   :  { %2084 = vmax.xlane.f32.xlu1 %v2083_v28  ;;  %v3649_v29 = vpop.f32.mrf.mxu1  ;;  %v3318_v28 = vld [vmem:[%s4899_s16] ss:$0 sm:$0xff] }
0x10e5   :  { %v2082_v31 = vadd.f32 %v4681_v30, %v2080_v27  ;;  %v2028_v29 = vadd.f32 %v3318_v28, %v4628_v47 }
0x10e7   :  { %v2086_v32 = vsel %vm626_vm3, %v2082_v31, -inf }
0x10e8   :  { %2087 = vmax.xlane.f32.xlu1 %v2086_v32 }
0x116d   :  { %v2085_v33 = vpop.xlane.xlu1 %2084 }
0x116e   :  { %v2089_v34 = vsub.f32 %v2081_v25, %v2085_v33 }
0x1170   :  { %v2091_v35 = vmul.f32 1.442695, %v2089_v34  ;;  %v2029_v34 = vadd.f32 %v3318_v28, %v4630_v48 }
0x1171   :  { %v2088_v36 = vpop.xlane.xlu1 %2087 }
0x1172   :  { %3935 = vpow2.f32 %v2091_v35  ;;  %v2090_v37 = vsub.f32 %v2082_v31, %v2088_v36 }
0x1174   :  { %v2093_v39 = vmul.f32 1.442695, %v2090_v37 }
0x1176   :  { %3937 = vpow2.f32 %v2093_v39 }
0x117f   :  { %v3936_v40 = vpop.eup %3935 }
0x1180   :  { %v2095_v43 = vsel %vm626_vm3, %v3936_v40, 0.0 }
0x1181   :  { %2096 = vadd.xlane.f32.xlu1 %v2095_v43 }
0x1183   :  { %v3938_v44 = vpop.eup %3937 }
0x1184   :  { %v2098_v45 = vsel %vm626_vm3, %v3938_v44, 0.0 }
0x1185   :  { %2099 = vadd.xlane.f32.xlu1 %v2098_v45 }
0x1196   :  { %2214 = vrot.lane.b32.xlu1 %v4666_v54, %s4134_s5 }
0x120a   :  { %v2097_v46 = vpop.xlane.xlu1 %2096 }
0x120b   :  { %3939 = vrcp.f32 %v2097_v46 }
0x120e   :  { %v2100_v16 = vpop.xlane.xlu1 %2099 }
0x120f   :  { %3941 = vrcp.f32 %v2100_v16 }
0x1212   :  { %v2215_v50 = vpop.permute.xlu1 %2214 }
0x1213   :  { %v2220_v52 = vsel %vm574_vm2, %v2215_v50, 0  ;;  %v3848_v50 = vld [vmem:[%s4898_s9 + $0xc] sm:$0xff]  }
0x1218   :  { %v3940_v41 = vpop.eup %3939 }
0x1219   :  { %v2103_v49 = vmul.f32 %v3940_v41, %v3936_v40 }
0x121c   :  { %v3942_v21 = vpop.eup %3941 }
0x121d   :  { %v2104_v42 = vmul.f32 %v3942_v21, %v3938_v44 }
0x121f   :  { %v2105_v51 = vpack.c.bf16 %v2104_v42, %v2103_v49  ;;  %v3847_v49 = vld [vmem:[%s4898_s9 + $0x14] ss:$0 sps:$4 sm:$0xff]  }
0x1220   :  { %v2352_v42 = vsel %vm708_vm4, %v3847_v49, 0 }
0x1221   :  { %3653 = vmatmul.mubr.msk.bf16.vlgmr.msra.gmra.mxu0 %vm626_vm3, %v2105_v51 }
0x1222   :  { %3665 = vmatpush3.bf16.xpose.msra.mxu0 %v2220_v52  ;;  %3666 = vmatprep.mubr.msk.bf16.mxu0 %vm4133_vm1, %v4132_v15 }
0x1223   :  { %3676 = vmatprep.subr.bf16.mxu0 %v4132_v15 }
0x1229   :  { %3667 = vmatmul.mubr.msk.bf16.vlgmr.msra.gmra.mxu0 %vm574_vm2, %v2212_v55 }
0x122a   :  { %3680 = vmatprep.mubr.msk.bf16.mxu0 %vm4133_vm1, %v4132_v15  ;;  %3677 = vmatpush3.bf16.msra.mxu0 %v2352_v42 }
0x122b   :  { %3678 = vmatprep.subr.bf16.mxu0 %v4132_v15 }
0x122e   :  { %3679 = vmatpush3.bf16.msra.mxu0 %v3848_v50 }
0x122f   :  { %3690 = vmatprep.subr.bf16.mxu0 %v4132_v15 }
0x12e1   :  { %v2144_v1 = vpop.f32.mrf.mxu0 }
0x12e3   :  { %v3654_v59 = vpop.f32.mrf.mxu0 }
0x12e5   :  { %v2147_v60 = vpop.f32.mrf.mxu0 }
0x12e6   :  { %v2151_v61 = vpack.c.bf16 %v2147_v60, %v2144_v1 }
0x12e7   :  { %v3655_v62 = vpop.f32.mrf.mxu0 }
0x12e8   :  { %3661 = vmatmul.mubr.msk.bf16.vlgmr.msra.gmra.mxu1 %vm574_vm2, %v2151_v61 }
0x12e9   :  { %v2256_v63 = vpop.f32.mrf.mxu0  ;;  %3672 = vmatprep.mubr.msk.bf16.mxu1 %vm4133_vm1, %v4132_v15 }
0x12ea   :  { %v2263_v2 = vmul.f32 0.20412415, %v2256_v63 }
0x12eb   :  { %v3668_v0 = vpop.f32.mrf.mxu0 }
0x12ec   :  { %v2265_v5 = vadd.f32 %v4676_v24, %v2263_v2 }
0x12ed   :  { %v2259_v7 = vpop.f32.mrf.mxu0 }
0x12ee   :  { %v2264_v8 = vmul.f32 0.20412415, %v2259_v7  ;;  %v2267_v12 = vsel %vm626_vm3, %v2265_v5, -inf }
0x12ef   :  { %2268 = vmax.xlane.f32.xlu1 %v2267_v12  ;;  %v3669_v13 = vpop.f32.mrf.mxu0 }
0x12f0   :  { %v2266_v53 = vadd.f32 %v4681_v30, %v2264_v8 }
0x12f2   :  { %v2270_v14 = vsel %vm626_vm3, %v2266_v53, -inf }
0x12f3   :  { %2271 = vmax.xlane.f32.xlu0 %v2270_v14 }
0x1309   :  { %2399 = vrot.lane.b32.xlu0 %v4666_v54, %s4135_s13 }
0x1378   :  { %v2269_v17 = vpop.xlane.xlu1 %2268 }
0x1379   :  { %v2273_v9 = vsub.f32 %v2265_v5, %v2269_v17 }
0x137b   :  { %v2275_v18 = vmul.f32 1.442695, %v2273_v9 }
0x137c   :  { %v2272_v19 = vpop.xlane.xlu0 %2271 }
0x137d   :  { %3943 = vpow2.f32 %v2275_v18  ;;  %v2274_v20 = vsub.f32 %v2266_v53, %v2272_v19 }
0x137f   :  { %v2277_v22 = vmul.f32 1.442695, %v2274_v20 }
0x1380   :  { %v2400_v16 = vpop.permute.xlu0 %2399 }
0x1381   :  { %3945 = vpow2.f32 %v2277_v22  ;;  %v2405_v41 = vsel %vm574_vm2, %v2400_v16, 0 }
0x138a   :  { %v3944_v23 = vpop.eup %3943 }
0x138b   :  { %v2279_v25 = vsel %vm626_vm3, %v3944_v23, 0.0 }
0x138c   :  { %2280 = vadd.xlane.f32.xlu1 %v2279_v25 }
0x138e   :  { %v3946_v26 = vpop.eup %3945 }
0x138f   :  { %v2282_v27 = vsel %vm626_vm3, %v3946_v26, 0.0 }
0x1390   :  { %2283 = vadd.xlane.f32.xlu1 %v2282_v27 }
0x13a1   :  { %2291 = vrot.lane.b32.xlu1 %v4659_v11, %s4134_s5 }
0x13a5   :  { %2397 = vrot.lane.b32.xlu1 %v4657_v10, %s4135_s13 }
0x13a8   :  { %v2201_v31 = vpop.f32.mrf.mxu1 }
0x13a9   :  { %v4719_v32 = vadd.f32 %v2201_v31, %v2028_v29 }
0x13aa   :  { %v3662_v33 = vpop.f32.mrf.mxu1 }
0x13ac   :  { %v2204_v35 = vpop.f32.mrf.mxu1 }
0x13ad   :  { %v4722_v36 = vadd.f32 %v2204_v35, %v2029_v34 }
0x13ae   :  { %v3663_v37 = vpop.f32.mrf.mxu1 }
0x1415   :  { %v2281_v39 = vpop.xlane.xlu1 %2280 }
0x1416   :  { %3947 = vrcp.f32 %v2281_v39  ;;  %v3849_v39 = vld [vmem:[%s4898_s9 + $0x20] ss:$0 sps:$4 sm:$0xff]  }
0x1419   :  { %v2284_v40 = vpop.xlane.xlu1 %2283 }
0x141a   :  { %3949 = vrcp.f32 %v2284_v40  ;;  %v2536_v40 = vsel %vm708_vm4, %v3849_v39, 0 }
0x141d   :  { %v2292_v43 = vpop.permute.xlu1 %2291 }
0x141e   :  { %3671 = vmatpush3.bf16.msra.mxu1 %v2292_v43  ;;  %v3850_v43 = vld [vmem:[%s4898_s9 + $0x18] sm:$0xff]  }
0x141f   :  { %3684 = vmatprep.subr.bf16.mxu1 %v4132_v15 }
0x1421   :  { %v2398_v21 = vpop.permute.xlu1 %2397 }
0x1423   :  { %v3948_v47 = vpop.eup %3947 }
0x1424   :  { %v2287_v45 = vmul.f32 %v3948_v47, %v3944_v23 }
0x1427   :  { %v3950_v44 = vpop.eup %3949 }
0x1428   :  { %v2288_v46 = vmul.f32 %v3950_v44, %v3946_v26 }
0x142a   :  { %v2289_v48 = vpack.c.bf16 %v2288_v46, %v2287_v45 }
0x142c   :  { %3673 = vmatmul.mubr.msk.bf16.vlgmr.msra.gmra.mxu1 %vm626_vm3, %v2289_v48 }
0x142d   :  { %3685 = vmatpush3.bf16.xpose.msra.mxu1 %v2405_v41  ;;  %3686 = vmatprep.mubr.msk.bf16.mxu1 %vm4133_vm1, %v4132_v15 }
0x142e   :  { %3696 = vmatprep.subr.bf16.mxu1 %v4132_v15 }
0x1434   :  { %3687 = vmatmul.mubr.msk.bf16.vlgmr.msra.gmra.mxu1 %vm574_vm2, %v2398_v21 }
0x1435   :  { %3700 = vmatprep.mubr.msk.bf16.mxu1 %vm4133_vm1, %v4132_v15  ;;  %3697 = vmatpush3.bf16.msra.mxu1 %v2536_v40 }
0x1436   :  { %3698 = vmatprep.subr.bf16.mxu1 %v4132_v15 }
0x1439   :  { %3699 = vmatpush3.bf16.msra.mxu1 %v3850_v43 }
0x143a   :  { %3710 = vmatprep.subr.bf16.mxu1 %v4132_v15 }
0x14ec   :  { %v2331_v51 = vpop.f32.mrf.mxu1 }
0x14ee   :  { %v3674_v52 = vpop.f32.mrf.mxu1 }
0x14f0   :  { %v2334_v55 = vpop.f32.mrf.mxu1 }
0x14f1   :  { %v2338_v56 = vpack.c.bf16 %v2334_v55, %v2331_v51 }
0x14f2   :  { %v3675_v57 = vpop.f32.mrf.mxu1 }
0x14f3   :  { %3681 = vmatmul.mubr.msk.bf16.vlgmr.msra.gmra.mxu0 %vm574_vm2, %v2338_v56 }
0x14f4   :  { %v2441_v58 = vpop.f32.mrf.mxu1  ;;  %3692 = vmatprep.mubr.msk.bf16.mxu0 %vm4133_vm1, %v4132_v15 }
0x14f5   :  { %v2448_v1 = vmul.f32 0.20412415, %v2441_v58 }
0x14f6   :  { %v3688_v59 = vpop.f32.mrf.mxu1 }
0x14f7   :  { %v2450_v60 = vadd.f32 %v4676_v24, %v2448_v1 }
0x14f8   :  { %v2444_v61 = vpop.f32.mrf.mxu1 }
0x14f9   :  { %v2449_v62 = vmul.f32 0.20412415, %v2444_v61  ;;  %v2452_v63 = vsel %vm626_vm3, %v2450_v60, -inf }
0x14fa   :  { %2453 = vmax.xlane.f32.xlu1 %v2452_v63  ;;  %v3689_v2 = vpop.f32.mrf.mxu1 }
0x14fb   :  { %v2451_v0 = vadd.f32 %v4681_v30, %v2449_v62 }
0x14fd   :  { %v2455_v5 = vsel %vm626_vm3, %v2451_v0, -inf }
0x14fe   :  { %2456 = vmax.xlane.f32.xlu0 %v2455_v5 }
0x1583   :  { %v2454_v7 = vpop.xlane.xlu1 %2453 }
0x1584   :  { %v2458_v8 = vsub.f32 %v2450_v60, %v2454_v7 }
0x1586   :  { %v2460_v12 = vmul.f32 1.442695, %v2458_v8 }
0x1587   :  { %v2457_v13 = vpop.xlane.xlu0 %2456 }
0x1588   :  { %3951 = vpow2.f32 %v2460_v12  ;;  %v2459_v53 = vsub.f32 %v2451_v0, %v2457_v13 }
0x158a   :  { %v2462_v14 = vmul.f32 1.442695, %v2459_v53 }
0x158c   :  { %3953 = vpow2.f32 %v2462_v14 }
0x1595   :  { %v3952_v17 = vpop.eup %3951 }
0x1596   :  { %v2464_v9 = vsel %vm626_vm3, %v3952_v17, 0.0 }
0x1597   :  { %2465 = vadd.xlane.f32.xlu0 %v2464_v9 }
0x1599   :  { %v3954_v18 = vpop.eup %3953 }
0x159a   :  { %v2467_v19 = vsel %vm626_vm3, %v3954_v18, 0.0 }
0x159b   :  { %2468 = vadd.xlane.f32.xlu1 %v2467_v19 }
0x15ac   :  { %2583 = vrot.lane.b32.xlu1 %v4666_v54, %s4136_s17 }
0x15ad   :  { %2475 = vrot.lane.b32.xlu0 %v4659_v11, %s4135_s13 }
0x15b0   :  { %2581 = vrot.lane.b32.xlu1 %v4657_v10, %s4136_s17 }
0x15b3   :  { %v2388_v20 = vpop.f32.mrf.mxu0 }
0x15b4   :  { %v4754_v22 = vadd.f32 %v2388_v20, %v4719_v32  ;;  %v3851_v20 = vld [vmem:[%s4898_s9 + $0x2c] ss:$0 sps:$4 sm:$0xff]  }
0x15b5   :  { %v3682_v23 = vpop.f32.mrf.mxu0 }
0x15b6   :  { %v3852_v23 = vld [vmem:[%s4898_s9 + $0x24] sm:$0xff]  }
0x15b7   :  { %v2391_v25 = vpop.f32.mrf.mxu0 }
0x15b8   :  { %v4757_v26 = vadd.f32 %v2391_v25, %v4722_v36 }
0x15b9   :  { %v3683_v27 = vpop.f32.mrf.mxu0 }
0x1620   :  { %v2466_v28 = vpop.xlane.xlu0 %2465 }
0x1621   :  { %3955 = vrcp.f32 %v2466_v28 }
0x1624   :  { %v2469_v29 = vpop.xlane.xlu1 %2468  ;;  %v2476_v54 = vpop.permute.xlu0 %2475 }
0x1625   :  { %3957 = vrcp.f32 %v2469_v29  ;;  %3691 = vmatpush3.bf16.msra.mxu0 %v2476_v54 }
0x1626   :  { %3704 = vmatprep.subr.bf16.mxu0 %v4132_v15 }
0x1628   :  { %v2584_v34 = vpop.permute.xlu1 %2583 }
0x1629   :  { %v2589_v36 = vsel %vm574_vm2, %v2584_v34, 0 }
0x162c   :  { %v2582_v37 = vpop.permute.xlu1 %2581 }
0x162e   :  { %v3956_v10 = vpop.eup %3955 }
0x162f   :  { %v2472_v33 = vmul.f32 %v3956_v10, %v3952_v17 }
0x1632   :  { %v3958_v31 = vpop.eup %3957 }
0x1633   :  { %v2473_v32 = vmul.f32 %v3958_v31, %v3954_v18 }
0x1635   :  { %v2474_v35 = vpack.c.bf16 %v2473_v32, %v2472_v33 }
0x1637   :  { %3693 = vmatmul.mubr.msk.bf16.vlgmr.msra.gmra.mxu0 %vm626_vm3, %v2474_v35 }
0x1638   :  { %3705 = vmatpush3.bf16.xpose.msra.mxu0 %v2589_v36  ;;  %3706 = vmatprep.mubr.msk.bf16.mxu0 %vm4133_vm1, %v4132_v15 }
0x1639   :  { %3716 = vmatprep.subr.bf16.mxu0 %v4132_v15 }
0x163f   :  { %3707 = vmatmul.mubr.msk.bf16.vlgmr.msra.gmra.mxu0 %vm574_vm2, %v2582_v37 }
0x1640   :  { %3720 = vmatprep.mubr.msk.bf16.mxu0 %vm4133_vm1, %v4132_v15 }
0x16f7   :  { %v2515_v47 = vpop.f32.mrf.mxu0 }
0x16f9   :  { %v3694_v44 = vpop.f32.mrf.mxu0 }
0x16fb   :  { %v2518_v45 = vpop.f32.mrf.mxu0 }
0x16fc   :  { %v2522_v46 = vpack.c.bf16 %v2518_v45, %v2515_v47 }
0x16fd   :  { %v3695_v16 = vpop.f32.mrf.mxu0 }
0x16fe   :  { %3701 = vmatmul.mubr.msk.bf16.vlgmr.msra.gmra.mxu1 %vm574_vm2, %v2522_v46 }
0x16ff   :  { %v2625_v48 = vpop.f32.mrf.mxu0  ;;  %3712 = vmatprep.mubr.msk.bf16.mxu1 %vm4133_vm1, %v4132_v15 }
0x1700   :  { %v2632_v41 = vmul.f32 0.20412415, %v2625_v48  ;;  %v3855_v48 = vld [vmem:[%s4900_s18 + $0x54] ss:$8 sps:$4 sm:$0xff]  }
0x1701   :  { %v3708_v21 = vpop.f32.mrf.mxu0 }
0x1702   :  { %v2634_v49 = vadd.f32 %v4676_v24, %v2632_v41  ;;  %v3853_v41 = vld [vmem:[%s4900_s18 + $0x50] ss:$8 sps:$4 sm:$0xff]   ;;  %v3858_v21 = vld [vmem:[%s4900_s18 + $0x44] ss:$8 sps:$4 sm:$0xff]  }
0x1703   :  { %v2628_v42 = vpop.f32.mrf.mxu0 }
0x1704   :  { %v2633_v50 = vmul.f32 0.20412415, %v2628_v42  ;;  %v2636_v51 = vsel %vm626_vm3, %v2634_v49, -inf  ;;  %v3861_v42 = vld [vmem:[%s4900_s18 + $0x34] ss:$8 sps:$4 sm:$0xff]  }
0x1705   :  { %2637 = vmax.xlane.f32.xlu0 %v2636_v51  ;;  %v3709_v52 = vpop.f32.mrf.mxu0  ;;  %v3864_v51 = vld [vmem:[%s4900_s18 + $0x24] ss:$8 sps:$4 sm:$0xff]  }
0x1706   :  { %v2635_v55 = vadd.f32 %v4681_v30, %v2633_v50  ;;  %v3859_v50 = vld [vmem:[%s4900_s18 + $0x30] ss:$8 sps:$4 sm:$0xff]   ;;  %v3862_v52 = vld [vmem:[%s4900_s18 + $0x20] ss:$8 sps:$4 sm:$0xff]  }
0x1708   :  { %v2639_v56 = vsel %vm626_vm3, %v2635_v55, -inf }
0x1709   :  { %2640 = vmax.xlane.f32.xlu1 %v2639_v56  ;;  %v3865_v56 = vld [vmem:[%s4900_s18 + $0x10] ss:$8 sps:$4 sm:$0xff]  }
0x171a   :  { %2659 = vrot.lane.b32.xlu1 %v4659_v11, %s4136_s17 }
0x178e   :  { %v2638_v57 = vpop.xlane.xlu0 %2637 }
0x178f   :  { %v2642_v58 = vsub.f32 %v2634_v49, %v2638_v57  ;;  %v3856_v49 = vld [vmem:[%s4900_s18 + $0x40] ss:$8 sps:$4 sm:$0xff]   ;;  %v3870_v57 = vld [vmem:[%s4900_s18 + $0x4] ss:$8 sps:$4 sm:$0xff]  }
0x1791   :  { %v2644_v1 = vmul.f32 1.442695, %v2642_v58  ;;  %v3868_v58 = vld [vmem:[%s4900_s18] ss:$8 sps:$4 sm:$0xff]  }
0x1792   :  { %v2641_v59 = vpop.xlane.xlu1 %2640 }
0x1793   :  { %3959 = vpow2.f32 %v2644_v1  ;;  %v2643_v24 = vsub.f32 %v2635_v55, %v2641_v59  ;;  %v3867_v55 = vld [vmem:[%s4900_s18 + $0x14] ss:$8 sps:$4 sm:$0xff]  }
0x1794   :  { %v3871_v1 = vld [vmem:[%s4901_s22 + $0x38] sm:$0xff]   ;;  %v3872_v59 = vld [vmem:[%s4901_s22 + $0x30] sm:$0xff]  }
0x1795   :  { %v2646_v60 = vmul.f32 1.442695, %v2643_v24 }
0x1796   :  { %v2660_v61 = vpop.permute.xlu1 %2659 }
0x1797   :  { %3961 = vpow2.f32 %v2646_v60  ;;  %3711 = vmatpush3.bf16.msra.mxu1 %v2660_v61 }
0x1798   :  { %2901 = vmatprep.subr.bf16.mxu1 %v3855_v48 }
0x17a0   :  { %v3960_v62 = vpop.eup %3959 }
0x17a1   :  { %v2648_v63 = vsel %vm626_vm3, %v3960_v62, 0.0 }
0x17a2   :  { %2649 = vadd.xlane.f32.xlu0 %v2648_v63 }
0x17a4   :  { %v3962_v30 = vpop.eup %3961 }
0x17a5   :  { %v2651_v2 = vsel %vm626_vm3, %v3962_v30, 0.0 }
0x17a6   :  { %2652 = vadd.xlane.f32.xlu0 %v2651_v2 }
0x17be   :  { %v2572_v0 = vpop.f32.mrf.mxu1 }
0x17bf   :  { %v2579_v11 = vadd.f32 %v2572_v0, %v4754_v22  ;;  %v2720_v22 = vsel %vm708_vm4, %v3851_v20, 0  ;;  %v3876_v20 = vld [vmem:[%s4901_s22 + $0x10] sm:$0xff]  }
0x17c0   :  { %v3702_v5 = vpop.f32.mrf.mxu1  ;;  %3717 = vmatpush3.bf16.msra.mxu0 %v2720_v22  ;;  %v3877_v22 = vld [vmem:[%s4901_s22 + $0x8] sm:$0xff]  }
0x17c1   :  { %3718 = vmatprep.subr.bf16.mxu0 %v4132_v15 }
0x17c2   :  { %v2575_v7 = vpop.f32.mrf.mxu1 }
0x17c3   :  { %v2580_v8 = vadd.f32 %v2575_v7, %v4757_v26 }
0x17c4   :  { %v3703_v12 = vpop.f32.mrf.mxu1  ;;  %3719 = vmatpush3.bf16.msra.mxu0 %v3852_v23  ;;  %v3878_v23 = vld [vmem:[%s4901_s22] sm:$0xff]  }
0x17c5   :  { %3084 = vmatprep.subr.bf16.mxu0 %v4137_v38  ;;  %v3340_v12 = vld [vmem:[#allocation4] ss:$0 sm:$0xff] }
0x182b   :  { %v2650_v13 = vpop.xlane.xlu0 %2649 }
0x182c   :  { %3963 = vrcp.f32 %v2650_v13 }
0x182f   :  { %v2653_v53 = vpop.xlane.xlu0 %2652 }
0x1830   :  { %3965 = vrcp.f32 %v2653_v53 }
0x1839   :  { %v3964_v14 = vpop.eup %3963 }
0x183a   :  { %v2656_v9 = vmul.f32 %v3964_v14, %v3960_v62 }
0x183d   :  { %v3966_v17 = vpop.eup %3965 }
0x183e   :  { %v2657_v18 = vmul.f32 %v3966_v17, %v3962_v30 }
0x1840   :  { %v2658_v19 = vpack.c.bf16 %v2657_v18, %v2656_v9  ;;  %v3873_v9 = vld [vmem:[%s4901_s22 + $0x28] sm:$0xff]   ;;  %v3874_v18 = vld [vmem:[%s4901_s22 + $0x20] sm:$0xff]  }
0x1842   :  { %3713 = vmatmul.mubr.msk.bf16.vlgmr.msra.gmra.mxu1 %vm626_vm3, %v2658_v19  ;;  %v3875_v19 = vld [vmem:[%s4901_s22 + $0x18] sm:$0xff]  }
0x1843   :  { %2929 = vmatprep.mubr.bf16.mxu1 %v4137_v38  ;;  %2902 = vmatpush1.bf16.msra.mxu1 %v3853_v41 }
0x1844   :  { %2903 = vmatprep.subr.bf16.mxu1 %v3858_v21 }
0x1847   :  { %2904 = vmatpush1.bf16.msra.mxu1 %v3856_v49 }
0x1848   :  { %2905 = vmatprep.subr.bf16.mxu1 %v3861_v42 }
0x184b   :  { %2906 = vmatpush1.bf16.msra.mxu1 %v3859_v50 }
0x184c   :  { %2907 = vmatprep.subr.bf16.mxu1 %v3864_v51 }
0x184f   :  { %2908 = vmatpush1.bf16.msra.mxu1 %v3862_v52 }
0x1850   :  { %2909 = vmatprep.subr.bf16.mxu1 %v3867_v55 }
0x1853   :  { %2910 = vmatpush1.bf16.msra.mxu1 %v3865_v56 }
0x1854   :  { %2911 = vmatprep.subr.bf16.mxu1 %v3870_v57 }
0x1857   :  { %2912 = vmatpush1.bf16.msra.mxu1 %v3868_v58 }
0x1902   :  { %v2699_v25 = vpop.f32.mrf.mxu1 }
0x1904   :  { %v3714_v26 = vpop.f32.mrf.mxu1 }
0x1905   :  { %v3880_v26 = vld [vmem:[%s4901_s22 + $0x50] sm:$0xff]  }
0x1906   :  { %v2702_v27 = vpop.f32.mrf.mxu1 }
0x1907   :  { %v2706_v28 = vpack.c.bf16 %v2702_v27, %v2699_v25  ;;  %v3879_v25 = vld [vmem:[%s4901_s22 + $0x58] sm:$0xff]   ;;  %v3881_v27 = vld [vmem:[%s4901_s22 + $0x48] sm:$0xff]  }
0x1908   :  { %v3715_v29 = vpop.f32.mrf.mxu1 }
0x1909   :  { %3721 = vmatmul.mubr.msk.bf16.vlgmr.msra.gmra.mxu0 %vm574_vm2, %v2706_v28  ;;  %v3882_v28 = vld [vmem:[%s4901_s22 + $0x40] sm:$0xff]  }
0x190a   :  { %3085 = vmatpush1.bf16.msra.mxu0 %v3871_v1  ;;  %v2822_v29 = vld [vmem:[%s4902_s23] sm:$0x3] }
0x190b   :  { %3086 = vmatprep.subr.bf16.mxu0 %v4137_v38 }
0x190e   :  { %3087 = vmatpush1.bf16.msra.mxu0 %v3872_v59 }
0x190f   :  { %3088 = vmatprep.subr.bf16.mxu0 %v4137_v38 }
0x1912   :  { %3089 = vmatpush1.bf16.msra.mxu0 %v3873_v9 }
0x1913   :  { %3090 = vmatprep.subr.bf16.mxu0 %v4137_v38 }
0x1916   :  { %3091 = vmatpush1.bf16.msra.mxu0 %v3874_v18 }
0x1917   :  { %3092 = vmatprep.subr.bf16.mxu0 %v4137_v38 }
0x191a   :  { %3093 = vmatpush1.bf16.msra.mxu0 %v3875_v19 }
0x191b   :  { %3094 = vmatprep.subr.bf16.mxu0 %v4137_v38 }
0x191e   :  { %3095 = vmatpush1.bf16.msra.mxu0 %v3876_v20 }
0x191f   :  { %3096 = vmatprep.subr.bf16.mxu0 %v4137_v38 }
0x1922   :  { %3097 = vmatpush1.bf16.msra.mxu0 %v3877_v22 }
0x1923   :  { %3098 = vmatprep.subr.bf16.mxu0 %v4137_v38 }
0x1926   :  { %3099 = vmatpush1.bf16.msra.mxu0 %v3878_v23 }
0x1927   :  { %3108 = vmatprep.subr.bf16.mxu0 %v4137_v38 }
0x192a   :  { %3109 = vmatpush2.bf16.msra.mxu0 %v3879_v25 }
0x192b   :  { %3110 = vmatprep.subr.bf16.mxu0 %v4137_v38 }
0x192e   :  { %3111 = vmatpush2.bf16.msra.mxu0 %v3880_v26 }
0x192f   :  { %3112 = vmatprep.subr.bf16.mxu0 %v4137_v38 }
0x1932   :  { %3113 = vmatpush2.bf16.msra.mxu0 %v3881_v27 }
0x1933   :  { %3114 = vmatprep.subr.bf16.mxu0 %v4137_v38 }
0x1936   :  { %3115 = vmatpush2.bf16.msra.mxu0 %v3882_v28 }
0x19c9   :  { %v2756_v54 = vpop.f32.mrf.mxu0 }
0x19ca   :  { %v2763_v10 = vadd.f32 %v2756_v54, %v2579_v11  ;;  %v3339_v11 = vld [vmem:[#allocation2] ss:$0 sm:$0xff]  ;;  %v2827_v54 = vrot.slane %v2822_v29, %v1371_v4 }
0x19cb   :  { %v3722_v31 = vpop.f32.mrf.mxu0 }
0x19cc   :  { %v2767_v33 = vsel %vm215_vm0, %v2763_v10, 0.0 }
0x19cd   :  { %2768 = vadd.xlane.f32.xlu0 %v2767_v33  ;;  %v2759_v32 = vpop.f32.mrf.mxu0 }
0x19ce   :  { %v2764_v34 = vadd.f32 %v2759_v32, %v2580_v8 }
0x19cf   :  { %v3723_v15 = vpop.f32.mrf.mxu0 }
0x19d0   :  { %v2770_v35 = vsel %vm215_vm0, %v2764_v34, 0.0 }
0x19d1   :  { %2771 = vadd.xlane.f32.xlu0 %v2770_v35 }
0x1a56   :  { %v2769_v36 = vpop.xlane.xlu0 %2768 }
0x1a57   :  { %v2773_v37 = vmul.f32 0.010416667, %v2769_v36 }
0x1a59   :  { %v2775_v39 = vsub.f32 %v2763_v10, %v2773_v37  ;;  %v2831_v10 = vrot.slane %v2822_v29, %v1375_v6 }
0x1a5a   :  { %v2772_v40 = vpop.xlane.xlu0 %2771 }
0x1a5b   :  { %v2774_v43 = vmul.f32 0.010416667, %v2772_v40  ;;  %v2777_v47 = vmul.f32 %v2775_v39, %v2775_v39 }
0x1a5d   :  { %v2776_v44 = vsub.f32 %v2764_v34, %v2774_v43  ;;  %v2779_v45 = vsel %vm215_vm0, %v2777_v47, 0.0 }
0x1a5e   :  { %2780 = vadd.xlane.f32.xlu0 %v2779_v45 }
0x1a5f   :  { %v2778_v46 = vmul.f32 %v2776_v44, %v2776_v44 }
0x1a61   :  { %v2782_v16 = vsel %vm215_vm0, %v2778_v46, 0.0 }
0x1a62   :  { %2783 = vadd.xlane.f32.xlu0 %v2782_v16 }
0x1ae7   :  { %v2781_v24 = vpop.xlane.xlu0 %2780 }
0x1ae8   :  { %v2785_v60 = vmul.f32 0.010416667, %v2781_v24 }
0x1aea   :  { %v2787_v61 = vadd.f32 1e-12, %v2785_v60 }
0x1aeb   :  { %v2784_v62 = vpop.xlane.xlu0 %2783 }
0x1aec   :  { %3967 = vrsqrt.f32 %v2787_v61  ;;  %v2786_v63 = vmul.f32 0.010416667, %v2784_v62 }
0x1aee   :  { %v2788_v30 = vadd.f32 1e-12, %v2786_v63 }
0x1af0   :  { %3969 = vrsqrt.f32 %v2788_v30 }
0x1af9   :  { %v3968_v2 = vpop.eup %3967 }
0x1afa   :  { %v2791_v0 = vmul.f32 %v3968_v2, %v2775_v39 }
0x1afc   :  { %v2799_v8 = vmul.f32 %v3339_v11, %v2791_v0 }
0x1afd   :  { %v3970_v5 = vpop.eup %3969 }
0x1afe   :  { %v2792_v7 = vmul.f32 %v3970_v5, %v2776_v44  ;;  %v4814_v53 = vadd.f32 %v3340_v12, %v2799_v8 }
0x1b00   :  { %v2800_v13 = vmul.f32 %v3339_v11, %v2792_v7 }
0x1b02   :  { %v4816_v14 = vadd.f32 %v3340_v12, %v2800_v13  ;;  %v3354_v12 = vld [vmem:[#allocation6] ss:$0 sm:$0xff] }
0x1b04   :  { %v2821_v17 = vpack.c.bf16 %v4816_v14, %v4814_v53 }
0x1b06   :  { %3353 = vmatmul.mubr.msk.bf16.vlgmr.msra.gmra.mxu1 %vm215_vm0, %v2821_v17 }
0x1bc6   :  { %v2931_v31 = vpop.f32.mrf.mxu1 }
0x1bc7   :  { %v2932_v33 = vadd.f32 %v2931_v31, %v2827_v54 }
0x1bc8   :  { %v2933_v32 = vpop.f32.mrf.mxu1 }
0x1bc9   :  { %v2944_v34 = vmul.f32 0.044715, %v2932_v33  ;;  %v2934_v15 = vadd.f32 %v2933_v32, %v2831_v10  ;;  %v2940_v30 = vmul.f32 0.5, %v2932_v33 }
0x1bca   :  { %v2935_v35 = vpop.f32.mrf.mxu1 }
0x1bcb   :  { %v2948_v36 = vmul.f32 %v2944_v34, %v2932_v33  ;;  %v2945_v37 = vmul.f32 0.044715, %v2934_v15  ;;  %v2936_v39 = vadd.f32 %v2935_v35, %v2827_v54  ;;  %v2941_v61 = vmul.f32 0.5, %v2934_v15 }
0x1bcc   :  { %v2937_v40 = vpop.f32.mrf.mxu1 }
0x1bcd   :  { %v2952_v43 = vmul.f32 %v2948_v36, %v2932_v33  ;;  %v2949_v38 = vmul.f32 %v2945_v37, %v2934_v15  ;;  %v2946_v47 = vmul.f32 0.044715, %v2936_v39  ;;  %v2938_v44 = vadd.f32 %v2937_v40, %v2831_v10 }
0x1bce   :  { %v2942_v24 = vmul.f32 0.5, %v2936_v39 }
0x1bcf   :  { %v2956_v45 = vadd.f32 %v2952_v43, %v2932_v33  ;;  %v2953_v46 = vmul.f32 %v2949_v38, %v2934_v15  ;;  %v2950_v4 = vmul.f32 %v2946_v47, %v2936_v39  ;;  %v2947_v16 = vmul.f32 0.044715, %v2938_v44  ;;  %v3368_v43 = vld [vmem:[#allocation7] ss:$0 sm:$0xff]  ;;  %v3369_v47 = vld [vmem:[#allocation9] ss:$0 sm:$0xff] }
0x1bd0   :  { %v2943_v62 = vmul.f32 0.5, %v2938_v44 }
0x1bd1   :  { %v2957_v3 = vadd.f32 %v2953_v46, %v2934_v15  ;;  %v2954_v6 = vmul.f32 %v2950_v4, %v2936_v39  ;;  %v2951_v48 = vmul.f32 %v2947_v16, %v2938_v44  ;;  %v2960_v41 = vmul.f32 0.7978846, %v2956_v45 }
0x1bd3   :  { %v2961_v21 = vmul.f32 0.7978846, %v2957_v3  ;;  %v2958_v49 = vadd.f32 %v2954_v6, %v2936_v39  ;;  %v2955_v42 = vmul.f32 %v2951_v48, %v2938_v44 }
0x1bd5   :  { %3971 = vtanh.f32 %v2961_v21  ;;  %v2962_v50 = vmul.f32 0.7978846, %v2958_v49  ;;  %v2959_v51 = vadd.f32 %v2955_v42, %v2938_v44 }
0x1bd6   :  { %3973 = vtanh.f32 %v2960_v41 }
0x1bd7   :  { %3975 = vtanh.f32 %v2962_v50  ;;  %v2963_v52 = vmul.f32 0.7978846, %v2959_v51 }
0x1bd9   :  { %3977 = vtanh.f32 %v2963_v52 }
0x1be2   :  { %v3972_v55 = vpop.eup %3971 }
0x1be3   :  { %v3974_v56 = vpop.eup %3973  ;;  %v2969_v58 = vadd.f32 1.0, %v3972_v55 }
0x1be4   :  { %v3976_v57 = vpop.eup %3975  ;;  %v2968_v60 = vadd.f32 1.0, %v3974_v56 }
0x1be5   :  { %v2970_v1 = vadd.f32 1.0, %v3976_v57  ;;  %v2973_v0 = vmul.f32 %v2969_v58, %v2941_v61 }
0x1be6   :  { %v3978_v59 = vpop.eup %3977  ;;  %v2972_v5 = vmul.f32 %v2968_v60, %v2940_v30 }
0x1be7   :  { %v2971_v63 = vadd.f32 1.0, %v3978_v59  ;;  %v2974_v2 = vmul.f32 %v2970_v1, %v2942_v24 }
0x1be9   :  { %v2975_v11 = vmul.f32 %v2971_v63, %v2943_v62  ;;  %v3000_v8 = vpack.c.bf16 %v2974_v2, %v2972_v5 }
0x1beb   :  { %v3001_v7 = vpack.c.bf16 %v2975_v11, %v2973_v0 }
0x1bed   :  { %3367 = vmatprep.mubr.msk.bf16.mxu0 %vm1626_vm5, %v3001_v7 }
0x1bee   :  { %3117 = vmatmul.mubr.bf16.vlgmr.msra.gmra.mxu0 %v3000_v8 }
0x1cae   :  { %v3118_v13 = vpop.f32.mrf.mxu0 }
0x1caf   :  { %v3119_v17 = vadd.f32 %v3354_v12, %v3118_v13 }
0x1cb0   :  { %v3120_v9 = vpop.f32.mrf.mxu0 }
0x1cb1   :  { %v3125_v18 = vadd.f32 %v3119_v17, %v4814_v53 }
0x1cb2   :  { %v3121_v19 = vpop.f32.mrf.mxu0 }
0x1cb3   :  { %v3122_v20 = vadd.f32 %v3354_v12, %v3121_v19  ;;  %v3129_v22 = vsel %vm215_vm0, %v3125_v18, 0.0 }
0x1cb4   :  { %v3123_v23 = vpop.f32.mrf.mxu0  ;;  %3130 = vadd.xlane.f32.xlu0 %v3129_v22 }
0x1cb5   :  { %v3126_v25 = vadd.f32 %v3122_v20, %v4816_v14 }
0x1cb7   :  { %v3132_v26 = vsel %vm215_vm0, %v3126_v25, 0.0 }
0x1cb8   :  { %3133 = vadd.xlane.f32.xlu1 %v3132_v26 }
0x1d3d   :  { %v3131_v27 = vpop.xlane.xlu0 %3130 }
0x1d3e   :  { %v3135_v28 = vmul.f32 0.010416667, %v3131_v27 }
0x1d40   :  { %v3137_v29 = vsub.f32 %v3125_v18, %v3135_v28 }
0x1d41   :  { %v3134_v54 = vpop.xlane.xlu1 %3133 }
0x1d42   :  { %v3136_v10 = vmul.f32 0.010416667, %v3134_v54  ;;  %v3139_v31 = vmul.f32 %v3137_v29, %v3137_v29 }
0x1d44   :  { %v3138_v33 = vsub.f32 %v3126_v25, %v3136_v10  ;;  %v3141_v53 = vsel %vm215_vm0, %v3139_v31, 0.0 }
0x1d45   :  { %3142 = vadd.xlane.f32.xlu0 %v3141_v53 }
0x1d46   :  { %v3140_v32 = vmul.f32 %v3138_v33, %v3138_v33 }
0x1d48   :  { %v3144_v34 = vsel %vm215_vm0, %v3140_v32, 0.0 }
0x1d49   :  { %3145 = vadd.xlane.f32.xlu0 %v3144_v34 }
0x1dce   :  { %v3143_v15 = vpop.xlane.xlu0 %3142 }
0x1dcf   :  { %v3147_v14 = vmul.f32 0.010416667, %v3143_v15 }
0x1dd1   :  { %v3149_v35 = vadd.f32 1e-12, %v3147_v14 }
0x1dd2   :  { %v3146_v36 = vpop.xlane.xlu0 %3145 }
0x1dd3   :  { %3979 = vrsqrt.f32 %v3149_v35  ;;  %v3148_v37 = vmul.f32 0.010416667, %v3146_v36 }
0x1dd5   :  { %v3150_v39 = vadd.f32 1e-12, %v3148_v37 }
0x1dd7   :  { %3981 = vrsqrt.f32 %v3150_v39 }
0x1de0   :  { %v3980_v40 = vpop.eup %3979 }
0x1de1   :  { %v3153_v38 = vmul.f32 %v3980_v40, %v3137_v29 }
0x1de3   :  { %v3161_v44 = vmul.f32 %v3368_v43, %v3153_v38 }
0x1de4   :  { %v3982_v45 = vpop.eup %3981 }
0x1de5   :  { %v3169_v46 = vadd.f32 %v3369_v47, %v3161_v44  ;;  %v3154_v4 = vmul.f32 %v3982_v45, %v3138_v33 }
0x1de7   :  { %3171 = vst.msk [vmem:[%s4326_s27] sm:$0xff] %vm215_vm0, %v3169_v46  ;;  %v3162_v16 = vmul.f32 %v3368_v43, %v3154_v4 }
0x1de9   :  { %v3170_v3 = vadd.f32 %v3369_v47, %v3162_v16 }
0x1deb   :  { %3172 = vst.msk [vmem:[%s4326_s27 + $0x8] sm:$0xff] %vm215_vm0, %v3170_v3 }
0x1dec   :  { %3177 = vsyncpa [#allocation3], 1 }
0x1ded   :  { %3178 = vsyncpa [#allocation5], 1 }
0x1dee   :  { %3179 = vsyncpa [#allocation8], 1 }

</bundles_post_ra>
